<compile_context>
chip_gen: v7x
topology: tpu7x:2x2x1
jax: 0.10.0
libtpu: 0.0.40
codegen_flags: <defaults>
</compile_context>

<pallas_src>
import math
import functools

import jax
import jax.numpy as jnp
from jax.experimental import pallas as pl
from jax.experimental.pallas import tpu as pltpu

LN_EPS = 1e-5  # PyTorch nn.LayerNorm default

WEIGHT_KEYS = ["wq", "bq", "wk", "bk", "wv", "bv", "wo", "bo",
               "w1", "b1", "w2", "b2", "g1", "be1", "g2", "be2"]
MATMUL_KEYS = {"wq", "wk", "wv", "wo", "w1", "w2"}   # MXU operands -> bf16


# ---------------------------------------------------------------------------
# Pallas kernel: fused stack of SelfAttentionLayers (+ optional output proj)
# ---------------------------------------------------------------------------
def _attn_stack_kernel(*refs, num_heads, num_layers, project):
    x_ref = refs[0]
    (wq, bq, wk, bk, wv, bv, wo, bo,
     w1, b1, w2, b2, g1, be1, g2, be2) = refs[1:17]
    if project:
        wout_ref, bout_ref, o_ref = refs[17], refs[18], refs[19]
    else:
        o_ref = refs[17]

    blk, L, D = x_ref.shape
    M = blk * L
    H = num_heads
    hd = D // H

    x2 = x_ref[...].reshape(M, D)                       # f32 residual stream

    for l in range(num_layers):                         # static unroll over fused layers
        xb = x2.astype(jnp.bfloat16)
        # 1/sqrt(hd) is folded into wq/bq in the wrapper.
        q = jnp.dot(xb, wq[l], preferred_element_type=jnp.float32) + bq[l]
        k = jnp.dot(xb, wk[l], preferred_element_type=jnp.float32) + bk[l]
        v = jnp.dot(xb, wv[l], preferred_element_type=jnp.float32) + bv[l]

        q3 = q.reshape(blk, L, D)
        k3 = k.reshape(blk, L, D)
        v3 = v.reshape(blk, L, D)

        heads = []
        for h in range(H):                              # static unroll; einsums batched over blk
            lo, hi = h * hd, (h + 1) * hd
            qh = q3[:, :, lo:hi].astype(jnp.bfloat16)
            kh = k3[:, :, lo:hi].astype(jnp.bfloat16)
            vh = v3[:, :, lo:hi].astype(jnp.bfloat16)
            s = jnp.einsum("bqd,bkd->bqk", qh, kh,
                           preferred_element_type=jnp.float32)
            s = s - jnp.max(s, axis=-1, keepdims=True)
            p = jnp.exp(s)
            p = p / jnp.sum(p, axis=-1, keepdims=True)
            heads.append(jnp.einsum("bqk,bkd->bqd", p.astype(jnp.bfloat16), vh,
                                    preferred_element_type=jnp.float32))
        attn = jnp.concatenate(heads, axis=-1).reshape(M, D)
        attn = jnp.dot(attn.astype(jnp.bfloat16), wo[l],
                       preferred_element_type=jnp.float32) + bo[l]

        # residual + LayerNorm 1   (dropout is a no-op at inference)
        y = x2 + attn
        mu = jnp.mean(y, axis=-1, keepdims=True)
        var = jnp.mean((y - mu) ** 2, axis=-1, keepdims=True)
        y = (y - mu) * jax.lax.rsqrt(var + LN_EPS) * g1[l] + be1[l]

        # feed-forward
        f = jnp.dot(y.astype(jnp.bfloat16), w1[l],
                    preferred_element_type=jnp.float32) + b1[l]
        f = jnp.maximum(f, 0.0)
        f = jnp.dot(f.astype(jnp.bfloat16), w2[l],
                    preferred_element_type=jnp.float32) + b2[l]

        # residual + LayerNorm 2
        z = y + f
        mu2 = jnp.mean(z, axis=-1, keepdims=True)
        var2 = jnp.mean((z - mu2) ** 2, axis=-1, keepdims=True)
        x2 = (z - mu2) * jax.lax.rsqrt(var2 + LN_EPS) * g2[l] + be2[l]

    if project:
        # output_projection restricted to the first D rows of out_w (the zero-pad to
        # d_llm contributes nothing under the identity LLM block) computed as a VPU
        # multiply + lane reduction instead of a width-1 MXU matmul.
        z3 = x2.reshape(blk, L, D)
        dec = jnp.sum(z3 * wout_ref[...], axis=-1, keepdims=True) + bout_ref[...]
        o_ref[...] = dec.astype(o_ref.dtype)
    else:
        o_ref[...] = x2.reshape(blk, L, D).astype(o_ref.dtype)


# ---------------------------------------------------------------------------
# Pallas wrapper
# ---------------------------------------------------------------------------
def _const_spec(arr):
    nd = arr.ndim
    return pl.BlockSpec(arr.shape, lambda i, _nd=nd: (0,) * _nd)


def attention_stack(x_sld, layer_params, num_heads, out_w_row=None, out_b=None,
                    row_budget=2048):
    """Fused stack of SelfAttentionLayers over (S, L, D); optional fused projection."""
    S, L, D = x_sld.shape
    nl = len(layer_params)
    hd = D // num_heads
    scale = 1.0 / math.sqrt(hd)

    # Stack per-layer weights along a leading layer axis; fold the attention scale
    # into Q; pre-cast MXU operands to bf16 (biases / LN params stay f32).
    stacked = []
    for key in WEIGHT_KEYS:
        w = jnp.stack([p[key] for p in layer_params], axis=0)
        if key in ("wq", "bq"):
            w = w * scale
        if key in MATMUL_KEYS:
            w = w.astype(jnp.bfloat16)
        stacked.append(w)

    project = out_w_row is not None
    s_blk = max(1, min(S, max(1, row_budget // L)))     # keep blocks ~<1 MiB of f32
    grid = (pl.cdiv(S, s_blk),)

    inputs = [x_sld] + stacked
    in_specs = [pl.BlockSpec((s_blk, L, D), lambda i: (i, 0, 0))]
    in_specs += [_const_spec(w) for w in stacked]
    if project:
        inputs += [out_w_row, out_b]
        in_specs += [_const_spec(out_w_row), _const_spec(out_b)]
        out_shape = jax.ShapeDtypeStruct((S, L, 1), jnp.float32)
        out_spec = pl.BlockSpec((s_blk, L, 1), lambda i: (i, 0, 0))
    else:
        out_shape = jax.ShapeDtypeStruct((S, L, D), jnp.float32)
        out_spec = pl.BlockSpec((s_blk, L, D), lambda i: (i, 0, 0))

    kernel = functools.partial(_attn_stack_kernel, num_heads=num_heads,
                               num_layers=nl, project=project)
    return pl.pallas_call(
        kernel,
        out_shape=out_shape,
        grid=grid,
        in_specs=in_specs,
        out_specs=out_spec,
        compiler_params=pltpu.CompilerParams(dimension_semantics=("parallel",)),
    )(*inputs)


# ---------------------------------------------------------------------------
# Parameter init (deterministic, synthetic)
# ---------------------------------------------------------------------------
def _init_linear(key, d_in, d_out):
    bound = 1.0 / math.sqrt(d_in)
    kw, kb = jax.random.split(key)
    w = jax.random.uniform(kw, (d_in, d_out), jnp.float32, -bound, bound)
    b = jax.random.uniform(kb, (1, d_out), jnp.float32, -bound, bound)
    return w, b


def _init_sa_params(key, D, F):
    ks = jax.random.split(key, 6)
    p = {}
    p["wq"], p["bq"] = _init_linear(ks[0], D, D)
    p["wk"], p["bk"] = _init_linear(ks[1], D, D)
    p["wv"], p["bv"] = _init_linear(ks[2], D, D)
    p["wo"], p["bo"] = _init_linear(ks[3], D, D)
    p["w1"], p["b1"] = _init_linear(ks[4], D, F)
    p["w2"], p["b2"] = _init_linear(ks[5], F, D)
    p["g1"] = jnp.ones((1, D), jnp.float32)
    p["be1"] = jnp.zeros((1, D), jnp.float32)
    p["g2"] = jnp.ones((1, D), jnp.float32)
    p["be2"] = jnp.zeros((1, D), jnp.float32)
    return p


def init_params(key, num_nodes, in_steps=12, steps_per_day=288,
                input_embedding_dim=24, tod_embedding_dim=24, dow_embedding_dim=24,
                positional_embedding_dim=24, wav_embedding_dim=24,
                feed_forward_dim=256, num_layers_t=3, num_layers_s=4,
                d_llm=4096, output_dim=1):
    model_dim_t = (input_embedding_dim + tod_embedding_dim
                   + dow_embedding_dim + positional_embedding_dim)      # 96
    model_dim_s = model_dim_t + wav_embedding_dim                        # 120
    keys = iter(jax.random.split(key, 32))
    p = {"model_dim_t": model_dim_t, "model_dim_s": model_dim_s,
         "steps_per_day": steps_per_day, "d_llm": d_llm}
    p["input_proj_w"] = 0.1 * jax.random.normal(next(keys), (input_embedding_dim,), jnp.float32)
    p["input_proj_b"] = 0.01 * jax.random.normal(next(keys), (input_embedding_dim,), jnp.float32)
    p["tod_emb"] = 0.1 * jax.random.normal(next(keys), (steps_per_day, tod_embedding_dim), jnp.float32)
    p["dow_emb"] = 0.1 * jax.random.normal(next(keys), (7, dow_embedding_dim), jnp.float32)
    p["pos_emb"] = 0.1 * jax.random.normal(next(keys), (in_steps, num_nodes, positional_embedding_dim), jnp.float32)
    p["wav_w"] = 0.1 * jax.random.normal(next(keys), (wav_embedding_dim,), jnp.float32)
    p["wav_b"] = 0.01 * jax.random.normal(next(keys), (wav_embedding_dim,), jnp.float32)
    p["attn_t"] = [_init_sa_params(next(keys), model_dim_t, feed_forward_dim)
                   for _ in range(num_layers_t)]
    p["attn_s"] = [_init_sa_params(next(keys), model_dim_s, feed_forward_dim)
                   for _ in range(num_layers_s)]
    ow, ob = _init_linear(next(keys), d_llm, output_dim)
    p["out_w"], p["out_b"] = ow, ob
    return p


# ---------------------------------------------------------------------------
# Forward pass (glue + Pallas kernels)
# ---------------------------------------------------------------------------
def haar_level1_zero(x):
    """pywt.wavedec(x, 'db1', level=1, axis=-1, mode='zero') then cat([cA, cD], -1).
    Valid for even-length last axis (in_steps=12)."""
    inv_sqrt2 = 1.0 / math.sqrt(2.0)
    xe = x[..., 0::2]
    xo = x[..., 1::2]
    cA = (xe + xo) * inv_sqrt2
    cD = (xe - xo) * inv_sqrt2
    return jnp.concatenate([cA, cD], axis=-1)


def sttlm_forward(x, params, num_heads=4):
    B, T, N, _ = x.shape
    xn0 = x[..., 0:1]                                   # (B,T,N,1)
    tod = x[..., 1]
    dow = x[..., 2]

    # ---- feature embedding (glue: gathers + 1->24 broadcast linears) ----
    x1 = xn0 * params["input_proj_w"] + params["input_proj_b"]          # (B,T,N,24)
    tod_idx = (tod * params["steps_per_day"]).astype(jnp.int32)
    tod_emb = params["tod_emb"][tod_idx]                                # (B,T,N,24)
    dow_emb = params["dow_emb"][dow.astype(jnp.int32)]                  # (B,T,N,24)
    pos_emb = jnp.broadcast_to(params["pos_emb"][None],
                               (B, T, N, params["pos_emb"].shape[-1]))
    Et = jnp.concatenate([x1, tod_emb, dow_emb, pos_emb], axis=-1)      # (B,T,N,96)

    # ---- temporal self-attention (attend along T) ----
    # The original loop feeds Et to every layer and keeps only the last output, so
    # layers 0..nt-2 are dead compute; running only the last layer is bit-identical.
    Dt = Et.shape[-1]
    Et_seq = jnp.transpose(Et, (0, 2, 1, 3)).reshape(B * N, T, Dt)
    x_t = attention_stack(Et_seq, params["attn_t"][-1:], num_heads)
    x_t = x_t.reshape(B, N, T, Dt).transpose(0, 2, 1, 3)                # (B,T,N,96)

    # ---- wavelet embedding (Haar db1 level-1, zero mode) ----
    xn1 = jnp.transpose(xn0, (0, 3, 2, 1))                              # (B,1,N,T)
    x_wav = haar_level1_zero(xn1)                                       # (B,1,N,T)
    xn1 = jnp.transpose(x_wav, (0, 3, 2, 1))                            # (B,T,N,1)
    wav_emb = xn1 * params["wav_w"] + params["wav_b"]                   # (B,T,N,24)

    x_s = jnp.concatenate([x_t, wav_emb], axis=-1)                      # (B,T,N,120)
    Ds = x_s.shape[-1]
    x_s = x_s.reshape(B * T, N, Ds)

    # ---- fused spatial attention stack + output projection ----
    # TODO(synk): pretrained LLaMA-7B + LoRA (peft_model) cannot be reproduced
    # in-script (external checkpoint); it is treated as identity between the
    # zero-pad to d_llm=4096 and the output_projection.  Under that identity the
    # zero-padded columns contribute nothing, so the projection uses only the
    # first Ds rows of out_w (exact) and never materializes the 4096-wide tensor.
    out_w_row = params["out_w"][:Ds, 0].reshape(1, Ds)
    dec = attention_stack(x_s, params["attn_s"], num_heads,
                          out_w_row=out_w_row, out_b=params["out_b"])   # (B*T, N, 1)
    return dec.reshape(B, T, N, 1)


# ---------------------------------------------------------------------------
if __name__ == "__main__":
    key = jax.random.PRNGKey(0)
    B, T, N = 2, 12, 8          # batch, in_steps, num_nodes
    kx, ktod, kdow, kp = jax.random.split(key, 4)

    flow = jax.random.normal(kx, (B, T, N, 1), jnp.float32)
    tod = jax.random.uniform(ktod, (B, T, N, 1), jnp.float32, 0.0, 1.0 - 1e-4)
    dow = jax.random.randint(kdow, (B, T, N, 1), 0, 7).astype(jnp.float32)
    x = jnp.concatenate([flow, tod, dow], axis=-1)      # (B, T, N, 3)

    params = init_params(kp, num_nodes=N, in_steps=T)

    out = sttlm_forward(x, params)
    out = jax.block_until_ready(out)
    assert out.shape == (B, T, N, 1), out.shape
    assert out.dtype == jnp.float32
    print("KERNEL_OK")
</pallas_src>

<mosaic_0001>
module attributes {stable_mosaic.version = 11 : i64} {
  func.func @_attn_stack_kernel(%arg0: i32, %arg1: memref<16x12x96xf32, #tpu.memory_space<vmem>>, %arg2: memref<1x96x96xbf16, #tpu.memory_space<vmem>>, %arg3: memref<1x1x96xf32, #tpu.memory_space<vmem>>, %arg4: memref<1x96x96xbf16, #tpu.memory_space<vmem>>, %arg5: memref<1x1x96xf32, #tpu.memory_space<vmem>>, %arg6: memref<1x96x96xbf16, #tpu.memory_space<vmem>>, %arg7: memref<1x1x96xf32, #tpu.memory_space<vmem>>, %arg8: memref<1x96x96xbf16, #tpu.memory_space<vmem>>, %arg9: memref<1x1x96xf32, #tpu.memory_space<vmem>>, %arg10: memref<1x96x256xbf16, #tpu.memory_space<vmem>>, %arg11: memref<1x1x256xf32, #tpu.memory_space<vmem>>, %arg12: memref<1x256x96xbf16, #tpu.memory_space<vmem>>, %arg13: memref<1x1x96xf32, #tpu.memory_space<vmem>>, %arg14: memref<1x1x96xf32, #tpu.memory_space<vmem>>, %arg15: memref<1x1x96xf32, #tpu.memory_space<vmem>>, %arg16: memref<1x1x96xf32, #tpu.memory_space<vmem>>, %arg17: memref<1x1x96xf32, #tpu.memory_space<vmem>>, %arg18: memref<16x12x96xf32, #tpu.memory_space<vmem>>) attributes {dimension_semantics = [#tpu.dimension_semantics<parallel>], iteration_bounds = array<i64: 1>, scalar_prefetch = 0 : i64, scratch_operands = 0 : i64, tpu.core_type = #tpu.core_type<tc>, window_params = [{transform_indices = @transform_0, window_bounds = array<i64: 16, 12, 96>}, {pipeline_mode = #tpu.pipeline_mode<synchronous>, transform_indices = @transform_1, window_bounds = array<i64: 1, 96, 96>}, {pipeline_mode = #tpu.pipeline_mode<synchronous>, transform_indices = @transform_2, window_bounds = array<i64: 1, 1, 96>}, {pipeline_mode = #tpu.pipeline_mode<synchronous>, transform_indices = @transform_3, window_bounds = array<i64: 1, 96, 96>}, {pipeline_mode = #tpu.pipeline_mode<synchronous>, transform_indices = @transform_4, window_bounds = array<i64: 1, 1, 96>}, {pipeline_mode = #tpu.pipeline_mode<synchronous>, transform_indices = @transform_5, window_bounds = array<i64: 1, 96, 96>}, {pipeline_mode = #tpu.pipeline_mode<synchronous>, transform_indices = @transform_6, window_bounds = array<i64: 1, 1, 96>}, {pipeline_mode = #tpu.pipeline_mode<synchronous>, transform_indices = @transform_7, window_bounds = array<i64: 1, 96, 96>}, {pipeline_mode = #tpu.pipeline_mode<synchronous>, transform_indices = @transform_8, window_bounds = array<i64: 1, 1, 96>}, {pipeline_mode = #tpu.pipeline_mode<synchronous>, transform_indices = @transform_9, window_bounds = array<i64: 1, 96, 256>}, {pipeline_mode = #tpu.pipeline_mode<synchronous>, transform_indices = @transform_10, window_bounds = array<i64: 1, 1, 256>}, {pipeline_mode = #tpu.pipeline_mode<synchronous>, transform_indices = @transform_11, window_bounds = array<i64: 1, 256, 96>}, {pipeline_mode = #tpu.pipeline_mode<synchronous>, transform_indices = @transform_12, window_bounds = array<i64: 1, 1, 96>}, {pipeline_mode = #tpu.pipeline_mode<synchronous>, transform_indices = @transform_13, window_bounds = array<i64: 1, 1, 96>}, {pipeline_mode = #tpu.pipeline_mode<synchronous>, transform_indices = @transform_14, window_bounds = array<i64: 1, 1, 96>}, {pipeline_mode = #tpu.pipeline_mode<synchronous>, transform_indices = @transform_15, window_bounds = array<i64: 1, 1, 96>}, {pipeline_mode = #tpu.pipeline_mode<synchronous>, transform_indices = @transform_16, window_bounds = array<i64: 1, 1, 96>}, {transform_indices = @transform_17, window_bounds = array<i64: 16, 12, 96>}]} {
    %c0 = arith.constant 0 : index
    %c0_0 = arith.constant 0 : index
    %c0_1 = arith.constant 0 : index
    %0 = vector.load %arg1[%c0, %c0_0, %c0_1] : memref<16x12x96xf32, #tpu.memory_space<vmem>>, vector<16x12x96xf32>
    %1 = vector.shape_cast %0 : vector<16x12x96xf32> to vector<192x96xf32>
    %2 = arith.truncf %1 : vector<192x96xf32> to vector<192x96xbf16>
    %c0_2 = arith.constant 0 : index
    %c0_3 = arith.constant 0 : index
    %c0_4 = arith.constant 0 : index
    %3 = vector.load %arg2[%c0_2, %c0_3, %c0_4] : memref<1x96x96xbf16, #tpu.memory_space<vmem>>, vector<1x96x96xbf16>
    %4 = vector.shape_cast %3 : vector<1x96x96xbf16> to vector<96x96xbf16>
    %cst = arith.constant dense<0.000000e+00> : vector<192x96xf32>
    %5 = tpu.matmul %2, %4, %cst {dimension_numbers = #tpu.dot_dimension_numbers<[1], [0], [0], [1], [0, 0, 1, 1], [], []>} : vector<192x96xbf16>, vector<96x96xbf16>, vector<192x96xf32> -> vector<192x96xf32>
    %c0_5 = arith.constant 0 : index
    %c0_6 = arith.constant 0 : index
    %c0_7 = arith.constant 0 : index
    %6 = vector.load %arg3[%c0_5, %c0_6, %c0_7] : memref<1x1x96xf32, #tpu.memory_space<vmem>>, vector<1x1x96xf32>
    %7 = vector.shape_cast %6 : vector<1x1x96xf32> to vector<1x96xf32>
    %8 = vector.broadcast %7 : vector<1x96xf32> to vector<192x96xf32>
    %9 = arith.addf %5, %8 : vector<192x96xf32>
    %c0_8 = arith.constant 0 : index
    %c0_9 = arith.constant 0 : index
    %c0_10 = arith.constant 0 : index
    %10 = vector.load %arg4[%c0_8, %c0_9, %c0_10] : memref<1x96x96xbf16, #tpu.memory_space<vmem>>, vector<1x96x96xbf16>
    %11 = vector.shape_cast %10 : vector<1x96x96xbf16> to vector<96x96xbf16>
    %cst_11 = arith.constant dense<0.000000e+00> : vector<192x96xf32>
    %12 = tpu.matmul %2, %11, %cst_11 {dimension_numbers = #tpu.dot_dimension_numbers<[1], [0], [0], [1], [0, 0, 1, 1], [], []>} : vector<192x96xbf16>, vector<96x96xbf16>, vector<192x96xf32> -> vector<192x96xf32>
    %c0_12 = arith.constant 0 : index
    %c0_13 = arith.constant 0 : index
    %c0_14 = arith.constant 0 : index
    %13 = vector.load %arg5[%c0_12, %c0_13, %c0_14] : memref<1x1x96xf32, #tpu.memory_space<vmem>>, vector<1x1x96xf32>
    %14 = vector.shape_cast %13 : vector<1x1x96xf32> to vector<1x96xf32>
    %15 = vector.broadcast %14 : vector<1x96xf32> to vector<192x96xf32>
    %16 = arith.addf %12, %15 : vector<192x96xf32>
    %c0_15 = arith.constant 0 : index
    %c0_16 = arith.constant 0 : index
    %c0_17 = arith.constant 0 : index
    %17 = vector.load %arg6[%c0_15, %c0_16, %c0_17] : memref<1x96x96xbf16, #tpu.memory_space<vmem>>, vector<1x96x96xbf16>
    %18 = vector.shape_cast %17 : vector<1x96x96xbf16> to vector<96x96xbf16>
    %cst_18 = arith.constant dense<0.000000e+00> : vector<192x96xf32>
    %19 = tpu.matmul %2, %18, %cst_18 {dimension_numbers = #tpu.dot_dimension_numbers<[1], [0], [0], [1], [0, 0, 1, 1], [], []>} : vector<192x96xbf16>, vector<96x96xbf16>, vector<192x96xf32> -> vector<192x96xf32>
    %c0_19 = arith.constant 0 : index
    %c0_20 = arith.constant 0 : index
    %c0_21 = arith.constant 0 : index
    %20 = vector.load %arg7[%c0_19, %c0_20, %c0_21] : memref<1x1x96xf32, #tpu.memory_space<vmem>>, vector<1x1x96xf32>
    %21 = vector.shape_cast %20 : vector<1x1x96xf32> to vector<1x96xf32>
    %22 = vector.broadcast %21 : vector<1x96xf32> to vector<192x96xf32>
    %23 = arith.addf %19, %22 : vector<192x96xf32>
    %24 = vector.shape_cast %9 : vector<192x96xf32> to vector<16x12x96xf32>
    %25 = vector.shape_cast %16 : vector<192x96xf32> to vector<16x12x96xf32>
    %26 = vector.shape_cast %23 : vector<192x96xf32> to vector<16x12x96xf32>
    %27 = vector.extract_strided_slice %24 {offsets = [0, 0, 0], sizes = [16, 12, 24], strides = [1, 1, 1]} : vector<16x12x96xf32> to vector<16x12x24xf32>
    %28 = arith.truncf %27 : vector<16x12x24xf32> to vector<16x12x24xbf16>
    %29 = vector.extract_strided_slice %25 {offsets = [0, 0, 0], sizes = [16, 12, 24], strides = [1, 1, 1]} : vector<16x12x96xf32> to vector<16x12x24xf32>
    %30 = arith.truncf %29 : vector<16x12x24xf32> to vector<16x12x24xbf16>
    %31 = vector.extract_strided_slice %26 {offsets = [0, 0, 0], sizes = [16, 12, 24], strides = [1, 1, 1]} : vector<16x12x96xf32> to vector<16x12x24xf32>
    %32 = arith.truncf %31 : vector<16x12x24xf32> to vector<16x12x24xbf16>
    "tpu.trace_start"() <{level = 10 : i32, message = "bqd,bkd->bqk"}> : () -> ()
    %cst_22 = arith.constant dense<0.000000e+00> : vector<16x12x12xf32>
    %33 = tpu.matmul %28, %30, %cst_22 {dimension_numbers = #tpu.dot_dimension_numbers<[2], [2], [1], [1], [0, 0, 0, 1, 1, 1], [0], [0]>} : vector<16x12x24xbf16>, vector<16x12x24xbf16>, vector<16x12x12xf32> -> vector<16x12x12xf32>
    "tpu.trace_stop"() : () -> ()
    %cst_23 = arith.constant dense<0xFF800000> : vector<16x12xf32>
    %34 = vector.multi_reduction <maximumf>, %33, %cst_23 [2] : vector<16x12x12xf32> to vector<16x12xf32>
    %35 = vector.shape_cast %34 : vector<16x12xf32> to vector<16x12x1xf32>
    %36 = vector.broadcast %35 : vector<16x12x1xf32> to vector<16x12x12xf32>
    %37 = arith.subf %33, %36 : vector<16x12x12xf32>
    %38 = math.exp %37 : vector<16x12x12xf32>
    %cst_24 = arith.constant dense<0.000000e+00> : vector<16x12xf32>
    %39 = vector.multi_reduction <add>, %38, %cst_24 [2] : vector<16x12x12xf32> to vector<16x12xf32>
    %40 = vector.shape_cast %39 : vector<16x12xf32> to vector<16x12x1xf32>
    %41 = vector.broadcast %40 : vector<16x12x1xf32> to vector<16x12x12xf32>
    %42 = arith.divf %38, %41 : vector<16x12x12xf32>
    %43 = arith.truncf %42 : vector<16x12x12xf32> to vector<16x12x12xbf16>
    "tpu.trace_start"() <{level = 10 : i32, message = "bqk,bkd->bqd"}> : () -> ()
    %cst_25 = arith.constant dense<0.000000e+00> : vector<16x12x24xf32>
    %44 = tpu.matmul %43, %32, %cst_25 {dimension_numbers = #tpu.dot_dimension_numbers<[2], [1], [1], [2], [0, 0, 0, 1, 1, 2], [0], [0]>} : vector<16x12x12xbf16>, vector<16x12x24xbf16>, vector<16x12x24xf32> -> vector<16x12x24xf32>
    "tpu.trace_stop"() : () -> ()
    %45 = vector.extract_strided_slice %24 {offsets = [0, 0, 24], sizes = [16, 12, 24], strides = [1, 1, 1]} : vector<16x12x96xf32> to vector<16x12x24xf32>
    %46 = arith.truncf %45 : vector<16x12x24xf32> to vector<16x12x24xbf16>
    %47 = vector.extract_strided_slice %25 {offsets = [0, 0, 24], sizes = [16, 12, 24], strides = [1, 1, 1]} : vector<16x12x96xf32> to vector<16x12x24xf32>
    %48 = arith.truncf %47 : vector<16x12x24xf32> to vector<16x12x24xbf16>
    %49 = vector.extract_strided_slice %26 {offsets = [0, 0, 24], sizes = [16, 12, 24], strides = [1, 1, 1]} : vector<16x12x96xf32> to vector<16x12x24xf32>
    %50 = arith.truncf %49 : vector<16x12x24xf32> to vector<16x12x24xbf16>
    "tpu.trace_start"() <{level = 10 : i32, message = "bqd,bkd->bqk"}> : () -> ()
    %cst_26 = arith.constant dense<0.000000e+00> : vector<16x12x12xf32>
    %51 = tpu.matmul %46, %48, %cst_26 {dimension_numbers = #tpu.dot_dimension_numbers<[2], [2], [1], [1], [0, 0, 0, 1, 1, 1], [0], [0]>} : vector<16x12x24xbf16>, vector<16x12x24xbf16>, vector<16x12x12xf32> -> vector<16x12x12xf32>
    "tpu.trace_stop"() : () -> ()
    %cst_27 = arith.constant dense<0xFF800000> : vector<16x12xf32>
    %52 = vector.multi_reduction <maximumf>, %51, %cst_27 [2] : vector<16x12x12xf32> to vector<16x12xf32>
    %53 = vector.shape_cast %52 : vector<16x12xf32> to vector<16x12x1xf32>
    %54 = vector.broadcast %53 : vector<16x12x1xf32> to vector<16x12x12xf32>
    %55 = arith.subf %51, %54 : vector<16x12x12xf32>
    %56 = math.exp %55 : vector<16x12x12xf32>
    %cst_28 = arith.constant dense<0.000000e+00> : vector<16x12xf32>
    %57 = vector.multi_reduction <add>, %56, %cst_28 [2] : vector<16x12x12xf32> to vector<16x12xf32>
    %58 = vector.shape_cast %57 : vector<16x12xf32> to vector<16x12x1xf32>
    %59 = vector.broadcast %58 : vector<16x12x1xf32> to vector<16x12x12xf32>
    %60 = arith.divf %56, %59 : vector<16x12x12xf32>
    %61 = arith.truncf %60 : vector<16x12x12xf32> to vector<16x12x12xbf16>
    "tpu.trace_start"() <{level = 10 : i32, message = "bqk,bkd->bqd"}> : () -> ()
    %cst_29 = arith.constant dense<0.000000e+00> : vector<16x12x24xf32>
    %62 = tpu.matmul %61, %50, %cst_29 {dimension_numbers = #tpu.dot_dimension_numbers<[2], [1], [1], [2], [0, 0, 0, 1, 1, 2], [0], [0]>} : vector<16x12x12xbf16>, vector<16x12x24xbf16>, vector<16x12x24xf32> -> vector<16x12x24xf32>
    "tpu.trace_stop"() : () -> ()
    %63 = vector.extract_strided_slice %24 {offsets = [0, 0, 48], sizes = [16, 12, 24], strides = [1, 1, 1]} : vector<16x12x96xf32> to vector<16x12x24xf32>
    %64 = arith.truncf %63 : vector<16x12x24xf32> to vector<16x12x24xbf16>
    %65 = vector.extract_strided_slice %25 {offsets = [0, 0, 48], sizes = [16, 12, 24], strides = [1, 1, 1]} : vector<16x12x96xf32> to vector<16x12x24xf32>
    %66 = arith.truncf %65 : vector<16x12x24xf32> to vector<16x12x24xbf16>
    %67 = vector.extract_strided_slice %26 {offsets = [0, 0, 48], sizes = [16, 12, 24], strides = [1, 1, 1]} : vector<16x12x96xf32> to vector<16x12x24xf32>
    %68 = arith.truncf %67 : vector<16x12x24xf32> to vector<16x12x24xbf16>
    "tpu.trace_start"() <{level = 10 : i32, message = "bqd,bkd->bqk"}> : () -> ()
    %cst_30 = arith.constant dense<0.000000e+00> : vector<16x12x12xf32>
    %69 = tpu.matmul %64, %66, %cst_30 {dimension_numbers = #tpu.dot_dimension_numbers<[2], [2], [1], [1], [0, 0, 0, 1, 1, 1], [0], [0]>} : vector<16x12x24xbf16>, vector<16x12x24xbf16>, vector<16x12x12xf32> -> vector<16x12x12xf32>
    "tpu.trace_stop"() : () -> ()
    %cst_31 = arith.constant dense<0xFF800000> : vector<16x12xf32>
    %70 = vector.multi_reduction <maximumf>, %69, %cst_31 [2] : vector<16x12x12xf32> to vector<16x12xf32>
    %71 = vector.shape_cast %70 : vector<16x12xf32> to vector<16x12x1xf32>
    %72 = vector.broadcast %71 : vector<16x12x1xf32> to vector<16x12x12xf32>
    %73 = arith.subf %69, %72 : vector<16x12x12xf32>
    %74 = math.exp %73 : vector<16x12x12xf32>
    %cst_32 = arith.constant dense<0.000000e+00> : vector<16x12xf32>
    %75 = vector.multi_reduction <add>, %74, %cst_32 [2] : vector<16x12x12xf32> to vector<16x12xf32>
    %76 = vector.shape_cast %75 : vector<16x12xf32> to vector<16x12x1xf32>
    %77 = vector.broadcast %76 : vector<16x12x1xf32> to vector<16x12x12xf32>
    %78 = arith.divf %74, %77 : vector<16x12x12xf32>
    %79 = arith.truncf %78 : vector<16x12x12xf32> to vector<16x12x12xbf16>
    "tpu.trace_start"() <{level = 10 : i32, message = "bqk,bkd->bqd"}> : () -> ()
    %cst_33 = arith.constant dense<0.000000e+00> : vector<16x12x24xf32>
    %80 = tpu.matmul %79, %68, %cst_33 {dimension_numbers = #tpu.dot_dimension_numbers<[2], [1], [1], [2], [0, 0, 0, 1, 1, 2], [0], [0]>} : vector<16x12x12xbf16>, vector<16x12x24xbf16>, vector<16x12x24xf32> -> vector<16x12x24xf32>
    "tpu.trace_stop"() : () -> ()
    %81 = vector.extract_strided_slice %24 {offsets = [0, 0, 72], sizes = [16, 12, 24], strides = [1, 1, 1]} : vector<16x12x96xf32> to vector<16x12x24xf32>
    %82 = arith.truncf %81 : vector<16x12x24xf32> to vector<16x12x24xbf16>
    %83 = vector.extract_strided_slice %25 {offsets = [0, 0, 72], sizes = [16, 12, 24], strides = [1, 1, 1]} : vector<16x12x96xf32> to vector<16x12x24xf32>
    %84 = arith.truncf %83 : vector<16x12x24xf32> to vector<16x12x24xbf16>
    %85 = vector.extract_strided_slice %26 {offsets = [0, 0, 72], sizes = [16, 12, 24], strides = [1, 1, 1]} : vector<16x12x96xf32> to vector<16x12x24xf32>
    %86 = arith.truncf %85 : vector<16x12x24xf32> to vector<16x12x24xbf16>
    "tpu.trace_start"() <{level = 10 : i32, message = "bqd,bkd->bqk"}> : () -> ()
    %cst_34 = arith.constant dense<0.000000e+00> : vector<16x12x12xf32>
    %87 = tpu.matmul %82, %84, %cst_34 {dimension_numbers = #tpu.dot_dimension_numbers<[2], [2], [1], [1], [0, 0, 0, 1, 1, 1], [0], [0]>} : vector<16x12x24xbf16>, vector<16x12x24xbf16>, vector<16x12x12xf32> -> vector<16x12x12xf32>
    "tpu.trace_stop"() : () -> ()
    %cst_35 = arith.constant dense<0xFF800000> : vector<16x12xf32>
    %88 = vector.multi_reduction <maximumf>, %87, %cst_35 [2] : vector<16x12x12xf32> to vector<16x12xf32>
    %89 = vector.shape_cast %88 : vector<16x12xf32> to vector<16x12x1xf32>
    %90 = vector.broadcast %89 : vector<16x12x1xf32> to vector<16x12x12xf32>
    %91 = arith.subf %87, %90 : vector<16x12x12xf32>
    %92 = math.exp %91 : vector<16x12x12xf32>
    %cst_36 = arith.constant dense<0.000000e+00> : vector<16x12xf32>
    %93 = vector.multi_reduction <add>, %92, %cst_36 [2] : vector<16x12x12xf32> to vector<16x12xf32>
    %94 = vector.shape_cast %93 : vector<16x12xf32> to vector<16x12x1xf32>
    %95 = vector.broadcast %94 : vector<16x12x1xf32> to vector<16x12x12xf32>
    %96 = arith.divf %92, %95 : vector<16x12x12xf32>
    %97 = arith.truncf %96 : vector<16x12x12xf32> to vector<16x12x12xbf16>
    "tpu.trace_start"() <{level = 10 : i32, message = "bqk,bkd->bqd"}> : () -> ()
    %cst_37 = arith.constant dense<0.000000e+00> : vector<16x12x24xf32>
    %98 = tpu.matmul %97, %86, %cst_37 {dimension_numbers = #tpu.dot_dimension_numbers<[2], [1], [1], [2], [0, 0, 0, 1, 1, 2], [0], [0]>} : vector<16x12x12xbf16>, vector<16x12x24xbf16>, vector<16x12x24xf32> -> vector<16x12x24xf32>
    "tpu.trace_stop"() : () -> ()
    %99 = tpu.concatenate %44, %62, %80, %98 in 2 : vector<16x12x24xf32>, vector<16x12x24xf32>, vector<16x12x24xf32>, vector<16x12x24xf32> -> vector<16x12x96xf32>
    %100 = vector.shape_cast %99 : vector<16x12x96xf32> to vector<192x96xf32>
    %101 = arith.truncf %100 : vector<192x96xf32> to vector<192x96xbf16>
    %c0_38 = arith.constant 0 : index
    %c0_39 = arith.constant 0 : index
    %c0_40 = arith.constant 0 : index
    %102 = vector.load %arg8[%c0_38, %c0_39, %c0_40] : memref<1x96x96xbf16, #tpu.memory_space<vmem>>, vector<1x96x96xbf16>
    %103 = vector.shape_cast %102 : vector<1x96x96xbf16> to vector<96x96xbf16>
    %cst_41 = arith.constant dense<0.000000e+00> : vector<192x96xf32>
    %104 = tpu.matmul %101, %103, %cst_41 {dimension_numbers = #tpu.dot_dimension_numbers<[1], [0], [0], [1], [0, 0, 1, 1], [], []>} : vector<192x96xbf16>, vector<96x96xbf16>, vector<192x96xf32> -> vector<192x96xf32>
    %c0_42 = arith.constant 0 : index
    %c0_43 = arith.constant 0 : index
    %c0_44 = arith.constant 0 : index
    %105 = vector.load %arg9[%c0_42, %c0_43, %c0_44] : memref<1x1x96xf32, #tpu.memory_space<vmem>>, vector<1x1x96xf32>
    %106 = vector.shape_cast %105 : vector<1x1x96xf32> to vector<1x96xf32>
    %107 = vector.broadcast %106 : vector<1x96xf32> to vector<192x96xf32>
    %108 = arith.addf %104, %107 : vector<192x96xf32>
    %109 = arith.addf %1, %108 : vector<192x96xf32>
    %cst_45 = arith.constant dense<0.000000e+00> : vector<192xf32>
    %110 = vector.multi_reduction <add>, %109, %cst_45 [1] : vector<192x96xf32> to vector<192xf32>
    %111 = vector.shape_cast %110 : vector<192xf32> to vector<192x1xf32>
    %cst_46 = arith.constant 9.600000e+01 : f32
    %112 = vector.broadcast %cst_46 : f32 to vector<192x1xf32>
    %113 = arith.divf %111, %112 : vector<192x1xf32>
    %114 = vector.broadcast %113 : vector<192x1xf32> to vector<192x96xf32>
    %115 = arith.subf %109, %114 : vector<192x96xf32>
    %116 = arith.mulf %115, %115 : vector<192x96xf32>
    %cst_47 = arith.constant dense<0.000000e+00> : vector<192xf32>
    %117 = vector.multi_reduction <add>, %116, %cst_47 [1] : vector<192x96xf32> to vector<192xf32>
    %118 = vector.shape_cast %117 : vector<192xf32> to vector<192x1xf32>
    %cst_48 = arith.constant 9.600000e+01 : f32
    %119 = vector.broadcast %cst_48 : f32 to vector<192x1xf32>
    %120 = arith.divf %118, %119 : vector<192x1xf32>
    %121 = vector.broadcast %113 : vector<192x1xf32> to vector<192x96xf32>
    %122 = arith.subf %109, %121 : vector<192x96xf32>
    %cst_49 = arith.constant 9.99999974E-6 : f32
    %123 = vector.broadcast %cst_49 : f32 to vector<192x1xf32>
    %124 = arith.addf %120, %123 : vector<192x1xf32>
    %125 = math.rsqrt %124 : vector<192x1xf32>
    %126 = vector.broadcast %125 : vector<192x1xf32> to vector<192x96xf32>
    %127 = arith.mulf %122, %126 : vector<192x96xf32>
    %c0_50 = arith.constant 0 : index
    %c0_51 = arith.constant 0 : index
    %c0_52 = arith.constant 0 : index
    %128 = vector.load %arg14[%c0_50, %c0_51, %c0_52] : memref<1x1x96xf32, #tpu.memory_space<vmem>>, vector<1x1x96xf32>
    %129 = vector.shape_cast %128 : vector<1x1x96xf32> to vector<1x96xf32>
    %130 = vector.broadcast %129 : vector<1x96xf32> to vector<192x96xf32>
    %131 = arith.mulf %127, %130 : vector<192x96xf32>
    %c0_53 = arith.constant 0 : index
    %c0_54 = arith.constant 0 : index
    %c0_55 = arith.constant 0 : index
    %132 = vector.load %arg15[%c0_53, %c0_54, %c0_55] : memref<1x1x96xf32, #tpu.memory_space<vmem>>, vector<1x1x96xf32>
    %133 = vector.shape_cast %132 : vector<1x1x96xf32> to vector<1x96xf32>
    %134 = vector.broadcast %133 : vector<1x96xf32> to vector<192x96xf32>
    %135 = arith.addf %131, %134 : vector<192x96xf32>
    %136 = arith.truncf %135 : vector<192x96xf32> to vector<192x96xbf16>
    %c0_56 = arith.constant 0 : index
    %c0_57 = arith.constant 0 : index
    %c0_58 = arith.constant 0 : index
    %137 = vector.load %arg10[%c0_56, %c0_57, %c0_58] : memref<1x96x256xbf16, #tpu.memory_space<vmem>>, vector<1x96x256xbf16>
    %138 = vector.shape_cast %137 : vector<1x96x256xbf16> to vector<96x256xbf16>
    %cst_59 = arith.constant dense<0.000000e+00> : vector<192x256xf32>
    %139 = tpu.matmul %136, %138, %cst_59 {dimension_numbers = #tpu.dot_dimension_numbers<[1], [0], [0], [1], [0, 0, 1, 1], [], []>} : vector<192x96xbf16>, vector<96x256xbf16>, vector<192x256xf32> -> vector<192x256xf32>
    %c0_60 = arith.constant 0 : index
    %c0_61 = arith.constant 0 : index
    %c0_62 = arith.constant 0 : index
    %140 = vector.load %arg11[%c0_60, %c0_61, %c0_62] : memref<1x1x256xf32, #tpu.memory_space<vmem>>, vector<1x1x256xf32>
    %141 = vector.shape_cast %140 : vector<1x1x256xf32> to vector<1x256xf32>
    %142 = vector.broadcast %141 : vector<1x256xf32> to vector<192x256xf32>
    %143 = arith.addf %139, %142 : vector<192x256xf32>
    %cst_63 = arith.constant 0.000000e+00 : f32
    %144 = vector.broadcast %cst_63 : f32 to vector<192x256xf32>
    %145 = arith.maximumf %143, %144 : vector<192x256xf32>
    %146 = arith.truncf %145 : vector<192x256xf32> to vector<192x256xbf16>
    %c0_64 = arith.constant 0 : index
    %c0_65 = arith.constant 0 : index
    %c0_66 = arith.constant 0 : index
    %147 = vector.load %arg12[%c0_64, %c0_65, %c0_66] : memref<1x256x96xbf16, #tpu.memory_space<vmem>>, vector<1x256x96xbf16>
    %148 = vector.shape_cast %147 : vector<1x256x96xbf16> to vector<256x96xbf16>
    %cst_67 = arith.constant dense<0.000000e+00> : vector<192x96xf32>
    %149 = tpu.matmul %146, %148, %cst_67 {dimension_numbers = #tpu.dot_dimension_numbers<[1], [0], [0], [1], [0, 0, 1, 1], [], []>} : vector<192x256xbf16>, vector<256x96xbf16>, vector<192x96xf32> -> vector<192x96xf32>
    %c0_68 = arith.constant 0 : index
    %c0_69 = arith.constant 0 : index
    %c0_70 = arith.constant 0 : index
    %150 = vector.load %arg13[%c0_68, %c0_69, %c0_70] : memref<1x1x96xf32, #tpu.memory_space<vmem>>, vector<1x1x96xf32>
    %151 = vector.shape_cast %150 : vector<1x1x96xf32> to vector<1x96xf32>
    %152 = vector.broadcast %151 : vector<1x96xf32> to vector<192x96xf32>
    %153 = arith.addf %149, %152 : vector<192x96xf32>
    %154 = arith.addf %135, %153 : vector<192x96xf32>
    %cst_71 = arith.constant dense<0.000000e+00> : vector<192xf32>
    %155 = vector.multi_reduction <add>, %154, %cst_71 [1] : vector<192x96xf32> to vector<192xf32>
    %156 = vector.shape_cast %155 : vector<192xf32> to vector<192x1xf32>
    %cst_72 = arith.constant 9.600000e+01 : f32
    %157 = vector.broadcast %cst_72 : f32 to vector<192x1xf32>
    %158 = arith.divf %156, %157 : vector<192x1xf32>
    %159 = vector.broadcast %158 : vector<192x1xf32> to vector<192x96xf32>
    %160 = arith.subf %154, %159 : vector<192x96xf32>
    %161 = arith.mulf %160, %160 : vector<192x96xf32>
    %cst_73 = arith.constant dense<0.000000e+00> : vector<192xf32>
    %162 = vector.multi_reduction <add>, %161, %cst_73 [1] : vector<192x96xf32> to vector<192xf32>
    %163 = vector.shape_cast %162 : vector<192xf32> to vector<192x1xf32>
    %cst_74 = arith.constant 9.600000e+01 : f32
    %164 = vector.broadcast %cst_74 : f32 to vector<192x1xf32>
    %165 = arith.divf %163, %164 : vector<192x1xf32>
    %166 = vector.broadcast %158 : vector<192x1xf32> to vector<192x96xf32>
    %167 = arith.subf %154, %166 : vector<192x96xf32>
    %cst_75 = arith.constant 9.99999974E-6 : f32
    %168 = vector.broadcast %cst_75 : f32 to vector<192x1xf32>
    %169 = arith.addf %165, %168 : vector<192x1xf32>
    %170 = math.rsqrt %169 : vector<192x1xf32>
    %171 = vector.broadcast %170 : vector<192x1xf32> to vector<192x96xf32>
    %172 = arith.mulf %167, %171 : vector<192x96xf32>
    %c0_76 = arith.constant 0 : index
    %c0_77 = arith.constant 0 : index
    %c0_78 = arith.constant 0 : index
    %173 = vector.load %arg16[%c0_76, %c0_77, %c0_78] : memref<1x1x96xf32, #tpu.memory_space<vmem>>, vector<1x1x96xf32>
    %174 = vector.shape_cast %173 : vector<1x1x96xf32> to vector<1x96xf32>
    %175 = vector.broadcast %174 : vector<1x96xf32> to vector<192x96xf32>
    %176 = arith.mulf %172, %175 : vector<192x96xf32>
    %c0_79 = arith.constant 0 : index
    %c0_80 = arith.constant 0 : index
    %c0_81 = arith.constant 0 : index
    %177 = vector.load %arg17[%c0_79, %c0_80, %c0_81] : memref<1x1x96xf32, #tpu.memory_space<vmem>>, vector<1x1x96xf32>
    %178 = vector.shape_cast %177 : vector<1x1x96xf32> to vector<1x96xf32>
    %179 = vector.broadcast %178 : vector<1x96xf32> to vector<192x96xf32>
    %180 = arith.addf %176, %179 : vector<192x96xf32>
    %181 = vector.shape_cast %180 : vector<192x96xf32> to vector<16x12x96xf32>
    %c0_82 = arith.constant 0 : index
    %c0_83 = arith.constant 0 : index
    %c0_84 = arith.constant 0 : index
    %182 = vector.load %arg18[%c0_82, %c0_83, %c0_84] : memref<16x12x96xf32, #tpu.memory_space<vmem>>, vector<16x12x96xf32>
    tpu.vector_store %arg18[%c0_82, %c0_83, %c0_84], %181 {strides = array<i32>} : memref<16x12x96xf32, #tpu.memory_space<vmem>>, vector<16x12x96xf32>,
    return
  }
  func.func @transform_0(%arg0: i32) -> (i32, i32, i32) {
    %c0_i32 = arith.constant 0 : i32
    %c0_i32_0 = arith.constant 0 : i32
    %c0_i32_1 = arith.constant 0 : i32
    return %arg0, %c0_i32, %c0_i32_0 : i32, i32, i32
  }
  func.func @transform_1(%arg0: i32) -> (i32, i32, i32) {
    %c0_i32 = arith.constant 0 : i32
    %c0_i32_0 = arith.constant 0 : i32
    %c0_i32_1 = arith.constant 0 : i32
    %c0_i32_2 = arith.constant 0 : i32
    return %c0_i32, %c0_i32_0, %c0_i32_1 : i32, i32, i32
  }
  func.func @transform_2(%arg0: i32) -> (i32, i32, i32) {
    %c0_i32 = arith.constant 0 : i32
    %c0_i32_0 = arith.constant 0 : i32
    %c0_i32_1 = arith.constant 0 : i32
    %c0_i32_2 = arith.constant 0 : i32
    return %c0_i32, %c0_i32_0, %c0_i32_1 : i32, i32, i32
  }
  func.func @transform_3(%arg0: i32) -> (i32, i32, i32) {
    %c0_i32 = arith.constant 0 : i32
    %c0_i32_0 = arith.constant 0 : i32
    %c0_i32_1 = arith.constant 0 : i32
    %c0_i32_2 = arith.constant 0 : i32
    return %c0_i32, %c0_i32_0, %c0_i32_1 : i32, i32, i32
  }
  func.func @transform_4(%arg0: i32) -> (i32, i32, i32) {
    %c0_i32 = arith.constant 0 : i32
    %c0_i32_0 = arith.constant 0 : i32
    %c0_i32_1 = arith.constant 0 : i32
    %c0_i32_2 = arith.constant 0 : i32
    return %c0_i32, %c0_i32_0, %c0_i32_1 : i32, i32, i32
  }
  func.func @transform_5(%arg0: i32) -> (i32, i32, i32) {
    %c0_i32 = arith.constant 0 : i32
    %c0_i32_0 = arith.constant 0 : i32
    %c0_i32_1 = arith.constant 0 : i32
    %c0_i32_2 = arith.constant 0 : i32
    return %c0_i32, %c0_i32_0, %c0_i32_1 : i32, i32, i32
  }
  func.func @transform_6(%arg0: i32) -> (i32, i32, i32) {
    %c0_i32 = arith.constant 0 : i32
    %c0_i32_0 = arith.constant 0 : i32
    %c0_i32_1 = arith.constant 0 : i32
    %c0_i32_2 = arith.constant 0 : i32
    return %c0_i32, %c0_i32_0, %c0_i32_1 : i32, i32, i32
  }
  func.func @transform_7(%arg0: i32) -> (i32, i32, i32) {
    %c0_i32 = arith.constant 0 : i32
    %c0_i32_0 = arith.constant 0 : i32
    %c0_i32_1 = arith.constant 0 : i32
    %c0_i32_2 = arith.constant 0 : i32
    return %c0_i32, %c0_i32_0, %c0_i32_1 : i32, i32, i32
  }
  func.func @transform_8(%arg0: i32) -> (i32, i32, i32) {
    %c0_i32 = arith.constant 0 : i32
    %c0_i32_0 = arith.constant 0 : i32
    %c0_i32_1 = arith.constant 0 : i32
    %c0_i32_2 = arith.constant 0 : i32
    return %c0_i32, %c0_i32_0, %c0_i32_1 : i32, i32, i32
  }
  func.func @transform_9(%arg0: i32) -> (i32, i32, i32) {
    %c0_i32 = arith.constant 0 : i32
    %c0_i32_0 = arith.constant 0 : i32
    %c0_i32_1 = arith.constant 0 : i32
    %c0_i32_2 = arith.constant 0 : i32
    return %c0_i32, %c0_i32_0, %c0_i32_1 : i32, i32, i32
  }
  func.func @transform_10(%arg0: i32) -> (i32, i32, i32) {
    %c0_i32 = arith.constant 0 : i32
    %c0_i32_0 = arith.constant 0 : i32
    %c0_i32_1 = arith.constant 0 : i32
    %c0_i32_2 = arith.constant 0 : i32
    return %c0_i32, %c0_i32_0, %c0_i32_1 : i32, i32, i32
  }
  func.func @transform_11(%arg0: i32) -> (i32, i32, i32) {
    %c0_i32 = arith.constant 0 : i32
    %c0_i32_0 = arith.constant 0 : i32
    %c0_i32_1 = arith.constant 0 : i32
    %c0_i32_2 = arith.constant 0 : i32
    return %c0_i32, %c0_i32_0, %c0_i32_1 : i32, i32, i32
  }
  func.func @transform_12(%arg0: i32) -> (i32, i32, i32) {
    %c0_i32 = arith.constant 0 : i32
    %c0_i32_0 = arith.constant 0 : i32
    %c0_i32_1 = arith.constant 0 : i32
    %c0_i32_2 = arith.constant 0 : i32
    return %c0_i32, %c0_i32_0, %c0_i32_1 : i32, i32, i32
  }
  func.func @transform_13(%arg0: i32) -> (i32, i32, i32) {
    %c0_i32 = arith.constant 0 : i32
    %c0_i32_0 = arith.constant 0 : i32
    %c0_i32_1 = arith.constant 0 : i32
    %c0_i32_2 = arith.constant 0 : i32
    return %c0_i32, %c0_i32_0, %c0_i32_1 : i32, i32, i32
  }
  func.func @transform_14(%arg0: i32) -> (i32, i32, i32) {
    %c0_i32 = arith.constant 0 : i32
    %c0_i32_0 = arith.constant 0 : i32
    %c0_i32_1 = arith.constant 0 : i32
    %c0_i32_2 = arith.constant 0 : i32
    return %c0_i32, %c0_i32_0, %c0_i32_1 : i32, i32, i32
  }
  func.func @transform_15(%arg0: i32) -> (i32, i32, i32) {
    %c0_i32 = arith.constant 0 : i32
    %c0_i32_0 = arith.constant 0 : i32
    %c0_i32_1 = arith.constant 0 : i32
    %c0_i32_2 = arith.constant 0 : i32
    return %c0_i32, %c0_i32_0, %c0_i32_1 : i32, i32, i32
  }
  func.func @transform_16(%arg0: i32) -> (i32, i32, i32) {
    %c0_i32 = arith.constant 0 : i32
    %c0_i32_0 = arith.constant 0 : i32
    %c0_i32_1 = arith.constant 0 : i32
    %c0_i32_2 = arith.constant 0 : i32
    return %c0_i32, %c0_i32_0, %c0_i32_1 : i32, i32, i32
  }
  func.func @transform_17(%arg0: i32) -> (i32, i32, i32) {
    %c0_i32 = arith.constant 0 : i32
    %c0_i32_0 = arith.constant 0 : i32
    %c0_i32_1 = arith.constant 0 : i32
    return %arg0, %c0_i32, %c0_i32_0 : i32, i32, i32
  }
}

</mosaic_0001>

<bundles_post_ra>
// kernel: tpu_custom_call.1
= control target key start
LH: loop header
LB: loop body
LE: loop exit
PB: predicated region body
PF: predicated region fallthrough
CT: control target
= control target key end

     0   :  { %vm268_vm0 = vcmask 785408   ;;  %vm16146_vm1 = vmmov 0   ;;  %vm1114_vm2 = vcmask 195584   ;;  %vm2240_vm3 = vcmask 1045504   ;;  %s16149_s30 = smov 56   ;;  %s16150_s18 = smov 24   ;;  %s21808_s1 = inlined_call_operand.vmem [shape: bf16[1,96,96], index: 1, kind: input, shape index: {}]   ;;  %s21809_s0 = inlined_call_operand.vmem [shape: f32[16,12,96], index: 0, kind: input, shape index: {}]   ;;  %s21810_s3 = inlined_call_operand.vmem [shape: bf16[1,96,96], index: 3, kind: input, shape index: {}]   ;;  %s21811_s5 = inlined_call_operand.vmem [shape: bf16[1,96,96], index: 5, kind: input, shape index: {}]   ;;  %s21812_s2 = inlined_call_operand.vmem [shape: f32[1,1,96], index: 2, kind: input, shape index: {}]   ;;  %s21813_s4 = inlined_call_operand.vmem [shape: f32[1,1,96], index: 4, kind: input, shape index: {}]   ;;  %s21814_s6 = inlined_call_operand.vmem [shape: f32[1,1,96], index: 6, kind: input, shape index: {}]   ;;  %s21815_s7 = inlined_call_operand.vmem [shape: bf16[1,96,96], index: 7, kind: input, shape index: {}]   ;;  %s21816_s8 = inlined_call_operand.vmem [shape: f32[1,1,96], index: 8, kind: input, shape index: {}]   ;;  %s21817_s9 = inlined_call_operand.vmem [shape: bf16[1,96,256], index: 9, kind: input, shape index: {}]   ;;  %s21818_s13 = inlined_call_operand.vmem [shape: f32[1,1,96], index: 13, kind: input, shape index: {}]   ;;  %s21819_s14 = inlined_call_operand.vmem [shape: f32[1,1,96], index: 14, kind: input, shape index: {}]   ;;  %s21820_s11 = inlined_call_operand.vmem [shape: bf16[1,256,96], index: 11, kind: input, shape index: {}]   ;;  %s21821_s10 = inlined_call_operand.vmem [shape: f32[1,1,256], index: 10, kind: input, shape index: {}]   ;;  %s21822_s12 = inlined_call_operand.vmem [shape: f32[1,1,96], index: 12, kind: input, shape index: {}]   ;;  %s21823_s15 = inlined_call_operand.vmem [shape: f32[1,1,96], index: 15, kind: input, shape index: {}]   ;;  %s21824_s16 = inlined_call_operand.vmem [shape: f32[1,1,96], index: 16, kind: input, shape index: {}]   ;;  %s21825_s17 = inlined_call_operand.vmem [shape: f32[16,12,96], index: 17, kind: output, shape index: {}]  }
   0x1   :  { %21961 = sst [smem:[#allocation128_spill]] %s21808_s1  ;;  %v15433_v37 = vld [vmem:[%s21810_s3] sm:$0xff]   ;;  %v15434_v48 = vld [vmem:[%s21810_s3 + $0x8] sm:$0xff]   ;;  %vm1867_vm4 = vcmask 97280   ;;  %vm1871_vm5 = vcmask 93184   ;;  %s16148_s1 = smov 80  }
   0x2   :  { %21962 = sst [smem:[#allocation129_spill]] %s21809_s0  ;;  %s21963_s26 = sld [smem:[#allocation128_spill]]  ;;  %v15459_v58 = vld [vmem:[%s21811_s5] sm:$0xff]   ;;  %vm9391_vm6 = vcmask 588800   ;;  %vm9358_vm7 = vcmask 392192   ;;  %vm13787_vm8 = vcmask 781312  }
   0x3   :  { %s21964_s19 = sld [smem:[#allocation129_spill]]  ;;  %s16151_s0 = smov 48  }
   0x4   :  { %s16152_s20 = smov 72  }
   0x8   :  { %v15423_v0 = vld [vmem:[%s21963_s26] sm:$0xff]   ;;  %v15424_v1 = vld [vmem:[%s21963_s26 + $0x8] sm:$0xff]   ;;  %v15425_v2 = vld [vmem:[%s21963_s26 + $0x10] sm:$0xff]  }
   0x9   :  { %15400 = vmatprep.subr.bf16.mxu1 %v15423_v0  ;;  %14488 = vmatprep.subr.bf16.mxu0 %v15423_v0  ;;  %v73_v3 = vld [vmem:[%s21964_s19 + $0x80] sm:$0xff]  ;;  %v74_v4 = vld [vmem:[%s21964_s19 + $0x88] sm:$0xf]  ;;  %v75_v5 = vld [vmem:[%s21964_s19 + $0x90] sm:$0xff] }
   0xa   :  { %15406 = vmatpush3.bf16.msra.mxu1 %v15423_v0  ;;  %14489 = vmatpush3.bf16.msra.mxu0 %v15423_v0  ;;  %v16264_v6 = vcombine.high %v73_v3, %v73_v3  ;;  %v166_v7 = vcombine.low %v74_v4, %v75_v5  ;;  %v15426_v8 = vld [vmem:[%s21963_s26 + $0x18] sm:$0xff]   ;;  %v77_v10 = vld [vmem:[%s21964_s19 + $0xa0] sm:$0xff]  ;;  %v79_v13 = vld [vmem:[%s21964_s19 + $0xb0] sm:$0xff]  ;;  %v16281_v14 = vcombine.high %v75_v5, %v75_v5 }
   0xb   :  { %15401 = vmatprep.subr.bf16.mxu1 %v15424_v1  ;;  %14490 = vmatprep.subr.bf16.mxu0 %v15424_v1  ;;  %v15427_v11 = vld [vmem:[%s21963_s26 + $0x20] sm:$0xff]   ;;  %v16285_v15 = vcombine.high %v77_v10, %v77_v10  ;;  %v15428_v16 = vld [vmem:[%s21963_s26 + $0x28] sm:$0xff]   ;;  %v76_v17 = vld [vmem:[%s21964_s19 + $0x98] sm:$0xf]  ;;  %v16296_v19 = vcombine.high %v79_v13, %v79_v13 }
   0xc   :  { %21965 = vst [vmem:[#allocation2_spill] sm:$0xff] %v16264_v6  ;;  %v165_v9 = vcombine.low %v73_v3, %v16264_v6  ;;  %21966 = vst [vmem:[#allocation3_spill] sm:$0xff] %v16281_v14  ;;  %v78_v18 = vld [vmem:[%s21964_s19 + $0xa8] sm:$0xf]  ;;  %v80_v20 = vld [vmem:[%s21964_s19 + $0xb8] sm:$0xf]  ;;  %v167_v21 = vcombine.low %v16281_v14, %v76_v17 }
   0xd   :  { %21967 = vst [vmem:[#allocation4_spill] sm:$0xff] %v16285_v15  ;;  %21968 = vst [vmem:[#allocation5_spill] sm:$0xff] %v16296_v19  ;;  %v168_v22 = vcombine.low %v77_v10, %v16285_v15  ;;  %v16306_v23 = vld [vmem:[%s21964_s19 + $0xc0] sm:$0xff]  ;;  %v58_v25 = vld [vmem:[%s21964_s19 + $0x8] sm:$0xf]  ;;  %v169_v30 = vcombine.low %v78_v18, %v79_v13  ;;  %v170_v31 = vcombine.low %v16296_v19, %v80_v20 }
   0xe   :  { %15407 = vmatpush3.bf16.msra.mxu1 %v15424_v1  ;;  %14491 = vmatpush3.bf16.msra.mxu0 %v15424_v1  ;;  %v16276_v12 = vpack.c.bf16 %v166_v7, %v165_v9  ;;  %v57_v24 = vld [vmem:[%s21964_s19] sm:$0xff]  ;;  %v59_v26 = vld [vmem:[%s21964_s19 + $0x10] sm:$0xff]  ;;  %v60_v27 = vld [vmem:[%s21964_s19 + $0x18] sm:$0xf]  ;;  %v16355_v44 = vcombine.high %v16306_v23, %v16306_v23 }
   0xf   :  { %15402 = vmatprep.subr.bf16.mxu1 %v15425_v2  ;;  %14492 = vmatprep.subr.bf16.mxu0 %v15425_v2  ;;  %v16320_v28 = vcombine.high %v57_v24, %v57_v24  ;;  %v61_v29 = vld [vmem:[%s21964_s19 + $0x20] sm:$0xff]  ;;  %v16326_v32 = vcombine.high %v59_v26, %v59_v26  ;;  %v154_v33 = vcombine.low %v58_v25, %v59_v26  ;;  %v62_v34 = vld [vmem:[%s21964_s19 + $0x28] sm:$0xf]  ;;  %v63_v35 = vld [vmem:[%s21964_s19 + $0x30] sm:$0xff] }
  0x10   :  { %14512 = vmatprep.mubr.msk.bf16.mxu1 %vm268_vm0, %v16276_v12  ;;  %v64_v36 = vld [vmem:[%s21964_s19 + $0x38] sm:$0xf]  ;;  %v85_v38 = vld [vmem:[%s21964_s19 + $0xe0] sm:$0xff]  ;;  %v16344_v40 = vcombine.high %v61_v29, %v61_v29  ;;  %v16346_v41 = vcombine.high %v63_v35, %v63_v35  ;;  %v16348_v42 = vpack.c.bf16 %v168_v22, %v167_v21  ;;  %v83_v43 = vld [vmem:[%s21964_s19 + $0xd0] sm:$0xff]  ;;  %21973 = vst [vmem:[#allocation10_spill] sm:$0xff] %v16355_v44 }
  0x11   :  { %21969 = vst [vmem:[#allocation6_spill] sm:$0xff] %v16320_v28  ;;  %21970 = vst [vmem:[#allocation7_spill] sm:$0xff] %v16326_v32  ;;  %v153_v39 = vcombine.low %v57_v24, %v16320_v28  ;;  %v155_v45 = vcombine.low %v16326_v32, %v60_v27  ;;  %v157_v46 = vcombine.low %v62_v34, %v63_v35  ;;  %v65_v47 = vld [vmem:[%s21964_s19 + $0x40] sm:$0xff]  ;;  %v82_v49 = vld [vmem:[%s21964_s19 + $0xc8] sm:$0xf] }
  0x12   :  { %15408 = vmatpush3.bf16.msra.mxu1 %v15425_v2  ;;  %14493 = vmatpush3.bf16.msra.mxu0 %v15425_v2  ;;  %21971 = vst [vmem:[#allocation8_spill] sm:$0xff] %v16344_v40  ;;  %21972 = vst [vmem:[#allocation9_spill] sm:$0xff] %v16346_v41  ;;  %v84_v50 = vld [vmem:[%s21964_s19 + $0xd8] sm:$0xf]  ;;  %v16370_v51 = vcombine.high %v83_v43, %v83_v43  ;;  %v156_v53 = vcombine.low %v61_v29, %v16344_v40  ;;  %v66_v57 = vld [vmem:[%s21964_s19 + $0x48] sm:$0xf] }
  0x13   :  { %15403 = vmatprep.subr.bf16.mxu1 %v15426_v8  ;;  %14494 = vmatprep.subr.bf16.mxu0 %v15426_v8  ;;  %v16372_v52 = vpack.c.bf16 %v154_v33, %v153_v39  ;;  %v158_v54 = vcombine.low %v16346_v41, %v64_v36  ;;  %v16376_v55 = vpack.c.bf16 %v170_v31, %v169_v30  ;;  %v69_v61 = vld [vmem:[%s21964_s19 + $0x60] sm:$0xff]  ;;  %v87_v62 = vld [vmem:[%s21964_s19 + $0xf0] sm:$0xff]  ;;  %v15460_v1 = vld [vmem:[%s21811_s5 + $0x8] sm:$0xff]  }
  0x14   :  { %21974 = vst [vmem:[#allocation11_spill] sm:$0xff] %v16370_v51  ;;  %v16378_v56 = vcombine.high %v85_v38, %v85_v38  ;;  %v16386_v59 = vpack.c.bf16 %v156_v53, %v155_v45  ;;  %v16388_v60 = vcombine.high %v65_v47, %v65_v47  ;;  %v67_v0 = vld [vmem:[%s21964_s19 + $0x50] sm:$0xff]  ;;  %v171_v2 = vcombine.low %v16306_v23, %v16355_v44  ;;  %v68_v13 = vld [vmem:[%s21964_s19 + $0x58] sm:$0xf]  ;;  %v86_v21 = vld [vmem:[%s21964_s19 + $0xe8] sm:$0xf] }
  0x15   :  { %14500 = vmatprep.mubr.msk.bf16.mxu0 %vm268_vm0, %v16372_v52  ;;  %v16398_v63 = vpack.c.bf16 %v158_v54, %v157_v46  ;;  %v172_v3 = vcombine.low %v82_v49, %v83_v43  ;;  %v173_v4 = vcombine.low %v16370_v51, %v84_v50  ;;  %v16414_v7 = vcombine.high %v67_v0, %v67_v0  ;;  %v15439_v9 = vld [vmem:[%s21810_s3 + $0x10] sm:$0xff]   ;;  %v88_v22 = vld [vmem:[%s21964_s19 + $0xf8] sm:$0xf]  ;;  %v70_v34 = vld [vmem:[%s21964_s19 + $0x68] sm:$0xf] }
  0x16   :  { %15409 = vmatpush3.bf16.msra.mxu1 %v15426_v8  ;;  %14495 = vmatpush3.bf16.msra.mxu0 %v15426_v8  ;;  %21975 = vst [vmem:[#allocation12_spill] sm:$0xff] %v16378_v56  ;;  %21976 = vst [vmem:[#allocation13_spill] sm:$0xff] %v16388_v60  ;;  %v174_v5 = vcombine.low %v85_v38, %v16378_v56  ;;  %v16416_v8 = vcombine.high %v69_v61, %v69_v61  ;;  %v15461_v18 = vld [vmem:[%s21811_s5 + $0x10] sm:$0xff]   ;;  %v15440_v26 = vld [vmem:[%s21810_s3 + $0x18] sm:$0xff]   ;;  %v21835_v49 = vmov 0.0  }
  0x17   :  { %15404 = vmatprep.subr.bf16.mxu1 %v15427_v11  ;;  %14496 = vmatprep.subr.bf16.mxu0 %v15427_v11  ;;  %21977 = vst [vmem:[#allocation14_spill] sm:$0xff] %v16414_v7  ;;  %v159_v10 = vcombine.low %v65_v47, %v16388_v60  ;;  %v16431_v17 = vcombine.high %v87_v62, %v87_v62  ;;  %v71_v25 = vld [vmem:[%s21964_s19 + $0x70] sm:$0xff]  ;;  %v72_v35 = vld [vmem:[%s21964_s19 + $0x78] sm:$0xf]  ;;  %v15445_v36 = vld [vmem:[%s21810_s3 + $0x20] sm:$0xff]  }
  0x18   :  { %21978 = vst [vmem:[#allocation15_spill] sm:$0xff] %v16416_v8  ;;  %v16436_v20 = vpack.c.bf16 %v174_v5, %v173_v4  ;;  %v161_v23 = vcombine.low %v16414_v7, %v68_v13  ;;  %v162_v24 = vcombine.low %v69_v61, %v16416_v8  ;;  %v175_v29 = vcombine.low %v86_v21, %v87_v62  ;;  %v15446_v43 = vld [vmem:[%s21810_s3 + $0x28] sm:$0xff]   ;;  %v15462_v46 = vld [vmem:[%s21811_s5 + $0x18] sm:$0xff]   ;;  %v15463_v47 = vld [vmem:[%s21811_s5 + $0x20] sm:$0xff]  }
  0x19   :  { %21979 = vst [vmem:[#allocation16_spill] sm:$0xff] %v16431_v17  ;;  %v176_v30 = vcombine.low %v16431_v17, %v88_v22  ;;  %v16455_v31 = vcombine.high %v71_v25, %v71_v25  ;;  %v163_v38 = vcombine.low %v70_v34, %v71_v25 }
  0x1a   :  { %15410 = vmatpush3.bf16.msra.mxu1 %v15427_v11  ;;  %14497 = vmatpush3.bf16.msra.mxu0 %v15427_v11  ;;  %v160_v11 = vcombine.low %v66_v57, %v67_v0  ;;  %v205_v33 = vpack.c.bf16 %v162_v24, %v161_v23 }
  0x1b   :  { %15405 = vmatprep.subr.bf16.mxu1 %v15428_v16  ;;  %14498 = vmatprep.subr.bf16.mxu0 %v15428_v16  ;;  %21980 = vst [vmem:[#allocation17_spill] sm:$0xff] %v16455_v31  ;;  %v164_v39 = vcombine.low %v16455_v31, %v72_v35 }
  0x1c   :  { %v204_v27 = vpack.c.bf16 %v160_v11, %v159_v10 }
  0x1d   :  { %v206_v45 = vpack.c.bf16 %v164_v39, %v163_v38 }
  0x1e   :  { %15411 = vmatpush3.bf16.msra.mxu1 %v15428_v16  ;;  %14499 = vmatpush3.bf16.msra.mxu0 %v15428_v16  ;;  %v16429_v16 = vpack.c.bf16 %v172_v3, %v171_v2 }
  0x1f   :  { %14524 = vmatprep.subr.bf16.mxu1 %v15433_v37  ;;  %14560 = vmatprep.subr.bf16.mxu0 %v15459_v58 }
  0x21   :  { %14513 = vmatmul.mubr.msk.bf16.vlgmr.msra.gmra.mrb[0].mxu1 %vm268_vm0, %v16348_v42  ;;  %14501 = vmatmul.mubr.msk.bf16.vlgmr.msra.gmra.mrb[0].mxu0 %vm268_vm0, %v16386_v59 }
  0x22   :  { %14525 = vmatpush3.bf16.msra.mxu1 %v15433_v37  ;;  %14516 = vmatprep.mubr.msk.bf16.mxu1 %vm268_vm0, %v16376_v55  ;;  %v212_v37 = vpack.c.bf16 %v176_v30, %v175_v29 }
  0x23   :  { %14526 = vmatprep.subr.bf16.mxu1 %v15434_v48  ;;  %14504 = vmatprep.mubr.msk.bf16.mxu0 %vm268_vm0, %v16398_v63 }
  0x24   :  { %14561 = vmatpush3.bf16.msra.mxu0 %v15459_v58 }
  0x25   :  { %14562 = vmatprep.subr.bf16.mxu0 %v15460_v1 }
  0x26   :  { %14527 = vmatpush3.bf16.msra.mxu1 %v15434_v48  ;;  %v15464_v48 = vld [vmem:[%s21811_s5 + $0x28] sm:$0xff]  }
  0x27   :  { %14528 = vmatprep.subr.bf16.mxu1 %v15439_v9 }
  0x28   :  { %14563 = vmatpush3.bf16.msra.mxu0 %v15460_v1 }
  0x29   :  { %14517 = vmatmul.mubr.msk.bf16.gmra.mrb[4].mxu1 %vm268_vm0, %v16429_v16  ;;  %14564 = vmatprep.subr.bf16.mxu0 %v15461_v18 }
  0x2a   :  { %14529 = vmatpush3.bf16.msra.mxu1 %v15439_v9  ;;  %14520 = vmatprep.mubr.msk.bf16.mxu1 %vm268_vm0, %v16436_v20 }
  0x2b   :  { %14530 = vmatprep.subr.bf16.mxu1 %v15440_v26  ;;  %14505 = vmatmul.mubr.msk.bf16.gmra.mrb[4].mxu0 %vm268_vm0, %v204_v27 }
  0x2c   :  { %14508 = vmatprep.mubr.msk.bf16.mxu0 %vm268_vm0, %v205_v33  ;;  %14565 = vmatpush3.bf16.msra.mxu0 %v15461_v18 }
  0x2d   :  { %14566 = vmatprep.subr.bf16.mxu0 %v15462_v46 }
  0x2e   :  { %14531 = vmatpush3.bf16.msra.mxu1 %v15440_v26 }
  0x2f   :  { %14532 = vmatprep.subr.bf16.mxu1 %v15445_v36 }
  0x30   :  { %14567 = vmatpush3.bf16.msra.mxu0 %v15462_v46 }
  0x31   :  { %14521 = vmatmul.mubr.msk.bf16.gmra.mrb[8].mxu1 %vm268_vm0, %v212_v37  ;;  %14568 = vmatprep.subr.bf16.mxu0 %v15463_v47 }
  0x32   :  { %14533 = vmatpush3.bf16.msra.mxu1 %v15445_v36  ;;  %14536 = vmatprep.mubr.msk.bf16.mxu1 %vm268_vm0, %v16372_v52 }
  0x33   :  { %14534 = vmatprep.subr.bf16.mxu1 %v15446_v43  ;;  %14509 = vmatmul.mubr.msk.bf16.gmra.mrb[8].mxu0 %vm268_vm0, %v206_v45 }
  0x34   :  { %14572 = vmatprep.mubr.msk.bf16.mxu0 %vm268_vm0, %v16372_v52  ;;  %14569 = vmatpush3.bf16.msra.mxu0 %v15463_v47 }
  0x35   :  { %14570 = vmatprep.subr.bf16.mxu0 %v15464_v48 }
  0x36   :  { %14535 = vmatpush3.bf16.msra.mxu1 %v15446_v43 }
  0x37   :  { %14596 = vmatprep.subr.bf16.mxu1 %v21835_v49 }
  0x38   :  { %14571 = vmatpush3.bf16.msra.mxu0 %v15464_v48 }
  0x39   :  { %14537 = vmatmul.mubr.msk.bf16.vlgmr.msra.gmra.mrb[12].mxu1 %vm268_vm0, %v16386_v59  ;;  %14632 = vmatprep.subr.bf16.mxu0 %v21835_v49 }
  0x3a   :  { %14540 = vmatprep.mubr.msk.bf16.mxu1 %vm268_vm0, %v16398_v63 }
  0x3b   :  { %14573 = vmatmul.mubr.msk.bf16.vlgmr.msra.gmra.mrb[12].mxu0 %vm268_vm0, %v16386_v59 }
  0x3c   :  { %14576 = vmatprep.mubr.msk.bf16.mxu0 %vm268_vm0, %v16398_v63 }
  0x41   :  { %14541 = vmatmul.mubr.msk.bf16.gmra.mrb[16].mxu1 %vm268_vm0, %v204_v27 }
  0x42   :  { %14544 = vmatprep.mubr.msk.bf16.mxu1 %vm268_vm0, %v205_v33 }
  0x43   :  { %14577 = vmatmul.mubr.msk.bf16.gmra.mrb[16].mxu0 %vm268_vm0, %v204_v27 }
  0x44   :  { %14580 = vmatprep.mubr.msk.bf16.mxu0 %vm268_vm0, %v205_v33 }
  0x49   :  { %14545 = vmatmul.mubr.msk.bf16.gmra.mrb[20].mxu1 %vm268_vm0, %v206_v45 }
  0x4a   :  { %14548 = vmatprep.mubr.msk.bf16.mxu1 %vm268_vm0, %v16276_v12 }
  0x4b   :  { %14581 = vmatmul.mubr.msk.bf16.gmra.mrb[20].mxu0 %vm268_vm0, %v206_v45 }
  0x4c   :  { %14584 = vmatprep.mubr.msk.bf16.mxu0 %vm268_vm0, %v16276_v12  ;;  %v16534_v12 = vld [vmem:[%s21812_s2] ss:$0 sm:$0xff] }
  0x51   :  { %14549 = vmatmul.mubr.msk.bf16.gmra.mrb[24].mxu1 %vm268_vm0, %v16348_v42 }
  0x52   :  { %14552 = vmatprep.mubr.msk.bf16.mxu1 %vm268_vm0, %v16376_v55 }
  0x53   :  { %14585 = vmatmul.mubr.msk.bf16.gmra.mrb[24].mxu0 %vm268_vm0, %v16348_v42 }
  0x54   :  { %14588 = vmatprep.mubr.msk.bf16.mxu0 %vm268_vm0, %v16376_v55 }
  0x59   :  { %14553 = vmatmul.mubr.msk.bf16.gmra.mrb[28].mxu1 %vm268_vm0, %v16429_v16 }
  0x5a   :  { %14556 = vmatprep.mubr.msk.bf16.mxu1 %vm268_vm0, %v16436_v20 }
  0x5b   :  { %14589 = vmatmul.mubr.msk.bf16.gmra.mrb[28].mxu0 %vm268_vm0, %v16429_v16 }
  0x5c   :  { %14592 = vmatprep.mubr.msk.bf16.mxu0 %vm268_vm0, %v16436_v20 }
  0x61   :  { %14557 = vmatmul.mubr.msk.bf16.gmra.mrb[32].mxu1 %vm268_vm0, %v212_v37 }
  0x62   :  { %14598 = vmatprep.mubr.msk.bf16.mxu1 %vm16146_vm1, %v21835_v49 }
  0x63   :  { %14593 = vmatmul.mubr.msk.bf16.gmra.mrb[32].mxu0 %vm268_vm0, %v212_v37 }
  0x64   :  { %14634 = vmatprep.mubr.msk.bf16.mxu0 %vm16146_vm1, %v21835_v49 }
  0xf4   :  { %v14514_v42 = vpop.f32.mrb[0].mxu1  ;;  %v14502_v54 = vpop.f32.mrb[0].mxu0 }
  0xf5   :  { %v387_v50 = vpop.f32.mrb[1].mxu1  ;;  %v396_v55 = vadd.f32 %v14514_v42, %v16534_v12  ;;  %v348_v59 = vadd.f32 %v14502_v54, %v16534_v12  ;;  %v339_v61 = vpop.f32.mrb[1].mxu0 }
  0xf6   :  { %v388_v52 = vadd.f32 %v16534_v12, %v387_v50  ;;  %v14515_v53 = vpop.f32.mrb[2].mxu1  ;;  %v340_v0 = vadd.f32 %v16534_v12, %v339_v61  ;;  %v14503_v1 = vpop.f32.mrb[2].mxu0 }
  0xf7   :  { %v399_v57 = vadd.f32 %v14515_v53, %v16534_v12  ;;  %v390_v58 = vpop.f32.mrb[3].mxu1  ;;  %v351_v3 = vadd.f32 %v14503_v1, %v16534_v12  ;;  %v342_v4 = vpop.f32.mrb[3].mxu0  ;;  %v840_v13 = vcombine.high %v396_v55, %v396_v55  ;;  %v828_v16 = vcombine.high %v348_v59, %v348_v59 }
  0xf8   :  { %v838_v62 = vcombine.high %v388_v52, %v388_v52  ;;  %v391_v63 = vadd.f32 %v16534_v12, %v390_v58  ;;  %v826_v10 = vcombine.high %v340_v0, %v340_v0  ;;  %v343_v11 = vadd.f32 %v16534_v12, %v342_v4 }
  0xf9   :  { %v841_v2 = vcombine.high %v399_v57, %v399_v57  ;;  %v829_v18 = vcombine.high %v351_v3, %v351_v3 }
  0xfa   :  { %v978_v5 = vcombine.low %v388_v52, %v838_v62  ;;  %v839_v9 = vcombine.high %v391_v63, %v391_v63  ;;  %v970_v23 = vcombine.low %v340_v0, %v826_v10  ;;  %v827_v24 = vcombine.high %v343_v11, %v343_v11 }
  0xfb   :  { %v980_v25 = vcombine.low %v399_v57, %v841_v2  ;;  %v972_v39 = vcombine.low %v351_v3, %v829_v18 }
  0xfc   :  { %v979_v20 = vcombine.low %v839_v9, %v396_v55  ;;  %v16544_v21 = vpack.c.bf16 %v391_v63, %v978_v5  ;;  %v14518_v22 = vpop.f32.mrb[4].mxu1  ;;  %v971_v34 = vcombine.low %v827_v24, %v348_v59  ;;  %v16550_v35 = vpack.c.bf16 %v343_v11, %v970_v23 }
  0xfd   :  { %v412_v26 = vadd.f32 %v14518_v22, %v16534_v12  ;;  %v403_v27 = vpop.f32.mrb[5].mxu1 }
  0xfe   :  { %21981 = vst [vmem:[#allocation18_spill] sm:$0xff] %v16544_v21  ;;  %v16547_v29 = vpack.c.bf16 %v840_v13, %v979_v20  ;;  %v404_v30 = vadd.f32 %v16534_v12, %v403_v27  ;;  %v14519_v33 = vpop.f32.mrb[6].mxu1  ;;  %v14506_v36 = vpop.f32.mrb[4].mxu0  ;;  %v16556_v42 = vpack.c.bf16 %v828_v16, %v971_v34 }
  0xff   :  { %v844_v37 = vcombine.high %v412_v26, %v412_v26  ;;  %v406_v38 = vpop.f32.mrb[7].mxu1  ;;  %v364_v43 = vadd.f32 %v14506_v36, %v16534_v12  ;;  %v355_v45 = vpop.f32.mrb[5].mxu0  ;;  %v415_v53 = vadd.f32 %v14519_v33, %v16534_v12 }
 0x100   :  { %21982 = vst [vmem:[#allocation19_spill] sm:$0xff] %v16547_v29  ;;  %v842_v46 = vcombine.high %v404_v30, %v404_v30  ;;  %v16553_v47 = vpack.c.bf16 %v404_v30, %v980_v25  ;;  %v407_v48 = vadd.f32 %v16534_v12, %v406_v38  ;;  %v14507_v50 = vpop.f32.mrb[6].mxu0  ;;  %v356_v55 = vadd.f32 %v16534_v12, %v355_v45 }
 0x101   :  { %v982_v52 = vcombine.low %v412_v26, %v844_v37  ;;  %v832_v54 = vcombine.high %v364_v43, %v364_v43  ;;  %v358_v57 = vpop.f32.mrb[7].mxu0  ;;  %v367_v61 = vadd.f32 %v14507_v50, %v16534_v12  ;;  %v845_v16 = vcombine.high %v415_v53, %v415_v53 }
 0x102   :  { %21983 = vst [vmem:[#allocation20_spill] sm:$0xff] %v16553_v47  ;;  %v843_v58 = vcombine.high %v407_v48, %v407_v48  ;;  %v981_v59 = vcombine.low %v842_v46, %v407_v48  ;;  %v359_v62 = vadd.f32 %v16534_v12, %v358_v57  ;;  %v830_v1 = vcombine.high %v356_v55, %v356_v55 }
 0x103   :  { %v16562_v63 = vpack.c.bf16 %v415_v53, %v982_v52  ;;  %v974_v0 = vcombine.low %v364_v43, %v832_v54  ;;  %v16564_v2 = vpack.c.bf16 %v356_v55, %v972_v39  ;;  %v833_v22 = vcombine.high %v367_v61, %v367_v61 }
 0x104   :  { %v16566_v3 = vpack.c.bf16 %v843_v58, %v981_v59  ;;  %v14522_v4 = vpop.f32.mrb[8].mxu1  ;;  %v831_v5 = vcombine.high %v359_v62, %v359_v62  ;;  %v973_v13 = vcombine.low %v830_v1, %v359_v62  ;;  %v16586_v58 = vld [vmem:[%s21813_s4] ss:$0 sm:$0xff] }
 0x105   :  { %21984 = vst [vmem:[#allocation21_spill] sm:$0xff] %v16562_v63  ;;  %v428_v9 = vadd.f32 %v14522_v4, %v16534_v12  ;;  %v419_v10 = vpop.f32.mrb[9].mxu1  ;;  %v16569_v11 = vpack.c.bf16 %v367_v61, %v974_v0 }
 0x106   :  { %21985 = vst [vmem:[#allocation22_spill] sm:$0xff] %v16566_v3  ;;  %v420_v18 = vadd.f32 %v16534_v12, %v419_v10  ;;  %v14523_v20 = vpop.f32.mrb[10].mxu1  ;;  %v14510_v23 = vpop.f32.mrb[8].mxu0  ;;  %v16573_v27 = vpack.c.bf16 %v831_v5, %v973_v13 }
 0x107   :  { %21986 = vst [vmem:[#allocation23_spill] sm:$0xff] %v16569_v11  ;;  %v848_v24 = vcombine.high %v428_v9, %v428_v9  ;;  %v431_v25 = vadd.f32 %v14523_v20, %v16534_v12  ;;  %v422_v26 = vpop.f32.mrb[11].mxu1  ;;  %v380_v30 = vadd.f32 %v14510_v23, %v16534_v12  ;;  %v371_v33 = vpop.f32.mrb[9].mxu0 }
 0x108   :  { %v846_v34 = vcombine.high %v420_v18, %v420_v18  ;;  %v983_v36 = vcombine.low %v845_v16, %v420_v18  ;;  %v423_v37 = vadd.f32 %v16534_v12, %v422_v26  ;;  %v372_v38 = vadd.f32 %v16534_v12, %v371_v33  ;;  %v14511_v39 = vpop.f32.mrb[10].mxu0 }
 0x109   :  { %v849_v43 = vcombine.high %v431_v25, %v431_v25  ;;  %v985_v45 = vcombine.low %v848_v24, %v431_v25  ;;  %v836_v46 = vcombine.high %v380_v30, %v380_v30  ;;  %v383_v48 = vadd.f32 %v14511_v39, %v16534_v12  ;;  %v374_v50 = vpop.f32.mrb[11].mxu0 }
 0x10a   :  { %v16579_v52 = vpack.c.bf16 %v846_v34, %v983_v36  ;;  %v847_v53 = vcombine.high %v423_v37, %v423_v37  ;;  %v834_v54 = vcombine.high %v372_v38, %v372_v38  ;;  %v975_v55 = vcombine.low %v833_v22, %v372_v38 }
 0x10b   :  { %v16581_v57 = vpack.c.bf16 %v849_v43, %v985_v45  ;;  %v837_v59 = vcombine.high %v383_v48, %v383_v48  ;;  %v977_v61 = vcombine.low %v836_v46, %v383_v48  ;;  %v375_v62 = vadd.f32 %v16534_v12, %v374_v50 }
 0x10c   :  { %21987 = vst [vmem:[#allocation24_spill] sm:$0xff] %v16579_v52  ;;  %v984_v0 = vcombine.low %v423_v37, %v847_v53  ;;  %v14538_v1 = vpop.f32.mrb[12].mxu1  ;;  %v16589_v4 = vpack.c.bf16 %v834_v54, %v975_v55 }
 0x10d   :  { %21988 = vst [vmem:[#allocation25_spill] sm:$0xff] %v16581_v57  ;;  %v523_v5 = vpop.f32.mrb[13].mxu1  ;;  %v16591_v10 = vpack.c.bf16 %v837_v59, %v977_v61  ;;  %v835_v13 = vcombine.high %v375_v62, %v375_v62  ;;  %v532_v25 = vadd.f32 %v14538_v1, %v16586_v58 }
 0x10e   :  { %21989 = vst [vmem:[#allocation26_spill] sm:$0xff] %v16589_v4  ;;  %v16593_v16 = vpack.c.bf16 %v428_v9, %v984_v0  ;;  %v524_v18 = vadd.f32 %v16586_v58, %v523_v5  ;;  %v14539_v20 = vpop.f32.mrb[14].mxu1 }
 0x10f   :  { %21990 = vst [vmem:[#allocation27_spill] sm:$0xff] %v16591_v10  ;;  %v535_v22 = vadd.f32 %v14539_v20, %v16586_v58  ;;  %v526_v23 = vpop.f32.mrb[15].mxu1  ;;  %v976_v24 = vcombine.low %v375_v62, %v835_v13  ;;  %v884_v9 = vcombine.high %v532_v25, %v532_v25 }
 0x110   :  { %21991 = vst [vmem:[#allocation28_spill] sm:$0xff] %v16593_v16  ;;  %v882_v12 = vcombine.high %v524_v18, %v524_v18  ;;  %v527_v26 = vadd.f32 %v16586_v58, %v526_v23 }
 0x111   :  { %v16599_v33 = vpack.c.bf16 %v380_v30, %v976_v24  ;;  %v885_v36 = vcombine.high %v535_v22, %v535_v22 }
 0x112   :  { %v1018_v34 = vcombine.low %v524_v18, %v882_v12  ;;  %v883_v37 = vcombine.high %v527_v26, %v527_v26 }
 0x113   :  { %21992 = vst [vmem:[#allocation29_spill] sm:$0xff] %v16599_v33  ;;  %v1020_v48 = vcombine.low %v535_v22, %v885_v36 }
 0x114   :  { %v1019_v38 = vcombine.low %v883_v37, %v532_v25  ;;  %v16601_v39 = vpack.c.bf16 %v527_v26, %v1018_v34  ;;  %v14542_v43 = vpop.f32.mrb[16].mxu1 }
 0x115   :  { %v548_v45 = vadd.f32 %v14542_v43, %v16586_v58  ;;  %v539_v46 = vpop.f32.mrb[17].mxu1 }
 0x116   :  { %v16604_v50 = vpack.c.bf16 %v884_v9, %v1019_v38  ;;  %v540_v53 = vadd.f32 %v16586_v58, %v539_v46  ;;  %v1119_v30 = vsel %vm1114_vm2, %v16601_v39, 0  ;;  %v14543_v54 = vpop.f32.mrb[18].mxu1 }
 0x117   :  { %v888_v55 = vcombine.high %v548_v45, %v548_v45  ;;  %14597 = vmatpush3.bf16.xpose.msra.mxu1 %v1119_v30  ;;  %v551_v59 = vadd.f32 %v14543_v54, %v16586_v58  ;;  %v542_v61 = vpop.f32.mrb[19].mxu1 }
 0x118   :  { %v886_v62 = vcombine.high %v540_v53, %v540_v53  ;;  %v16610_v0 = vpack.c.bf16 %v540_v53, %v1020_v48  ;;  %v543_v1 = vadd.f32 %v16586_v58, %v542_v61  ;;  %14602 = vmatprep.subr.bf16.mxu1 %v21835_v49  ;;  %v1166_v36 = vsel %vm1114_vm2, %v16604_v50, 0 }
 0x119   :  { %v1022_v5 = vcombine.low %v548_v45, %v888_v55  ;;  %v889_v22 = vcombine.high %v551_v59, %v551_v59 }
 0x11a   :  { %v887_v13 = vcombine.high %v543_v1, %v543_v1  ;;  %v1021_v18 = vcombine.low %v886_v62, %v543_v1 }
 0x11b   :  { %v16614_v20 = vpack.c.bf16 %v551_v59, %v1022_v5 }
 0x11c   :  { %v16616_v23 = vpack.c.bf16 %v887_v13, %v1021_v18  ;;  %v14546_v24 = vpop.f32.mrb[20].mxu1  ;;  %v1213_v18 = vsel %vm1114_vm2, %v16610_v0, 0 }
 0x11d   :  { %21993 = vst [vmem:[#allocation30_spill] sm:$0xff] %v16614_v20  ;;  %v564_v25 = vadd.f32 %v14546_v24, %v16586_v58  ;;  %v555_v12 = vpop.f32.mrb[21].mxu1 }
 0x11e   :  { %v556_v26 = vadd.f32 %v16586_v58, %v555_v12  ;;  %v14547_v34 = vpop.f32.mrb[22].mxu1  ;;  %14599 = vmatmul.mubr.msk.bf16.vlgmr.msra.gmra.mrb[36].mxu1 %vm1114_vm2, %v16550_v35 }
 0x11f   :  { %v892_v37 = vcombine.high %v564_v25, %v564_v25  ;;  %v567_v9 = vadd.f32 %v14547_v34, %v16586_v58  ;;  %v558_v38 = vpop.f32.mrb[23].mxu1  ;;  %14603 = vmatpush3.bf16.xpose.msra.mxu1 %v1166_v36  ;;  %14604 = vmatprep.mubr.msk.bf16.mxu1 %vm16146_vm1, %v21835_v49 }
 0x120   :  { %v890_v43 = vcombine.high %v556_v26, %v556_v26  ;;  %v1023_v45 = vcombine.low %v889_v22, %v556_v26  ;;  %v559_v46 = vadd.f32 %v16586_v58, %v558_v38  ;;  %14608 = vmatprep.subr.bf16.mxu1 %v21835_v49 }
 0x121   :  { %v893_v48 = vcombine.high %v567_v9, %v567_v9  ;;  %v1025_v53 = vcombine.low %v892_v37, %v567_v9 }
 0x122   :  { %v16629_v30 = vpack.c.bf16 %v890_v43, %v1023_v45  ;;  %v891_v54 = vcombine.high %v559_v46, %v559_v46 }
 0x123   :  { %v16631_v55 = vpack.c.bf16 %v893_v48, %v1025_v53 }
 0x124   :  { %v1024_v59 = vcombine.low %v559_v46, %v891_v54  ;;  %v14550_v61 = vpop.f32.mrb[24].mxu1 }
 0x125   :  { %21994 = vst [vmem:[#allocation31_spill] sm:$0xff] %v16631_v55  ;;  %v571_v62 = vpop.f32.mrb[25].mxu1  ;;  %v580_v5 = vadd.f32 %v14550_v61, %v16586_v58  ;;  %v1260_v61 = vsel %vm1114_vm2, %v16616_v23, 0 }
 0x126   :  { %v16633_v1 = vpack.c.bf16 %v564_v25, %v1024_v59  ;;  %14605 = vmatmul.mubr.msk.bf16.vlgmr.msra.gmra.mrb[40].mxu1 %vm1114_vm2, %v16556_v42  ;;  %v572_v13 = vadd.f32 %v16586_v58, %v571_v62  ;;  %v14551_v22 = vpop.f32.mrb[26].mxu1 }
 0x127   :  { %14609 = vmatpush3.bf16.xpose.msra.mxu1 %v1213_v18  ;;  %v583_v24 = vadd.f32 %v14551_v22, %v16586_v58  ;;  %v574_v12 = vpop.f32.mrb[27].mxu1  ;;  %14610 = vmatprep.mubr.msk.bf16.mxu1 %vm16146_vm1, %v21835_v49  ;;  %v896_v37 = vcombine.high %v580_v5, %v580_v5 }
 0x128   :  { %21995 = vst [vmem:[#allocation32_spill] sm:$0xff] %v16633_v1  ;;  %v894_v25 = vcombine.high %v572_v13, %v572_v13  ;;  %v1401_v26 = vsel %vm1114_vm2, %v16633_v1, 0  ;;  %v575_v34 = vadd.f32 %v16586_v58, %v574_v12  ;;  %14614 = vmatprep.subr.bf16.mxu1 %v21835_v49 }
 0x129   :  { %14633 = vmatpush3.bf16.xpose.msra.mxu0 %v1401_v26  ;;  %v897_v36 = vcombine.high %v583_v24, %v583_v24 }
 0x12a   :  { %v1026_v9 = vcombine.low %v572_v13, %v894_v25  ;;  %v895_v38 = vcombine.high %v575_v34, %v575_v34  ;;  %14644 = vmatprep.subr.bf16.mxu0 %v21835_v49 }
 0x12b   :  { %v1028_v43 = vcombine.low %v583_v24, %v897_v36 }
 0x12c   :  { %v1027_v45 = vcombine.low %v895_v38, %v580_v5  ;;  %v16649_v46 = vpack.c.bf16 %v575_v34, %v1026_v9  ;;  %v14554_v48 = vpop.f32.mrb[28].mxu1 }
 0x12d   :  { %v596_v53 = vadd.f32 %v14554_v48, %v16586_v58  ;;  %v587_v54 = vpop.f32.mrb[29].mxu1 }
 0x12e   :  { %21996 = vst [vmem:[#allocation33_spill] sm:$0xff] %v16649_v46  ;;  %v16652_v59 = vpack.c.bf16 %v896_v37, %v1027_v45  ;;  %14611 = vmatmul.mubr.msk.bf16.vlgmr.msra.gmra.mrb[44].mxu1 %vm1114_vm2, %v16564_v2  ;;  %v1495_v62 = vsel %vm1114_vm2, %v16649_v46, 0  ;;  %v588_v13 = vadd.f32 %v16586_v58, %v587_v54  ;;  %v14555_v5 = vpop.f32.mrb[30].mxu1 }
 0x12f   :  { %14615 = vmatpush3.bf16.xpose.msra.mxu1 %v1260_v61  ;;  %v900_v18 = vcombine.high %v596_v53, %v596_v53  ;;  %14616 = vmatprep.mubr.msk.bf16.mxu1 %vm16146_vm1, %v21835_v49  ;;  %v599_v22 = vadd.f32 %v14555_v5, %v16586_v58  ;;  %v590_v24 = vpop.f32.mrb[31].mxu1 }
 0x130   :  { %21997 = vst [vmem:[#allocation34_spill] sm:$0xff] %v16652_v59  ;;  %14635 = vmatmul.mubr.msk.bf16.vlgmr.msra.gmra.mrb[36].mxu0 %vm1114_vm2, %v16599_v33  ;;  %v898_v12 = vcombine.high %v588_v13, %v588_v13  ;;  %v16666_v25 = vpack.c.bf16 %v588_v13, %v1028_v43  ;;  %14620 = vmatprep.subr.bf16.mxu1 %v21835_v49 }
 0x131   :  { %v591_v26 = vadd.f32 %v16586_v58, %v590_v24  ;;  %14645 = vmatpush3.bf16.xpose.msra.mxu0 %v1495_v62  ;;  %v1030_v34 = vcombine.low %v596_v53, %v900_v18  ;;  %14646 = vmatprep.mubr.msk.bf16.mxu0 %vm16146_vm1, %v21835_v49  ;;  %v901_v38 = vcombine.high %v599_v22, %v599_v22  ;;  %v1307_v53 = vsel %vm1114_vm2, %v16614_v20, 0 }
 0x132   :  { %21998 = vst [vmem:[#allocation35_spill] sm:$0xff] %v16666_v25  ;;  %14656 = vmatprep.subr.bf16.mxu0 %v21835_v49  ;;  %v1589_v61 = vsel %vm1114_vm2, %v16666_v25, 0 }
 0x133   :  { %v899_v36 = vcombine.high %v591_v26, %v591_v26  ;;  %v1029_v37 = vcombine.low %v898_v12, %v591_v26  ;;  %v16673_v9 = vpack.c.bf16 %v599_v22, %v1030_v34 }
 0x134   :  { %v14558_v43 = vpop.f32.mrb[32].mxu1 }
 0x135   :  { %21999 = vst [vmem:[#allocation36_spill] sm:$0xff] %v16673_v9  ;;  %v16675_v45 = vpack.c.bf16 %v899_v36, %v1029_v37  ;;  %v612_v48 = vadd.f32 %v14558_v43, %v16586_v58  ;;  %v603_v54 = vpop.f32.mrb[33].mxu1 }
 0x136   :  { %14617 = vmatmul.mubr.msk.bf16.vlgmr.msra.gmra.mrb[48].mxu1 %vm1114_vm2, %v16573_v27  ;;  %v604_v62 = vadd.f32 %v16586_v58, %v603_v54  ;;  %v14559_v13 = vpop.f32.mrb[34].mxu1 }
 0x137   :  { %22000 = vst [vmem:[#allocation37_spill] sm:$0xff] %v16675_v45  ;;  %14621 = vmatpush3.bf16.xpose.msra.mxu1 %v1307_v53  ;;  %v904_v5 = vcombine.high %v612_v48, %v612_v48  ;;  %14622 = vmatprep.mubr.msk.bf16.mxu1 %vm16146_vm1, %v21835_v49  ;;  %v615_v18 = vadd.f32 %v14559_v13, %v16586_v58  ;;  %v606_v22 = vpop.f32.mrb[35].mxu1  ;;  %v1542_v13 = vsel %vm1114_vm2, %v16652_v59, 0 }
 0x138   :  { %14647 = vmatmul.mubr.msk.bf16.vlgmr.msra.gmra.mrb[40].mxu0 %vm1114_vm2, %v16544_v21  ;;  %v902_v24 = vcombine.high %v604_v62, %v604_v62  ;;  %v1031_v12 = vcombine.low %v901_v38, %v604_v62  ;;  %14626 = vmatprep.subr.bf16.mxu1 %v21835_v49  ;;  %v607_v26 = vadd.f32 %v16586_v58, %v606_v22  ;;  %v1354_v58 = vsel %vm1114_vm2, %v16629_v30, 0  ;;  %v16743_v22 = vld [vmem:[%s21814_s6] ss:$0 sm:$0xff]  ;;  %s16147_s6 = smov 104  }
 0x139   :  { %14657 = vmatpush3.bf16.xpose.msra.mxu0 %v1589_v61  ;;  %v905_v34 = vcombine.high %v615_v18, %v615_v18  ;;  %v1033_v36 = vcombine.low %v904_v5, %v615_v18  ;;  %14658 = vmatprep.mubr.msk.bf16.mxu0 %vm16146_vm1, %v21835_v49  ;;  %v1683_v61 = vsel %vm1114_vm2, %v16673_v9, 0  ;;  %v14574_v5 = vpop.f32.mrb[12].mxu0 }
 0x13a   :  { %v16694_v37 = vpack.c.bf16 %v902_v24, %v1031_v12  ;;  %v903_v43 = vcombine.high %v607_v26, %v607_v26  ;;  %14668 = vmatprep.subr.bf16.mxu0 %v21835_v49  ;;  %v707_v18 = vpop.f32.mrb[13].mxu0  ;;  %v1636_v12 = vsel %vm1114_vm2, %v16675_v45, 0 }
 0x13b   :  { %v16697_v54 = vpack.c.bf16 %v905_v34, %v1033_v36  ;;  %v14575_v24 = vpop.f32.mrb[14].mxu0  ;;  %v708_v34 = vadd.f32 %v16743_v22, %v707_v18 }
 0x13c   :  { %22001 = vst [vmem:[#allocation38_spill] sm:$0xff] %v16694_v37  ;;  %v1032_v53 = vcombine.low %v607_v26, %v903_v43  ;;  %v719_v26 = vadd.f32 %v14575_v24, %v16743_v22  ;;  %v1730_v43 = vsel %vm1114_vm2, %v16694_v37, 0 }
 0x13d   :  { %22002 = vst [vmem:[#allocation39_spill] sm:$0xff] %v16697_v54  ;;  %v938_v36 = vcombine.high %v708_v34, %v708_v34 }
 0x13e   :  { %14623 = vmatmul.mubr.msk.bf16.vlgmr.msra.gmra.mrb[52].mxu1 %vm1114_vm2, %v16569_v11  ;;  %v16701_v38 = vpack.c.bf16 %v612_v48, %v1032_v53  ;;  %v1448_v48 = vsel %vm1114_vm2, %v16631_v55, 0  ;;  %v716_v53 = vadd.f32 %v14574_v5, %v16743_v22 }
 0x13f   :  { %14627 = vmatpush3.bf16.xpose.msra.mxu1 %v1354_v58  ;;  %14628 = vmatprep.mubr.msk.bf16.mxu1 %vm16146_vm1, %v21835_v49  ;;  %v941_v58 = vcombine.high %v719_v26, %v719_v26 }
 0x140   :  { %22003 = vst [vmem:[#allocation40_spill] sm:$0xff] %v16701_v38  ;;  %14659 = vmatmul.mubr.msk.bf16.vlgmr.msra.gmra.mrb[44].mxu0 %vm1114_vm2, %v16553_v47  ;;  %14638 = vmatprep.subr.bf16.mxu1 %v21835_v49  ;;  %v1777_v62 = vsel %vm1114_vm2, %v16701_v38, 0 }
 0x141   :  { %14669 = vmatpush3.bf16.xpose.msra.mxu0 %v1683_v61  ;;  %14670 = vmatprep.mubr.msk.bf16.mxu0 %vm16146_vm1, %v21835_v49  ;;  %v710_v61 = vpop.f32.mrb[15].mxu0  ;;  %v1068_v18 = vcombine.low %v719_v26, %v941_v58 }
 0x142   :  { %14680 = vmatprep.subr.bf16.mxu0 %v21835_v49 }
 0x146   :  { %14629 = vmatmul.mubr.msk.bf16.vlgmr.msra.gmra.mrb[56].mxu1 %vm1114_vm2, %v16589_v4 }
 0x147   :  { %14639 = vmatpush3.bf16.xpose.msra.mxu1 %v1448_v48  ;;  %14640 = vmatprep.mubr.msk.bf16.mxu1 %vm16146_vm1, %v21835_v49  ;;  %v1066_v48 = vcombine.low %v708_v34, %v938_v36 }
 0x148   :  { %14671 = vmatmul.mubr.msk.bf16.vlgmr.msra.gmra.mrb[48].mxu0 %vm1114_vm2, %v16562_v63  ;;  %14650 = vmatprep.subr.bf16.mxu1 %v21835_v49 }
 0x149   :  { %14681 = vmatpush3.bf16.xpose.msra.mxu0 %v1777_v62  ;;  %14682 = vmatprep.mubr.msk.bf16.mxu0 %vm16146_vm1, %v21835_v49  ;;  %v711_v62 = vadd.f32 %v16743_v22, %v710_v61 }
 0x14a   :  { %14692 = vmatprep.subr.bf16.mxu0 %v21835_v49 }
 0x14b   :  { %v939_v24 = vcombine.high %v711_v62, %v711_v62  ;;  %v16763_v51 = vpack.c.bf16 %v711_v62, %v1066_v48 }
 0x14d   :  { %v1067_v56 = vcombine.low %v939_v24, %v716_v53  ;;  %22004 = vst [vmem:[#allocation41_spill] sm:$0xff] %v16763_v51 }
 0x14e   :  { %14641 = vmatmul.mubr.msk.bf16.vlgmr.msra.gmra.mrb[60].mxu1 %vm1114_vm2, %v16591_v10 }
 0x14f   :  { %14651 = vmatpush3.bf16.xpose.msra.mxu1 %v1542_v13  ;;  %14652 = vmatprep.mubr.msk.bf16.mxu1 %vm16146_vm1, %v21835_v49  ;;  %v940_v13 = vcombine.high %v716_v53, %v716_v53  ;;  %v2242_v53 = vsel %vm2240_vm3, %v16763_v51, 0 }
 0x150   :  { %14683 = vmatmul.mubr.msk.bf16.vlgmr.msra.gmra.mrb[52].mxu0 %vm1114_vm2, %v16593_v16  ;;  %14662 = vmatprep.subr.bf16.mxu1 %v21835_v49 }
 0x151   :  { %14694 = vmatprep.mubr.msk.bf16.mxu0 %vm16146_vm1, %v21835_v49  ;;  %v16770_v34 = vpack.c.bf16 %v940_v13, %v1067_v56  ;;  %14693 = vmatpush3.bf16.msra.mxu0 %v2242_v53 }
 0x152   :  { %14704 = vmatprep.subr.bf16.mxu0 %v21835_v49 }
 0x153   :  { %22005 = vst [vmem:[#allocation42_spill] sm:$0xff] %v16770_v34 }
 0x156   :  { %14653 = vmatmul.mubr.msk.bf16.vlgmr.msra.gmra.mrb[64].mxu1 %vm1114_vm2, %v16547_v29 }
 0x157   :  { %14663 = vmatpush3.bf16.xpose.msra.mxu1 %v1636_v12  ;;  %14664 = vmatprep.mubr.msk.bf16.mxu1 %vm16146_vm1, %v21835_v49  ;;  %v14578_v12 = vpop.f32.mrb[16].mxu0 }
 0x158   :  { %14674 = vmatprep.subr.bf16.mxu1 %v21835_v49  ;;  %v723_v17 = vpop.f32.mrb[17].mxu0  ;;  %v732_v36 = vadd.f32 %v14578_v12, %v16743_v22  ;;  %v2289_v12 = vsel %vm2240_vm3, %v16770_v34, 0 }
 0x159   :  { %v724_v5 = vadd.f32 %v16743_v22, %v723_v17  ;;  %v14579_v58 = vpop.f32.mrb[18].mxu0 }
 0x15a   :  { %v944_v17 = vcombine.high %v732_v36, %v732_v36  ;;  %v726_v61 = vpop.f32.mrb[19].mxu0  ;;  %v735_v62 = vadd.f32 %v14579_v58, %v16743_v22 }
 0x15b   :  { %v16773_v26 = vpack.c.bf16 %v724_v5, %v1068_v18  ;;  %v942_v48 = vcombine.high %v724_v5, %v724_v5  ;;  %v727_v13 = vadd.f32 %v16743_v22, %v726_v61  ;;  %v14582_v18 = vpop.f32.mrb[20].mxu0  ;;  %v22009_v61 = vmov 0.0  }
 0x15c   :  { %v1070_v56 = vcombine.low %v732_v36, %v944_v17  ;;  %v739_v24 = vpop.f32.mrb[21].mxu0 }
 0x15d   :  { %22006 = vst [vmem:[#allocation43_spill] sm:$0xff] %v16773_v26  ;;  %v943_v53 = vcombine.high %v727_v13, %v727_v13  ;;  %v1069_v44 = vcombine.low %v942_v48, %v727_v13  ;;  %v14583_v15 = vpop.f32.mrb[22].mxu0  ;;  %v740_v14 = vadd.f32 %v16743_v22, %v739_v24 }
 0x15e   :  { %14665 = vmatmul.mubr.msk.bf16.vlgmr.msra.gmra.mrb[68].mxu1 %vm1114_vm2, %v16566_v3  ;;  %v16785_v19 = vpack.c.bf16 %v735_v62, %v1070_v56  ;;  %v748_v56 = vadd.f32 %v14582_v18, %v16743_v22  ;;  %v751_v24 = vadd.f32 %v14583_v15, %v16743_v22 }
 0x15f   :  { %14675 = vmatpush3.bf16.xpose.msra.mxu1 %v1730_v43  ;;  %14676 = vmatprep.mubr.msk.bf16.mxu1 %vm16146_vm1, %v21835_v49  ;;  %v1824_v43 = vsel %vm1114_vm2, %v16697_v54, 0  ;;  %v16790_v5 = vpack.c.bf16 %v943_v53, %v1069_v44  ;;  %v946_v17 = vcombine.high %v740_v14, %v740_v14 }
 0x160   :  { %14686 = vmatprep.subr.bf16.mxu1 %v21835_v49  ;;  %22007 = vst [vmem:[#allocation44_spill] sm:$0xff] %v16785_v19  ;;  %v948_v13 = vcombine.high %v748_v56, %v748_v56  ;;  %v949_v53 = vcombine.high %v751_v24, %v751_v24 }
 0x161   :  { %22008 = vst [vmem:[#allocation45_spill] sm:$0xff] %v16790_v5 }
 0x162   :  { %v1073_v6 = vcombine.low %v948_v13, %v751_v24 }
 0x166   :  { %14677 = vmatmul.mubr.msk.bf16.vlgmr.msra.gmra.mrb[72].mxu1 %vm1114_vm2, %v16579_v52 }
 0x167   :  { %14687 = vmatpush3.bf16.xpose.msra.mxu1 %v1824_v43  ;;  %14688 = vmatprep.mubr.msk.bf16.mxu1 %vm16146_vm1, %v21835_v49  ;;  %v945_v43 = vcombine.high %v735_v62, %v735_v62 }
 0x168   :  { %14698 = vmatprep.subr.bf16.mxu1 %v21835_v49  ;;  %v742_v49 = vpop.f32.mrb[23].mxu0 }
 0x169   :  { %v743_v36 = vadd.f32 %v16743_v22, %v742_v49  ;;  %v1071_v58 = vcombine.low %v945_v43, %v740_v14  ;;  %v14586_v49 = vpop.f32.mrb[24].mxu0 }
 0x16a   :  { %v755_v31 = vpop.f32.mrb[25].mxu0  ;;  %v764_v15 = vadd.f32 %v14586_v49, %v16743_v22 }
 0x16b   :  { %v947_v48 = vcombine.high %v743_v36, %v743_v36  ;;  %v16797_v62 = vpack.c.bf16 %v946_v17, %v1071_v58  ;;  %v756_v43 = vadd.f32 %v16743_v22, %v755_v31  ;;  %v14587_v18 = vpop.f32.mrb[26].mxu0 }
 0x16c   :  { %v758_v8 = vpop.f32.mrb[27].mxu0  ;;  %v767_v17 = vadd.f32 %v14587_v18, %v16743_v22  ;;  %v952_v41 = vcombine.high %v764_v15, %v764_v15 }
 0x16d   :  { %22010 = vst [vmem:[#allocation46_spill] sm:$0xff] %v16797_v62  ;;  %v1072_v44 = vcombine.low %v743_v36, %v947_v48  ;;  %v950_v7 = vcombine.high %v756_v43, %v756_v43  ;;  %v759_v58 = vadd.f32 %v16743_v22, %v758_v8  ;;  %v14590_v24 = vpop.f32.mrb[28].mxu0 }
 0x16e   :  { %14689 = vmatmul.mubr.msk.bf16.vlgmr.msra.gmra.mrb[76].mxu1 %vm1114_vm2, %v16581_v57  ;;  %v953_v48 = vcombine.high %v767_v17, %v767_v17 }
 0x16f   :  { %14699 = vmatpush3.bf16.msra.mxu1 %v2289_v12  ;;  %14700 = vmatprep.mubr.msk.bf16.mxu1 %vm16146_vm1, %v22009_v61  ;;  %v16800_v14 = vpack.c.bf16 %v748_v56, %v1072_v44  ;;  %v16802_v12 = vpack.c.bf16 %v949_v53, %v1073_v6  ;;  %v1074_v36 = vcombine.low %v756_v43, %v950_v7  ;;  %v771_v6 = vpop.f32.mrb[29].mxu0 }
 0x170   :  { %14710 = vmatprep.subr.bf16.mxu1 %v22009_v61  ;;  %v951_v13 = vcombine.high %v759_v58, %v759_v58  ;;  %v780_v56 = vadd.f32 %v14590_v24, %v16743_v22  ;;  %v1076_v44 = vcombine.low %v767_v17, %v953_v48  ;;  %v772_v60 = vadd.f32 %v16743_v22, %v771_v6  ;;  %v14591_v7 = vpop.f32.mrb[30].mxu0 }
 0x171   :  { %22011 = vst [vmem:[#allocation47_spill] sm:$0xff] %v16800_v14  ;;  %22012 = vst [vmem:[#allocation48_spill] sm:$0xff] %v16802_v12  ;;  %v16809_v31 = vpack.c.bf16 %v759_v58, %v1074_v36  ;;  %v783_v32 = vadd.f32 %v14591_v7, %v16743_v22  ;;  %v774_v28 = vpop.f32.mrb[31].mxu0 }
 0x172   :  { %v1075_v53 = vcombine.low %v951_v13, %v764_v15  ;;  %v956_v40 = vcombine.high %v780_v56, %v780_v56  ;;  %v16814_v8 = vpack.c.bf16 %v772_v60, %v1076_v44  ;;  %v954_v43 = vcombine.high %v772_v60, %v772_v60  ;;  %v14594_v58 = vpop.f32.mrb[32].mxu0 }
 0x173   :  { %22013 = vst [vmem:[#allocation49_spill] sm:$0xff] %v16809_v31  ;;  %v957_v34 = vcombine.high %v783_v32, %v783_v32  ;;  %v775_v17 = vadd.f32 %v16743_v22, %v774_v28  ;;  %v796_v15 = vadd.f32 %v14594_v58, %v16743_v22  ;;  %v787_v36 = vpop.f32.mrb[33].mxu0 }
 0x174   :  { %v16812_v18 = vpack.c.bf16 %v952_v41, %v1075_v53  ;;  %22015 = vst [vmem:[#allocation51_spill] sm:$0xff] %v16814_v8  ;;  %v1078_v49 = vcombine.low %v780_v56, %v956_v40  ;;  %v788_v13 = vadd.f32 %v16743_v22, %v787_v36  ;;  %v14595_v6 = vpop.f32.mrb[34].mxu0 }
 0x175   :  { %v955_v48 = vcombine.high %v775_v17, %v775_v17  ;;  %v1077_v41 = vcombine.low %v954_v43, %v775_v17  ;;  %v960_v40 = vcombine.high %v796_v15, %v796_v15  ;;  %v799_v60 = vadd.f32 %v14595_v6, %v16743_v22  ;;  %v790_v56 = vpop.f32.mrb[35].mxu0 }
 0x176   :  { %22014 = vst [vmem:[#allocation50_spill] sm:$0xff] %v16812_v18  ;;  %v16817_v24 = vpack.c.bf16 %v783_v32, %v1078_v49  ;;  %v958_v53 = vcombine.high %v788_v13, %v788_v13  ;;  %v1079_v32 = vcombine.low %v957_v34, %v788_v13  ;;  %v791_v49 = vadd.f32 %v16743_v22, %v790_v56 }
 0x177   :  { %v16823_v44 = vpack.c.bf16 %v955_v48, %v1077_v41  ;;  %v961_v28 = vcombine.high %v799_v60, %v799_v60  ;;  %v1081_v7 = vcombine.low %v960_v40, %v799_v60 }
 0x178   :  { %22016 = vst [vmem:[#allocation52_spill] sm:$0xff] %v16817_v24  ;;  %v959_v24 = vcombine.high %v791_v49, %v791_v49  ;;  %v16828_v18 = vpack.c.bf16 %v958_v53, %v1079_v32 }
 0x179   :  { %22017 = vst [vmem:[#allocation53_spill] sm:$0xff] %v16823_v44  ;;  %v16826_v58 = vpack.c.bf16 %v961_v28, %v1081_v7 }
 0x17a   :  { %22019 = vst [vmem:[#allocation55_spill] sm:$0xff] %v16828_v18  ;;  %v1080_v43 = vcombine.low %v791_v49, %v959_v24 }
 0x17b   :  { %22018 = vst [vmem:[#allocation54_spill] sm:$0xff] %v16826_v58 }
 0x17c   :  { %v16830_v17 = vpack.c.bf16 %v796_v15, %v1080_v43 }
 0x17e   :  { %22020 = vst [vmem:[#allocation56_spill] sm:$0xff] %v16830_v17 }
 0x1f1   :  { %v16832_v36 = vpop.f32.mrb[36].mxu1 }
 0x1f2   :  { %v1868_v48 = vsel %vm1867_vm4, %v16832_v36, -inf  ;;  %v14600_v41 = vpop.f32.mrb[37].mxu1 }
 0x1f3   :  { %1869 = vmax.xlane.f32.xlu0 %v1868_v48  ;;  %v16836_v34 = vpop.f32.mrb[38].mxu1 }
 0x1f4   :  { %v14601_v22 = vpop.f32.mrb[39].mxu1  ;;  %v1872_v13 = vsel %vm1871_vm5, %v16836_v34, -inf }
 0x1f7   :  { %1873 = vmax.xlane.f32.xlu0 %v1872_v13 }
 0x1f9   :  { %v16840_v6 = vpop.f32.mrb[40].mxu1 }
 0x1fa   :  { %v1875_v24 = vsel %vm1867_vm4, %v16840_v6, -inf  ;;  %v14606_v15 = vpop.f32.mrb[41].mxu1 }
 0x1fb   :  { %1876 = vmax.xlane.f32.xlu1 %v1875_v24  ;;  %v16844_v40 = vpop.f32.mrb[42].mxu1 }
 0x1fc   :  { %v14607_v60 = vpop.f32.mrb[43].mxu1  ;;  %v1878_v56 = vsel %vm1871_vm5, %v16844_v40, -inf }
 0x1ff   :  { %1879 = vmax.xlane.f32.xlu1 %v1878_v56 }
 0x201   :  { %v16848_v53 = vpop.f32.mrb[44].mxu1 }
 0x202   :  { %v14612_v32 = vpop.f32.mrb[45].mxu1  ;;  %v1881_v49 = vsel %vm1867_vm4, %v16848_v53, -inf }
 0x203   :  { %1882 = vmax.xlane.f32.xlu0 %v1881_v49  ;;  %v16852_v28 = vpop.f32.mrb[46].mxu1  ;;  %v16854_v7 = vpop.f32.mrb[36].mxu0 }
 0x204   :  { %v1884_v43 = vsel %vm1871_vm5, %v16852_v28, -inf  ;;  %v14613_v48 = vpop.f32.mrb[47].mxu1  ;;  %v14636_v41 = vpop.f32.mrb[37].mxu0 }
 0x205   :  { %1885 = vmax.xlane.f32.xlu1 %v1884_v43  ;;  %v16858_v22 = vpop.f32.mrb[38].mxu0 }
 0x206   :  { %v14637_v13 = vpop.f32.mrb[39].mxu0 }
 0x209   :  { %v16860_v24 = vpop.f32.mrb[48].mxu1 }
 0x20a   :  { %v14618_v15 = vpop.f32.mrb[49].mxu1  ;;  %v1887_v60 = vsel %vm1867_vm4, %v16860_v24, -inf }
 0x20b   :  { %v16864_v56 = vpop.f32.mrb[40].mxu0  ;;  %1888 = vmax.xlane.f32.xlu0 %v1887_v60  ;;  %v16866_v32 = vpop.f32.mrb[50].mxu1  ;;  %v1908_v15 = vsel %vm1871_vm5, %v16858_v22, -inf }
 0x20c   :  { %v14648_v49 = vpop.f32.mrb[41].mxu0  ;;  %v1890_v48 = vsel %vm1871_vm5, %v16866_v32, -inf  ;;  %v14619_v41 = vpop.f32.mrb[51].mxu1 }
 0x20d   :  { %v16870_v43 = vpop.f32.mrb[42].mxu0  ;;  %1891 = vmax.xlane.f32.xlu1 %v1890_v48 }
 0x20e   :  { %v14649_v13 = vpop.f32.mrb[43].mxu0  ;;  %v1920_v12 = vsel %vm1871_vm5, %v16870_v43, -inf }
 0x211   :  { %1909 = vmax.xlane.f32.xlu1 %v1908_v15  ;;  %v16874_v58 = vpop.f32.mrb[52].mxu1 }
 0x212   :  { %v14624_v17 = vpop.f32.mrb[53].mxu1  ;;  %v1893_v60 = vsel %vm1867_vm4, %v16874_v58, -inf }
 0x213   :  { %v16878_v44 = vpop.f32.mrb[44].mxu0  ;;  %1894 = vmax.xlane.f32.xlu0 %v1893_v60  ;;  %v16880_v49 = vpop.f32.mrb[54].mxu1  ;;  %v1905_v17 = vsel %vm1867_vm4, %v16854_v7, -inf }
 0x214   :  { %v14660_v41 = vpop.f32.mrb[45].mxu0  ;;  %v1896_v48 = vsel %vm1871_vm5, %v16880_v49, -inf  ;;  %v14625_v13 = vpop.f32.mrb[55].mxu1 }
 0x215   :  { %v16884_v57 = vpop.f32.mrb[46].mxu0  ;;  %1897 = vmax.xlane.f32.xlu1 %v1896_v48 }
 0x216   :  { %v14661_v15 = vpop.f32.mrb[47].mxu0  ;;  %v1932_v62 = vsel %vm1871_vm5, %v16884_v57, -inf }
 0x217   :  { %1906 = vmax.xlane.f32.xlu0 %v1905_v17 }
 0x219   :  { %1921 = vmax.xlane.f32.xlu1 %v1920_v12  ;;  %v16890_v60 = vpop.f32.mrb[56].mxu1 }
 0x21a   :  { %v14630_v16 = vpop.f32.mrb[57].mxu1  ;;  %v1899_v41 = vsel %vm1867_vm4, %v16890_v60, -inf }
 0x21b   :  { %v16894_v38 = vpop.f32.mrb[48].mxu0  ;;  %1900 = vmax.xlane.f32.xlu0 %v1899_v41  ;;  %v16896_v13 = vpop.f32.mrb[58].mxu1  ;;  %v1917_v16 = vsel %vm1867_vm4, %v16864_v56, -inf }
 0x21c   :  { %v14672_v48 = vpop.f32.mrb[49].mxu0  ;;  %v1902_v15 = vsel %vm1871_vm5, %v16896_v13, -inf  ;;  %v14631_v17 = vpop.f32.mrb[59].mxu1 }
 0x21d   :  { %v16900_v63 = vpop.f32.mrb[50].mxu0  ;;  %1903 = vmax.xlane.f32.xlu1 %v1902_v15 }
 0x21e   :  { %v14673_v12 = vpop.f32.mrb[51].mxu0  ;;  %v1944_v8 = vsel %vm1871_vm5, %v16900_v63, -inf }
 0x21f   :  { %1918 = vmax.xlane.f32.xlu0 %v1917_v16 }
 0x221   :  { %1933 = vmax.xlane.f32.xlu1 %v1932_v62  ;;  %v16906_v41 = vpop.f32.mrb[60].mxu1 }
 0x222   :  { %v14642_v9 = vpop.f32.mrb[61].mxu1  ;;  %v1911_v48 = vsel %vm1867_vm4, %v16906_v41, -inf }
 0x223   :  { %v16910_v18 = vpop.f32.mrb[52].mxu0  ;;  %1912 = vmax.xlane.f32.xlu0 %v1911_v48  ;;  %v16912_v17 = vpop.f32.mrb[62].mxu1  ;;  %v1929_v9 = vsel %vm1867_vm4, %v16878_v44, -inf }
 0x224   :  { %v14684_v15 = vpop.f32.mrb[53].mxu0  ;;  %v1914_v12 = vsel %vm1871_vm5, %v16912_v17, -inf  ;;  %v14643_v16 = vpop.f32.mrb[63].mxu1 }
 0x225   :  { %v16916_v47 = vpop.f32.mrb[54].mxu0  ;;  %1915 = vmax.xlane.f32.xlu1 %v1914_v12 }
 0x226   :  { %v14685_v62 = vpop.f32.mrb[55].mxu0 }
 0x227   :  { %1930 = vmax.xlane.f32.xlu0 %v1929_v9  ;;  %v1941_v62 = vsel %vm1867_vm4, %v16894_v38, -inf }
 0x229   :  { %1945 = vmax.xlane.f32.xlu1 %v1944_v8  ;;  %v16922_v48 = vpop.f32.mrb[64].mxu1 }
 0x22a   :  { %v14654_v25 = vpop.f32.mrb[65].mxu1  ;;  %v1923_v15 = vsel %vm1867_vm4, %v16922_v48, -inf }
 0x22b   :  { %1924 = vmax.xlane.f32.xlu0 %v1923_v15  ;;  %v16926_v16 = vpop.f32.mrb[66].mxu1 }
 0x22c   :  { %v14655_v31 = vpop.f32.mrb[67].mxu1  ;;  %v1926_v12 = vsel %vm1871_vm5, %v16926_v16, -inf }
 0x22d   :  { %1927 = vmax.xlane.f32.xlu1 %v1926_v12  ;;  %v1956_v12 = vsel %vm1871_vm5, %v16916_v47, -inf }
 0x22f   :  { %1942 = vmax.xlane.f32.xlu0 %v1941_v62 }
 0x231   :  { %v16932_v9 = vpop.f32.mrb[68].mxu1 }
 0x232   :  { %v14666_v8 = vpop.f32.mrb[69].mxu1  ;;  %v1935_v25 = vsel %vm1867_vm4, %v16932_v9, -inf }
 0x233   :  { %1936 = vmax.xlane.f32.xlu0 %v1935_v25  ;;  %v16936_v21 = vpop.f32.mrb[70].mxu1 }
 0x234   :  { %v14667_v15 = vpop.f32.mrb[71].mxu1  ;;  %v1938_v31 = vsel %vm1871_vm5, %v16936_v21, -inf }
 0x235   :  { %1939 = vmax.xlane.f32.xlu1 %v1938_v31  ;;  %v1953_v31 = vsel %vm1867_vm4, %v16910_v18, -inf }
 0x239   :  { %1957 = vmax.xlane.f32.xlu1 %v1956_v12  ;;  %v16942_v14 = vpop.f32.mrb[72].mxu1 }
 0x23a   :  { %v14678_v62 = vpop.f32.mrb[73].mxu1  ;;  %v1947_v8 = vsel %vm1867_vm4, %v16942_v14, -inf }
 0x23b   :  { %1948 = vmax.xlane.f32.xlu0 %v1947_v8  ;;  %v16946_v46 = vpop.f32.mrb[74].mxu1 }
 0x23c   :  { %v14679_v25 = vpop.f32.mrb[75].mxu1  ;;  %v1950_v15 = vsel %vm1871_vm5, %v16946_v46, -inf }
 0x23d   :  { %1951 = vmax.xlane.f32.xlu1 %v1950_v15 }
 0x23f   :  { %1954 = vmax.xlane.f32.xlu0 %v1953_v31 }
 0x241   :  { %v16952_v33 = vpop.f32.mrb[76].mxu1 }
 0x242   :  { %v14690_v12 = vpop.f32.mrb[77].mxu1  ;;  %v1959_v62 = vsel %vm1867_vm4, %v16952_v33, -inf }
 0x243   :  { %1960 = vmax.xlane.f32.xlu0 %v1959_v62  ;;  %v16956_v19 = vpop.f32.mrb[78].mxu1 }
 0x244   :  { %v14691_v8 = vpop.f32.mrb[79].mxu1  ;;  %v1962_v25 = vsel %vm1871_vm5, %v16956_v19, -inf }
 0x245   :  { %1963 = vmax.xlane.f32.xlu1 %v1962_v25 }
 0x280   :  { %v1870_v1 = vpop.xlane.xlu0 %1869 }
 0x281   :  { %v1965_v15 = vsub.f32 %v16832_v36, %v1870_v1 }
 0x283   :  { %v1997_v51 = vmul.f32 1.442695, %v1965_v15 }
 0x284   :  { %v1874_v5 = vpop.xlane.xlu0 %1873 }
 0x285   :  { %15505 = vpow2.f32 %v1997_v51  ;;  %v1966_v31 = vsub.f32 %v16836_v34, %v1874_v5 }
 0x287   :  { %v1999_v12 = vmul.f32 1.442695, %v1966_v31 }
 0x288   :  { %v1877_v11 = vpop.xlane.xlu1 %1876 }
 0x289   :  { %15507 = vpow2.f32 %v1999_v12  ;;  %v1967_v62 = vsub.f32 %v16840_v6, %v1877_v11 }
 0x28b   :  { %v2001_v54 = vmul.f32 1.442695, %v1967_v62 }
 0x28c   :  { %v1880_v20 = vpop.xlane.xlu1 %1879 }
 0x28d   :  { %15509 = vpow2.f32 %v2001_v54  ;;  %v1968_v8 = vsub.f32 %v16844_v40, %v1880_v20 }
 0x28f   :  { %v16964_v61 = vpop.eup %15505  ;;  %v2003_v25 = vmul.f32 1.442695, %v1968_v8 }
 0x290   :  { %v1883_v52 = vpop.xlane.xlu0 %1882  ;;  %v2061_v1 = vsel %vm1867_vm4, %v16964_v61, 0.0 }
 0x291   :  { %15511 = vpow2.f32 %v2003_v25  ;;  %v1969_v51 = vsub.f32 %v16848_v53, %v1883_v52  ;;  %2062 = vadd.xlane.f32.xlu0 %v2061_v1 }
 0x292   :  { %v1886_v5 = vpop.xlane.xlu1 %1885 }
 0x293   :  { %v16969_v36 = vpop.eup %15507  ;;  %v2005_v11 = vmul.f32 1.442695, %v1969_v51  ;;  %v1970_v34 = vsub.f32 %v16852_v28, %v1886_v5 }
 0x294   :  { %v2064_v20 = vsel %vm1871_vm5, %v16969_v36, 0.0 }
 0x295   :  { %15513 = vpow2.f32 %v2005_v11  ;;  %v2007_v54 = vmul.f32 1.442695, %v1970_v34  ;;  %2065 = vadd.xlane.f32.xlu1 %v2064_v20 }
 0x297   :  { %v16974_v6 = vpop.eup %15509  ;;  %15515 = vpow2.f32 %v2007_v54 }
 0x298   :  { %v2067_v40 = vsel %vm1867_vm4, %v16974_v6, 0.0  ;;  %v1889_v15 = vpop.xlane.xlu0 %1888 }
 0x299   :  { %2068 = vadd.xlane.f32.xlu0 %v2067_v40  ;;  %v1971_v34 = vsub.f32 %v16860_v24, %v1889_v15 }
 0x29a   :  { %v1892_v52 = vpop.xlane.xlu1 %1891 }
 0x29b   :  { %v16978_v53 = vpop.eup %15511  ;;  %v1972_v31 = vsub.f32 %v16866_v32, %v1892_v52  ;;  %v2009_v52 = vmul.f32 1.442695, %v1971_v34 }
 0x29c   :  { %v2070_v28 = vsel %vm1871_vm5, %v16978_v53, 0.0 }
 0x29d   :  { %2071 = vadd.xlane.f32.xlu1 %v2070_v28  ;;  %v2011_v5 = vmul.f32 1.442695, %v1972_v31 }
 0x29e   :  { %v1910_v12 = vpop.xlane.xlu1 %1909 }
 0x29f   :  { %v16983_v62 = vpop.eup %15513  ;;  %v1978_v8 = vsub.f32 %v16858_v22, %v1910_v12 }
 0x2a0   :  { %v1895_v25 = vpop.xlane.xlu0 %1894  ;;  %v2073_v1 = vsel %vm1867_vm4, %v16983_v62, 0.0 }
 0x2a1   :  { %v16988_v51 = vpop.eup %15515  ;;  %v2023_v11 = vmul.f32 1.442695, %v1978_v8  ;;  %2074 = vadd.xlane.f32.xlu0 %v2073_v1  ;;  %v1973_v31 = vsub.f32 %v16874_v58, %v1895_v25 }
 0x2a2   :  { %22021 = vst [vmem:[#allocation57_spill] sm:$0xff] %v16988_v51  ;;  %v1898_v20 = vpop.xlane.xlu1 %1897  ;;  %v2076_v32 = vsel %vm1871_vm5, %v16988_v51, 0.0 }
 0x2a3   :  { %15517 = vpow2.f32 %v2023_v11  ;;  %2077 = vadd.xlane.f32.xlu1 %v2076_v32  ;;  %v1974_v22 = vsub.f32 %v16880_v49, %v1898_v20  ;;  %v2013_v32 = vmul.f32 1.442695, %v1973_v31 }
 0x2a4   :  { %v1907_v54 = vpop.xlane.xlu0 %1906  ;;  %15519 = vpow2.f32 %v2011_v5 }
 0x2a5   :  { %v1977_v40 = vsub.f32 %v16854_v7, %v1907_v54  ;;  %v2015_v15 = vmul.f32 1.442695, %v1974_v22 }
 0x2a6   :  { %v1922_v28 = vpop.xlane.xlu1 %1921 }
 0x2a7   :  { %v2021_v12 = vmul.f32 1.442695, %v1977_v40  ;;  %v1982_v8 = vsub.f32 %v16870_v43, %v1922_v28 }
 0x2a8   :  { %v1901_v24 = vpop.xlane.xlu0 %1900 }
 0x2a9   :  { %15521 = vpow2.f32 %v2021_v12  ;;  %v2031_v1 = vmul.f32 1.442695, %v1982_v8  ;;  %v1975_v34 = vsub.f32 %v16890_v60, %v1901_v24 }
 0x2aa   :  { %15523 = vpow2.f32 %v2009_v52  ;;  %v1904_v11 = vpop.xlane.xlu1 %1903 }
 0x2ab   :  { %15525 = vpow2.f32 %v2031_v1  ;;  %v1976_v7 = vsub.f32 %v16896_v13, %v1904_v11  ;;  %v2017_v31 = vmul.f32 1.442695, %v1975_v34 }
 0x2ac   :  { %v1919_v5 = vpop.xlane.xlu0 %1918  ;;  %15527 = vpow2.f32 %v2015_v15 }
 0x2ad   :  { %v16997_v51 = vpop.eup %15517  ;;  %v1981_v49 = vsub.f32 %v16864_v56, %v1919_v5  ;;  %15529 = vpow2.f32 %v2013_v32  ;;  %v2019_v40 = vmul.f32 1.442695, %v1976_v7 }
 0x2ae   :  { %v1934_v58 = vpop.xlane.xlu1 %1933  ;;  %v2100_v43 = vsel %vm1871_vm5, %v16997_v51, 0.0  ;;  %v17003_v25 = vpop.eup %15519 }
 0x2af   :  { %v2029_v20 = vmul.f32 1.442695, %v1981_v49  ;;  %v1986_v54 = vsub.f32 %v16884_v57, %v1934_v58  ;;  %2101 = vadd.xlane.f32.xlu1 %v2100_v43  ;;  %v2082_v56 = vsel %vm1871_vm5, %v17003_v25, 0.0 }
 0x2b0   :  { %v1913_v22 = vpop.xlane.xlu0 %1912 }
 0x2b1   :  { %v2039_v52 = vmul.f32 1.442695, %v1986_v54  ;;  %15531 = vpow2.f32 %v2029_v20  ;;  %v1979_v5 = vsub.f32 %v16906_v41, %v1913_v22 }
 0x2b2   :  { %v1916_v13 = vpop.xlane.xlu1 %1915 }
 0x2b3   :  { %v17009_v28 = vpop.eup %15521  ;;  %15533 = vpow2.f32 %v2039_v52  ;;  %2083 = vadd.xlane.f32.xlu1 %v2082_v56  ;;  %v1980_v24 = vsub.f32 %v16912_v17, %v1916_v13  ;;  %v2025_v54 = vmul.f32 1.442695, %v1979_v5 }
 0x2b4   :  { %v17011_v12 = vpop.eup %15523  ;;  %v1931_v60 = vpop.xlane.xlu0 %1930  ;;  %v2097_v57 = vsel %vm1867_vm4, %v17009_v28, 0.0  ;;  %15535 = vpow2.f32 %v2019_v40 }
 0x2b5   :  { %v17015_v8 = vpop.eup %15525  ;;  %v1985_v15 = vsub.f32 %v16878_v44, %v1931_v60  ;;  %2098 = vadd.xlane.f32.xlu0 %v2097_v57  ;;  %15537 = vpow2.f32 %v2017_v31  ;;  %v2079_v17 = vsel %vm1867_vm4, %v17011_v12, 0.0  ;;  %v2027_v44 = vmul.f32 1.442695, %v1980_v24 }
 0x2b6   :  { %v1946_v1 = vpop.xlane.xlu1 %1945  ;;  %v2112_v11 = vsel %vm1871_vm5, %v17015_v8, 0.0  ;;  %v17021_v32 = vpop.eup %15527 }
 0x2b7   :  { %v2037_v7 = vmul.f32 1.442695, %v1985_v15  ;;  %v1990_v49 = vsub.f32 %v16900_v63, %v1946_v1  ;;  %2113 = vadd.xlane.f32.xlu1 %v2112_v11  ;;  %v17027_v43 = vpop.eup %15529  ;;  %v2088_v20 = vsel %vm1871_vm5, %v17021_v32, 0.0 }
 0x2b8   :  { %v1925_v58 = vpop.xlane.xlu0 %1924  ;;  %v2085_v22 = vsel %vm1867_vm4, %v17027_v43, 0.0 }
 0x2b9   :  { %v2047_v34 = vmul.f32 1.442695, %v1990_v49  ;;  %2080 = vadd.xlane.f32.xlu0 %v2079_v17  ;;  %15539 = vpow2.f32 %v2037_v7  ;;  %v1983_v60 = vsub.f32 %v16922_v48, %v1925_v58 }
 0x2ba   :  { %v1928_v13 = vpop.xlane.xlu1 %1927 }
 0x2bb   :  { %15541 = vpow2.f32 %v2047_v34  ;;  %2089 = vadd.xlane.f32.xlu1 %v2088_v20  ;;  %v17031_v41 = vpop.eup %15531  ;;  %v2033_v11 = vmul.f32 1.442695, %v1983_v60  ;;  %v1984_v58 = vsub.f32 %v16926_v16, %v1928_v13 }
 0x2bc   :  { %v1943_v63 = vpop.xlane.xlu0 %1942  ;;  %15543 = vpow2.f32 %v2027_v44  ;;  %v2109_v24 = vsel %vm1867_vm4, %v17031_v41, 0.0 }
 0x2bd   :  { %v17035_v40 = vpop.eup %15533  ;;  %v1989_v52 = vsub.f32 %v16894_v38, %v1943_v63  ;;  %2086 = vadd.xlane.f32.xlu0 %v2085_v22  ;;  %15545 = vpow2.f32 %v2025_v54  ;;  %v2035_v16 = vmul.f32 1.442695, %v1984_v58 }
 0x2be   :  { %v2124_v56 = vsel %vm1871_vm5, %v17035_v40, 0.0  ;;  %v17040_v31 = vpop.eup %15535 }
 0x2bf   :  { %v2045_v57 = vmul.f32 1.442695, %v1989_v52  ;;  %2125 = vadd.xlane.f32.xlu1 %v2124_v56  ;;  %v17045_v15 = vpop.eup %15537  ;;  %v2094_v38 = vsel %vm1871_vm5, %v17040_v31, 0.0 }
 0x2c0   :  { %v1937_v7 = vpop.xlane.xlu0 %1936  ;;  %v2091_v48 = vsel %vm1867_vm4, %v17045_v15, 0.0 }
 0x2c1   :  { %2110 = vadd.xlane.f32.xlu0 %v2109_v24  ;;  %15547 = vpow2.f32 %v2045_v57  ;;  %v1987_v57 = vsub.f32 %v16932_v9, %v1937_v7 }
 0x2c2   :  { %v1940_v1 = vpop.xlane.xlu1 %1939  ;;  %15549 = vpow2.f32 %v2033_v11 }
 0x2c3   :  { %2095 = vadd.xlane.f32.xlu1 %v2094_v38  ;;  %v17049_v5 = vpop.eup %15539  ;;  %v1988_v54 = vsub.f32 %v16936_v21, %v1940_v1 }
 0x2c4   :  { %v2121_v22 = vsel %vm1867_vm4, %v17049_v5, 0.0 }
 0x2c5   :  { %v17053_v49 = vpop.eup %15541  ;;  %2092 = vadd.xlane.f32.xlu0 %v2091_v48  ;;  %v2041_v48 = vmul.f32 1.442695, %v1987_v57 }
 0x2c6   :  { %v1958_v17 = vpop.xlane.xlu1 %1957  ;;  %v2136_v44 = vsel %vm1871_vm5, %v17053_v49, 0.0  ;;  %v17058_v34 = vpop.eup %15543 }
 0x2c7   :  { %v1994_v20 = vsub.f32 %v16916_v47, %v1958_v17  ;;  %2137 = vadd.xlane.f32.xlu1 %v2136_v44  ;;  %v17064_v52 = vpop.eup %15545  ;;  %v2106_v60 = vsel %vm1871_vm5, %v17058_v34, 0.0  ;;  %v2043_v47 = vmul.f32 1.442695, %v1988_v54 }
 0x2c8   :  { %v1949_v63 = vpop.xlane.xlu0 %1948  ;;  %v2103_v21 = vsel %vm1867_vm4, %v17064_v52, 0.0 }
 0x2c9   :  { %v2055_v13 = vmul.f32 1.442695, %v1994_v20  ;;  %2122 = vadd.xlane.f32.xlu0 %v2121_v22  ;;  %v1991_v58 = vsub.f32 %v16942_v14, %v1949_v63 }
 0x2ca   :  { %v1952_v56 = vpop.xlane.xlu1 %1951 }
 0x2cb   :  { %15551 = vpow2.f32 %v2055_v13  ;;  %2107 = vadd.xlane.f32.xlu1 %v2106_v60  ;;  %v17071_v1 = vpop.eup %15547  ;;  %v1992_v38 = vsub.f32 %v16946_v46, %v1952_v56  ;;  %v2049_v54 = vmul.f32 1.442695, %v1991_v58 }
 0x2cc   :  { %v1955_v24 = vpop.xlane.xlu0 %1954  ;;  %15553 = vpow2.f32 %v2035_v16  ;;  %v2133_v7 = vsel %vm1867_vm4, %v17071_v1, 0.0  ;;  %v17078_v44 = vpop.eup %15549 }
 0x2cd   :  { %v1993_v11 = vsub.f32 %v16910_v18, %v1955_v24  ;;  %2104 = vadd.xlane.f32.xlu0 %v2103_v21  ;;  %15555 = vpow2.f32 %v2043_v47  ;;  %v2051_v20 = vmul.f32 1.442695, %v1992_v38  ;;  %v2115_v18 = vsel %vm1867_vm4, %v17078_v44, 0.0 }
 0x2cf   :  { %v2053_v17 = vmul.f32 1.442695, %v1993_v11 }
 0x2d0   :  { %v1961_v9 = vpop.xlane.xlu0 %1960 }
 0x2d1   :  { %15557 = vpow2.f32 %v2053_v17  ;;  %2134 = vadd.xlane.f32.xlu0 %v2133_v7  ;;  %v1995_v46 = vsub.f32 %v16952_v33, %v1961_v9 }
 0x2d2   :  { %15559 = vpow2.f32 %v2041_v48  ;;  %v1964_v9 = vpop.xlane.xlu1 %1963 }
 0x2d3   :  { %15561 = vpow2.f32 %v2051_v20  ;;  %v2057_v16 = vmul.f32 1.442695, %v1995_v46  ;;  %v1996_v7 = vsub.f32 %v16956_v19, %v1964_v9  ;;  %v2336_v9 = vsel %vm2240_vm3, %v16773_v26, 0 }
 0x2d4   :  { %15563 = vpow2.f32 %v2049_v54 }
 0x2d5   :  { %v17083_v22 = vpop.eup %15551  ;;  %2116 = vadd.xlane.f32.xlu0 %v2115_v18  ;;  %15565 = vpow2.f32 %v2057_v16  ;;  %v2059_v20 = vmul.f32 1.442695, %v1996_v7 }
 0x2d6   :  { %v2148_v14 = vsel %vm1871_vm5, %v17083_v22, 0.0  ;;  %v17087_v63 = vpop.eup %15553 }
 0x2d7   :  { %2149 = vadd.xlane.f32.xlu1 %v2148_v14  ;;  %v17089_v13 = vpop.eup %15555  ;;  %v2118_v33 = vsel %vm1871_vm5, %v17087_v63, 0.0  ;;  %15567 = vpow2.f32 %v2059_v20 }
 0x2d8   :  { %v2130_v47 = vsel %vm1871_vm5, %v17089_v13, 0.0 }
 0x2db   :  { %v17093_v56 = vpop.eup %15557  ;;  %2119 = vadd.xlane.f32.xlu1 %v2118_v33 }
 0x2dc   :  { %v2145_v60 = vsel %vm1867_vm4, %v17093_v56, 0.0  ;;  %v17097_v57 = vpop.eup %15559 }
 0x2dd   :  { %2146 = vadd.xlane.f32.xlu0 %v2145_v60  ;;  %v17101_v24 = vpop.eup %15561  ;;  %v2127_v21 = vsel %vm1867_vm4, %v17097_v57, 0.0 }
 0x2de   :  { %v17105_v38 = vpop.eup %15563  ;;  %v2142_v11 = vsel %vm1871_vm5, %v17101_v24, 0.0 }
 0x2df   :  { %2131 = vadd.xlane.f32.xlu1 %v2130_v47  ;;  %v2139_v48 = vsel %vm1867_vm4, %v17105_v38, 0.0  ;;  %v17111_v58 = vpop.eup %15565 }
 0x2e0   :  { %v2151_v17 = vsel %vm1867_vm4, %v17111_v58, 0.0 }
 0x2e1   :  { %2128 = vadd.xlane.f32.xlu0 %v2127_v21  ;;  %v17138_v54 = vpop.eup %15567 }
 0x2e2   :  { %v2154_v46 = vsel %vm1871_vm5, %v17138_v54, 0.0 }
 0x2e3   :  { %2143 = vadd.xlane.f32.xlu1 %v2142_v11 }
 0x2e5   :  { %2140 = vadd.xlane.f32.xlu0 %v2139_v48 }
 0x2e9   :  { %2152 = vadd.xlane.f32.xlu0 %v2151_v17 }
 0x2f4   :  { %2991 = vrot.lane.b32.xlu1 %v16550_v35, %s16147_s6 }
 0x2f8   :  { %3047 = vrot.lane.b32.xlu1 %v16604_v50, %s16147_s6 }
 0x2fc   :  { %3100 = vrot.lane.b32.xlu1 %v16610_v0, %s16147_s6 }
 0x2ff   :  { %2994 = vrot.lane.b32.xlu0 %v16601_v39, %s16147_s6 }
 0x303   :  { %3044 = vrot.lane.b32.xlu0 %v16556_v42, %s16147_s6 }
 0x307   :  { %3153 = vrot.lane.b32.xlu0 %v16616_v23, %s16147_s6 }
 0x30b   :  { %3150 = vrot.lane.b32.xlu0 %v16573_v27, %s16147_s6 }
 0x30f   :  { %3259 = vrot.lane.b32.xlu0 %v16629_v30, %s16147_s6 }
 0x313   :  { %3256 = vrot.lane.b32.xlu0 %v16589_v4, %s16147_s6 }
 0x317   :  { %3365 = vrot.lane.b32.xlu0 %v16631_v55, %s16147_s6 }
 0x31b   :  { %3362 = vrot.lane.b32.xlu0 %v16591_v10, %s16147_s6 }
 0x31e   :  { %v2063_v19 = vpop.xlane.xlu0 %2062 }
 0x31f   :  { %3471 = vrot.lane.b32.xlu0 %v16652_v59, %s16147_s6  ;;  %15569 = vrcp.f32 %v2063_v19  ;;  %v22024_v19 = vld [vmem:[#allocation30_spill] sm:$0xff]  ;;  %v22040_v59 = vld [vmem:[#allocation55_spill] sm:$0xff] }
 0x320   :  { %2155 = vadd.xlane.f32.xlu1 %v2154_v46 }
 0x322   :  { %v2066_v18 = vpop.xlane.xlu1 %2065 }
 0x323   :  { %15571 = vrcp.f32 %v2066_v18  ;;  %3468 = vrot.lane.b32.xlu0 %v16547_v29, %s16147_s6 }
 0x326   :  { %v2069_v14 = vpop.xlane.xlu0 %2068 }
 0x327   :  { %3577 = vrot.lane.b32.xlu0 %v16675_v45, %s16147_s6  ;;  %15573 = vrcp.f32 %v2069_v14  ;;  %v22025_v14 = vld [vmem:[#allocation39_spill] sm:$0xff] }
 0x329   :  { %v15570_v33 = vpop.eup %15569 }
 0x32a   :  { %v2072_v16 = vpop.xlane.xlu1 %2071  ;;  %v2158_v47 = vmul.f32 %v15570_v33, %v16964_v61  ;;  %v22022_v61 = vld [vmem:[#allocation24_spill] sm:$0xff] }
 0x32b   :  { %15575 = vrcp.f32 %v2072_v16  ;;  %3574 = vrot.lane.b32.xlu0 %v16566_v3, %s16147_s6 }
 0x32d   :  { %v15572_v60 = vpop.eup %15571 }
 0x32e   :  { %v2160_v21 = vmul.f32 %v15572_v60, %v16969_v36  ;;  %v2075_v11 = vpop.xlane.xlu0 %2074  ;;  %v22023_v36 = vmov 0.0   ;;  %v22026_v60 = vld [vmem:[#allocation23_spill] sm:$0xff] }
 0x32f   :  { %15577 = vrcp.f32 %v2075_v11  ;;  %3683 = vrot.lane.b32.xlu0 %v16694_v37, %s16147_s6  ;;  %v22039_v37 = vld [vmem:[#allocation20_spill] sm:$0xff] }
 0x330   :  { %v2078_v48 = vpop.xlane.xlu1 %2077  ;;  %v2221_v17 = vpack.c.bf16 %v2160_v21, %v2158_v47  ;;  %v22027_v47 = vld [vmem:[#allocation45_spill] sm:$0xff] }
 0x331   :  { %15579 = vrcp.f32 %v2078_v48  ;;  %3097 = vrot.lane.b32.xlu1 %v16564_v2, %s16147_s6  ;;  %v15574_v7 = vpop.eup %15573  ;;  %v2383_v21 = vsel %vm2240_vm3, %v22027_v47, 0  ;;  %v22028_v48 = vld [vmem:[#allocation41_spill] sm:$0xff] }
 0x332   :  { %14695 = vmatmul.mubr.msk.bf16.vlgmr.msra.gmra.mrb[56].mxu0 %vm1867_vm4, %v2221_v17  ;;  %v2162_v46 = vmul.f32 %v15574_v7, %v16974_v6  ;;  %v22030_v7 = vld [vmem:[#allocation32_spill] sm:$0xff] }
 0x333   :  { %14705 = vmatpush3.bf16.msra.mxu0 %v2336_v9  ;;  %3680 = vrot.lane.b32.xlu0 %v22022_v61, %s16147_s6 }
 0x334   :  { %14706 = vmatprep.mubr.msk.bf16.mxu0 %vm16146_vm1, %v22023_v36  ;;  %14716 = vmatprep.subr.bf16.mxu0 %v22023_v36 }
 0x335   :  { %v15576_v20 = vpop.eup %15575  ;;  %3206 = vrot.lane.b32.xlu1 %v22024_v19, %s16147_s6 }
 0x336   :  { %v2164_v18 = vmul.f32 %v15576_v20, %v16978_v53  ;;  %v22029_v53 = vld [vmem:[#allocation57_spill] sm:$0xff] }
 0x337   :  { %3789 = vrot.lane.b32.xlu0 %v22025_v14, %s16147_s6 }
 0x338   :  { %v2222_v16 = vpack.c.bf16 %v2164_v18, %v2162_v46  ;;  %v22031_v46 = vld [vmem:[#allocation44_spill] sm:$0xff] }
 0x339   :  { %v15578_v33 = vpop.eup %15577  ;;  %3203 = vrot.lane.b32.xlu1 %v22026_v60, %s16147_s6 }
 0x33a   :  { %14701 = vmatmul.mubr.msk.bf16.vlgmr.msra.gmra.mrb[80].mxu1 %vm1867_vm4, %v2222_v16  ;;  %v2166_v6 = vmul.f32 %v15578_v33, %v16983_v62  ;;  %v2430_v62 = vsel %vm2240_vm3, %v22031_v46, 0  ;;  %v22032_v16 = vld [vmem:[#allocation29_spill] sm:$0xff] }
 0x33b   :  { %v15580_v11 = vpop.eup %15579  ;;  %14711 = vmatpush3.bf16.msra.mxu1 %v2383_v21  ;;  %4207 = vrot.lane.b32.xlu0 %v22028_v48, %s16147_s6 }
 0x33c   :  { %v2168_v17 = vmul.f32 %v15580_v11, %v22029_v53  ;;  %v2102_v9 = vpop.xlane.xlu1 %2101  ;;  %14712 = vmatprep.mubr.msk.bf16.mxu1 %vm16146_vm1, %v22023_v36  ;;  %14722 = vmatprep.subr.bf16.mxu1 %v22023_v36  ;;  %v22033_v11 = vld [vmem:[#allocation33_spill] sm:$0xff]  ;;  %v22034_v53 = vld [vmem:[#allocation47_spill] sm:$0xff] }
 0x33d   :  { %3312 = vrot.lane.b32.xlu1 %v22030_v7, %s16147_s6 }
 0x33e   :  { %v2223_v20 = vpack.c.bf16 %v2168_v17, %v2166_v6 }
 0x33f   :  { %4307 = vrot.lane.b32.xlu0 %v16773_v26, %s16147_s6  ;;  %v22036_v26 = vld [vmem:[#allocation49_spill] sm:$0xff] }
 0x340   :  { %14707 = vmatmul.mubr.msk.bf16.vlgmr.msra.gmra.mrb[60].mxu0 %vm1867_vm4, %v2223_v20  ;;  %v2084_v18 = vpop.xlane.xlu1 %2083  ;;  %v22035_v20 = vld [vmem:[#allocation18_spill] sm:$0xff] }
 0x341   :  { %14717 = vmatpush3.bf16.msra.mxu0 %v2430_v62  ;;  %3309 = vrot.lane.b32.xlu1 %v22032_v16, %s16147_s6  ;;  %15581 = vrcp.f32 %v2084_v18  ;;  %v22037_v18 = vld [vmem:[#allocation35_spill] sm:$0xff] }
 0x342   :  { %v2099_v33 = vpop.xlane.xlu0 %2098  ;;  %14718 = vmatprep.mubr.msk.bf16.mxu0 %vm16146_vm1, %v22023_v36  ;;  %14728 = vmatprep.subr.bf16.mxu0 %v22023_v36 }
 0x343   :  { %4357 = vrot.lane.b32.xlu0 %v22027_v47, %s16147_s6 }
 0x344   :  { %v2114_v21 = vpop.xlane.xlu1 %2113 }
 0x345   :  { %3418 = vrot.lane.b32.xlu1 %v22033_v11, %s16147_s6 }
 0x346   :  { %v2081_v6 = vpop.xlane.xlu0 %2080 }
 0x347   :  { %15583 = vrcp.f32 %v2081_v6  ;;  %4507 = vrot.lane.b32.xlu0 %v22034_v53, %s16147_s6  ;;  %v22038_v6 = vld [vmem:[#allocation51_spill] sm:$0xff] }
 0x348   :  { %v2090_v17 = vpop.xlane.xlu1 %2089 }
 0x349   :  { %15585 = vrcp.f32 %v2090_v17  ;;  %3415 = vrot.lane.b32.xlu1 %v22035_v20, %s16147_s6 }
 0x34a   :  { %v2087_v62 = vpop.xlane.xlu0 %2086 }
 0x34b   :  { %15587 = vrcp.f32 %v2087_v62  ;;  %4607 = vrot.lane.b32.xlu0 %v22036_v26, %s16147_s6  ;;  %v15582_v14 = vpop.eup %15581 }
 0x34c   :  { %v2126_v47 = vpop.xlane.xlu1 %2125  ;;  %15589 = vrcp.f32 %v2099_v33  ;;  %v2172_v62 = vmul.f32 %v15582_v14, %v17003_v25  ;;  %v22042_v25 = vld [vmem:[#allocation46_spill] sm:$0xff] }
 0x34d   :  { %3524 = vrot.lane.b32.xlu1 %v22037_v18, %s16147_s6  ;;  %15591 = vrcp.f32 %v2102_v9  ;;  %v22041_v9 = vld [vmem:[#allocation36_spill] sm:$0xff] }
 0x34e   :  { %v2111_v48 = vpop.xlane.xlu0 %2110 }
 0x34f   :  { %4707 = vrot.lane.b32.xlu0 %v22038_v6, %s16147_s6 }
 0x350   :  { %v2096_v17 = vpop.xlane.xlu1 %2095 }
 0x351   :  { %v15584_v61 = vpop.eup %15583  ;;  %15593 = vrcp.f32 %v2096_v17  ;;  %3521 = vrot.lane.b32.xlu1 %v22039_v37, %s16147_s6 }
 0x352   :  { %v2170_v3 = vmul.f32 %v15584_v61, %v17011_v12  ;;  %v2093_v45 = vpop.xlane.xlu0 %2092  ;;  %v2477_v12 = vsel %vm2240_vm3, %v22042_v25, 0 }
 0x353   :  { %v15586_v29 = vpop.eup %15585  ;;  %15595 = vrcp.f32 %v2093_v45  ;;  %4857 = vrot.lane.b32.xlu0 %v22040_v59, %s16147_s6 }
 0x354   :  { %v2138_v33 = vpop.xlane.xlu1 %2137  ;;  %v2224_v10 = vpack.c.bf16 %v2172_v62, %v2170_v3  ;;  %v2176_v17 = vmul.f32 %v15586_v29, %v17021_v32  ;;  %15597 = vrcp.f32 %v2111_v48  ;;  %v22043_v29 = vld [vmem:[#allocation21_spill] sm:$0xff]  ;;  %v2524_v32 = vsel %vm2240_vm3, %v22034_v53, 0  ;;  %v22044_v48 = vld [vmem:[#allocation40_spill] sm:$0xff] }
 0x355   :  { %v15588_v55 = vpop.eup %15587  ;;  %3630 = vrot.lane.b32.xlu1 %v22041_v9, %s16147_s6  ;;  %15599 = vrcp.f32 %v2114_v21 }
 0x356   :  { %v2174_v37 = vmul.f32 %v15588_v55, %v17027_v43  ;;  %v2123_v18 = vpop.xlane.xlu0 %2122  ;;  %14713 = vmatmul.mubr.msk.bf16.vlgmr.msra.gmra.mrb[84].mxu1 %vm1867_vm4, %v2224_v10  ;;  %v15590_v61 = vpop.eup %15589 }
 0x357   :  { %14723 = vmatpush3.bf16.msra.mxu1 %v2477_v12  ;;  %14724 = vmatprep.mubr.msk.bf16.mxu1 %vm16146_vm1, %v22023_v36  ;;  %v15592_v55 = vpop.eup %15591 }
 0x358   :  { %v2108_v3 = vpop.xlane.xlu1 %2107  ;;  %v2225_v45 = vpack.c.bf16 %v2176_v17, %v2174_v37  ;;  %14734 = vmatprep.subr.bf16.mxu1 %v22023_v36  ;;  %v2182_v37 = vmul.f32 %v15590_v61, %v17009_v28  ;;  %v2184_v21 = vmul.f32 %v15592_v55, %v16997_v51  ;;  %v22045_v28 = vld [vmem:[#allocation28_spill] sm:$0xff] }
 0x359   :  { %15601 = vrcp.f32 %v2108_v3  ;;  %3627 = vrot.lane.b32.xlu1 %v22043_v29, %s16147_s6 }
 0x35a   :  { %v2105_v10 = vpop.xlane.xlu0 %2104  ;;  %14719 = vmatmul.mubr.msk.bf16.vlgmr.msra.gmra.mrb[64].mxu0 %vm1867_vm4, %v2225_v45  ;;  %v2227_v45 = vpack.c.bf16 %v2184_v21, %v2182_v37  ;;  %v22047_v37 = vld [vmem:[#allocation25_spill] sm:$0xff] }
 0x35b   :  { %v15594_v43 = vpop.eup %15593  ;;  %15603 = vrcp.f32 %v2105_v10  ;;  %14729 = vmatpush3.bf16.msra.mxu0 %v2524_v32  ;;  %14730 = vmatprep.mubr.msk.bf16.mxu0 %vm16146_vm1, %v22023_v36  ;;  %v22046_v32 = vld [vmem:[#allocation48_spill] sm:$0xff] }
 0x35c   :  { %14740 = vmatprep.subr.bf16.mxu0 %v22023_v36  ;;  %v2180_v62 = vmul.f32 %v15594_v43, %v17040_v31  ;;  %15605 = vrcp.f32 %v2123_v18  ;;  %v2571_v51 = vsel %vm2240_vm3, %v22046_v32, 0  ;;  %v2618_v31 = vsel %vm2240_vm3, %v22036_v26, 0 }
 0x35d   :  { %v15596_v14 = vpop.eup %15595  ;;  %3736 = vrot.lane.b32.xlu1 %v22044_v48, %s16147_s6  ;;  %15607 = vrcp.f32 %v2126_v47 }
 0x35e   :  { %v2178_v17 = vmul.f32 %v15596_v14, %v17045_v15  ;;  %v2135_v12 = vpop.xlane.xlu0 %2134  ;;  %v15598_v10 = vpop.eup %15597 }
 0x35f   :  { %v15600_v61 = vpop.eup %15599  ;;  %v2190_v18 = vmul.f32 %v15598_v10, %v17031_v41  ;;  %15609 = vrcp.f32 %v2135_v12  ;;  %v22048_v10 = vld [vmem:[#allocation42_spill] sm:$0xff] }
 0x360   :  { %v2226_v3 = vpack.c.bf16 %v2180_v62, %v2178_v17  ;;  %v2192_v14 = vmul.f32 %v15600_v61, %v17015_v8  ;;  %v22049_v8 = vld [vmem:[#allocation50_spill] sm:$0xff] }
 0x361   :  { %3733 = vrot.lane.b32.xlu1 %v22045_v28, %s16147_s6 }
 0x362   :  { %14725 = vmatmul.mubr.msk.bf16.vlgmr.msra.gmra.mrb[88].mxu1 %vm1867_vm4, %v2226_v3  ;;  %14731 = vmatmul.mubr.msk.bf16.vlgmr.msra.gmra.mrb[68].mxu0 %vm1867_vm4, %v2227_v45  ;;  %v2117_v47 = vpop.xlane.xlu0 %2116  ;;  %v2229_v3 = vpack.c.bf16 %v2192_v14, %v2190_v18 }
 0x363   :  { %v15602_v15 = vpop.eup %15601  ;;  %14735 = vmatpush3.bf16.msra.mxu1 %v2571_v51  ;;  %14741 = vmatpush3.bf16.msra.mxu0 %v2618_v31  ;;  %15611 = vrcp.f32 %v2117_v47 }
 0x364   :  { %v2150_v55 = vpop.xlane.xlu1 %2149  ;;  %14736 = vmatprep.mubr.msk.bf16.mxu1 %vm16146_vm1, %v22023_v36  ;;  %14742 = vmatprep.mubr.msk.bf16.mxu0 %vm16146_vm1, %v22023_v36  ;;  %v2188_v21 = vmul.f32 %v15602_v15, %v17058_v34  ;;  %15613 = vrcp.f32 %v2138_v33  ;;  %v2665_v34 = vsel %vm2240_vm3, %v22049_v8, 0 }
 0x365   :  { %v15604_v43 = vpop.eup %15603  ;;  %3786 = vrot.lane.b32.xlu1 %v22047_v37, %s16147_s6  ;;  %14746 = vmatprep.subr.bf16.mxu1 %v22023_v36 }
 0x366   :  { %v2186_v41 = vmul.f32 %v15604_v43, %v17064_v52  ;;  %14752 = vmatprep.subr.bf16.mxu0 %v22023_v36  ;;  %v15606_v45 = vpop.eup %15605  ;;  %v2712_v52 = vsel %vm2240_vm3, %v22038_v6, 0 }
 0x367   :  { %v15608_v33 = vpop.eup %15607  ;;  %v2198_v12 = vmul.f32 %v15606_v45, %v17049_v5 }
 0x368   :  { %v2120_v62 = vpop.xlane.xlu1 %2119  ;;  %v2228_v17 = vpack.c.bf16 %v2188_v21, %v2186_v41  ;;  %v2200_v31 = vmul.f32 %v15608_v33, %v17035_v40  ;;  %v22050_v21 = vld [vmem:[#allocation52_spill] sm:$0xff] }
 0x369   :  { %15615 = vrcp.f32 %v2120_v62  ;;  %4257 = vrot.lane.b32.xlu1 %v22048_v10, %s16147_s6  ;;  %v15610_v5 = vpop.eup %15609  ;;  %v2806_v41 = vsel %vm2240_vm3, %v22050_v21, 0 }
 0x36a   :  { %v2147_v51 = vpop.xlane.xlu0 %2146  ;;  %14737 = vmatmul.mubr.msk.bf16.vlgmr.msra.gmra.mrb[92].mxu1 %vm1867_vm4, %v2228_v17  ;;  %14743 = vmatmul.mubr.msk.bf16.vlgmr.msra.gmra.mrb[72].mxu0 %vm1867_vm4, %v2229_v3  ;;  %v2231_v18 = vpack.c.bf16 %v2200_v31, %v2198_v12  ;;  %v2206_v62 = vmul.f32 %v15610_v5, %v17071_v1  ;;  %v22051_v1 = vld [vmem:[#allocation53_spill] sm:$0xff] }
 0x36b   :  { %14747 = vmatpush3.bf16.msra.mxu1 %v2665_v34  ;;  %14753 = vmatpush3.bf16.msra.mxu0 %v2712_v52  ;;  %15617 = vrcp.f32 %v2147_v51 }
 0x36c   :  { %v2132_v61 = vpop.xlane.xlu1 %2131  ;;  %14754 = vmatprep.mubr.msk.bf16.mxu0 %vm16146_vm1, %v22023_v36  ;;  %14764 = vmatprep.subr.bf16.mxu0 %v22023_v36 }
 0x36d   :  { %4407 = vrot.lane.b32.xlu1 %v22031_v46, %s16147_s6  ;;  %14748 = vmatprep.mubr.msk.bf16.mxu1 %vm16146_vm1, %v22023_v36  ;;  %15619 = vrcp.f32 %v2132_v61  ;;  %v15612_v47 = vpop.eup %15611 }
 0x36e   :  { %v2129_v15 = vpop.xlane.xlu0 %2128  ;;  %14758 = vmatprep.subr.bf16.mxu1 %v22023_v36  ;;  %v15614_v43 = vpop.eup %15613  ;;  %v2194_v17 = vmul.f32 %v15612_v47, %v17078_v44  ;;  %v2759_v44 = vsel %vm2240_vm3, %v22051_v1, 0 }
 0x36f   :  { %15621 = vrcp.f32 %v2129_v15  ;;  %v2208_v45 = vmul.f32 %v15614_v43, %v17053_v49  ;;  %v22052_v49 = vld [vmem:[#allocation56_spill] sm:$0xff] }
 0x370   :  { %15623 = vrcp.f32 %v2150_v55  ;;  %v2144_v3 = vpop.xlane.xlu1 %2143  ;;  %v2900_v31 = vsel %vm2240_vm3, %v22052_v49, 0 }
 0x371   :  { %4457 = vrot.lane.b32.xlu1 %v22042_v25, %s16147_s6  ;;  %v2233_v33 = vpack.c.bf16 %v2208_v45, %v2206_v62  ;;  %v22053_v45 = vld [vmem:[#allocation54_spill] sm:$0xff] }
 0x372   :  { %v2141_v14 = vpop.xlane.xlu0 %2140  ;;  %14755 = vmatmul.mubr.msk.bf16.vlgmr.msra.gmra.mrb[76].mxu0 %vm1867_vm4, %v2231_v18 }
 0x373   :  { %v15616_v40 = vpop.eup %15615  ;;  %14765 = vmatpush3.bf16.msra.mxu0 %v2806_v41  ;;  %14766 = vmatprep.mubr.msk.bf16.mxu0 %vm16146_vm1, %v22023_v36  ;;  %15625 = vrcp.f32 %v2141_v14 }
 0x374   :  { %v2196_v55 = vmul.f32 %v15616_v40, %v17087_v63  ;;  %14776 = vmatprep.subr.bf16.mxu0 %v22023_v36  ;;  %15627 = vrcp.f32 %v2144_v3  ;;  %v2992_v47 = vpop.permute.xlu1 %2991 }
 0x375   :  { %4557 = vrot.lane.b32.xlu1 %v22046_v32, %s16147_s6  ;;  %v15618_v34 = vpop.eup %15617 }
 0x376   :  { %v2230_v51 = vpack.c.bf16 %v2196_v55, %v2194_v17  ;;  %v2153_v61 = vpop.xlane.xlu0 %2152  ;;  %v2214_v5 = vmul.f32 %v15618_v34, %v17093_v56  ;;  %v2853_v56 = vsel %vm2240_vm3, %v22040_v59, 0 }
 0x377   :  { %v15620_v52 = vpop.eup %15619  ;;  %15629 = vrcp.f32 %v2153_v61 }
 0x378   :  { %14749 = vmatmul.mubr.msk.bf16.vlgmr.msra.gmra.mrb[96].mxu1 %vm1867_vm4, %v2230_v51  ;;  %v2204_v18 = vmul.f32 %v15620_v52, %v17089_v13  ;;  %v3048_v17 = vpop.permute.xlu1 %3047  ;;  %v2947_v51 = vsel %vm2240_vm3, %v22053_v45, 0 }
 0x379   :  { %v15622_v63 = vpop.eup %15621  ;;  %14759 = vmatpush3.bf16.msra.mxu1 %v2759_v44  ;;  %4657 = vrot.lane.b32.xlu1 %v22049_v8, %s16147_s6 }
 0x37a   :  { %v2202_v12 = vmul.f32 %v15622_v63, %v17097_v57  ;;  %14767 = vmatmul.mubr.msk.bf16.vlgmr.msra.gmra.mrb[80].mxu0 %vm1867_vm4, %v2233_v33  ;;  %14760 = vmatprep.mubr.msk.bf16.mxu1 %vm16146_vm1, %v22023_v36  ;;  %v15624_v15 = vpop.eup %15623  ;;  %v2995_v41 = vpop.permute.xlu0 %2994 }
 0x37b   :  { %14777 = vmatpush3.bf16.msra.mxu0 %v2900_v31  ;;  %14770 = vmatprep.subr.bf16.mxu1 %v22023_v36  ;;  %v2216_v57 = vmul.f32 %v15624_v15, %v17083_v22  ;;  %v3000_v22 = vsel %vm1114_vm2, %v2995_v41, 0 }
 0x37c   :  { %14778 = vmatprep.mubr.msk.bf16.mxu0 %vm16146_vm1, %v22023_v36  ;;  %14788 = vmatprep.subr.bf16.mxu0 %v22023_v36  ;;  %v2232_v43 = vpack.c.bf16 %v2204_v18, %v2202_v12  ;;  %v3101_v3 = vpop.permute.xlu1 %3100 }
 0x37d   :  { %4807 = vrot.lane.b32.xlu1 %v22050_v21, %s16147_s6  ;;  %v15626_v14 = vpop.eup %15625  ;;  %v2235_v13 = vpack.c.bf16 %v2216_v57, %v2214_v5 }
 0x37e   :  { %v15628_v40 = vpop.eup %15627  ;;  %v2210_v62 = vmul.f32 %v15626_v14, %v17105_v38  ;;  %v3045_v34 = vpop.permute.xlu0 %3044 }
 0x37f   :  { %v2212_v55 = vmul.f32 %v15628_v40, %v17101_v24  ;;  %v3106_v24 = vsel %vm1114_vm2, %v3101_v3, 0  ;;  %v3053_v40 = vsel %vm1114_vm2, %v3048_v17, 0 }
 0x380   :  { %14761 = vmatmul.mubr.msk.bf16.vlgmr.msra.gmra.mrb[100].mxu1 %vm1867_vm4, %v2232_v43 }
 0x381   :  { %14771 = vmatpush3.bf16.msra.mxu1 %v2853_v56  ;;  %4757 = vrot.lane.b32.xlu1 %v22051_v1, %s16147_s6  ;;  %v2234_v38 = vpack.c.bf16 %v2212_v55, %v2210_v62 }
 0x382   :  { %14779 = vmatmul.mubr.msk.bf16.vlgmr.msra.gmra.mrb[84].mxu0 %vm1867_vm4, %v2235_v13  ;;  %14772 = vmatprep.mubr.msk.bf16.mxu1 %vm16146_vm1, %v22023_v36  ;;  %v3154_v52 = vpop.permute.xlu0 %3153 }
 0x383   :  { %14782 = vmatprep.subr.bf16.mxu1 %v22023_v36  ;;  %14790 = vmatprep.mubr.msk.bf16.mxu0 %vm16146_vm1, %v22023_v36 }
 0x384   :  { %14789 = vmatpush3.bf16.xpose.msra.mxu0 %v3000_v22 }
 0x385   :  { %4907 = vrot.lane.b32.xlu1 %v22052_v49, %s16147_s6  ;;  %14800 = vmatprep.subr.bf16.mxu0 %v22023_v36 }
 0x386   :  { %v3151_v44 = vpop.permute.xlu0 %3150 }
 0x388   :  { %14773 = vmatmul.mubr.msk.bf16.vlgmr.msra.gmra.mrb[104].mxu1 %vm1867_vm4, %v2234_v38 }
 0x389   :  { %14783 = vmatpush3.bf16.msra.mxu1 %v2947_v51  ;;  %4957 = vrot.lane.b32.xlu1 %v22053_v45, %s16147_s6 }
 0x38a   :  { %14784 = vmatprep.mubr.msk.bf16.mxu1 %vm16146_vm1, %v22023_v36  ;;  %14794 = vmatprep.subr.bf16.mxu1 %v22023_v36  ;;  %v3260_v33 = vpop.permute.xlu0 %3259 }
 0x38b   :  { %14791 = vmatmul.mubr.msk.bf16.vlgmr.msra.gmra.mrb[88].mxu0 %vm1114_vm2, %v2992_v47  ;;  %v15630_v47 = vpop.eup %15629 }
 0x38c   :  { %14801 = vmatpush3.bf16.xpose.msra.mxu0 %v3106_v24  ;;  %14802 = vmatprep.mubr.msk.bf16.mxu0 %vm16146_vm1, %v22023_v36  ;;  %v2218_v61 = vmul.f32 %v15630_v47, %v17111_v58 }
 0x38d   :  { %14812 = vmatprep.subr.bf16.mxu0 %v22023_v36 }
 0x38e   :  { %v3257_v63 = vpop.permute.xlu0 %3256 }
 0x392   :  { %v3366_v12 = vpop.permute.xlu0 %3365 }
 0x396   :  { %v17341_v5 = vpop.permute.xlu0 %3362 }
 0x39a   :  { %v3472_v14 = vpop.permute.xlu0 %3471 }
 0x39e   :  { %v3469_v55 = vpop.permute.xlu0 %3468 }
 0x3a2   :  { %v3578_v17 = vpop.permute.xlu0 %3577 }
 0x3a6   :  { %v3575_v24 = vpop.permute.xlu0 %3574 }
 0x3ad   :  { %v2156_v31 = vpop.xlane.xlu1 %2155 }
 0x3ae   :  { %15631 = vrcp.f32 %v2156_v31 }
 0x3b1   :  { %v3098_v15 = vpop.permute.xlu1 %3097 }
 0x3b2   :  { %14803 = vmatmul.mubr.msk.bf16.vlgmr.msra.gmra.mrb[92].mxu0 %vm1114_vm2, %v3098_v15  ;;  %v3684_v15 = vpop.permute.xlu0 %3683 }
 0x3b3   :  { %14814 = vmatprep.mubr.msk.bf16.mxu0 %vm16146_vm1, %v22023_v36 }
 0x3b5   :  { %v3207_v18 = vpop.permute.xlu1 %3206 }
 0x3b6   :  { %v3212_v57 = vsel %vm1114_vm2, %v3207_v18, 0 }
 0x3b7   :  { %14813 = vmatpush3.bf16.xpose.msra.mxu0 %v3212_v57  ;;  %v3681_v57 = vpop.permute.xlu0 %3680 }
 0x3b8   :  { %v15632_v43 = vpop.eup %15631  ;;  %14824 = vmatprep.subr.bf16.mxu0 %v22023_v36 }
 0x3b9   :  { %v2220_v41 = vmul.f32 %v15632_v43, %v17138_v54  ;;  %v3204_v56 = vpop.permute.xlu1 %3203  ;;  %v3159_v54 = vsel %vm1114_vm2, %v3154_v52, 0 }
 0x3bb   :  { %v2236_v13 = vpack.c.bf16 %v2220_v41, %v2218_v61 }
 0x3bd   :  { %14785 = vmatmul.mubr.msk.bf16.vlgmr.msra.gmra.mrb[108].mxu1 %vm1867_vm4, %v2236_v13  ;;  %v3313_v62 = vpop.permute.xlu1 %3312 }
 0x3be   :  { %14795 = vmatpush3.bf16.xpose.msra.mxu1 %v3053_v40  ;;  %v3318_v22 = vsel %vm1114_vm2, %v3313_v62, 0  ;;  %14815 = vmatmul.mubr.msk.bf16.vlgmr.msra.gmra.mrb[96].mxu0 %vm1114_vm2, %v3204_v56  ;;  %v3689_v40 = vsel %vm1114_vm2, %v3684_v15, 0 }
 0x3bf   :  { %14825 = vmatpush3.bf16.xpose.msra.mxu0 %v3318_v22  ;;  %14796 = vmatprep.mubr.msk.bf16.mxu1 %vm16146_vm1, %v22023_v36 }
 0x3c0   :  { %14806 = vmatprep.subr.bf16.mxu1 %v22023_v36  ;;  %14826 = vmatprep.mubr.msk.bf16.mxu0 %vm16146_vm1, %v22023_v36 }
 0x3c1   :  { %v3310_v58 = vpop.permute.xlu1 %3309  ;;  %14836 = vmatprep.subr.bf16.mxu0 %v22023_v36 }
 0x3c5   :  { %14797 = vmatmul.mubr.msk.bf16.vlgmr.msra.gmra.mrb[112].mxu1 %vm1114_vm2, %v3045_v34  ;;  %v3419_v38 = vpop.permute.xlu1 %3418  ;;  %v3265_v34 = vsel %vm1114_vm2, %v3260_v33, 0 }
 0x3c6   :  { %14807 = vmatpush3.bf16.xpose.msra.mxu1 %v3159_v54  ;;  %v3424_v3 = vsel %vm1114_vm2, %v3419_v38, 0  ;;  %14827 = vmatmul.mubr.msk.bf16.vlgmr.msra.gmra.mrb[100].mxu0 %vm1114_vm2, %v3310_v58 }
 0x3c7   :  { %14837 = vmatpush3.bf16.xpose.msra.mxu0 %v3424_v3  ;;  %14808 = vmatprep.mubr.msk.bf16.mxu1 %vm16146_vm1, %v22023_v36 }
 0x3c8   :  { %14818 = vmatprep.subr.bf16.mxu1 %v22023_v36  ;;  %14838 = vmatprep.mubr.msk.bf16.mxu0 %vm16146_vm1, %v22023_v36 }
 0x3c9   :  { %v3416_v51 = vpop.permute.xlu1 %3415  ;;  %14848 = vmatprep.subr.bf16.mxu0 %v22023_v36 }
 0x3cd   :  { %14809 = vmatmul.mubr.msk.bf16.vlgmr.msra.gmra.mrb[116].mxu1 %vm1114_vm2, %v3151_v44  ;;  %v3525_v52 = vpop.permute.xlu1 %3524  ;;  %v3371_v44 = vsel %vm1114_vm2, %v3366_v12, 0  ;;  %v3790_v12 = vpop.permute.xlu0 %3789 }
 0x3ce   :  { %14819 = vmatpush3.bf16.xpose.msra.mxu1 %v3265_v34  ;;  %v3530_v31 = vsel %vm1114_vm2, %v3525_v52, 0  ;;  %14839 = vmatmul.mubr.msk.bf16.vlgmr.msra.gmra.mrb[104].mxu0 %vm1114_vm2, %v3416_v51  ;;  %v3795_v22 = vsel %vm1114_vm2, %v3790_v12, 0 }
 0x3cf   :  { %14849 = vmatpush3.bf16.xpose.msra.mxu0 %v3530_v31  ;;  %14820 = vmatprep.mubr.msk.bf16.mxu1 %vm16146_vm1, %v22023_v36 }
 0x3d0   :  { %14830 = vmatprep.subr.bf16.mxu1 %v22023_v36  ;;  %14850 = vmatprep.mubr.msk.bf16.mxu0 %vm16146_vm1, %v22023_v36 }
 0x3d1   :  { %v3522_v18 = vpop.permute.xlu1 %3521  ;;  %14860 = vmatprep.subr.bf16.mxu0 %v22023_v36 }
 0x3d5   :  { %14821 = vmatmul.mubr.msk.bf16.vlgmr.msra.gmra.mrb[120].mxu1 %vm1114_vm2, %v3257_v63  ;;  %v3631_v33 = vpop.permute.xlu1 %3630  ;;  %v3477_v63 = vsel %vm1114_vm2, %v3472_v14, 0  ;;  %v4208_v14 = vpop.permute.xlu0 %4207 }
 0x3d6   :  { %14831 = vmatpush3.bf16.xpose.msra.mxu1 %v3371_v44  ;;  %v3636_v47 = vsel %vm1114_vm2, %v3631_v33, 0  ;;  %14851 = vmatmul.mubr.msk.bf16.vlgmr.msra.gmra.mrb[108].mxu0 %vm1114_vm2, %v3522_v18  ;;  %v4213_v13 = vsel %vm2240_vm3, %v4208_v14, 0 }
 0x3d7   :  { %14861 = vmatpush3.bf16.xpose.msra.mxu0 %v3636_v47  ;;  %14832 = vmatprep.mubr.msk.bf16.mxu1 %vm16146_vm1, %v22023_v36 }
 0x3d8   :  { %14842 = vmatprep.subr.bf16.mxu1 %v22023_v36  ;;  %14862 = vmatprep.mubr.msk.bf16.mxu0 %vm16146_vm1, %v22023_v36 }
 0x3d9   :  { %v3628_v43 = vpop.permute.xlu1 %3627  ;;  %14872 = vmatprep.subr.bf16.mxu0 %v22023_v36 }
 0x3dd   :  { %14833 = vmatmul.mubr.msk.bf16.vlgmr.msra.gmra.mrb[124].mxu1 %vm1114_vm2, %v17341_v5  ;;  %v3737_v61 = vpop.permute.xlu1 %3736  ;;  %v3583_v5 = vsel %vm1114_vm2, %v3578_v17, 0 }
 0x3de   :  { %14843 = vmatpush3.bf16.xpose.msra.mxu1 %v3477_v63  ;;  %v3742_v41 = vsel %vm1114_vm2, %v3737_v61, 0  ;;  %14863 = vmatmul.mubr.msk.bf16.vlgmr.msra.gmra.mrb[112].mxu0 %vm1114_vm2, %v3628_v43 }
 0x3df   :  { %14873 = vmatpush3.bf16.xpose.msra.mxu0 %v3742_v41  ;;  %14844 = vmatprep.mubr.msk.bf16.mxu1 %vm16146_vm1, %v22023_v36 }
 0x3e0   :  { %14854 = vmatprep.subr.bf16.mxu1 %v22023_v36  ;;  %14874 = vmatprep.mubr.msk.bf16.mxu0 %vm16146_vm1, %v22023_v36 }
 0x3e1   :  { %14884 = vmatprep.subr.bf16.mxu0 %v22023_v36  ;;  %v3734_v56 = vpop.permute.xlu1 %3733 }
 0x3e5   :  { %14845 = vmatmul.mubr.msk.bf16.vlgmr.msra.gmra.mrb[128].mxu1 %vm1114_vm2, %v3469_v55  ;;  %v3787_v62 = vpop.permute.xlu1 %3786 }
 0x3e6   :  { %14855 = vmatpush3.bf16.xpose.msra.mxu1 %v3583_v5  ;;  %14875 = vmatmul.mubr.msk.bf16.vlgmr.msra.gmra.mrb[116].mxu0 %vm1114_vm2, %v3734_v56 }
 0x3e7   :  { %14885 = vmatpush3.bf16.msra.mxu0 %v4213_v13  ;;  %14856 = vmatprep.mubr.msk.bf16.mxu1 %vm16146_vm1, %v22023_v36 }
 0x3e8   :  { %14866 = vmatprep.subr.bf16.mxu1 %v22023_v36  ;;  %14886 = vmatprep.mubr.msk.bf16.mxu0 %vm16146_vm1, %v22023_v36 }
 0x3e9   :  { %14896 = vmatprep.subr.bf16.mxu0 %v22023_v36  ;;  %v4258_v55 = vpop.permute.xlu1 %4257 }
 0x3ea   :  { %v4263_v58 = vsel %vm2240_vm3, %v4258_v55, 0 }
 0x3ed   :  { %14857 = vmatmul.mubr.msk.bf16.vlgmr.msra.gmra.mrb[132].mxu1 %vm1114_vm2, %v3575_v24 }
 0x3ee   :  { %14867 = vmatpush3.bf16.xpose.msra.mxu1 %v3689_v40  ;;  %14868 = vmatprep.mubr.msk.bf16.mxu1 %vm16146_vm1, %v22023_v36 }
 0x3ef   :  { %14878 = vmatprep.subr.bf16.mxu1 %v22023_v36 }
 0x3f5   :  { %14869 = vmatmul.mubr.msk.bf16.vlgmr.msra.gmra.mrb[136].mxu1 %vm1114_vm2, %v3681_v57 }
 0x3f6   :  { %14879 = vmatpush3.bf16.xpose.msra.mxu1 %v3795_v22  ;;  %14880 = vmatprep.mubr.msk.bf16.mxu1 %vm16146_vm1, %v22023_v36 }
 0x3f7   :  { %14890 = vmatprep.subr.bf16.mxu1 %v22023_v36 }
 0x3fd   :  { %14881 = vmatmul.mubr.msk.bf16.vlgmr.msra.gmra.mrb[140].mxu1 %vm1114_vm2, %v3787_v62 }
 0x3fe   :  { %14891 = vmatpush3.bf16.msra.mxu1 %v4263_v58  ;;  %14892 = vmatprep.mubr.msk.bf16.mxu1 %vm16146_vm1, %v22023_v36 }
 0x3ff   :  { %14902 = vmatprep.subr.bf16.mxu1 %v22023_v36 }
 0x405   :  { %v17425_v54 = vpop.f32.mrb[56].mxu0 }
 0x406   :  { %22054 = vst [vmem:[#allocation30_spill] sm:$0xff] %v17425_v54  ;;  %v14696_v17 = vpop.f32.mrb[57].mxu0 }
 0x407   :  { %v17427_v38 = vpop.f32.mrb[58].mxu0 }
 0x408   :  { %22055 = vst [vmem:[#allocation23_spill] sm:$0xff] %v17427_v38  ;;  %v14697_v3 = vpop.f32.mrb[59].mxu0 }
 0x40d   :  { %v17429_v51 = vpop.f32.mrb[80].mxu1 }
 0x40e   :  { %22056 = vst [vmem:[#allocation57_spill] sm:$0xff] %v17429_v51  ;;  %v14702_v24 = vpop.f32.mrb[81].mxu1 }
 0x40f   :  { %v17431_v34 = vpop.f32.mrb[82].mxu1 }
 0x410   :  { %22057 = vst [vmem:[#allocation18_spill] sm:$0xff] %v17431_v34  ;;  %v14703_v52 = vpop.f32.mrb[83].mxu1 }
 0x413   :  { %v17433_v31 = vpop.f32.mrb[60].mxu0 }
 0x414   :  { %22058 = vst [vmem:[#allocation58_spill] sm:$0xff] %v17433_v31  ;;  %v14708_v15 = vpop.f32.mrb[61].mxu0 }
 0x415   :  { %v17435_v18 = vpop.f32.mrb[62].mxu0 }
 0x416   :  { %22059 = vst [vmem:[#allocation59_spill] sm:$0xff] %v17435_v18  ;;  %v14709_v44 = vpop.f32.mrb[63].mxu0 }
 0x429   :  { %v17437_v33 = vpop.f32.mrb[84].mxu1 }
 0x42a   :  { %22060 = vst [vmem:[#allocation60_spill] sm:$0xff] %v17437_v33  ;;  %v14714_v47 = vpop.f32.mrb[85].mxu1 }
 0x42b   :  { %v17439_v57 = vpop.f32.mrb[86].mxu1 }
 0x42c   :  { %22061 = vst [vmem:[#allocation61_spill] sm:$0xff] %v17439_v57  ;;  %v14715_v43 = vpop.f32.mrb[87].mxu1 }
 0x42d   :  { %v17441_v63 = vpop.f32.mrb[64].mxu0 }
 0x42e   :  { %22062 = vst [vmem:[#allocation62_spill] sm:$0xff] %v17441_v63  ;;  %v14720_v12 = vpop.f32.mrb[65].mxu0 }
 0x42f   :  { %v17443_v61 = vpop.f32.mrb[66].mxu0 }
 0x430   :  { %22063 = vst [vmem:[#allocation63_spill] sm:$0xff] %v17443_v61  ;;  %v14721_v41 = vpop.f32.mrb[67].mxu0 }
 0x435   :  { %v17445_v14 = vpop.f32.mrb[88].mxu1  ;;  %v17447_v5 = vpop.f32.mrb[68].mxu0 }
 0x436   :  { %22064 = vst [vmem:[#allocation64_spill] sm:$0xff] %v17445_v14  ;;  %22065 = vst [vmem:[#allocation65_spill] sm:$0xff] %v17447_v5  ;;  %v14726_v56 = vpop.f32.mrb[89].mxu1  ;;  %v14732_v13 = vpop.f32.mrb[69].mxu0 }
 0x437   :  { %v17449_v40 = vpop.f32.mrb[90].mxu1  ;;  %v17451_v62 = vpop.f32.mrb[70].mxu0 }
 0x438   :  { %22066 = vst [vmem:[#allocation66_spill] sm:$0xff] %v17449_v40  ;;  %22067 = vst [vmem:[#allocation67_spill] sm:$0xff] %v17451_v62  ;;  %v14727_v22 = vpop.f32.mrb[91].mxu1  ;;  %v14733_v55 = vpop.f32.mrb[71].mxu0 }
 0x43d   :  { %v17453_v58 = vpop.f32.mrb[92].mxu1  ;;  %v17455_v17 = vpop.f32.mrb[72].mxu0 }
 0x43e   :  { %22068 = vst [vmem:[#allocation68_spill] sm:$0xff] %v17453_v58  ;;  %22069 = vst [vmem:[#allocation69_spill] sm:$0xff] %v17455_v17  ;;  %v14738_v3 = vpop.f32.mrb[93].mxu1  ;;  %v14744_v24 = vpop.f32.mrb[73].mxu0 }
 0x43f   :  { %v17457_v52 = vpop.f32.mrb[94].mxu1  ;;  %v17459_v15 = vpop.f32.mrb[74].mxu0 }
 0x440   :  { %22070 = vst [vmem:[#allocation70_spill] sm:$0xff] %v17457_v52  ;;  %22071 = vst [vmem:[#allocation71_spill] sm:$0xff] %v17459_v15  ;;  %v14739_v44 = vpop.f32.mrb[95].mxu1  ;;  %v14745_v47 = vpop.f32.mrb[75].mxu0 }
 0x445   :  { %v17461_v43 = vpop.f32.mrb[76].mxu0 }
 0x446   :  { %22072 = vst [vmem:[#allocation72_spill] sm:$0xff] %v17461_v43  ;;  %v14756_v12 = vpop.f32.mrb[77].mxu0 }
 0x447   :  { %v17463_v41 = vpop.f32.mrb[78].mxu0 }
 0x448   :  { %22073 = vst [vmem:[#allocation73_spill] sm:$0xff] %v17463_v41  ;;  %v14757_v56 = vpop.f32.mrb[79].mxu0 }
 0x44b   :  { %v17465_v13 = vpop.f32.mrb[96].mxu1 }
 0x44c   :  { %22074 = vst [vmem:[#allocation74_spill] sm:$0xff] %v17465_v13  ;;  %v14750_v22 = vpop.f32.mrb[97].mxu1 }
 0x44d   :  { %v17467_v55 = vpop.f32.mrb[98].mxu1  ;;  %v17469_v17 = vpop.f32.mrb[80].mxu0 }
 0x44e   :  { %22075 = vst [vmem:[#allocation75_spill] sm:$0xff] %v17467_v55  ;;  %22076 = vst [vmem:[#allocation76_spill] sm:$0xff] %v17469_v17  ;;  %v14751_v3 = vpop.f32.mrb[99].mxu1  ;;  %v14768_v24 = vpop.f32.mrb[81].mxu0 }
 0x44f   :  { %v17471_v52 = vpop.f32.mrb[82].mxu0 }
 0x450   :  { %22077 = vst [vmem:[#allocation77_spill] sm:$0xff] %v17471_v52  ;;  %v14769_v15 = vpop.f32.mrb[83].mxu0 }
 0x453   :  { %v17473_v44 = vpop.f32.mrb[100].mxu1 }
 0x454   :  { %22078 = vst [vmem:[#allocation78_spill] sm:$0xff] %v17473_v44  ;;  %v14762_v47 = vpop.f32.mrb[101].mxu1 }
 0x455   :  { %v17475_v43 = vpop.f32.mrb[102].mxu1  ;;  %v17477_v12 = vpop.f32.mrb[84].mxu0 }
 0x456   :  { %22079 = vst [vmem:[#allocation79_spill] sm:$0xff] %v17475_v43  ;;  %22080 = vst [vmem:[#allocation80_spill] sm:$0xff] %v17477_v12  ;;  %v14763_v56 = vpop.f32.mrb[103].mxu1  ;;  %v14780_v41 = vpop.f32.mrb[85].mxu0 }
 0x457   :  { %v17479_v13 = vpop.f32.mrb[86].mxu0 }
 0x458   :  { %22081 = vst [vmem:[#allocation81_spill] sm:$0xff] %v17479_v13  ;;  %v14781_v22 = vpop.f32.mrb[87].mxu0 }
 0x45b   :  { %v17481_v55 = vpop.f32.mrb[104].mxu1 }
 0x45c   :  { %22082 = vst [vmem:[#allocation82_spill] sm:$0xff] %v17481_v55  ;;  %v14774_v17 = vpop.f32.mrb[105].mxu1 }
 0x45d   :  { %v17483_v3 = vpop.f32.mrb[106].mxu1 }
 0x45e   :  { %22083 = vst [vmem:[#allocation83_spill] sm:$0xff] %v17483_v3  ;;  %v17485_v24 = vpop.f32.mrb[88].mxu0  ;;  %v14775_v15 = vpop.f32.mrb[107].mxu1 }
 0x45f   :  { %v14792_v52 = vpop.f32.mrb[89].mxu0  ;;  %v3838_v47 = vsel %vm1867_vm4, %v17485_v24, -inf }
 0x460   :  { %3839 = vmax.xlane.f32.xlu0 %v3838_v47  ;;  %v17489_v43 = vpop.f32.mrb[90].mxu0 }
 0x461   :  { %v14793_v56 = vpop.f32.mrb[91].mxu0  ;;  %v3841_v41 = vsel %vm1871_vm5, %v17489_v43, -inf }
 0x462   :  { %3842 = vmax.xlane.f32.xlu1 %v3841_v41 }
 0x485   :  { %v17493_v22 = vpop.f32.mrb[92].mxu0 }
 0x486   :  { %v14804_v17 = vpop.f32.mrb[93].mxu0 }
 0x487   :  { %v17495_v13 = vpop.f32.mrb[94].mxu0 }
 0x488   :  { %v14805_v3 = vpop.f32.mrb[95].mxu0  ;;  %v3853_v52 = vsel %vm1871_vm5, %v17495_v13, -inf }
 0x489   :  { %3854 = vmax.xlane.f32.xlu1 %v3853_v52 }
 0x490   :  { %v17499_v15 = vpop.f32.mrb[108].mxu1 }
 0x491   :  { %22084 = vst [vmem:[#allocation84_spill] sm:$0xff] %v17499_v15  ;;  %v14786_v47 = vpop.f32.mrb[109].mxu1  ;;  %v17501_v12 = vpop.f32.mrb[96].mxu0 }
 0x492   :  { %v17503_v56 = vpop.f32.mrb[110].mxu1  ;;  %v14816_v55 = vpop.f32.mrb[97].mxu0 }
 0x493   :  { %22085 = vst [vmem:[#allocation85_spill] sm:$0xff] %v17503_v56  ;;  %v14787_v44 = vpop.f32.mrb[111].mxu1  ;;  %v17505_v41 = vpop.f32.mrb[98].mxu0 }
 0x494   :  { %v14817_v62 = vpop.f32.mrb[99].mxu0  ;;  %v3850_v44 = vsel %vm1867_vm4, %v17493_v22, -inf }
 0x498   :  { %v17507_v17 = vpop.f32.mrb[112].mxu1 }
 0x499   :  { %v14798_v58 = vpop.f32.mrb[113].mxu1  ;;  %v17509_v3 = vpop.f32.mrb[100].mxu0  ;;  %v3844_v52 = vsel %vm1867_vm4, %v17507_v17, -inf }
 0x49a   :  { %v14828_v5 = vpop.f32.mrb[101].mxu0  ;;  %3845 = vmax.xlane.f32.xlu0 %v3844_v52  ;;  %v17513_v47 = vpop.f32.mrb[114].mxu1 }
 0x49b   :  { %v14799_v15 = vpop.f32.mrb[115].mxu1  ;;  %v17515_v40 = vpop.f32.mrb[102].mxu0  ;;  %v3847_v61 = vsel %vm1871_vm5, %v17513_v47, -inf }
 0x49c   :  { %v14829_v55 = vpop.f32.mrb[103].mxu0 }
 0x49e   :  { %3851 = vmax.xlane.f32.xlu0 %v3850_v44 }
 0x4a0   :  { %v17519_v62 = vpop.f32.mrb[116].mxu1 }
 0x4a1   :  { %v14810_v58 = vpop.f32.mrb[117].mxu1  ;;  %v17521_v56 = vpop.f32.mrb[104].mxu0  ;;  %v3856_v44 = vsel %vm1867_vm4, %v17519_v62, -inf }
 0x4a2   :  { %v14840_v5 = vpop.f32.mrb[105].mxu0  ;;  %3848 = vmax.xlane.f32.xlu0 %v3847_v61  ;;  %v17525_v52 = vpop.f32.mrb[118].mxu1  ;;  %v3865_v58 = vsel %vm1871_vm5, %v17505_v41, -inf }
 0x4a3   :  { %v14811_v15 = vpop.f32.mrb[119].mxu1  ;;  %v17527_v14 = vpop.f32.mrb[106].mxu0  ;;  %v3859_v55 = vsel %vm1871_vm5, %v17525_v52, -inf }
 0x4a4   :  { %v14841_v57 = vpop.f32.mrb[107].mxu0  ;;  %3860 = vmax.xlane.f32.xlu1 %v3859_v55  ;;  %v3862_v15 = vsel %vm1867_vm4, %v17501_v12, -inf }
 0x4a6   :  { %3857 = vmax.xlane.f32.xlu0 %v3856_v44 }
 0x4a8   :  { %3866 = vmax.xlane.f32.xlu1 %v3865_v58  ;;  %v17535_v5 = vpop.f32.mrb[120].mxu1 }
 0x4a9   :  { %v14822_v61 = vpop.f32.mrb[121].mxu1  ;;  %v17537_v63 = vpop.f32.mrb[108].mxu0  ;;  %v3868_v58 = vsel %vm1867_vm4, %v17535_v5, -inf }
 0x4aa   :  { %v14852_v33 = vpop.f32.mrb[109].mxu0  ;;  %3863 = vmax.xlane.f32.xlu0 %v3862_v15  ;;  %v17541_v57 = vpop.f32.mrb[122].mxu1  ;;  %v3877_v61 = vsel %vm1871_vm5, %v17515_v40, -inf  ;;  %v3898_v26 = vsel %vm1867_vm4, %v17537_v63, -inf }
 0x4ab   :  { %v14823_v55 = vpop.f32.mrb[123].mxu1  ;;  %v17543_v18 = vpop.f32.mrb[110].mxu0  ;;  %v3871_v44 = vsel %vm1871_vm5, %v17541_v57, -inf }
 0x4ac   :  { %v14853_v34 = vpop.f32.mrb[111].mxu0  ;;  %3872 = vmax.xlane.f32.xlu1 %v3871_v44  ;;  %v3874_v55 = vsel %vm1867_vm4, %v17509_v3, -inf }
 0x4ae   :  { %3869 = vmax.xlane.f32.xlu0 %v3868_v58 }
 0x4b0   :  { %3878 = vmax.xlane.f32.xlu1 %v3877_v61  ;;  %v17551_v33 = vpop.f32.mrb[124].mxu1 }
 0x4b1   :  { %v14834_v15 = vpop.f32.mrb[125].mxu1  ;;  %v17553_v31 = vpop.f32.mrb[112].mxu0  ;;  %v3880_v61 = vsel %vm1867_vm4, %v17551_v33, -inf }
 0x4b2   :  { %v14864_v51 = vpop.f32.mrb[113].mxu0  ;;  %3875 = vmax.xlane.f32.xlu0 %v3874_v55  ;;  %v17557_v34 = vpop.f32.mrb[126].mxu1  ;;  %v3889_v15 = vsel %vm1871_vm5, %v17527_v14, -inf }
 0x4b3   :  { %v14835_v44 = vpop.f32.mrb[127].mxu1  ;;  %v17559_v38 = vpop.f32.mrb[114].mxu0  ;;  %v3883_v58 = vsel %vm1871_vm5, %v17557_v34, -inf }
 0x4b4   :  { %v14865_v54 = vpop.f32.mrb[115].mxu0  ;;  %3884 = vmax.xlane.f32.xlu1 %v3883_v58  ;;  %v3886_v44 = vsel %vm1867_vm4, %v17521_v56, -inf }
 0x4b6   :  { %3881 = vmax.xlane.f32.xlu0 %v3880_v61 }
 0x4b8   :  { %3890 = vmax.xlane.f32.xlu1 %v3889_v15  ;;  %v17567_v51 = vpop.f32.mrb[128].mxu1 }
 0x4b9   :  { %v14846_v55 = vpop.f32.mrb[129].mxu1  ;;  %v17569_v59 = vpop.f32.mrb[116].mxu0  ;;  %v3892_v15 = vsel %vm1867_vm4, %v17567_v51, -inf }
 0x4ba   :  { %v14876_v45 = vpop.f32.mrb[117].mxu0  ;;  %3887 = vmax.xlane.f32.xlu0 %v3886_v44  ;;  %v17573_v54 = vpop.f32.mrb[130].mxu1  ;;  %v3901_v55 = vsel %vm1871_vm5, %v17543_v18, -inf }
 0x4bb   :  { %v14847_v58 = vpop.f32.mrb[131].mxu1  ;;  %v17575_v6 = vpop.f32.mrb[118].mxu0  ;;  %v3895_v61 = vsel %vm1871_vm5, %v17573_v54, -inf }
 0x4bc   :  { %v14877_v49 = vpop.f32.mrb[119].mxu0  ;;  %3896 = vmax.xlane.f32.xlu1 %v3895_v61  ;;  %v17585_v44 = vpop.permute.xlu1 %4407 }
 0x4bd   :  { %22086 = vst [vmem:[#allocation86_spill] sm:$0xff] %v17585_v44 }
 0x4be   :  { %3893 = vmax.xlane.f32.xlu0 %v3892_v15 }
 0x4c0   :  { %3902 = vmax.xlane.f32.xlu1 %v3901_v55  ;;  %v17583_v45 = vpop.f32.mrb[132].mxu1  ;;  %v17595_v55 = vpop.permute.xlu1 %4457 }
 0x4c1   :  { %v14858_v58 = vpop.f32.mrb[133].mxu1  ;;  %v3904_v15 = vsel %vm1867_vm4, %v17583_v45, -inf  ;;  %22087 = vst [vmem:[#allocation87_spill] sm:$0xff] %v17595_v55 }
 0x4c2   :  { %3899 = vmax.xlane.f32.xlu0 %v3898_v26  ;;  %v17589_v1 = vpop.f32.mrb[134].mxu1  ;;  %v3913_v58 = vsel %vm1871_vm5, %v17559_v38, -inf }
 0x4c3   :  { %v14859_v49 = vpop.f32.mrb[135].mxu1  ;;  %v3907_v61 = vsel %vm1871_vm5, %v17589_v1, -inf }
 0x4c4   :  { %3908 = vmax.xlane.f32.xlu1 %v3907_v61  ;;  %v3910_v49 = vsel %vm1867_vm4, %v17553_v31, -inf  ;;  %v17605_v61 = vpop.permute.xlu0 %4307  ;;  %v17609_v32 = vpop.permute.xlu1 %4557 }
 0x4c5   :  { %22088 = vst [vmem:[#allocation88_spill] sm:$0xff] %v17609_v32 }
 0x4c6   :  { %3905 = vmax.xlane.f32.xlu0 %v3904_v15 }
 0x4c8   :  { %3914 = vmax.xlane.f32.xlu1 %v3913_v58  ;;  %v17599_v53 = vpop.f32.mrb[136].mxu1  ;;  %v17617_v25 = vpop.permute.xlu0 %4357 }
 0x4c9   :  { %v14870_v26 = vpop.f32.mrb[137].mxu1  ;;  %v3916_v58 = vsel %vm1867_vm4, %v17599_v53, -inf  ;;  %22089 = vst [vmem:[#allocation89_spill] sm:$0xff] %v17617_v25  ;;  %v17623_v10 = vpop.permute.xlu1 %4657 }
 0x4ca   :  { %3911 = vmax.xlane.f32.xlu0 %v3910_v49  ;;  %v17603_v21 = vpop.f32.mrb[138].mxu1  ;;  %v3925_v26 = vsel %vm1871_vm5, %v17575_v6, -inf  ;;  %22090 = vst [vmem:[#allocation90_spill] sm:$0xff] %v17623_v10 }
 0x4cb   :  { %v14871_v8 = vpop.f32.mrb[139].mxu1  ;;  %v3919_v15 = vsel %vm1871_vm5, %v17603_v21, -inf }
 0x4cc   :  { %3920 = vmax.xlane.f32.xlu1 %v3919_v15  ;;  %v3922_v8 = vsel %vm1867_vm4, %v17569_v59, -inf  ;;  %v17629_v28 = vpop.permute.xlu0 %4507 }
 0x4cd   :  { %22091 = vst [vmem:[#allocation91_spill] sm:$0xff] %v17629_v28 }
 0x4ce   :  { %3917 = vmax.xlane.f32.xlu0 %v3916_v58 }
 0x4d0   :  { %3926 = vmax.xlane.f32.xlu1 %v3925_v26  ;;  %v17615_v49 = vpop.f32.mrb[140].mxu1  ;;  %v17633_v32 = vpop.permute.xlu0 %4607 }
 0x4d1   :  { %v14882_v46 = vpop.f32.mrb[141].mxu1  ;;  %v3928_v26 = vsel %vm1867_vm4, %v17615_v49, -inf  ;;  %22093 = vst [vmem:[#allocation93_spill] sm:$0xff] %v17633_v32 }
 0x4d2   :  { %3923 = vmax.xlane.f32.xlu0 %v3922_v8  ;;  %v17621_v15 = vpop.f32.mrb[142].mxu1  ;;  %v17631_v46 = vpop.permute.xlu1 %4807 }
 0x4d3   :  { %v14883_v37 = vpop.f32.mrb[143].mxu1  ;;  %v3931_v58 = vsel %vm1871_vm5, %v17621_v15, -inf  ;;  %22092 = vst [vmem:[#allocation92_spill] sm:$0xff] %v17631_v46 }
 0x4d4   :  { %3932 = vmax.xlane.f32.xlu1 %v3931_v58  ;;  %v17637_v48 = vpop.permute.xlu0 %4707 }
 0x4d5   :  { %22095 = vst [vmem:[#allocation95_spill] sm:$0xff] %v17637_v48 }
 0x4d6   :  { %3929 = vmax.xlane.f32.xlu0 %v3928_v26  ;;  %v17635_v8 = vpop.permute.xlu1 %4757 }
 0x4d7   :  { %22094 = vst [vmem:[#allocation94_spill] sm:$0xff] %v17635_v8 }
 0x4d8   :  { %v17641_v37 = vpop.permute.xlu0 %4857 }
 0x4d9   :  { %22097 = vst [vmem:[#allocation97_spill] sm:$0xff] %v17641_v37 }
 0x4da   :  { %v17639_v10 = vpop.permute.xlu1 %4907 }
 0x4db   :  { %22096 = vst [vmem:[#allocation96_spill] sm:$0xff] %v17639_v10 }
 0x4de   :  { %v17643_v29 = vpop.permute.xlu1 %4957 }
 0x4df   :  { %22098 = vst [vmem:[#allocation98_spill] sm:$0xff] %v17643_v29 }
 0x4ed   :  { %v3840_v58 = vpop.xlane.xlu0 %3839 }
 0x4ee   :  { %v3934_v55 = vsub.f32 %v17485_v24, %v3840_v58 }
 0x4ef   :  { %v3843_v26 = vpop.xlane.xlu1 %3842 }
 0x4f0   :  { %v3966_v9 = vmul.f32 1.442695, %v3934_v55  ;;  %v3935_v28 = vsub.f32 %v17489_v43, %v3843_v26 }
 0x4f2   :  { %15633 = vpow2.f32 %v3966_v9  ;;  %v3968_v46 = vmul.f32 1.442695, %v3935_v28 }
 0x4f4   :  { %15635 = vpow2.f32 %v3968_v46 }
 0x4fc   :  { %v17647_v32 = vpop.eup %15633 }
 0x4fd   :  { %v4030_v8 = vsel %vm1867_vm4, %v17647_v32, 0.0 }
 0x4fe   :  { %v17651_v10 = vpop.eup %15635  ;;  %4031 = vadd.xlane.f32.xlu0 %v4030_v8 }
 0x4ff   :  { %v4033_v29 = vsel %vm1871_vm5, %v17651_v10, 0.0 }
 0x500   :  { %4034 = vadd.xlane.f32.xlu1 %v4033_v29 }
 0x516   :  { %v3855_v43 = vpop.xlane.xlu1 %3854 }
 0x517   :  { %v3939_v46 = vsub.f32 %v17495_v13, %v3855_v43 }
 0x519   :  { %v3976_v44 = vmul.f32 1.442695, %v3939_v46 }
 0x527   :  { %v3846_v24 = vpop.xlane.xlu0 %3845 }
 0x528   :  { %v3936_v55 = vsub.f32 %v17507_v17, %v3846_v24 }
 0x52a   :  { %v3970_v58 = vmul.f32 1.442695, %v3936_v55 }
 0x52b   :  { %v3852_v9 = vpop.xlane.xlu0 %3851 }
 0x52c   :  { %15637 = vpow2.f32 %v3970_v58  ;;  %v3938_v28 = vsub.f32 %v17493_v22, %v3852_v9 }
 0x52e   :  { %v3974_v26 = vmul.f32 1.442695, %v3938_v28 }
 0x52f   :  { %v3849_v37 = vpop.xlane.xlu0 %3848 }
 0x530   :  { %15639 = vpow2.f32 %v3974_v26  ;;  %v3937_v8 = vsub.f32 %v17513_v47, %v3849_v37 }
 0x531   :  { %v3861_v48 = vpop.xlane.xlu1 %3860 }
 0x532   :  { %v3972_v25 = vmul.f32 1.442695, %v3937_v8  ;;  %v3941_v29 = vsub.f32 %v17525_v52, %v3861_v48 }
 0x533   :  { %v3858_v4 = vpop.xlane.xlu0 %3857 }
 0x534   :  { %15641 = vpow2.f32 %v3972_v25  ;;  %v3940_v17 = vsub.f32 %v17519_v62, %v3858_v4  ;;  %v3980_v22 = vmul.f32 1.442695, %v3941_v29 }
 0x535   :  { %v3867_v24 = vpop.xlane.xlu1 %3866  ;;  %15643 = vpow2.f32 %v3976_v44 }
 0x536   :  { %v17661_v55 = vpop.eup %15637  ;;  %v3978_v13 = vmul.f32 1.442695, %v3940_v17  ;;  %v3943_v58 = vsub.f32 %v17505_v41, %v3867_v24 }
 0x537   :  { %v3864_v43 = vpop.xlane.xlu0 %3863  ;;  %v4036_v47 = vsel %vm1867_vm4, %v17661_v55, 0.0 }
 0x538   :  { %15645 = vpow2.f32 %v3978_v13  ;;  %v3942_v37 = vsub.f32 %v17501_v12, %v3864_v43  ;;  %4037 = vadd.xlane.f32.xlu0 %v4036_v47  ;;  %v3984_v4 = vmul.f32 1.442695, %v3943_v58 }
 0x539   :  { %v3873_v48 = vpop.xlane.xlu1 %3872  ;;  %15647 = vpow2.f32 %v3980_v22 }
 0x53a   :  { %v17667_v25 = vpop.eup %15639  ;;  %v3982_v62 = vmul.f32 1.442695, %v3942_v37  ;;  %v3945_v52 = vsub.f32 %v17541_v57, %v3873_v48 }
 0x53b   :  { %v3870_v44 = vpop.xlane.xlu0 %3869  ;;  %v4042_v41 = vsel %vm1867_vm4, %v17667_v25, 0.0 }
 0x53c   :  { %15649 = vpow2.f32 %v3982_v62  ;;  %v3944_v9 = vsub.f32 %v17535_v5, %v3870_v44  ;;  %4043 = vadd.xlane.f32.xlu0 %v4042_v41  ;;  %v3988_v12 = vmul.f32 1.442695, %v3945_v52 }
 0x53d   :  { %v3879_v28 = vpop.xlane.xlu1 %3878  ;;  %15651 = vpow2.f32 %v3984_v4 }
 0x53e   :  { %v17673_v46 = vpop.eup %15641  ;;  %v3986_v26 = vmul.f32 1.442695, %v3944_v9  ;;  %v3947_v8 = vsub.f32 %v17515_v40, %v3879_v28 }
 0x53f   :  { %v3876_v29 = vpop.xlane.xlu0 %3875  ;;  %v4039_v57 = vsel %vm1871_vm5, %v17673_v46, 0.0  ;;  %v17678_v17 = vpop.eup %15643 }
 0x540   :  { %15653 = vpow2.f32 %v3986_v26  ;;  %v3946_v24 = vsub.f32 %v17509_v3, %v3876_v29  ;;  %4040 = vadd.xlane.f32.xlu1 %v4039_v57  ;;  %v3992_v13 = vmul.f32 1.442695, %v3947_v8  ;;  %v4045_v47 = vsel %vm1871_vm5, %v17678_v17, 0.0 }
 0x541   :  { %v3885_v5 = vpop.xlane.xlu1 %3884  ;;  %15655 = vpow2.f32 %v3988_v12 }
 0x542   :  { %v17681_v22 = vpop.eup %15645  ;;  %v3990_v58 = vmul.f32 1.442695, %v3946_v24  ;;  %v3949_v26 = vsub.f32 %v17557_v34, %v3885_v5 }
 0x543   :  { %v3882_v43 = vpop.xlane.xlu0 %3881  ;;  %v4048_v40 = vsel %vm1867_vm4, %v17681_v22, 0.0  ;;  %v17687_v37 = vpop.eup %15647 }
 0x544   :  { %15657 = vpow2.f32 %v3990_v58  ;;  %v3948_v48 = vsub.f32 %v17551_v33, %v3882_v43  ;;  %4049 = vadd.xlane.f32.xlu0 %v4048_v40  ;;  %4046 = vadd.xlane.f32.xlu1 %v4045_v47  ;;  %v4051_v41 = vsel %vm1871_vm5, %v17687_v37, 0.0  ;;  %v3996_v34 = vmul.f32 1.442695, %v3949_v26 }
 0x545   :  { %v3891_v3 = vpop.xlane.xlu1 %3890  ;;  %15659 = vpow2.f32 %v3992_v13 }
 0x546   :  { %v17690_v4 = vpop.eup %15649  ;;  %v3994_v62 = vmul.f32 1.442695, %v3948_v48  ;;  %v3951_v58 = vsub.f32 %v17527_v14, %v3891_v3 }
 0x547   :  { %v3888_v52 = vpop.xlane.xlu0 %3887  ;;  %v4054_v44 = vsel %vm1867_vm4, %v17690_v4, 0.0  ;;  %v17696_v9 = vpop.eup %15651 }
 0x548   :  { %v3950_v28 = vsub.f32 %v17521_v56, %v3888_v52  ;;  %4055 = vadd.xlane.f32.xlu0 %v4054_v44  ;;  %4052 = vadd.xlane.f32.xlu1 %v4051_v41  ;;  %15661 = vpow2.f32 %v3994_v62  ;;  %v4057_v24 = vsel %vm1871_vm5, %v17696_v9, 0.0  ;;  %v4000_v3 = vmul.f32 1.442695, %v3951_v58 }
 0x549   :  { %v3897_v33 = vpop.xlane.xlu1 %3896 }
 0x54a   :  { %v17699_v12 = vpop.eup %15653  ;;  %v3998_v8 = vmul.f32 1.442695, %v3950_v28  ;;  %v3953_v41 = vsub.f32 %v17573_v54, %v3897_v33 }
 0x54b   :  { %v3894_v29 = vpop.xlane.xlu0 %3893  ;;  %v4060_v57 = vsel %vm1867_vm4, %v17699_v12, 0.0  ;;  %v17706_v13 = vpop.eup %15655 }
 0x54c   :  { %v3952_v56 = vsub.f32 %v17567_v51, %v3894_v29  ;;  %4061 = vadd.xlane.f32.xlu0 %v4060_v57  ;;  %4058 = vadd.xlane.f32.xlu1 %v4057_v24  ;;  %15663 = vpow2.f32 %v3998_v8  ;;  %v4063_v52 = vsel %vm1871_vm5, %v17706_v13, 0.0  ;;  %v4004_v24 = vmul.f32 1.442695, %v3953_v41 }
 0x54d   :  { %v3903_v43 = vpop.xlane.xlu1 %3902 }
 0x54e   :  { %v17710_v40 = vpop.eup %15657  ;;  %v4002_v5 = vmul.f32 1.442695, %v3952_v56  ;;  %v3955_v47 = vsub.f32 %v17543_v18, %v3903_v43 }
 0x54f   :  { %v3900_v48 = vpop.xlane.xlu0 %3899  ;;  %v4066_v62 = vsel %vm1867_vm4, %v17710_v40, 0.0  ;;  %v17717_v51 = vpop.eup %15659 }
 0x550   :  { %15665 = vpow2.f32 %v4002_v5  ;;  %v3954_v14 = vsub.f32 %v17537_v63, %v3900_v48  ;;  %4067 = vadd.xlane.f32.xlu0 %v4066_v62  ;;  %4064 = vadd.xlane.f32.xlu1 %v4063_v52  ;;  %v4008_v18 = vmul.f32 1.442695, %v3955_v47  ;;  %v4069_v8 = vsel %vm1871_vm5, %v17717_v51, 0.0 }
 0x551   :  { %v3909_v44 = vpop.xlane.xlu1 %3908  ;;  %15667 = vpow2.f32 %v3996_v34 }
 0x552   :  { %v4006_v28 = vmul.f32 1.442695, %v3954_v14  ;;  %v17723_v29 = vpop.eup %15661  ;;  %v3957_v63 = vsub.f32 %v17589_v1, %v3909_v44 }
 0x553   :  { %v3906_v26 = vpop.xlane.xlu0 %3905  ;;  %v4072_v54 = vsel %vm1867_vm4, %v17723_v29, 0.0 }
 0x554   :  { %15669 = vpow2.f32 %v4006_v28  ;;  %4070 = vadd.xlane.f32.xlu1 %v4069_v8  ;;  %v3956_v56 = vsub.f32 %v17583_v45, %v3906_v26  ;;  %v4012_v34 = vmul.f32 1.442695, %v3957_v63 }
 0x555   :  { %15671 = vpow2.f32 %v4000_v3  ;;  %v3915_v57 = vpop.xlane.xlu1 %3914 }
 0x556   :  { %15673 = vpow2.f32 %v4008_v18  ;;  %v17729_v33 = vpop.eup %15663  ;;  %v3959_v5 = vsub.f32 %v17559_v38, %v3915_v57  ;;  %v4010_v1 = vmul.f32 1.442695, %v3956_v56 }
 0x557   :  { %v3912_v58 = vpop.xlane.xlu0 %3911  ;;  %15675 = vpow2.f32 %v4004_v24  ;;  %v4078_v14 = vsel %vm1867_vm4, %v17729_v33, 0.0 }
 0x558   :  { %v3958_v43 = vsub.f32 %v17553_v31, %v3912_v58  ;;  %4073 = vadd.xlane.f32.xlu1 %v4072_v54  ;;  %v4016_v38 = vmul.f32 1.442695, %v3959_v5 }
 0x559   :  { %v3921_v47 = vpop.xlane.xlu1 %3920 }
 0x55a   :  { %v17733_v48 = vpop.eup %15665  ;;  %v4014_v62 = vmul.f32 1.442695, %v3958_v43  ;;  %v3961_v44 = vsub.f32 %v17603_v21, %v3921_v47 }
 0x55b   :  { %v3918_v52 = vpop.xlane.xlu0 %3917  ;;  %v4084_v45 = vsel %vm1867_vm4, %v17733_v48, 0.0  ;;  %v17739_v3 = vpop.eup %15667 }
 0x55c   :  { %15677 = vpow2.f32 %v4014_v62  ;;  %v3960_v31 = vsub.f32 %v17599_v53, %v3918_v52  ;;  %4085 = vadd.xlane.f32.xlu0 %v4084_v45  ;;  %4079 = vadd.xlane.f32.xlu1 %v4078_v14  ;;  %v4075_v53 = vsel %vm1871_vm5, %v17739_v3, 0.0  ;;  %v4020_v21 = vmul.f32 1.442695, %v3961_v44 }
 0x55d   :  { %15679 = vpow2.f32 %v4012_v34  ;;  %v3927_v26 = vpop.xlane.xlu1 %3926 }
 0x55e   :  { %v17743_v41 = vpop.eup %15669  ;;  %15681 = vpow2.f32 %v4010_v1  ;;  %v4018_v18 = vmul.f32 1.442695, %v3960_v31  ;;  %v3963_v56 = vsub.f32 %v17575_v6, %v3927_v26 }
 0x55f   :  { %v17745_v28 = vpop.eup %15671  ;;  %v3924_v8 = vpop.xlane.xlu0 %3923  ;;  %v4090_v63 = vsel %vm1867_vm4, %v17743_v41, 0.0  ;;  %15683 = vpow2.f32 %v4016_v38 }
 0x560   :  { %v17751_v57 = vpop.eup %15673  ;;  %v3962_v24 = vsub.f32 %v17569_v59, %v3924_v8  ;;  %4091 = vadd.xlane.f32.xlu0 %v4090_v63  ;;  %4076 = vadd.xlane.f32.xlu1 %v4075_v53  ;;  %15685 = vpow2.f32 %v4018_v18  ;;  %v4081_v43 = vsel %vm1871_vm5, %v17745_v28, 0.0  ;;  %v4024_v5 = vmul.f32 1.442695, %v3963_v56 }
 0x561   :  { %v4093_v54 = vsel %vm1871_vm5, %v17751_v57, 0.0  ;;  %v17759_v34 = vpop.eup %15675  ;;  %15687 = vpow2.f32 %v4020_v21  ;;  %v3933_v56 = vpop.xlane.xlu1 %3932 }
 0x562   :  { %v4022_v58 = vmul.f32 1.442695, %v3962_v24  ;;  %v4087_v1 = vsel %vm1871_vm5, %v17759_v34, 0.0 }
 0x563   :  { %v3930_v21 = vpop.xlane.xlu0 %3929 }
 0x564   :  { %4094 = vadd.xlane.f32.xlu0 %v4093_v54  ;;  %4082 = vadd.xlane.f32.xlu1 %v4081_v43  ;;  %15689 = vpow2.f32 %v4022_v58  ;;  %v3964_v43 = vsub.f32 %v17615_v49, %v3930_v21 }
 0x565   :  { %15691 = vpow2.f32 %v4024_v5 }
 0x566   :  { %v17761_v59 = vpop.eup %15677 }
 0x567   :  { %v17763_v47 = vpop.eup %15679  ;;  %v4102_v6 = vsel %vm1867_vm4, %v17761_v59, 0.0 }
 0x568   :  { %v17769_v62 = vpop.eup %15681  ;;  %4103 = vadd.xlane.f32.xlu0 %v4102_v6  ;;  %4088 = vadd.xlane.f32.xlu1 %v4087_v1  ;;  %v4099_v45 = vsel %vm1871_vm5, %v17763_v47, 0.0  ;;  %v3965_v6 = vsub.f32 %v17621_v15, %v3933_v56  ;;  %v4026_v1 = vmul.f32 1.442695, %v3964_v43 }
 0x569   :  { %v17771_v52 = vpop.eup %15683  ;;  %v4096_v14 = vsel %vm1867_vm4, %v17769_v62, 0.0 }
 0x56a   :  { %v17777_v31 = vpop.eup %15685  ;;  %v4105_v44 = vsel %vm1871_vm5, %v17771_v52, 0.0 }
 0x56b   :  { %v17779_v38 = vpop.eup %15687  ;;  %v4108_v18 = vsel %vm1867_vm4, %v17777_v31, 0.0 }
 0x56c   :  { %4100 = vadd.xlane.f32.xlu0 %v4099_v45  ;;  %4097 = vadd.xlane.f32.xlu1 %v4096_v14  ;;  %v4111_v8 = vsel %vm1871_vm5, %v17779_v38, 0.0 }
 0x56e   :  { %v17785_v26 = vpop.eup %15689 }
 0x56f   :  { %v4114_v63 = vsel %vm1867_vm4, %v17785_v26, 0.0  ;;  %v17791_v53 = vpop.eup %15691 }
 0x570   :  { %4106 = vadd.xlane.f32.xlu0 %v4105_v44  ;;  %4109 = vadd.xlane.f32.xlu1 %v4108_v18  ;;  %v4117_v24 = vsel %vm1871_vm5, %v17791_v53, 0.0  ;;  %v4028_v18 = vmul.f32 1.442695, %v3965_v6  ;;  %v22099_v6 = vld [vmem:[#allocation26_spill] sm:$0xff] }
 0x574   :  { %4112 = vadd.xlane.f32.xlu0 %v4111_v8  ;;  %4115 = vadd.xlane.f32.xlu1 %v4114_v63  ;;  %v4313_v63 = vsel %vm2240_vm3, %v17605_v61, 0 }
 0x578   :  { %4118 = vadd.xlane.f32.xlu0 %v4117_v24 }
 0x585   :  { %5006 = vrot.lane.b32.xlu1 %v16550_v35, %s16148_s1 }
 0x58b   :  { %v4032_v58 = vpop.xlane.xlu0 %4031 }
 0x58c   :  { %15693 = vrcp.f32 %v4032_v58 }
 0x58d   :  { %v4035_v54 = vpop.xlane.xlu1 %4034 }
 0x58e   :  { %15695 = vrcp.f32 %v4035_v54  ;;  %5008 = vrot.lane.b32.xlu0 %v16601_v39, %s16148_s1 }
 0x58f   :  { %15697 = vpow2.f32 %v4026_v1 }
 0x590   :  { %15699 = vpow2.f32 %v4028_v18 }
 0x596   :  { %v15694_v5 = vpop.eup %15693 }
 0x597   :  { %v4127_v14 = vmul.f32 %v15694_v5, %v17647_v32 }
 0x598   :  { %v15696_v45 = vpop.eup %15695 }
 0x599   :  { %v4129_v44 = vmul.f32 %v15696_v45, %v17651_v10  ;;  %v17809_v49 = vpop.eup %15697 }
 0x59a   :  { %v4120_v32 = vsel %vm1867_vm4, %v17809_v49, 0.0  ;;  %v17813_v10 = vpop.eup %15699 }
 0x59b   :  { %v4190_v8 = vpack.c.bf16 %v4129_v44, %v4127_v14  ;;  %v4123_v61 = vsel %vm1871_vm5, %v17813_v10, 0.0 }
 0x59d   :  { %14887 = vmatmul.mubr.msk.bf16.vlgmr.msra.gmra.mrb[120].mxu0 %vm1867_vm4, %v4190_v8  ;;  %v22100_v8 = vld [vmem:[#allocation35_spill] sm:$0xff] }
 0x59e   :  { %14897 = vmatpush3.bf16.msra.mxu0 %v4313_v63  ;;  %14898 = vmatprep.mubr.msk.bf16.mxu0 %vm16146_vm1, %v22023_v36 }
 0x59f   :  { %14908 = vmatprep.subr.bf16.mxu0 %v22023_v36 }
 0x5a9   :  { %4121 = vadd.xlane.f32.xlu1 %v4120_v32  ;;  %v22101_v32 = vld [vmem:[#allocation31_spill] sm:$0xff] }
 0x5ad   :  { %4124 = vadd.xlane.f32.xlu0 %v4123_v61 }
 0x5ba   :  { %5110 = vrot.lane.b32.xlu1 %v16610_v0, %s16148_s1 }
 0x5be   :  { %5108 = vrot.lane.b32.xlu1 %v16564_v2, %s16148_s1 }
 0x5c2   :  { %5212 = vrot.lane.b32.xlu1 %v22024_v19, %s16148_s1 }
 0x5c3   :  { %5059 = vrot.lane.b32.xlu0 %v16604_v50, %s16148_s1 }
 0x5c5   :  { %v4038_v15 = vpop.xlane.xlu0 %4037 }
 0x5c6   :  { %5210 = vrot.lane.b32.xlu1 %v22026_v60, %s16148_s1  ;;  %15701 = vrcp.f32 %v4038_v15 }
 0x5c7   :  { %5057 = vrot.lane.b32.xlu0 %v16556_v42, %s16148_s1 }
 0x5c9   :  { %v4044_v24 = vpop.xlane.xlu0 %4043 }
 0x5ca   :  { %5314 = vrot.lane.b32.xlu1 %v22030_v7, %s16148_s1 }
 0x5cb   :  { %5161 = vrot.lane.b32.xlu0 %v16616_v23, %s16148_s1 }
 0x5cd   :  { %v4041_v21 = vpop.xlane.xlu1 %4040 }
 0x5ce   :  { %15703 = vrcp.f32 %v4041_v21  ;;  %5312 = vrot.lane.b32.xlu1 %v22032_v16, %s16148_s1 }
 0x5cf   :  { %5159 = vrot.lane.b32.xlu0 %v16573_v27, %s16148_s1  ;;  %15705 = vrcp.f32 %v4044_v24  ;;  %v22102_v24 = vld [vmem:[#allocation89_spill] sm:$0xff] }
 0x5d0   :  { %v15702_v5 = vpop.eup %15701  ;;  %v4363_v21 = vsel %vm2240_vm3, %v22102_v24, 0 }
 0x5d1   :  { %v4050_v56 = vpop.xlane.xlu0 %4049  ;;  %v4047_v58 = vpop.xlane.xlu1 %4046  ;;  %v4131_v45 = vmul.f32 %v15702_v5, %v17661_v55  ;;  %v22104_v5 = vld [vmem:[#allocation27_spill] sm:$0xff] }
 0x5d2   :  { %5416 = vrot.lane.b32.xlu1 %v22033_v11, %s16148_s1  ;;  %15707 = vrcp.f32 %v4047_v58 }
 0x5d3   :  { %5263 = vrot.lane.b32.xlu0 %v16629_v30, %s16148_s1  ;;  %15709 = vrcp.f32 %v4050_v56 }
 0x5d5   :  { %v4056_v54 = vpop.xlane.xlu0 %4055  ;;  %v4053_v43 = vpop.xlane.xlu1 %4052 }
 0x5d6   :  { %5414 = vrot.lane.b32.xlu1 %v22035_v20, %s16148_s1  ;;  %15711 = vrcp.f32 %v4053_v43 }
 0x5d7   :  { %5261 = vrot.lane.b32.xlu0 %v22099_v6, %s16148_s1  ;;  %15713 = vrcp.f32 %v4056_v54  ;;  %v22103_v54 = vld [vmem:[#allocation20_spill] sm:$0xff] }
 0x5d8   :  { %v15704_v1 = vpop.eup %15703 }
 0x5d9   :  { %v4133_v14 = vmul.f32 %v15704_v1, %v17673_v46  ;;  %v4062_v44 = vpop.xlane.xlu0 %4061  ;;  %v4059_v18 = vpop.xlane.xlu1 %4058 }
 0x5da   :  { %5518 = vrot.lane.b32.xlu1 %v22100_v8, %s16148_s1  ;;  %v15706_v63 = vpop.eup %15705  ;;  %15715 = vrcp.f32 %v4059_v18 }
 0x5db   :  { %5365 = vrot.lane.b32.xlu0 %v22101_v32, %s16148_s1  ;;  %v4191_v61 = vpack.c.bf16 %v4133_v14, %v4131_v45  ;;  %15717 = vrcp.f32 %v4062_v44  ;;  %v4135_v56 = vmul.f32 %v15706_v63, %v17667_v25  ;;  %v22105_v14 = vld [vmem:[#allocation86_spill] sm:$0xff]  ;;  %v22106_v63 = vld [vmem:[#allocation36_spill] sm:$0xff] }
 0x5dc   :  { %v15708_v15 = vpop.eup %15707 }
 0x5dd   :  { %v4068_v55 = vpop.xlane.xlu0 %4067  ;;  %14893 = vmatmul.mubr.msk.bf16.vlgmr.msra.gmra.mrb[144].mxu1 %vm1867_vm4, %v4191_v61  ;;  %v4065_v46 = vpop.xlane.xlu1 %4064  ;;  %v4137_v58 = vmul.f32 %v15708_v15, %v17678_v17  ;;  %v4413_v17 = vsel %vm2240_vm3, %v22105_v14, 0  ;;  %v22107_v15 = vld [vmem:[#allocation34_spill] sm:$0xff] }
 0x5de   :  { %14903 = vmatpush3.bf16.msra.mxu1 %v4363_v21  ;;  %5516 = vrot.lane.b32.xlu1 %v22103_v54, %s16148_s1  ;;  %v15710_v43 = vpop.eup %15709  ;;  %15719 = vrcp.f32 %v4065_v46 }
 0x5df   :  { %5363 = vrot.lane.b32.xlu0 %v22104_v5, %s16148_s1  ;;  %14904 = vmatprep.mubr.msk.bf16.mxu1 %vm16146_vm1, %v22023_v36  ;;  %15721 = vrcp.f32 %v4068_v55  ;;  %v4192_v1 = vpack.c.bf16 %v4137_v58, %v4135_v56  ;;  %v4139_v44 = vmul.f32 %v15710_v43, %v17681_v22  ;;  %v22109_v58 = vld [vmem:[#allocation21_spill] sm:$0xff] }
 0x5e0   :  { %14914 = vmatprep.subr.bf16.mxu1 %v22023_v36  ;;  %v15712_v45 = vpop.eup %15711 }
 0x5e1   :  { %v4071_v25 = vpop.xlane.xlu1 %4070  ;;  %v4141_v18 = vmul.f32 %v15712_v45, %v17687_v37  ;;  %14899 = vmatmul.mubr.msk.bf16.vlgmr.msra.gmra.mrb[124].mxu0 %vm1867_vm4, %v4192_v1  ;;  %v15714_v61 = vpop.eup %15713  ;;  %v22108_v37 = vld [vmem:[#allocation87_spill] sm:$0xff] }
 0x5e2   :  { %15723 = vrcp.f32 %v4071_v25  ;;  %5620 = vrot.lane.b32.xlu1 %v22106_v63, %s16148_s1  ;;  %14909 = vmatpush3.bf16.msra.mxu0 %v4413_v17  ;;  %v4463_v55 = vsel %vm2240_vm3, %v22108_v37, 0  ;;  %v4143_v46 = vmul.f32 %v15714_v61, %v17690_v4  ;;  %v22110_v1 = vld [vmem:[#allocation19_spill] sm:$0xff] }
 0x5e3   :  { %5467 = vrot.lane.b32.xlu0 %v22107_v15, %s16148_s1  ;;  %v4193_v24 = vpack.c.bf16 %v4141_v18, %v4139_v44  ;;  %14910 = vmatprep.mubr.msk.bf16.mxu0 %vm16146_vm1, %v22023_v36  ;;  %v22111_v17 = vld [vmem:[#allocation91_spill] sm:$0xff] }
 0x5e4   :  { %14920 = vmatprep.subr.bf16.mxu0 %v22023_v36  ;;  %v15716_v22 = vpop.eup %15715  ;;  %v4513_v44 = vsel %vm2240_vm3, %v22111_v17, 0  ;;  %v22116_v17 = vld [vmem:[#allocation22_spill] sm:$0xff] }
 0x5e5   :  { %v4074_v21 = vpop.xlane.xlu1 %4073  ;;  %v4145_v56 = vmul.f32 %v15716_v22, %v17696_v9  ;;  %14905 = vmatmul.mubr.msk.bf16.vlgmr.msra.gmra.mrb[148].mxu1 %vm1867_vm4, %v4193_v24  ;;  %v15718_v43 = vpop.eup %15717  ;;  %v22112_v24 = vld [vmem:[#allocation40_spill] sm:$0xff]  ;;  %v22113_v22 = vld [vmem:[#allocation37_spill] sm:$0xff] }
 0x5e6   :  { %5618 = vrot.lane.b32.xlu1 %v22109_v58, %s16148_s1  ;;  %14915 = vmatpush3.bf16.msra.mxu1 %v4463_v55  ;;  %v4147_v18 = vmul.f32 %v15718_v43, %v17699_v12  ;;  %15725 = vrcp.f32 %v4074_v21  ;;  %v22114_v43 = vld [vmem:[#allocation88_spill] sm:$0xff]  ;;  %v22117_v21 = vld [vmem:[#allocation93_spill] sm:$0xff] }
 0x5e7   :  { %5465 = vrot.lane.b32.xlu0 %v22110_v1, %s16148_s1  ;;  %v4194_v45 = vpack.c.bf16 %v4145_v56, %v4143_v46  ;;  %14916 = vmatprep.mubr.msk.bf16.mxu1 %vm16146_vm1, %v22023_v36 }
 0x5e8   :  { %14926 = vmatprep.subr.bf16.mxu1 %v22023_v36  ;;  %v15720_v25 = vpop.eup %15719 }
 0x5e9   :  { %v4086_v4 = vpop.xlane.xlu0 %4085  ;;  %v4080_v14 = vpop.xlane.xlu1 %4079  ;;  %v4149_v61 = vmul.f32 %v15720_v25, %v17706_v13  ;;  %14911 = vmatmul.mubr.msk.bf16.vlgmr.msra.gmra.mrb[128].mxu0 %vm1867_vm4, %v4194_v45  ;;  %v4563_v45 = vsel %vm2240_vm3, %v22114_v43, 0  ;;  %v22115_v25 = vld [vmem:[#allocation28_spill] sm:$0xff] }
 0x5ea   :  { %v15722_v9 = vpop.eup %15721  ;;  %5722 = vrot.lane.b32.xlu1 %v22112_v24, %s16148_s1  ;;  %14921 = vmatpush3.bf16.msra.mxu0 %v4513_v44  ;;  %v22124_v24 = vld [vmem:[#allocation90_spill] sm:$0xff] }
 0x5eb   :  { %5569 = vrot.lane.b32.xlu0 %v22113_v22, %s16148_s1  ;;  %v4195_v55 = vpack.c.bf16 %v4149_v61, %v4147_v18  ;;  %14922 = vmatprep.mubr.msk.bf16.mxu0 %vm16146_vm1, %v22023_v36  ;;  %v4151_v12 = vmul.f32 %v15722_v9, %v17710_v40  ;;  %v4613_v9 = vsel %vm2240_vm3, %v22117_v21, 0  ;;  %v22118_v18 = vld [vmem:[#allocation25_spill] sm:$0xff]  ;;  %v22119_v61 = vld [vmem:[#allocation38_spill] sm:$0xff]  ;;  %v22123_v21 = vld [vmem:[#allocation39_spill] sm:$0xff] }
 0x5ec   :  { %v15724_v37 = vpop.eup %15723  ;;  %14932 = vmatprep.subr.bf16.mxu0 %v22023_v36 }
 0x5ed   :  { %v4153_v13 = vmul.f32 %v15724_v37, %v17717_v51  ;;  %v4092_v46 = vpop.xlane.xlu0 %4091  ;;  %v4077_v56 = vpop.xlane.xlu1 %4076  ;;  %14917 = vmatmul.mubr.msk.bf16.vlgmr.msra.gmra.mrb[152].mxu1 %vm1867_vm4, %v4195_v55  ;;  %v22120_v55 = vld [vmem:[#allocation42_spill] sm:$0xff] }
 0x5ee   :  { %5720 = vrot.lane.b32.xlu1 %v22115_v25, %s16148_s1  ;;  %14927 = vmatpush3.bf16.msra.mxu1 %v4563_v45  ;;  %15727 = vrcp.f32 %v4077_v56 }
 0x5ef   :  { %5567 = vrot.lane.b32.xlu0 %v22116_v17, %s16148_s1  ;;  %v4196_v44 = vpack.c.bf16 %v4153_v13, %v4151_v12  ;;  %14928 = vmatprep.mubr.msk.bf16.mxu1 %vm16146_vm1, %v22023_v36  ;;  %15729 = vrcp.f32 %v4080_v14  ;;  %v22121_v13 = vld [vmem:[#allocation24_spill] sm:$0xff] }
 0x5f0   :  { %14938 = vmatprep.subr.bf16.mxu1 %v22023_v36  ;;  %v15726_v12 = vpop.eup %15725 }
 0x5f1   :  { %v4095_v40 = vpop.xlane.xlu0 %4094  ;;  %v4083_v51 = vpop.xlane.xlu1 %4082  ;;  %14923 = vmatmul.mubr.msk.bf16.vlgmr.msra.gmra.mrb[132].mxu0 %vm1867_vm4, %v4196_v44  ;;  %v4155_v44 = vmul.f32 %v15726_v12, %v17723_v29 }
 0x5f2   :  { %5771 = vrot.lane.b32.xlu1 %v22118_v18, %s16148_s1  ;;  %14933 = vmatpush3.bf16.msra.mxu0 %v4613_v9  ;;  %15731 = vrcp.f32 %v4083_v51 }
 0x5f3   :  { %5671 = vrot.lane.b32.xlu0 %v22119_v61, %s16148_s1  ;;  %14934 = vmatprep.mubr.msk.bf16.mxu0 %vm16146_vm1, %v22023_v36  ;;  %15733 = vrcp.f32 %v4086_v4  ;;  %v22122_v4 = vld [vmem:[#allocation44_spill] sm:$0xff] }
 0x5f4   :  { %14944 = vmatprep.subr.bf16.mxu0 %v22023_v36  ;;  %15735 = vrcp.f32 %v4095_v40 }
 0x5f5   :  { %v4104_v14 = vpop.xlane.xlu0 %4103  ;;  %v4089_v37 = vpop.xlane.xlu1 %4088 }
 0x5f6   :  { %6239 = vrot.lane.b32.xlu1 %v22120_v55, %s16148_s1  ;;  %15737 = vrcp.f32 %v4089_v37 }
 0x5f7   :  { %5669 = vrot.lane.b32.xlu0 %v22121_v13, %s16148_s1  ;;  %15739 = vrcp.f32 %v4092_v46  ;;  %v4663_v46 = vsel %vm2240_vm3, %v22124_v24, 0  ;;  %v22127_v24 = vld [vmem:[#allocation95_spill] sm:$0xff] }
 0x5f8   :  { %v15728_v56 = vpop.eup %15727 }
 0x5f9   :  { %v4101_v43 = vpop.xlane.xlu0 %4100  ;;  %v4098_v45 = vpop.xlane.xlu1 %4097  ;;  %v4157_v51 = vmul.f32 %v15728_v56, %v17739_v3  ;;  %v22125_v3 = vld [vmem:[#allocation46_spill] sm:$0xff]  ;;  %v22126_v56 = vld [vmem:[#allocation41_spill] sm:$0xff] }
 0x5fa   :  { %15741 = vrcp.f32 %v4101_v43  ;;  %6386 = vrot.lane.b32.xlu1 %v22122_v4, %s16148_s1  ;;  %v15730_v40 = vpop.eup %15729 }
 0x5fb   :  { %15743 = vrcp.f32 %v4098_v45  ;;  %5773 = vrot.lane.b32.xlu0 %v22123_v21, %s16148_s1  ;;  %v4197_v9 = vpack.c.bf16 %v4157_v51, %v4155_v44  ;;  %v4159_v55 = vmul.f32 %v15730_v40, %v17729_v33  ;;  %v4713_v51 = vsel %vm2240_vm3, %v22127_v24, 0  ;;  %v22131_v24 = vld [vmem:[#allocation50_spill] sm:$0xff] }
 0x5fc   :  { %v15732_v37 = vpop.eup %15731 }
 0x5fd   :  { %v4107_v25 = vpop.xlane.xlu0 %4106  ;;  %v4161_v29 = vmul.f32 %v15732_v37, %v17745_v28  ;;  %14929 = vmatmul.mubr.msk.bf16.vlgmr.msra.gmra.mrb[156].mxu1 %vm1867_vm4, %v4197_v9  ;;  %v15734_v12 = vpop.eup %15733  ;;  %v22128_v9 = vld [vmem:[#allocation48_spill] sm:$0xff]  ;;  %v22129_v37 = vld [vmem:[#allocation43_spill] sm:$0xff] }
 0x5fe   :  { %6435 = vrot.lane.b32.xlu1 %v22125_v3, %s16148_s1  ;;  %15745 = vrcp.f32 %v4107_v25  ;;  %14939 = vmatpush3.bf16.msra.mxu1 %v4663_v46  ;;  %v15736_v43 = vpop.eup %15735  ;;  %v4110_v45 = vpop.xlane.xlu1 %4109  ;;  %v4163_v25 = vmul.f32 %v15734_v12, %v17733_v48  ;;  %v22130_v12 = vld [vmem:[#allocation94_spill] sm:$0xff] }
 0x5ff   :  { %6190 = vrot.lane.b32.xlu0 %v22126_v56, %s16148_s1  ;;  %v4198_v44 = vpack.c.bf16 %v4161_v29, %v4159_v55  ;;  %14940 = vmatprep.mubr.msk.bf16.mxu1 %vm16146_vm1, %v22023_v36  ;;  %15747 = vrcp.f32 %v4104_v14  ;;  %v4169_v46 = vmul.f32 %v15736_v43, %v17751_v57  ;;  %v22132_v57 = vld [vmem:[#allocation45_spill] sm:$0xff] }
 0x600   :  { %14950 = vmatprep.subr.bf16.mxu1 %v22023_v36  ;;  %v15738_v33 = vpop.eup %15737 }
 0x601   :  { %v4113_v28 = vpop.xlane.xlu0 %4112  ;;  %v4165_v40 = vmul.f32 %v15738_v33, %v17759_v34  ;;  %14935 = vmatmul.mubr.msk.bf16.vlgmr.msra.gmra.mrb[136].mxu0 %vm1867_vm4, %v4198_v44  ;;  %v15740_v55 = vpop.eup %15739  ;;  %v4763_v44 = vsel %vm2240_vm3, %v22130_v12, 0 }
 0x602   :  { %6533 = vrot.lane.b32.xlu1 %v22128_v9, %s16148_s1  ;;  %15749 = vrcp.f32 %v4113_v28  ;;  %14945 = vmatpush3.bf16.msra.mxu0 %v4713_v51  ;;  %v4167_v33 = vmul.f32 %v15740_v55, %v17743_v41  ;;  %v4116_v28 = vpop.xlane.xlu1 %4115  ;;  %v22134_v55 = vld [vmem:[#allocation52_spill] sm:$0xff] }
 0x603   :  { %6288 = vrot.lane.b32.xlu0 %v22129_v37, %s16148_s1  ;;  %v4199_v29 = vpack.c.bf16 %v4165_v40, %v4163_v25  ;;  %14946 = vmatprep.mubr.msk.bf16.mxu0 %vm16146_vm1, %v22023_v36  ;;  %15751 = vrcp.f32 %v4110_v45  ;;  %v22133_v25 = vld [vmem:[#allocation92_spill] sm:$0xff] }
 0x604   :  { %v15742_v14 = vpop.eup %15741  ;;  %14956 = vmatprep.subr.bf16.mxu0 %v22023_v36  ;;  %v4200_v51 = vpack.c.bf16 %v4169_v46, %v4167_v33  ;;  %v4813_v40 = vsel %vm2240_vm3, %v22133_v25, 0  ;;  %v22140_v25 = vld [vmem:[#allocation56_spill] sm:$0xff] }
 0x605   :  { %v15744_v48 = vpop.eup %15743  ;;  %v4119_v34 = vpop.xlane.xlu0 %4118  ;;  %14941 = vmatmul.mubr.msk.bf16.vlgmr.msra.gmra.mrb[160].mxu1 %vm1867_vm4, %v4199_v29  ;;  %v4173_v43 = vmul.f32 %v15742_v14, %v17763_v47  ;;  %v22135_v47 = vld [vmem:[#allocation47_spill] sm:$0xff] }
 0x606   :  { %6631 = vrot.lane.b32.xlu1 %v22131_v24, %s16148_s1  ;;  %15753 = vrcp.f32 %v4119_v34  ;;  %14951 = vmatpush3.bf16.msra.mxu1 %v4763_v44  ;;  %v4171_v45 = vmul.f32 %v15744_v48, %v17769_v62  ;;  %v22136_v48 = vld [vmem:[#allocation97_spill] sm:$0xff] }
 0x607   :  { %6337 = vrot.lane.b32.xlu0 %v22132_v57, %s16148_s1  ;;  %14952 = vmatprep.mubr.msk.bf16.mxu1 %vm16146_vm1, %v22023_v36  ;;  %15755 = vrcp.f32 %v4116_v28  ;;  %v4863_v34 = vsel %vm2240_vm3, %v22136_v48, 0  ;;  %v22137_v44 = vld [vmem:[#allocation53_spill] sm:$0xff]  ;;  %v22143_v48 = vld [vmem:[#allocation54_spill] sm:$0xff] }
 0x608   :  { %14962 = vmatprep.subr.bf16.mxu1 %v22023_v36  ;;  %v15746_v41 = vpop.eup %15745  ;;  %v4201_v14 = vpack.c.bf16 %v4173_v43, %v4171_v45 }
 0x609   :  { %14947 = vmatmul.mubr.msk.bf16.vlgmr.msra.gmra.mrb[140].mxu0 %vm1867_vm4, %v4200_v51  ;;  %v15748_v29 = vpop.eup %15747  ;;  %v4177_v62 = vmul.f32 %v15746_v41, %v17771_v52  ;;  %v22138_v52 = vld [vmem:[#allocation49_spill] sm:$0xff] }
 0x60a   :  { %6778 = vrot.lane.b32.xlu1 %v22134_v55, %s16148_s1  ;;  %14957 = vmatpush3.bf16.msra.mxu0 %v4813_v40  ;;  %v4175_v12 = vmul.f32 %v15748_v29, %v17761_v59  ;;  %v22139_v59 = vld [vmem:[#allocation96_spill] sm:$0xff] }
 0x60b   :  { %6484 = vrot.lane.b32.xlu0 %v22135_v47, %s16148_s1  ;;  %14958 = vmatprep.mubr.msk.bf16.mxu0 %vm16146_vm1, %v22023_v36  ;;  %v4913_v51 = vsel %vm2240_vm3, %v22139_v59, 0 }
 0x60c   :  { %14968 = vmatprep.subr.bf16.mxu0 %v22023_v36  ;;  %v15750_v46 = vpop.eup %15749  ;;  %v4202_v43 = vpack.c.bf16 %v4177_v62, %v4175_v12 }
 0x60d   :  { %14953 = vmatmul.mubr.msk.bf16.vlgmr.msra.gmra.mrb[164].mxu1 %vm1867_vm4, %v4201_v14  ;;  %v15752_v33 = vpop.eup %15751  ;;  %v4181_v28 = vmul.f32 %v15750_v46, %v17779_v38  ;;  %v22141_v38 = vld [vmem:[#allocation51_spill] sm:$0xff]  ;;  %v22142_v14 = vld [vmem:[#allocation98_spill] sm:$0xff] }
 0x60e   :  { %6729 = vrot.lane.b32.xlu1 %v22137_v44, %s16148_s1  ;;  %14963 = vmatpush3.bf16.msra.mxu1 %v4863_v34  ;;  %v4179_v41 = vmul.f32 %v15752_v33, %v17777_v31  ;;  %v4963_v31 = vsel %vm2240_vm3, %v22142_v14, 0  ;;  %v22144_v34 = vld [vmem:[#allocation55_spill] sm:$0xff]  ;;  %v5007_v33 = vpop.permute.xlu1 %5006 }
 0x60f   :  { %6582 = vrot.lane.b32.xlu0 %v22138_v52, %s16148_s1  ;;  %14964 = vmatprep.mubr.msk.bf16.mxu1 %vm16146_vm1, %v22023_v36 }
 0x610   :  { %14974 = vmatprep.subr.bf16.mxu1 %v22023_v36  ;;  %v15754_v45 = vpop.eup %15753  ;;  %v4203_v62 = vpack.c.bf16 %v4181_v28, %v4179_v41 }
 0x611   :  { %14959 = vmatmul.mubr.msk.bf16.vlgmr.msra.gmra.mrb[144].mxu0 %vm1867_vm4, %v4202_v43  ;;  %v15756_v40 = vpop.eup %15755  ;;  %v4185_v29 = vmul.f32 %v15754_v45, %v17791_v53  ;;  %v5009_v53 = vpop.permute.xlu0 %5008 }
 0x612   :  { %6876 = vrot.lane.b32.xlu1 %v22140_v25, %s16148_s1  ;;  %14969 = vmatpush3.bf16.msra.mxu0 %v4913_v51  ;;  %v4183_v46 = vmul.f32 %v15756_v40, %v17785_v26  ;;  %v5014_v26 = vsel %vm1114_vm2, %v5009_v53, 0 }
 0x613   :  { %6680 = vrot.lane.b32.xlu0 %v22141_v38, %s16148_s1  ;;  %14970 = vmatprep.mubr.msk.bf16.mxu0 %vm16146_vm1, %v22023_v36 }
 0x614   :  { %14980 = vmatprep.subr.bf16.mxu0 %v22023_v36  ;;  %v4204_v12 = vpack.c.bf16 %v4185_v29, %v4183_v46 }
 0x615   :  { %14965 = vmatmul.mubr.msk.bf16.vlgmr.msra.gmra.mrb[168].mxu1 %vm1867_vm4, %v4203_v62 }
 0x616   :  { %6925 = vrot.lane.b32.xlu1 %v22143_v48, %s16148_s1  ;;  %14975 = vmatpush3.bf16.msra.mxu1 %v4963_v31 }
 0x617   :  { %6827 = vrot.lane.b32.xlu0 %v22144_v34, %s16148_s1  ;;  %14976 = vmatprep.mubr.msk.bf16.mxu1 %vm16146_vm1, %v22023_v36 }
 0x618   :  { %14986 = vmatprep.subr.bf16.mxu1 %v22023_v36 }
 0x619   :  { %14971 = vmatmul.mubr.msk.bf16.vlgmr.msra.gmra.mrb[148].mxu0 %vm1867_vm4, %v4204_v12 }
 0x61a   :  { %14982 = vmatprep.mubr.msk.bf16.mxu0 %vm16146_vm1, %v22023_v36 }
 0x61b   :  { %14981 = vmatpush3.bf16.xpose.msra.mxu0 %v5014_v26 }
 0x61c   :  { %14992 = vmatprep.subr.bf16.mxu0 %v22023_v36 }
 0x622   :  { %14983 = vmatmul.mubr.msk.bf16.vlgmr.msra.gmra.mrb[152].mxu0 %vm1114_vm2, %v5007_v33 }
 0x623   :  { %14994 = vmatprep.mubr.msk.bf16.mxu0 %vm16146_vm1, %v22023_v36 }
 0x636   :  { %v4122_v28 = vpop.xlane.xlu1 %4121 }
 0x637   :  { %15757 = vrcp.f32 %v4122_v28 }
 0x63a   :  { %v4125_v43 = vpop.xlane.xlu0 %4124  ;;  %v5111_v45 = vpop.permute.xlu1 %5110 }
 0x63b   :  { %15759 = vrcp.f32 %v4125_v43  ;;  %v5116_v59 = vsel %vm1114_vm2, %v5111_v45, 0 }
 0x63c   :  { %14993 = vmatpush3.bf16.xpose.msra.mxu0 %v5116_v59 }
 0x63d   :  { %15004 = vmatprep.subr.bf16.mxu0 %v22023_v36 }
 0x63e   :  { %v5060_v51 = vpop.permute.xlu0 %5059  ;;  %v5109_v41 = vpop.permute.xlu1 %5108 }
 0x63f   :  { %v5065_v28 = vsel %vm1114_vm2, %v5060_v51, 0 }
 0x641   :  { %v15758_v62 = vpop.eup %15757 }
 0x642   :  { %v5058_v40 = vpop.permute.xlu0 %5057  ;;  %v5213_v29 = vpop.permute.xlu1 %5212  ;;  %v4187_v46 = vmul.f32 %v15758_v62, %v17809_v49 }
 0x643   :  { %v5218_v14 = vsel %vm1114_vm2, %v5213_v29, 0  ;;  %14995 = vmatmul.mubr.msk.bf16.vlgmr.msra.gmra.mrb[156].mxu0 %vm1114_vm2, %v5109_v41 }
 0x644   :  { %15005 = vmatpush3.bf16.xpose.msra.mxu0 %v5218_v14  ;;  %15006 = vmatprep.mubr.msk.bf16.mxu0 %vm16146_vm1, %v22023_v36 }
 0x645   :  { %v15760_v31 = vpop.eup %15759  ;;  %15016 = vmatprep.subr.bf16.mxu0 %v22023_v36 }
 0x646   :  { %v4189_v53 = vmul.f32 %v15760_v31, %v17813_v10  ;;  %v5162_v12 = vpop.permute.xlu0 %5161  ;;  %v5211_v26 = vpop.permute.xlu1 %5210 }
 0x647   :  { %v5167_v51 = vsel %vm1114_vm2, %v5162_v12, 0 }
 0x648   :  { %v4205_v33 = vpack.c.bf16 %v4189_v53, %v4187_v46 }
 0x64a   :  { %v5160_v43 = vpop.permute.xlu0 %5159  ;;  %14977 = vmatmul.mubr.msk.bf16.vlgmr.msra.gmra.mrb[172].mxu1 %vm1867_vm4, %v4205_v33  ;;  %v5315_v45 = vpop.permute.xlu1 %5314 }
 0x64b   :  { %14987 = vmatpush3.bf16.xpose.msra.mxu1 %v5065_v28  ;;  %v5320_v59 = vsel %vm1114_vm2, %v5315_v45, 0  ;;  %15007 = vmatmul.mubr.msk.bf16.vlgmr.msra.gmra.mrb[160].mxu0 %vm1114_vm2, %v5211_v26 }
 0x64c   :  { %15017 = vmatpush3.bf16.xpose.msra.mxu0 %v5320_v59  ;;  %14988 = vmatprep.mubr.msk.bf16.mxu1 %vm16146_vm1, %v22023_v36 }
 0x64d   :  { %14998 = vmatprep.subr.bf16.mxu1 %v22023_v36  ;;  %15018 = vmatprep.mubr.msk.bf16.mxu0 %vm16146_vm1, %v22023_v36 }
 0x64e   :  { %v5264_v49 = vpop.permute.xlu0 %5263  ;;  %v5313_v10 = vpop.permute.xlu1 %5312  ;;  %15028 = vmatprep.subr.bf16.mxu0 %v22023_v36 }
 0x652   :  { %v5262_v41 = vpop.permute.xlu0 %5261  ;;  %14989 = vmatmul.mubr.msk.bf16.vlgmr.msra.gmra.mrb[176].mxu1 %vm1114_vm2, %v5058_v40  ;;  %v5417_v29 = vpop.permute.xlu1 %5416  ;;  %v5269_v40 = vsel %vm1114_vm2, %v5264_v49, 0 }
 0x653   :  { %14999 = vmatpush3.bf16.xpose.msra.mxu1 %v5167_v51  ;;  %v5422_v62 = vsel %vm1114_vm2, %v5417_v29, 0  ;;  %15019 = vmatmul.mubr.msk.bf16.vlgmr.msra.gmra.mrb[164].mxu0 %vm1114_vm2, %v5313_v10 }
 0x654   :  { %15029 = vmatpush3.bf16.xpose.msra.mxu0 %v5422_v62  ;;  %15000 = vmatprep.mubr.msk.bf16.mxu1 %vm16146_vm1, %v22023_v36 }
 0x655   :  { %15010 = vmatprep.subr.bf16.mxu1 %v22023_v36  ;;  %15030 = vmatprep.mubr.msk.bf16.mxu0 %vm16146_vm1, %v22023_v36 }
 0x656   :  { %v5366_v14 = vpop.permute.xlu0 %5365  ;;  %v5415_v31 = vpop.permute.xlu1 %5414  ;;  %15040 = vmatprep.subr.bf16.mxu0 %v22023_v36 }
 0x657   :  { %v5371_v28 = vsel %vm1114_vm2, %v5366_v14, 0 }
 0x65a   :  { %v5364_v46 = vpop.permute.xlu0 %5363  ;;  %15001 = vmatmul.mubr.msk.bf16.vlgmr.msra.gmra.mrb[180].mxu1 %vm1114_vm2, %v5160_v43  ;;  %v5519_v53 = vpop.permute.xlu1 %5518 }
 0x65b   :  { %15011 = vmatpush3.bf16.xpose.msra.mxu1 %v5269_v40  ;;  %v5524_v12 = vsel %vm1114_vm2, %v5519_v53, 0  ;;  %15031 = vmatmul.mubr.msk.bf16.vlgmr.msra.gmra.mrb[168].mxu0 %vm1114_vm2, %v5415_v31 }
 0x65c   :  { %15041 = vmatpush3.bf16.xpose.msra.mxu0 %v5524_v12  ;;  %15012 = vmatprep.mubr.msk.bf16.mxu1 %vm16146_vm1, %v22023_v36 }
 0x65d   :  { %15022 = vmatprep.subr.bf16.mxu1 %v22023_v36  ;;  %15042 = vmatprep.mubr.msk.bf16.mxu0 %vm16146_vm1, %v22023_v36 }
 0x65e   :  { %v5468_v26 = vpop.permute.xlu0 %5467  ;;  %v5517_v33 = vpop.permute.xlu1 %5516  ;;  %15052 = vmatprep.subr.bf16.mxu0 %v22023_v36 }
 0x65f   :  { %v5473_v51 = vsel %vm1114_vm2, %v5468_v26, 0 }
 0x662   :  { %v5466_v43 = vpop.permute.xlu0 %5465  ;;  %15013 = vmatmul.mubr.msk.bf16.vlgmr.msra.gmra.mrb[184].mxu1 %vm1114_vm2, %v5262_v41  ;;  %v5621_v45 = vpop.permute.xlu1 %5620 }
 0x663   :  { %15023 = vmatpush3.bf16.xpose.msra.mxu1 %v5371_v28  ;;  %v5626_v59 = vsel %vm1114_vm2, %v5621_v45, 0  ;;  %15043 = vmatmul.mubr.msk.bf16.vlgmr.msra.gmra.mrb[172].mxu0 %vm1114_vm2, %v5517_v33 }
 0x664   :  { %15053 = vmatpush3.bf16.xpose.msra.mxu0 %v5626_v59  ;;  %15024 = vmatprep.mubr.msk.bf16.mxu1 %vm16146_vm1, %v22023_v36 }
 0x665   :  { %15034 = vmatprep.subr.bf16.mxu1 %v22023_v36  ;;  %15054 = vmatprep.mubr.msk.bf16.mxu0 %vm16146_vm1, %v22023_v36 }
 0x666   :  { %v5570_v49 = vpop.permute.xlu0 %5569  ;;  %v5619_v10 = vpop.permute.xlu1 %5618  ;;  %15064 = vmatprep.subr.bf16.mxu0 %v22023_v36 }
 0x667   :  { %v5575_v53 = vsel %vm1114_vm2, %v5570_v49, 0 }
 0x66a   :  { %v5568_v41 = vpop.permute.xlu0 %5567  ;;  %15025 = vmatmul.mubr.msk.bf16.vlgmr.msra.gmra.mrb[188].mxu1 %vm1114_vm2, %v5364_v46  ;;  %v5723_v29 = vpop.permute.xlu1 %5722 }
 0x66b   :  { %15035 = vmatpush3.bf16.xpose.msra.mxu1 %v5473_v51  ;;  %v5728_v62 = vsel %vm1114_vm2, %v5723_v29, 0  ;;  %15055 = vmatmul.mubr.msk.bf16.vlgmr.msra.gmra.mrb[176].mxu0 %vm1114_vm2, %v5619_v10 }
 0x66c   :  { %15065 = vmatpush3.bf16.xpose.msra.mxu0 %v5728_v62  ;;  %15036 = vmatprep.mubr.msk.bf16.mxu1 %vm16146_vm1, %v22023_v36 }
 0x66d   :  { %15046 = vmatprep.subr.bf16.mxu1 %v22023_v36  ;;  %15066 = vmatprep.mubr.msk.bf16.mxu0 %vm16146_vm1, %v22023_v36 }
 0x66e   :  { %v5672_v14 = vpop.permute.xlu0 %5671  ;;  %15076 = vmatprep.subr.bf16.mxu0 %v22023_v36  ;;  %v5721_v40 = vpop.permute.xlu1 %5720 }
 0x66f   :  { %v5677_v45 = vsel %vm1114_vm2, %v5672_v14, 0 }
 0x670   :  { %v18082_v31 = vpop.f32.mrb[120].mxu0 }
 0x671   :  { %22145 = vst [vmem:[#allocation26_spill] sm:$0xff] %v18082_v31  ;;  %v14888_v46 = vpop.f32.mrb[121].mxu0 }
 0x672   :  { %v18085_v12 = vpop.f32.mrb[122].mxu0  ;;  %v5670_v26 = vpop.permute.xlu0 %5669  ;;  %15037 = vmatmul.mubr.msk.bf16.vlgmr.msra.gmra.mrb[192].mxu1 %vm1114_vm2, %v5466_v43 }
 0x673   :  { %22146 = vst [vmem:[#allocation31_spill] sm:$0xff] %v18085_v12  ;;  %v14889_v33 = vpop.f32.mrb[123].mxu0  ;;  %15047 = vmatpush3.bf16.xpose.msra.mxu1 %v5575_v53  ;;  %15067 = vmatmul.mubr.msk.bf16.vlgmr.msra.gmra.mrb[180].mxu0 %vm1114_vm2, %v5721_v40  ;;  %v5772_v49 = vpop.permute.xlu1 %5771 }
 0x674   :  { %15048 = vmatprep.mubr.msk.bf16.mxu1 %vm16146_vm1, %v22023_v36  ;;  %15058 = vmatprep.subr.bf16.mxu1 %v22023_v36 }
 0x675   :  { %15078 = vmatprep.mubr.msk.bf16.mxu0 %vm16146_vm1, %v22023_v36 }
 0x676   :  { %v5774_v28 = vpop.permute.xlu0 %5773 }
 0x677   :  { %v5779_v10 = vsel %vm1114_vm2, %v5774_v28, 0  ;;  %v6240_v51 = vpop.permute.xlu1 %6239 }
 0x67a   :  { %v6191_v59 = vpop.permute.xlu0 %6190  ;;  %15049 = vmatmul.mubr.msk.bf16.vlgmr.msra.gmra.mrb[196].mxu1 %vm1114_vm2, %v5568_v41  ;;  %v6245_v41 = vsel %vm2240_vm3, %v6240_v51, 0 }
 0x67b   :  { %v6196_v43 = vsel %vm2240_vm3, %v6191_v59, 0  ;;  %15059 = vmatpush3.bf16.xpose.msra.mxu1 %v5677_v45  ;;  %15060 = vmatprep.mubr.msk.bf16.mxu1 %vm16146_vm1, %v22023_v36  ;;  %v18285_v21 = vpop.permute.xlu1 %6386 }
 0x67c   :  { %15077 = vmatpush3.bf16.msra.mxu0 %v6196_v43  ;;  %15070 = vmatprep.subr.bf16.mxu1 %v22023_v36  ;;  %22177 = vst [vmem:[#allocation115_spill] sm:$0xff] %v18285_v21 }
 0x67d   :  { %15088 = vmatprep.subr.bf16.mxu0 %v22023_v36 }
 0x67f   :  { %v18295_v22 = vpop.permute.xlu1 %6435 }
 0x680   :  { %22178 = vst [vmem:[#allocation116_spill] sm:$0xff] %v18295_v22 }
 0x682   :  { %15061 = vmatmul.mubr.msk.bf16.vlgmr.msra.gmra.mrb[200].mxu1 %vm1114_vm2, %v5670_v26 }
 0x683   :  { %15071 = vmatpush3.bf16.xpose.msra.mxu1 %v5779_v10  ;;  %15072 = vmatprep.mubr.msk.bf16.mxu1 %vm16146_vm1, %v22023_v36 }
 0x684   :  { %15082 = vmatprep.subr.bf16.mxu1 %v22023_v36 }
 0x68a   :  { %15073 = vmatmul.mubr.msk.bf16.vlgmr.msra.gmra.mrb[204].mxu1 %vm1114_vm2, %v5772_v49 }
 0x68b   :  { %15083 = vmatpush3.bf16.msra.mxu1 %v6245_v41  ;;  %15084 = vmatprep.mubr.msk.bf16.mxu1 %vm16146_vm1, %v22023_v36 }
 0x68c   :  { %15094 = vmatprep.subr.bf16.mxu1 %v22023_v36 }
 0x6b0   :  { %v18111_v29 = vpop.f32.mrb[144].mxu1 }
 0x6b1   :  { %22147 = vst [vmem:[#allocation89_spill] sm:$0xff] %v18111_v29  ;;  %v14894_v62 = vpop.f32.mrb[145].mxu1 }
 0x6b2   :  { %v18113_v14 = vpop.f32.mrb[146].mxu1 }
 0x6b3   :  { %22148 = vst [vmem:[#allocation27_spill] sm:$0xff] %v18113_v14  ;;  %v14895_v40 = vpop.f32.mrb[147].mxu1 }
 0x6b4   :  { %v18115_v46 = vpop.f32.mrb[124].mxu0 }
 0x6b5   :  { %22149 = vst [vmem:[#allocation86_spill] sm:$0xff] %v18115_v46  ;;  %v14900_v53 = vpop.f32.mrb[125].mxu0 }
 0x6b6   :  { %v18117_v26 = vpop.f32.mrb[126].mxu0 }
 0x6b7   :  { %22150 = vst [vmem:[#allocation87_spill] sm:$0xff] %v18117_v26  ;;  %v14901_v33 = vpop.f32.mrb[127].mxu0 }
 0x6b8   :  { %v18119_v28 = vpop.f32.mrb[148].mxu1 }
 0x6b9   :  { %22151 = vst [vmem:[#allocation91_spill] sm:$0xff] %v18119_v28  ;;  %v14906_v45 = vpop.f32.mrb[149].mxu1 }
 0x6ba   :  { %v18121_v59 = vpop.f32.mrb[150].mxu1 }
 0x6bb   :  { %22152 = vst [vmem:[#allocation88_spill] sm:$0xff] %v18121_v59  ;;  %v14907_v43 = vpop.f32.mrb[151].mxu1 }
 0x6bc   :  { %v18123_v49 = vpop.f32.mrb[128].mxu0 }
 0x6bd   :  { %22153 = vst [vmem:[#allocation93_spill] sm:$0xff] %v18123_v49  ;;  %v14912_v10 = vpop.f32.mrb[129].mxu0 }
 0x6be   :  { %v18125_v51 = vpop.f32.mrb[130].mxu0 }
 0x6bf   :  { %22154 = vst [vmem:[#allocation90_spill] sm:$0xff] %v18125_v51  ;;  %v14913_v41 = vpop.f32.mrb[131].mxu0 }
 0x6c0   :  { %v18127_v62 = vpop.f32.mrb[152].mxu1 }
 0x6c1   :  { %22155 = vst [vmem:[#allocation95_spill] sm:$0xff] %v18127_v62  ;;  %v14918_v40 = vpop.f32.mrb[153].mxu1 }
 0x6c2   :  { %v18129_v14 = vpop.f32.mrb[154].mxu1 }
 0x6c3   :  { %22156 = vst [vmem:[#allocation94_spill] sm:$0xff] %v18129_v14  ;;  %v14919_v53 = vpop.f32.mrb[155].mxu1 }
 0x6c4   :  { %v18131_v26 = vpop.f32.mrb[132].mxu0 }
 0x6c5   :  { %22157 = vst [vmem:[#allocation92_spill] sm:$0xff] %v18131_v26  ;;  %v14924_v33 = vpop.f32.mrb[133].mxu0 }
 0x6c6   :  { %v18133_v28 = vpop.f32.mrb[134].mxu0 }
 0x6c7   :  { %22158 = vst [vmem:[#allocation97_spill] sm:$0xff] %v18133_v28  ;;  %v14925_v45 = vpop.f32.mrb[135].mxu0 }
 0x6d0   :  { %v18135_v59 = vpop.f32.mrb[156].mxu1 }
 0x6d1   :  { %22159 = vst [vmem:[#allocation96_spill] sm:$0xff] %v18135_v59  ;;  %v14930_v43 = vpop.f32.mrb[157].mxu1 }
 0x6d2   :  { %v18137_v49 = vpop.f32.mrb[158].mxu1 }
 0x6d3   :  { %22160 = vst [vmem:[#allocation98_spill] sm:$0xff] %v18137_v49  ;;  %v14931_v10 = vpop.f32.mrb[159].mxu1 }
 0x6d4   :  { %v18139_v51 = vpop.f32.mrb[136].mxu0 }
 0x6d5   :  { %22161 = vst [vmem:[#allocation99_spill] sm:$0xff] %v18139_v51  ;;  %v14936_v41 = vpop.f32.mrb[137].mxu0 }
 0x6d6   :  { %v18141_v62 = vpop.f32.mrb[138].mxu0 }
 0x6d7   :  { %22162 = vst [vmem:[#allocation100_spill] sm:$0xff] %v18141_v62  ;;  %v14937_v40 = vpop.f32.mrb[139].mxu0 }
 0x6d8   :  { %v18143_v14 = vpop.f32.mrb[160].mxu1 }
 0x6d9   :  { %22163 = vst [vmem:[#allocation101_spill] sm:$0xff] %v18143_v14  ;;  %v14942_v53 = vpop.f32.mrb[161].mxu1 }
 0x6da   :  { %v18145_v26 = vpop.f32.mrb[162].mxu1 }
 0x6db   :  { %22164 = vst [vmem:[#allocation102_spill] sm:$0xff] %v18145_v26  ;;  %v14943_v33 = vpop.f32.mrb[163].mxu1 }
 0x6dc   :  { %v18147_v28 = vpop.f32.mrb[140].mxu0 }
 0x6dd   :  { %22165 = vst [vmem:[#allocation103_spill] sm:$0xff] %v18147_v28  ;;  %v14948_v45 = vpop.f32.mrb[141].mxu0 }
 0x6de   :  { %v18149_v59 = vpop.f32.mrb[142].mxu0 }
 0x6df   :  { %22166 = vst [vmem:[#allocation104_spill] sm:$0xff] %v18149_v59  ;;  %v14949_v43 = vpop.f32.mrb[143].mxu0 }
 0x6e0   :  { %v18151_v49 = vpop.f32.mrb[164].mxu1 }
 0x6e1   :  { %22167 = vst [vmem:[#allocation105_spill] sm:$0xff] %v18151_v49  ;;  %v14954_v10 = vpop.f32.mrb[165].mxu1 }
 0x6e2   :  { %v18153_v51 = vpop.f32.mrb[166].mxu1 }
 0x6e3   :  { %22168 = vst [vmem:[#allocation106_spill] sm:$0xff] %v18153_v51  ;;  %v14955_v41 = vpop.f32.mrb[167].mxu1 }
 0x6e4   :  { %v18155_v62 = vpop.f32.mrb[144].mxu0 }
 0x6e5   :  { %22169 = vst [vmem:[#allocation107_spill] sm:$0xff] %v18155_v62  ;;  %v14960_v40 = vpop.f32.mrb[145].mxu0 }
 0x6e6   :  { %v18157_v14 = vpop.f32.mrb[146].mxu0 }
 0x6e7   :  { %22170 = vst [vmem:[#allocation108_spill] sm:$0xff] %v18157_v14  ;;  %v14961_v53 = vpop.f32.mrb[147].mxu0 }
 0x6e8   :  { %v18159_v26 = vpop.f32.mrb[168].mxu1 }
 0x6e9   :  { %22171 = vst [vmem:[#allocation109_spill] sm:$0xff] %v18159_v26  ;;  %v14966_v33 = vpop.f32.mrb[169].mxu1 }
 0x6ea   :  { %v18161_v28 = vpop.f32.mrb[170].mxu1 }
 0x6eb   :  { %22172 = vst [vmem:[#allocation110_spill] sm:$0xff] %v18161_v28  ;;  %v14967_v45 = vpop.f32.mrb[171].mxu1 }
 0x6ec   :  { %v18163_v59 = vpop.f32.mrb[148].mxu0 }
 0x6ed   :  { %22173 = vst [vmem:[#allocation111_spill] sm:$0xff] %v18163_v59  ;;  %v14972_v43 = vpop.f32.mrb[149].mxu0 }
 0x6ee   :  { %v18165_v49 = vpop.f32.mrb[150].mxu0 }
 0x6ef   :  { %22174 = vst [vmem:[#allocation112_spill] sm:$0xff] %v18165_v49  ;;  %v14973_v10 = vpop.f32.mrb[151].mxu0 }
 0x6f5   :  { %v18167_v51 = vpop.f32.mrb[152].mxu0 }
 0x6f6   :  { %v14984_v41 = vpop.f32.mrb[153].mxu0  ;;  %v5822_v40 = vsel %vm1867_vm4, %v18167_v51, -inf }
 0x6f7   :  { %5823 = vmax.xlane.f32.xlu0 %v5822_v40  ;;  %v18171_v53 = vpop.f32.mrb[154].mxu0 }
 0x6f8   :  { %v14985_v26 = vpop.f32.mrb[155].mxu0  ;;  %v5825_v33 = vsel %vm1871_vm5, %v18171_v53, -inf }
 0x6f9   :  { %5826 = vmax.xlane.f32.xlu1 %v5825_v33 }
 0x716   :  { %v18175_v45 = vpop.f32.mrb[156].mxu0 }
 0x717   :  { %v14996_v43 = vpop.f32.mrb[157].mxu0 }
 0x718   :  { %v18177_v28 = vpop.f32.mrb[158].mxu0 }
 0x719   :  { %v14997_v10 = vpop.f32.mrb[159].mxu0  ;;  %v5837_v41 = vsel %vm1871_vm5, %v18177_v28, -inf }
 0x71a   :  { %5838 = vmax.xlane.f32.xlu1 %v5837_v41 }
 0x71d   :  { %v18181_v49 = vpop.f32.mrb[172].mxu1 }
 0x71e   :  { %22175 = vst [vmem:[#allocation113_spill] sm:$0xff] %v18181_v49  ;;  %v14978_v40 = vpop.f32.mrb[173].mxu1  ;;  %v18183_v59 = vpop.f32.mrb[160].mxu0 }
 0x71f   :  { %v18185_v26 = vpop.f32.mrb[174].mxu1  ;;  %v15008_v14 = vpop.f32.mrb[161].mxu0 }
 0x720   :  { %22176 = vst [vmem:[#allocation114_spill] sm:$0xff] %v18185_v26  ;;  %v14979_v62 = vpop.f32.mrb[175].mxu1  ;;  %v18187_v33 = vpop.f32.mrb[162].mxu0 }
 0x721   :  { %v15009_v29 = vpop.f32.mrb[163].mxu0  ;;  %v5834_v62 = vsel %vm1867_vm4, %v18175_v45, -inf }
 0x725   :  { %v18189_v43 = vpop.f32.mrb[176].mxu1 }
 0x726   :  { %v14990_v12 = vpop.f32.mrb[177].mxu1  ;;  %v18191_v10 = vpop.f32.mrb[164].mxu0  ;;  %v5828_v41 = vsel %vm1867_vm4, %v18189_v43, -inf }
 0x727   :  { %v15020_v48 = vpop.f32.mrb[165].mxu0  ;;  %5829 = vmax.xlane.f32.xlu0 %v5828_v41  ;;  %v18195_v40 = vpop.f32.mrb[178].mxu1 }
 0x728   :  { %v14991_v49 = vpop.f32.mrb[179].mxu1  ;;  %v18197_v46 = vpop.f32.mrb[166].mxu0  ;;  %v5831_v25 = vsel %vm1871_vm5, %v18195_v40, -inf }
 0x729   :  { %v15021_v14 = vpop.f32.mrb[167].mxu0 }
 0x72b   :  { %5835 = vmax.xlane.f32.xlu0 %v5834_v62 }
 0x72d   :  { %v18201_v29 = vpop.f32.mrb[180].mxu1 }
 0x72e   :  { %v15002_v12 = vpop.f32.mrb[181].mxu1  ;;  %v18203_v26 = vpop.f32.mrb[168].mxu0  ;;  %v5840_v62 = vsel %vm1867_vm4, %v18201_v29, -inf }
 0x72f   :  { %v15032_v48 = vpop.f32.mrb[169].mxu0  ;;  %5832 = vmax.xlane.f32.xlu0 %v5831_v25  ;;  %v18207_v41 = vpop.f32.mrb[182].mxu1  ;;  %v5849_v12 = vsel %vm1871_vm5, %v18187_v33, -inf }
 0x730   :  { %v15003_v49 = vpop.f32.mrb[183].mxu1  ;;  %v18209_v31 = vpop.f32.mrb[170].mxu0  ;;  %v5843_v14 = vsel %vm1871_vm5, %v18207_v41, -inf }
 0x731   :  { %v15033_v34 = vpop.f32.mrb[171].mxu0  ;;  %5844 = vmax.xlane.f32.xlu1 %v5843_v14  ;;  %v5846_v49 = vsel %vm1867_vm4, %v18183_v59, -inf }
 0x733   :  { %5841 = vmax.xlane.f32.xlu0 %v5840_v62 }
 0x735   :  { %5850 = vmax.xlane.f32.xlu1 %v5849_v12  ;;  %v18217_v48 = vpop.f32.mrb[184].mxu1 }
 0x736   :  { %v15014_v25 = vpop.f32.mrb[185].mxu1  ;;  %v18219_v55 = vpop.f32.mrb[172].mxu0  ;;  %v5852_v12 = vsel %vm1867_vm4, %v18217_v48, -inf }
 0x737   :  { %v15044_v44 = vpop.f32.mrb[173].mxu0  ;;  %5847 = vmax.xlane.f32.xlu0 %v5846_v49  ;;  %v18223_v34 = vpop.f32.mrb[186].mxu1  ;;  %v5861_v25 = vsel %vm1871_vm5, %v18197_v46, -inf }
 0x738   :  { %v15015_v14 = vpop.f32.mrb[187].mxu1  ;;  %v18225_v38 = vpop.f32.mrb[174].mxu0  ;;  %v5855_v62 = vsel %vm1871_vm5, %v18223_v34, -inf }
 0x739   :  { %v15045_v52 = vpop.f32.mrb[175].mxu0  ;;  %5856 = vmax.xlane.f32.xlu1 %v5855_v62  ;;  %v5858_v14 = vsel %vm1867_vm4, %v18191_v10, -inf }
 0x73b   :  { %5853 = vmax.xlane.f32.xlu0 %v5852_v12 }
 0x73d   :  { %5862 = vmax.xlane.f32.xlu1 %v5861_v25  ;;  %v18233_v44 = vpop.f32.mrb[188].mxu1 }
 0x73e   :  { %v15026_v49 = vpop.f32.mrb[189].mxu1  ;;  %v18235_v47 = vpop.f32.mrb[176].mxu0  ;;  %v5864_v25 = vsel %vm1867_vm4, %v18233_v44, -inf }
 0x73f   :  { %v15056_v4 = vpop.f32.mrb[177].mxu0  ;;  %5859 = vmax.xlane.f32.xlu0 %v5858_v14  ;;  %v18239_v52 = vpop.f32.mrb[190].mxu1  ;;  %v5873_v49 = vsel %vm1871_vm5, %v18209_v31, -inf }
 0x740   :  { %v15027_v62 = vpop.f32.mrb[191].mxu1  ;;  %v18241_v24 = vpop.f32.mrb[178].mxu0  ;;  %v5867_v12 = vsel %vm1871_vm5, %v18239_v52, -inf }
 0x741   :  { %v15057_v37 = vpop.f32.mrb[179].mxu0  ;;  %5868 = vmax.xlane.f32.xlu1 %v5867_v12  ;;  %v5870_v62 = vsel %vm1867_vm4, %v18203_v26, -inf }
 0x743   :  { %5865 = vmax.xlane.f32.xlu0 %v5864_v25 }
 0x745   :  { %5874 = vmax.xlane.f32.xlu1 %v5873_v49  ;;  %v18249_v4 = vpop.f32.mrb[192].mxu1 }
 0x746   :  { %v15038_v14 = vpop.f32.mrb[193].mxu1  ;;  %v18251_v9 = vpop.f32.mrb[180].mxu0  ;;  %v5876_v49 = vsel %vm1867_vm4, %v18249_v4, -inf }
 0x747   :  { %v15068_v56 = vpop.f32.mrb[181].mxu0  ;;  %5871 = vmax.xlane.f32.xlu0 %v5870_v62  ;;  %v18255_v37 = vpop.f32.mrb[194].mxu1  ;;  %v5885_v14 = vsel %vm1871_vm5, %v18225_v38, -inf }
 0x748   :  { %v15039_v12 = vpop.f32.mrb[195].mxu1  ;;  %v18257_v3 = vpop.f32.mrb[182].mxu0  ;;  %v5879_v25 = vsel %vm1871_vm5, %v18255_v37, -inf }
 0x749   :  { %v15069_v57 = vpop.f32.mrb[183].mxu0  ;;  %5880 = vmax.xlane.f32.xlu1 %v5879_v25  ;;  %v5882_v12 = vsel %vm1867_vm4, %v18219_v55, -inf }
 0x74b   :  { %5877 = vmax.xlane.f32.xlu0 %v5876_v49  ;;  %v5897_v49 = vsel %vm1871_vm5, %v18241_v24, -inf }
 0x74d   :  { %5886 = vmax.xlane.f32.xlu1 %v5885_v14  ;;  %v18265_v56 = vpop.f32.mrb[196].mxu1 }
 0x74e   :  { %v15050_v62 = vpop.f32.mrb[197].mxu1  ;;  %v5888_v25 = vsel %vm1867_vm4, %v18265_v56, -inf }
 0x74f   :  { %5883 = vmax.xlane.f32.xlu0 %v5882_v12  ;;  %v18269_v58 = vpop.f32.mrb[198].mxu1  ;;  %v5894_v12 = vsel %vm1867_vm4, %v18235_v47, -inf }
 0x750   :  { %v15051_v18 = vpop.f32.mrb[199].mxu1  ;;  %v5891_v57 = vsel %vm1871_vm5, %v18269_v58, -inf }
 0x751   :  { %5892 = vmax.xlane.f32.xlu1 %v5891_v57 }
 0x753   :  { %5889 = vmax.xlane.f32.xlu0 %v5888_v25 }
 0x755   :  { %5898 = vmax.xlane.f32.xlu1 %v5897_v49  ;;  %v18277_v14 = vpop.f32.mrb[200].mxu1  ;;  %v5909_v49 = vsel %vm1871_vm5, %v18257_v3, -inf }
 0x756   :  { %v15062_v62 = vpop.f32.mrb[201].mxu1  ;;  %v5900_v25 = vsel %vm1867_vm4, %v18277_v14, -inf }
 0x757   :  { %5895 = vmax.xlane.f32.xlu0 %v5894_v12  ;;  %v18281_v18 = vpop.f32.mrb[202].mxu1 }
 0x758   :  { %v15063_v17 = vpop.f32.mrb[203].mxu1  ;;  %v5903_v57 = vsel %vm1871_vm5, %v18281_v18, -inf }
 0x759   :  { %5904 = vmax.xlane.f32.xlu1 %v5903_v57  ;;  %v5906_v17 = vsel %vm1867_vm4, %v18251_v9, -inf }
 0x75b   :  { %5901 = vmax.xlane.f32.xlu0 %v5900_v25 }
 0x75d   :  { %5910 = vmax.xlane.f32.xlu1 %v5909_v49  ;;  %v18291_v62 = vpop.f32.mrb[204].mxu1  ;;  %v18303_v49 = vpop.permute.xlu0 %6288 }
 0x75e   :  { %v15074_v12 = vpop.f32.mrb[205].mxu1  ;;  %v5912_v25 = vsel %vm1867_vm4, %v18291_v62, -inf }
 0x75f   :  { %5907 = vmax.xlane.f32.xlu0 %v5906_v17  ;;  %v18297_v13 = vpop.f32.mrb[206].mxu1  ;;  %v18305_v12 = vpop.permute.xlu1 %6533 }
 0x760   :  { %v15075_v57 = vpop.f32.mrb[207].mxu1  ;;  %v5915_v1 = vsel %vm1871_vm5, %v18297_v13, -inf  ;;  %22179 = vst [vmem:[#allocation117_spill] sm:$0xff] %v18305_v12 }
 0x761   :  { %5916 = vmax.xlane.f32.xlu1 %v5915_v1  ;;  %v18307_v61 = vpop.permute.xlu0 %6337 }
 0x762   :  { %22180 = vst [vmem:[#allocation118_spill] sm:$0xff] %v18307_v61 }
 0x763   :  { %5913 = vmax.xlane.f32.xlu0 %v5912_v25  ;;  %v18309_v15 = vpop.permute.xlu1 %6631 }
 0x764   :  { %22181 = vst [vmem:[#allocation119_spill] sm:$0xff] %v18309_v15 }
 0x765   :  { %v18311_v17 = vpop.permute.xlu0 %6484 }
 0x766   :  { %22182 = vst [vmem:[#allocation120_spill] sm:$0xff] %v18311_v17 }
 0x767   :  { %v18313_v22 = vpop.permute.xlu1 %6778 }
 0x768   :  { %22183 = vst [vmem:[#allocation121_spill] sm:$0xff] %v18313_v22 }
 0x769   :  { %v18315_v57 = vpop.permute.xlu0 %6582 }
 0x76a   :  { %22184 = vst [vmem:[#allocation122_spill] sm:$0xff] %v18315_v57 }
 0x76b   :  { %v18317_v63 = vpop.permute.xlu1 %6729 }
 0x76c   :  { %22185 = vst [vmem:[#allocation123_spill] sm:$0xff] %v18317_v63 }
 0x76d   :  { %v18319_v1 = vpop.permute.xlu0 %6680 }
 0x76e   :  { %22186 = vst [vmem:[#allocation124_spill] sm:$0xff] %v18319_v1 }
 0x76f   :  { %v18321_v21 = vpop.permute.xlu1 %6876 }
 0x770   :  { %22187 = vst [vmem:[#allocation125_spill] sm:$0xff] %v18321_v21 }
 0x771   :  { %v18323_v11 = vpop.permute.xlu0 %6827 }
 0x772   :  { %22188 = vst [vmem:[#allocation126_spill] sm:$0xff] %v18323_v11 }
 0x773   :  { %v18325_v25 = vpop.permute.xlu1 %6925 }
 0x774   :  { %22189 = vst [vmem:[#allocation127_spill] sm:$0xff] %v18325_v25 }
 0x784   :  { %v5824_v12 = vpop.xlane.xlu0 %5823 }
 0x785   :  { %v5918_v54 = vsub.f32 %v18167_v51, %v5824_v12 }
 0x786   :  { %v5827_v15 = vpop.xlane.xlu1 %5826 }
 0x787   :  { %v5950_v61 = vmul.f32 1.442695, %v5918_v54  ;;  %v5919_v17 = vsub.f32 %v18171_v53, %v5827_v15 }
 0x789   :  { %15761 = vpow2.f32 %v5950_v61  ;;  %v5952_v22 = vmul.f32 1.442695, %v5919_v17 }
 0x78b   :  { %15763 = vpow2.f32 %v5952_v22 }
 0x793   :  { %v18329_v57 = vpop.eup %15761 }
 0x794   :  { %v6014_v63 = vsel %vm1867_vm4, %v18329_v57, 0.0 }
 0x795   :  { %v18333_v21 = vpop.eup %15763  ;;  %6015 = vadd.xlane.f32.xlu0 %v6014_v63 }
 0x796   :  { %v6017_v25 = vsel %vm1871_vm5, %v18333_v21, 0.0 }
 0x797   :  { %6018 = vadd.xlane.f32.xlu1 %v6017_v25 }
 0x7a7   :  { %v5839_v15 = vpop.xlane.xlu1 %5838 }
 0x7a8   :  { %v5923_v53 = vsub.f32 %v18177_v28, %v5839_v15 }
 0x7aa   :  { %v5960_v16 = vmul.f32 1.442695, %v5923_v53 }
 0x7b4   :  { %v5830_v51 = vpop.xlane.xlu0 %5829 }
 0x7b5   :  { %v5920_v54 = vsub.f32 %v18189_v43, %v5830_v51 }
 0x7b7   :  { %v5954_v12 = vmul.f32 1.442695, %v5920_v54 }
 0x7b8   :  { %v5836_v61 = vpop.xlane.xlu0 %5835 }
 0x7b9   :  { %15765 = vpow2.f32 %v5954_v12  ;;  %v5922_v22 = vsub.f32 %v18175_v45, %v5836_v61 }
 0x7bb   :  { %v5958_v17 = vmul.f32 1.442695, %v5922_v22 }
 0x7bc   :  { %v5833_v11 = vpop.xlane.xlu0 %5832 }
 0x7bd   :  { %15767 = vpow2.f32 %v5958_v17  ;;  %v5921_v63 = vsub.f32 %v18195_v40, %v5833_v11 }
 0x7be   :  { %v5845_v1 = vpop.xlane.xlu1 %5844 }
 0x7bf   :  { %v5956_v8 = vmul.f32 1.442695, %v5921_v63  ;;  %v5925_v25 = vsub.f32 %v18207_v41, %v5845_v1 }
 0x7c0   :  { %v5842_v7 = vpop.xlane.xlu0 %5841 }
 0x7c1   :  { %15769 = vpow2.f32 %v5956_v8  ;;  %v5924_v43 = vsub.f32 %v18201_v29, %v5842_v7  ;;  %v5964_v45 = vmul.f32 1.442695, %v5925_v25 }
 0x7c2   :  { %v5851_v51 = vpop.xlane.xlu1 %5850  ;;  %15771 = vpow2.f32 %v5960_v16 }
 0x7c3   :  { %v18343_v54 = vpop.eup %15765  ;;  %v5962_v28 = vmul.f32 1.442695, %v5924_v43  ;;  %v5927_v12 = vsub.f32 %v18187_v33, %v5851_v51 }
 0x7c4   :  { %v5848_v15 = vpop.xlane.xlu0 %5847  ;;  %v6020_v11 = vsel %vm1867_vm4, %v18343_v54, 0.0 }
 0x7c5   :  { %15773 = vpow2.f32 %v5962_v28  ;;  %v5926_v40 = vsub.f32 %v18183_v59, %v5848_v15  ;;  %6021 = vadd.xlane.f32.xlu0 %v6020_v11  ;;  %v5968_v7 = vmul.f32 1.442695, %v5927_v12 }
 0x7c6   :  { %v5857_v41 = vpop.xlane.xlu1 %5856  ;;  %15775 = vpow2.f32 %v5964_v45 }
 0x7c7   :  { %v18349_v8 = vpop.eup %15767  ;;  %v5966_v29 = vmul.f32 1.442695, %v5926_v40  ;;  %v5929_v16 = vsub.f32 %v18223_v34, %v5857_v41 }
 0x7c8   :  { %v5854_v1 = vpop.xlane.xlu0 %5853  ;;  %v6026_v33 = vsel %vm1867_vm4, %v18349_v8, 0.0 }
 0x7c9   :  { %15777 = vpow2.f32 %v5966_v29  ;;  %v5928_v61 = vsub.f32 %v18217_v48, %v5854_v1  ;;  %6027 = vadd.xlane.f32.xlu0 %v6026_v33  ;;  %v5972_v59 = vmul.f32 1.442695, %v5929_v16 }
 0x7ca   :  { %v5863_v22 = vpop.xlane.xlu1 %5862  ;;  %15779 = vpow2.f32 %v5968_v7 }
 0x7cb   :  { %v18355_v53 = vpop.eup %15769  ;;  %v5970_v17 = vmul.f32 1.442695, %v5928_v61  ;;  %v5931_v63 = vsub.f32 %v18197_v46, %v5863_v22 }
 0x7cc   :  { %v5860_v25 = vpop.xlane.xlu0 %5859  ;;  %v6023_v34 = vsel %vm1871_vm5, %v18355_v53, 0.0  ;;  %v18360_v43 = vpop.eup %15771 }
 0x7cd   :  { %15781 = vpow2.f32 %v5970_v17  ;;  %v5930_v51 = vsub.f32 %v18191_v10, %v5860_v25  ;;  %6024 = vadd.xlane.f32.xlu1 %v6023_v34  ;;  %v5976_v28 = vmul.f32 1.442695, %v5931_v63  ;;  %v6029_v11 = vsel %vm1871_vm5, %v18360_v43, 0.0 }
 0x7ce   :  { %v5869_v48 = vpop.xlane.xlu1 %5868  ;;  %15783 = vpow2.f32 %v5972_v59 }
 0x7cf   :  { %v18363_v45 = vpop.eup %15773  ;;  %v5974_v12 = vmul.f32 1.442695, %v5930_v51  ;;  %v5933_v17 = vsub.f32 %v18239_v52, %v5869_v48 }
 0x7d0   :  { %v5866_v15 = vpop.xlane.xlu0 %5865  ;;  %v6032_v46 = vsel %vm1867_vm4, %v18363_v45, 0.0  ;;  %v18369_v40 = vpop.eup %15775 }
 0x7d1   :  { %15785 = vpow2.f32 %v5974_v12  ;;  %v5932_v41 = vsub.f32 %v18233_v44, %v5866_v15  ;;  %6033 = vadd.xlane.f32.xlu0 %v6032_v46  ;;  %6030 = vadd.xlane.f32.xlu1 %v6029_v11  ;;  %v6035_v33 = vsel %vm1871_vm5, %v18369_v40, 0.0  ;;  %v5980_v52 = vmul.f32 1.442695, %v5933_v17 }
 0x7d2   :  { %v5875_v10 = vpop.xlane.xlu1 %5874  ;;  %15787 = vpow2.f32 %v5976_v28 }
 0x7d3   :  { %v18372_v7 = vpop.eup %15777  ;;  %v5978_v29 = vmul.f32 1.442695, %v5932_v41  ;;  %v5935_v12 = vsub.f32 %v18209_v31, %v5875_v10 }
 0x7d4   :  { %v5872_v16 = vpop.xlane.xlu0 %5871  ;;  %v6038_v1 = vsel %vm1867_vm4, %v18372_v7, 0.0  ;;  %v18378_v61 = vpop.eup %15779 }
 0x7d5   :  { %v5934_v22 = vsub.f32 %v18203_v26, %v5872_v16  ;;  %6039 = vadd.xlane.f32.xlu0 %v6038_v1  ;;  %6036 = vadd.xlane.f32.xlu1 %v6035_v33  ;;  %15789 = vpow2.f32 %v5978_v29  ;;  %v6041_v51 = vsel %vm1871_vm5, %v18378_v61, 0.0  ;;  %v5984_v10 = vmul.f32 1.442695, %v5935_v12 }
 0x7d6   :  { %v5881_v44 = vpop.xlane.xlu1 %5880 }
 0x7d7   :  { %v18381_v59 = vpop.eup %15781  ;;  %v5982_v63 = vmul.f32 1.442695, %v5934_v22  ;;  %v5937_v33 = vsub.f32 %v18255_v37, %v5881_v44 }
 0x7d8   :  { %v5878_v25 = vpop.xlane.xlu0 %5877  ;;  %v6044_v34 = vsel %vm1867_vm4, %v18381_v59, 0.0  ;;  %v18388_v28 = vpop.eup %15783 }
 0x7d9   :  { %v5936_v26 = vsub.f32 %v18249_v4, %v5878_v25  ;;  %6045 = vadd.xlane.f32.xlu0 %v6044_v34  ;;  %6042 = vadd.xlane.f32.xlu1 %v6041_v51  ;;  %15791 = vpow2.f32 %v5982_v63  ;;  %v6047_v16 = vsel %vm1871_vm5, %v18388_v28, 0.0  ;;  %v5988_v51 = vmul.f32 1.442695, %v5937_v33 }
 0x7da   :  { %v5887_v15 = vpop.xlane.xlu1 %5886 }
 0x7db   :  { %v18392_v46 = vpop.eup %15785  ;;  %v5986_v48 = vmul.f32 1.442695, %v5936_v26  ;;  %v5939_v11 = vsub.f32 %v18225_v38, %v5887_v15 }
 0x7dc   :  { %v5884_v41 = vpop.xlane.xlu0 %5883  ;;  %v6050_v29 = vsel %vm1867_vm4, %v18392_v46, 0.0  ;;  %v18399_v4 = vpop.eup %15787 }
 0x7dd   :  { %15793 = vpow2.f32 %v5986_v48  ;;  %v5938_v31 = vsub.f32 %v18219_v55, %v5884_v41  ;;  %6051 = vadd.xlane.f32.xlu0 %v6050_v29  ;;  %6048 = vadd.xlane.f32.xlu1 %v6047_v16  ;;  %v5992_v38 = vmul.f32 1.442695, %v5939_v11  ;;  %v6053_v63 = vsel %vm1871_vm5, %v18399_v4, 0.0 }
 0x7de   :  { %v5893_v1 = vpop.xlane.xlu1 %5892  ;;  %15795 = vpow2.f32 %v5980_v52 }
 0x7df   :  { %v5990_v22 = vmul.f32 1.442695, %v5938_v31  ;;  %v18405_v25 = vpop.eup %15789  ;;  %v5941_v55 = vsub.f32 %v18269_v58, %v5893_v1 }
 0x7e0   :  { %v5890_v17 = vpop.xlane.xlu0 %5889  ;;  %v6056_v37 = vsel %vm1867_vm4, %v18405_v25, 0.0 }
 0x7e1   :  { %15797 = vpow2.f32 %v5990_v22  ;;  %6054 = vadd.xlane.f32.xlu1 %v6053_v63  ;;  %v5940_v26 = vsub.f32 %v18265_v56, %v5890_v17  ;;  %v5996_v52 = vmul.f32 1.442695, %v5941_v55 }
 0x7e2   :  { %15799 = vpow2.f32 %v5984_v10  ;;  %v5899_v34 = vpop.xlane.xlu1 %5898 }
 0x7e3   :  { %15801 = vpow2.f32 %v5992_v38  ;;  %v18411_v44 = vpop.eup %15791  ;;  %v5943_v48 = vsub.f32 %v18241_v24, %v5899_v34  ;;  %v5994_v58 = vmul.f32 1.442695, %v5940_v26 }
 0x7e4   :  { %v5896_v12 = vpop.xlane.xlu0 %5895  ;;  %15803 = vpow2.f32 %v5988_v51  ;;  %v6062_v31 = vsel %vm1867_vm4, %v18411_v44, 0.0 }
 0x7e5   :  { %v5942_v15 = vsub.f32 %v18235_v47, %v5896_v12  ;;  %6057 = vadd.xlane.f32.xlu1 %v6056_v37  ;;  %v6000_v24 = vmul.f32 1.442695, %v5943_v48 }
 0x7e6   :  { %v5905_v11 = vpop.xlane.xlu1 %5904 }
 0x7e7   :  { %v18415_v41 = vpop.eup %15793  ;;  %v5998_v29 = vmul.f32 1.442695, %v5942_v15  ;;  %v5945_v1 = vsub.f32 %v18281_v18, %v5905_v11 }
 0x7e8   :  { %v5902_v16 = vpop.xlane.xlu0 %5901  ;;  %v6068_v56 = vsel %vm1867_vm4, %v18415_v41, 0.0  ;;  %v18421_v10 = vpop.eup %15795 }
 0x7e9   :  { %15805 = vpow2.f32 %v5998_v29  ;;  %v5944_v47 = vsub.f32 %v18277_v14, %v5902_v16  ;;  %6069 = vadd.xlane.f32.xlu0 %v6068_v56  ;;  %6063 = vadd.xlane.f32.xlu1 %v6062_v31  ;;  %v6059_v14 = vsel %vm1871_vm5, %v18421_v10, 0.0  ;;  %v6004_v18 = vmul.f32 1.442695, %v5945_v1 }
 0x7ea   :  { %15807 = vpow2.f32 %v5996_v52  ;;  %v5911_v17 = vpop.xlane.xlu1 %5910 }
 0x7eb   :  { %v18425_v33 = vpop.eup %15797  ;;  %15809 = vpow2.f32 %v5994_v58  ;;  %v6002_v38 = vmul.f32 1.442695, %v5944_v47  ;;  %v5947_v26 = vsub.f32 %v18257_v3, %v5911_v17 }
 0x7ec   :  { %v18427_v22 = vpop.eup %15799  ;;  %v5908_v63 = vpop.xlane.xlu0 %5907  ;;  %v6074_v55 = vsel %vm1867_vm4, %v18425_v33, 0.0  ;;  %15811 = vpow2.f32 %v6000_v24 }
 0x7ed   :  { %v18433_v34 = vpop.eup %15801  ;;  %v5946_v51 = vsub.f32 %v18251_v9, %v5908_v63  ;;  %6075 = vadd.xlane.f32.xlu0 %v6074_v55  ;;  %6060 = vadd.xlane.f32.xlu1 %v6059_v14  ;;  %15813 = vpow2.f32 %v6002_v38  ;;  %v6065_v15 = vsel %vm1871_vm5, %v18427_v22, 0.0  ;;  %v6008_v48 = vmul.f32 1.442695, %v5947_v26 }
 0x7ee   :  { %v6077_v37 = vsel %vm1871_vm5, %v18433_v34, 0.0  ;;  %v18441_v52 = vpop.eup %15803  ;;  %15815 = vpow2.f32 %v6004_v18 }
 0x7ef   :  { %v6006_v12 = vmul.f32 1.442695, %v5946_v51  ;;  %v6071_v58 = vsel %vm1871_vm5, %v18441_v52, 0.0 }
 0x7f0   :  { %v5914_v18 = vpop.xlane.xlu0 %5913 }
 0x7f1   :  { %6078 = vadd.xlane.f32.xlu0 %v6077_v37  ;;  %6066 = vadd.xlane.f32.xlu1 %v6065_v15  ;;  %15817 = vpow2.f32 %v6006_v12  ;;  %v5948_v26 = vsub.f32 %v18291_v62, %v5914_v18  ;;  %v5917_v12 = vpop.xlane.xlu1 %5916  ;;  %v22192_v18 = vld [vmem:[#allocation29_spill] sm:$0xff] }
 0x7f2   :  { %15819 = vpow2.f32 %v6008_v48  ;;  %v5949_v15 = vsub.f32 %v18297_v13, %v5917_v12  ;;  %v22193_v12 = vld [vmem:[#allocation118_spill] sm:$0xff] }
 0x7f3   :  { %v18443_v9 = vpop.eup %15805  ;;  %v6010_v48 = vmul.f32 1.442695, %v5948_v26 }
 0x7f4   :  { %v18445_v11 = vpop.eup %15807  ;;  %v6086_v3 = vsel %vm1867_vm4, %v18443_v9, 0.0 }
 0x7f5   :  { %v18451_v29 = vpop.eup %15809  ;;  %6087 = vadd.xlane.f32.xlu0 %v6086_v3  ;;  %6072 = vadd.xlane.f32.xlu1 %v6071_v58  ;;  %v6083_v56 = vsel %vm1871_vm5, %v18445_v11, 0.0  ;;  %v6012_v58 = vmul.f32 1.442695, %v5949_v15 }
 0x7f6   :  { %v18453_v16 = vpop.eup %15811  ;;  %v6080_v31 = vsel %vm1867_vm4, %v18451_v29, 0.0 }
 0x7f7   :  { %v18459_v47 = vpop.eup %15813  ;;  %v6089_v1 = vsel %vm1871_vm5, %v18453_v16, 0.0 }
 0x7f8   :  { %v18461_v24 = vpop.eup %15815  ;;  %v6092_v38 = vsel %vm1867_vm4, %v18459_v47, 0.0 }
 0x7f9   :  { %6084 = vadd.xlane.f32.xlu0 %v6083_v56  ;;  %6081 = vadd.xlane.f32.xlu1 %v6080_v31  ;;  %v6095_v63 = vsel %vm1871_vm5, %v18461_v24, 0.0 }
 0x7fb   :  { %v18467_v17 = vpop.eup %15817 }
 0x7fc   :  { %v6098_v55 = vsel %vm1867_vm4, %v18467_v17, 0.0  ;;  %v18473_v14 = vpop.eup %15819 }
 0x7fd   :  { %6090 = vadd.xlane.f32.xlu0 %v6089_v1  ;;  %6093 = vadd.xlane.f32.xlu1 %v6092_v38  ;;  %v6101_v51 = vsel %vm1871_vm5, %v18473_v14, 0.0  ;;  %v6294_v38 = vsel %vm2240_vm3, %v18303_v49, 0 }
 0x801   :  { %6096 = vadd.xlane.f32.xlu0 %v6095_v63  ;;  %6099 = vadd.xlane.f32.xlu1 %v6098_v55 }
 0x805   :  { %6102 = vadd.xlane.f32.xlu0 %v6101_v51 }
 0x812   :  { %6974 = vrot.lane.b32.xlu1 %v16550_v35, %s16149_s30 }
 0x81b   :  { %6976 = vrot.lane.b32.xlu0 %v16601_v39, %s16149_s30 }
 0x822   :  { %v6016_v37 = vpop.xlane.xlu0 %6015 }
 0x823   :  { %15821 = vrcp.f32 %v6016_v37  ;;  %v6343_v37 = vsel %vm2240_vm3, %v22193_v12, 0 }
 0x824   :  { %v6019_v3 = vpop.xlane.xlu1 %6018 }
 0x825   :  { %15823 = vrcp.f32 %v6019_v3  ;;  %v22194_v3 = vld [vmem:[#allocation20_spill] sm:$0xff] }
 0x826   :  { %15825 = vpow2.f32 %v6010_v48 }
 0x827   :  { %15827 = vpow2.f32 %v6012_v58 }
 0x82d   :  { %v15822_v56 = vpop.eup %15821 }
 0x82e   :  { %v6111_v35 = vmul.f32 %v15822_v56, %v18329_v57  ;;  %v22195_v56 = vld [vmem:[#allocation33_spill] sm:$0xff] }
 0x82f   :  { %v15824_v31 = vpop.eup %15823 }
 0x830   :  { %v6113_v39 = vmul.f32 %v15824_v31, %v18333_v21  ;;  %v18485_v1 = vpop.eup %15825 }
 0x831   :  { %v6104_v13 = vsel %vm1867_vm4, %v18485_v1, 0.0  ;;  %v18492_v63 = vpop.eup %15827 }
 0x832   :  { %v6174_v62 = vpack.c.bf16 %v6113_v39, %v6111_v35  ;;  %v6107_v21 = vsel %vm1871_vm5, %v18492_v63, 0.0  ;;  %v22196_v39 = vld [vmem:[#allocation115_spill] sm:$0xff] }
 0x834   :  { %15079 = vmatmul.mubr.msk.bf16.vlgmr.msra.gmra.mrb[184].mxu0 %vm1867_vm4, %v6174_v62 }
 0x835   :  { %15089 = vmatpush3.bf16.msra.mxu0 %v6294_v38  ;;  %15090 = vmatprep.mubr.msk.bf16.mxu0 %vm16146_vm1, %v22023_v36 }
 0x836   :  { %6105 = vadd.xlane.f32.xlu1 %v6104_v13  ;;  %15100 = vmatprep.subr.bf16.mxu0 %v22023_v36  ;;  %v22197_v13 = vld [vmem:[#allocation36_spill] sm:$0xff] }
 0x83a   :  { %6108 = vadd.xlane.f32.xlu0 %v6107_v21 }
 0x847   :  { %7078 = vrot.lane.b32.xlu1 %v16610_v0, %s16149_s30 }
 0x84b   :  { %7076 = vrot.lane.b32.xlu1 %v16564_v2, %s16149_s30 }
 0x84f   :  { %7180 = vrot.lane.b32.xlu1 %v22024_v19, %s16149_s30 }
 0x850   :  { %7027 = vrot.lane.b32.xlu0 %v16604_v50, %s16149_s30 }
 0x852   :  { %v6022_v49 = vpop.xlane.xlu0 %6021 }
 0x853   :  { %7231 = vrot.lane.b32.xlu1 %v16629_v30, %s16149_s30  ;;  %15829 = vrcp.f32 %v6022_v49  ;;  %v22198_v49 = vld [vmem:[#allocation34_spill] sm:$0xff] }
 0x854   :  { %7025 = vrot.lane.b32.xlu0 %v16556_v42, %s16149_s30 }
 0x856   :  { %v6028_v2 = vpop.xlane.xlu0 %6027 }
 0x857   :  { %7229 = vrot.lane.b32.xlu1 %v22099_v6, %s16149_s30 }
 0x858   :  { %7129 = vrot.lane.b32.xlu0 %v16616_v23, %s16149_s30 }
 0x85a   :  { %v6025_v0 = vpop.xlane.xlu1 %6024 }
 0x85b   :  { %15831 = vrcp.f32 %v6025_v0  ;;  %7333 = vrot.lane.b32.xlu1 %v22101_v32, %s16149_s30 }
 0x85c   :  { %7127 = vrot.lane.b32.xlu0 %v16573_v27, %s16149_s30  ;;  %15833 = vrcp.f32 %v6028_v2  ;;  %v22190_v27 = vld [vmem:[#allocation32_spill] sm:$0xff] }
 0x85d   :  { %v15830_v19 = vpop.eup %15829 }
 0x85e   :  { %v6034_v50 = vpop.xlane.xlu0 %6033  ;;  %v6031_v30 = vpop.xlane.xlu1 %6030  ;;  %v6115_v32 = vmul.f32 %v15830_v19, %v18343_v54 }
 0x85f   :  { %7331 = vrot.lane.b32.xlu1 %v22104_v5, %s16149_s30  ;;  %15835 = vrcp.f32 %v6031_v30 }
 0x860   :  { %7178 = vrot.lane.b32.xlu0 %v22026_v60, %s16149_s30  ;;  %15837 = vrcp.f32 %v6034_v50  ;;  %v22191_v60 = vld [vmem:[#allocation35_spill] sm:$0xff] }
 0x862   :  { %v6040_v42 = vpop.xlane.xlu0 %6039  ;;  %v6037_v23 = vpop.xlane.xlu1 %6036 }
 0x863   :  { %7382 = vrot.lane.b32.xlu1 %v22035_v20, %s16149_s30  ;;  %15839 = vrcp.f32 %v6037_v23  ;;  %v22200_v23 = vld [vmem:[#allocation38_spill] sm:$0xff] }
 0x864   :  { %7282 = vrot.lane.b32.xlu0 %v22190_v27, %s16149_s30  ;;  %15841 = vrcp.f32 %v6040_v42  ;;  %v22201_v27 = vld [vmem:[#allocation19_spill] sm:$0xff] }
 0x865   :  { %v15832_v6 = vpop.eup %15831 }
 0x866   :  { %v6117_v5 = vmul.f32 %v15832_v6, %v18355_v53  ;;  %v6046_v57 = vpop.xlane.xlu0 %6045  ;;  %v6043_v55 = vpop.xlane.xlu1 %6042 }
 0x867   :  { %7486 = vrot.lane.b32.xlu1 %v22191_v60, %s16149_s30  ;;  %v15834_v51 = vpop.eup %15833  ;;  %15843 = vrcp.f32 %v6043_v55 }
 0x868   :  { %7280 = vrot.lane.b32.xlu0 %v22192_v18, %s16149_s30  ;;  %v6175_v20 = vpack.c.bf16 %v6117_v5, %v6115_v32  ;;  %15845 = vrcp.f32 %v6046_v57  ;;  %v6119_v15 = vmul.f32 %v15834_v51, %v18349_v8  ;;  %v22202_v57 = vld [vmem:[#allocation120_spill] sm:$0xff] }
 0x869   :  { %v15836_v26 = vpop.eup %15835  ;;  %v6490_v55 = vsel %vm2240_vm3, %v22202_v57, 0  ;;  %v22203_v18 = vld [vmem:[#allocation24_spill] sm:$0xff] }
 0x86a   :  { %v6052_v54 = vpop.xlane.xlu0 %6051  ;;  %15085 = vmatmul.mubr.msk.bf16.vlgmr.msra.gmra.mrb[208].mxu1 %vm1867_vm4, %v6175_v20  ;;  %v6049_v53 = vpop.xlane.xlu1 %6048  ;;  %v6121_v48 = vmul.f32 %v15836_v26, %v18360_v43  ;;  %v6392_v43 = vsel %vm2240_vm3, %v22196_v39, 0  ;;  %v22204_v20 = vld [vmem:[#allocation37_spill] sm:$0xff] }
 0x86b   :  { %15095 = vmatpush3.bf16.msra.mxu1 %v6343_v37  ;;  %7484 = vrot.lane.b32.xlu1 %v22194_v3, %s16149_s30  ;;  %v15838_v58 = vpop.eup %15837  ;;  %15847 = vrcp.f32 %v6049_v53  ;;  %v22205_v53 = vld [vmem:[#allocation117_spill] sm:$0xff]  ;;  %v22207_v3 = vld [vmem:[#allocation22_spill] sm:$0xff] }
 0x86c   :  { %7384 = vrot.lane.b32.xlu0 %v22195_v56, %s16149_s30  ;;  %15096 = vmatprep.mubr.msk.bf16.mxu1 %vm16146_vm1, %v22023_v36  ;;  %15849 = vrcp.f32 %v6052_v54  ;;  %v6176_v31 = vpack.c.bf16 %v6121_v48, %v6119_v15  ;;  %v6123_v62 = vmul.f32 %v15838_v58, %v18363_v45  ;;  %v6539_v15 = vsel %vm2240_vm3, %v22205_v53, 0  ;;  %v22206_v48 = vld [vmem:[#allocation39_spill] sm:$0xff]  ;;  %v22208_v56 = vld [vmem:[#allocation122_spill] sm:$0xff] }
 0x86d   :  { %15106 = vmatprep.subr.bf16.mxu1 %v22023_v36  ;;  %v15840_v35 = vpop.eup %15839  ;;  %v22221_v53 = vld [vmem:[#allocation123_spill] sm:$0xff] }
 0x86e   :  { %v6055_v8 = vpop.xlane.xlu1 %6054  ;;  %v6125_v38 = vmul.f32 %v15840_v35, %v18369_v40  ;;  %15091 = vmatmul.mubr.msk.bf16.vlgmr.msra.gmra.mrb[188].mxu0 %vm1867_vm4, %v6176_v31  ;;  %v15842_v21 = vpop.eup %15841  ;;  %v22199_v40 = vld [vmem:[#allocation116_spill] sm:$0xff]  ;;  %v6588_v31 = vsel %vm2240_vm3, %v22208_v56, 0  ;;  %v22209_v35 = vld [vmem:[#allocation25_spill] sm:$0xff] }
 0x86f   :  { %15851 = vrcp.f32 %v6055_v8  ;;  %7588 = vrot.lane.b32.xlu1 %v22197_v13, %s16149_s30  ;;  %15101 = vmatpush3.bf16.msra.mxu0 %v6392_v43  ;;  %v6441_v50 = vsel %vm2240_vm3, %v22199_v40, 0  ;;  %v6127_v30 = vmul.f32 %v15842_v21, %v18372_v7  ;;  %v22210_v8 = vld [vmem:[#allocation21_spill] sm:$0xff]  ;;  %v22212_v13 = vld [vmem:[#allocation40_spill] sm:$0xff] }
 0x870   :  { %7435 = vrot.lane.b32.xlu0 %v22198_v49, %s16149_s30  ;;  %v6177_v2 = vpack.c.bf16 %v6125_v38, %v6123_v62  ;;  %15102 = vmatprep.mubr.msk.bf16.mxu0 %vm16146_vm1, %v22023_v36  ;;  %v22211_v62 = vld [vmem:[#allocation42_spill] sm:$0xff]  ;;  %v22213_v40 = vld [vmem:[#allocation45_spill] sm:$0xff] }
 0x871   :  { %15112 = vmatprep.subr.bf16.mxu0 %v22023_v36  ;;  %v15844_v45 = vpop.eup %15843 }
 0x872   :  { %v6058_v0 = vpop.xlane.xlu1 %6057  ;;  %v6129_v42 = vmul.f32 %v15844_v45, %v18378_v61  ;;  %15097 = vmatmul.mubr.msk.bf16.vlgmr.msra.gmra.mrb[212].mxu1 %vm1867_vm4, %v6177_v2  ;;  %v15846_v19 = vpop.eup %15845 }
 0x873   :  { %7639 = vrot.lane.b32.xlu1 %v22200_v23, %s16149_s30  ;;  %15107 = vmatpush3.bf16.msra.mxu1 %v6441_v50  ;;  %v6131_v60 = vmul.f32 %v15846_v19, %v18381_v59  ;;  %15853 = vrcp.f32 %v6058_v0 }
 0x874   :  { %7433 = vrot.lane.b32.xlu0 %v22201_v27, %s16149_s30  ;;  %v6178_v6 = vpack.c.bf16 %v6129_v42, %v6127_v30  ;;  %15108 = vmatprep.mubr.msk.bf16.mxu1 %vm16146_vm1, %v22023_v36  ;;  %v22214_v30 = vld [vmem:[#allocation28_spill] sm:$0xff]  ;;  %v22215_v27 = vld [vmem:[#allocation119_spill] sm:$0xff] }
 0x875   :  { %15118 = vmatprep.subr.bf16.mxu1 %v22023_v36  ;;  %v15848_v32 = vpop.eup %15847 }
 0x876   :  { %v6070_v7 = vpop.xlane.xlu0 %6069  ;;  %v6064_v5 = vpop.xlane.xlu1 %6063  ;;  %v6133_v51 = vmul.f32 %v15848_v32, %v18388_v28  ;;  %15103 = vmatmul.mubr.msk.bf16.vlgmr.msra.gmra.mrb[192].mxu0 %vm1867_vm4, %v6178_v6  ;;  %v6637_v6 = vsel %vm2240_vm3, %v22215_v27, 0 }
 0x877   :  { %v15850_v61 = vpop.eup %15849  ;;  %7637 = vrot.lane.b32.xlu1 %v22203_v18, %s16149_s30  ;;  %15113 = vmatpush3.bf16.msra.mxu0 %v6490_v55 }
 0x878   :  { %7537 = vrot.lane.b32.xlu0 %v22204_v20, %s16149_s30  ;;  %v6179_v12 = vpack.c.bf16 %v6133_v51, %v6131_v60  ;;  %15114 = vmatprep.mubr.msk.bf16.mxu0 %vm16146_vm1, %v22023_v36  ;;  %v6135_v59 = vmul.f32 %v15850_v61, %v18392_v46  ;;  %v22218_v60 = vld [vmem:[#allocation124_spill] sm:$0xff] }
 0x879   :  { %v15852_v26 = vpop.eup %15851  ;;  %15124 = vmatprep.subr.bf16.mxu0 %v22023_v36  ;;  %v6686_v51 = vsel %vm2240_vm3, %v22218_v60, 0 }
 0x87a   :  { %v6137_v28 = vmul.f32 %v15852_v26, %v18399_v4  ;;  %v6076_v37 = vpop.xlane.xlu0 %6075  ;;  %v6061_v54 = vpop.xlane.xlu1 %6060  ;;  %15109 = vmatmul.mubr.msk.bf16.vlgmr.msra.gmra.mrb[216].mxu1 %vm1867_vm4, %v6179_v12  ;;  %v22219_v26 = vld [vmem:[#allocation48_spill] sm:$0xff] }
 0x87b   :  { %7741 = vrot.lane.b32.xlu1 %v22206_v48, %s16149_s30  ;;  %15119 = vmatpush3.bf16.msra.mxu1 %v6539_v15  ;;  %15855 = vrcp.f32 %v6061_v54  ;;  %v6735_v15 = vsel %vm2240_vm3, %v22221_v53, 0 }
 0x87c   :  { %7535 = vrot.lane.b32.xlu0 %v22207_v3, %s16149_s30  ;;  %v6180_v58 = vpack.c.bf16 %v6137_v28, %v6135_v59  ;;  %15120 = vmatprep.mubr.msk.bf16.mxu1 %vm16146_vm1, %v22023_v36  ;;  %15857 = vrcp.f32 %v6064_v5  ;;  %v22217_v5 = vld [vmem:[#allocation41_spill] sm:$0xff]  ;;  %v22220_v59 = vld [vmem:[#allocation43_spill] sm:$0xff] }
 0x87d   :  { %15130 = vmatprep.subr.bf16.mxu1 %v22023_v36  ;;  %v15854_v38 = vpop.eup %15853 }
 0x87e   :  { %v6079_v46 = vpop.xlane.xlu0 %6078  ;;  %v6067_v4 = vpop.xlane.xlu1 %6066  ;;  %15115 = vmatmul.mubr.msk.bf16.vlgmr.msra.gmra.mrb[196].mxu0 %vm1867_vm4, %v6180_v58  ;;  %v6139_v45 = vmul.f32 %v15854_v38, %v18405_v25  ;;  %v22222_v58 = vld [vmem:[#allocation50_spill] sm:$0xff] }
 0x87f   :  { %7739 = vrot.lane.b32.xlu1 %v22209_v35, %s16149_s30  ;;  %15125 = vmatpush3.bf16.msra.mxu0 %v6588_v31  ;;  %15859 = vrcp.f32 %v6067_v4  ;;  %v22224_v31 = vld [vmem:[#allocation121_spill] sm:$0xff] }
 0x880   :  { %7586 = vrot.lane.b32.xlu0 %v22210_v8, %s16149_s30  ;;  %15126 = vmatprep.mubr.msk.bf16.mxu0 %vm16146_vm1, %v22023_v36  ;;  %15861 = vrcp.f32 %v6070_v7  ;;  %v6784_v35 = vsel %vm2240_vm3, %v22224_v31, 0 }
 0x881   :  { %15136 = vmatprep.subr.bf16.mxu0 %v22023_v36  ;;  %15863 = vrcp.f32 %v6079_v46 }
 0x882   :  { %v6088_v39 = vpop.xlane.xlu0 %6087  ;;  %v6073_v43 = vpop.xlane.xlu1 %6072 }
 0x883   :  { %8207 = vrot.lane.b32.xlu1 %v22211_v62, %s16149_s30  ;;  %15865 = vrcp.f32 %v6073_v43  ;;  %v22226_v62 = vld [vmem:[#allocation126_spill] sm:$0xff] }
 0x884   :  { %7690 = vrot.lane.b32.xlu0 %v22212_v13, %s16149_s30  ;;  %15867 = vrcp.f32 %v6076_v37  ;;  %v6833_v38 = vsel %vm2240_vm3, %v22226_v62, 0 }
 0x885   :  { %v15856_v21 = vpop.eup %15855 }
 0x886   :  { %v6085_v49 = vpop.xlane.xlu0 %6084  ;;  %v6082_v2 = vpop.xlane.xlu1 %6081  ;;  %v6141_v0 = vmul.f32 %v15856_v21, %v18421_v10  ;;  %v22216_v10 = vld [vmem:[#allocation46_spill] sm:$0xff] }
 0x887   :  { %15869 = vrcp.f32 %v6085_v49  ;;  %8305 = vrot.lane.b32.xlu1 %v22213_v40, %s16149_s30  ;;  %v15858_v50 = vpop.eup %15857  ;;  %v22227_v49 = vld [vmem:[#allocation49_spill] sm:$0xff] }
 0x888   :  { %15871 = vrcp.f32 %v6082_v2  ;;  %7688 = vrot.lane.b32.xlu0 %v22214_v30, %s16149_s30  ;;  %v6181_v42 = vpack.c.bf16 %v6141_v0, %v6139_v45  ;;  %v6143_v32 = vmul.f32 %v15858_v50, %v18411_v44  ;;  %v22228_v0 = vld [vmem:[#allocation125_spill] sm:$0xff] }
 0x889   :  { %v15860_v23 = vpop.eup %15859  ;;  %v6882_v40 = vsel %vm2240_vm3, %v22228_v0, 0 }
 0x88a   :  { %v6091_v19 = vpop.xlane.xlu0 %6090  ;;  %v6145_v25 = vmul.f32 %v15860_v23, %v18427_v22  ;;  %15121 = vmatmul.mubr.msk.bf16.vlgmr.msra.gmra.mrb[220].mxu1 %vm1867_vm4, %v6181_v42  ;;  %v15862_v7 = vpop.eup %15861  ;;  %v22229_v42 = vld [vmem:[#allocation127_spill] sm:$0xff] }
 0x88b   :  { %8403 = vrot.lane.b32.xlu1 %v22216_v10, %s16149_s30  ;;  %15873 = vrcp.f32 %v6091_v19  ;;  %15131 = vmatpush3.bf16.msra.mxu1 %v6637_v6  ;;  %v15864_v61 = vpop.eup %15863  ;;  %v6094_v57 = vpop.xlane.xlu1 %6093  ;;  %v6147_v18 = vmul.f32 %v15862_v7, %v18415_v41  ;;  %v6931_v23 = vsel %vm2240_vm3, %v22229_v42, 0 }
 0x88c   :  { %8158 = vrot.lane.b32.xlu0 %v22217_v5, %s16149_s30  ;;  %v6182_v55 = vpack.c.bf16 %v6145_v25, %v6143_v32  ;;  %15132 = vmatprep.mubr.msk.bf16.mxu1 %vm16146_vm1, %v22023_v36  ;;  %15875 = vrcp.f32 %v6088_v39  ;;  %v6153_v37 = vmul.f32 %v15864_v61, %v18433_v34  ;;  %v22223_v34 = vld [vmem:[#allocation44_spill] sm:$0xff]  ;;  %v22225_v39 = vld [vmem:[#allocation47_spill] sm:$0xff] }
 0x88d   :  { %15142 = vmatprep.subr.bf16.mxu1 %v22023_v36  ;;  %v15866_v44 = vpop.eup %15865 }
 0x88e   :  { %v6097_v22 = vpop.xlane.xlu0 %6096  ;;  %v6149_v20 = vmul.f32 %v15866_v44, %v18441_v52  ;;  %15127 = vmatmul.mubr.msk.bf16.vlgmr.msra.gmra.mrb[200].mxu0 %vm1867_vm4, %v6182_v55  ;;  %v15868_v12 = vpop.eup %15867 }
 0x88f   :  { %8501 = vrot.lane.b32.xlu1 %v22219_v26, %s16149_s30  ;;  %15877 = vrcp.f32 %v6097_v22  ;;  %15137 = vmatpush3.bf16.msra.mxu0 %v6686_v51  ;;  %v6151_v48 = vmul.f32 %v15868_v12, %v18425_v33  ;;  %v6100_v3 = vpop.xlane.xlu1 %6099 }
 0x890   :  { %8256 = vrot.lane.b32.xlu0 %v22220_v59, %s16149_s30  ;;  %v6183_v54 = vpack.c.bf16 %v6149_v20, %v6147_v18  ;;  %15138 = vmatprep.mubr.msk.bf16.mxu0 %vm16146_vm1, %v22023_v36  ;;  %15879 = vrcp.f32 %v6094_v57 }
 0x891   :  { %v15870_v28 = vpop.eup %15869  ;;  %15148 = vmatprep.subr.bf16.mxu0 %v22023_v36  ;;  %v6184_v56 = vpack.c.bf16 %v6153_v37, %v6151_v48 }
 0x892   :  { %v15872_v41 = vpop.eup %15871  ;;  %v6103_v52 = vpop.xlane.xlu0 %6102  ;;  %15133 = vmatmul.mubr.msk.bf16.vlgmr.msra.gmra.mrb[224].mxu1 %vm1867_vm4, %v6183_v54  ;;  %v6157_v46 = vmul.f32 %v15870_v28, %v18445_v11 }
 0x893   :  { %8599 = vrot.lane.b32.xlu1 %v22222_v58, %s16149_s30  ;;  %15881 = vrcp.f32 %v6103_v52  ;;  %15143 = vmatpush3.bf16.msra.mxu1 %v6735_v15  ;;  %v6155_v4 = vmul.f32 %v15872_v41, %v18451_v29 }
 0x894   :  { %8354 = vrot.lane.b32.xlu0 %v22223_v34, %s16149_s30  ;;  %15144 = vmatprep.mubr.msk.bf16.mxu1 %vm16146_vm1, %v22023_v36  ;;  %15883 = vrcp.f32 %v6100_v3 }
 0x895   :  { %15154 = vmatprep.subr.bf16.mxu1 %v22023_v36  ;;  %v15874_v33 = vpop.eup %15873  ;;  %v6185_v29 = vpack.c.bf16 %v6157_v46, %v6155_v4 }
 0x896   :  { %15139 = vmatmul.mubr.msk.bf16.vlgmr.msra.gmra.mrb[204].mxu0 %vm1867_vm4, %v6184_v56  ;;  %v15876_v8 = vpop.eup %15875  ;;  %v6161_v11 = vmul.f32 %v15874_v33, %v18453_v16 }
 0x897   :  { %15149 = vmatpush3.bf16.msra.mxu0 %v6784_v35  ;;  %15150 = vmatprep.mubr.msk.bf16.mxu0 %vm16146_vm1, %v22023_v36  ;;  %v6159_v13 = vmul.f32 %v15876_v8, %v18443_v9 }
 0x898   :  { %8452 = vrot.lane.b32.xlu0 %v22225_v39, %s16149_s30  ;;  %15160 = vmatprep.subr.bf16.mxu0 %v22023_v36 }
 0x899   :  { %v15878_v43 = vpop.eup %15877  ;;  %v6186_v2 = vpack.c.bf16 %v6161_v11, %v6159_v13 }
 0x89a   :  { %15145 = vmatmul.mubr.msk.bf16.vlgmr.msra.gmra.mrb[228].mxu1 %vm1867_vm4, %v6185_v29  ;;  %v15880_v21 = vpop.eup %15879  ;;  %v6165_v16 = vmul.f32 %v15878_v43, %v18461_v24 }
 0x89b   :  { %15155 = vmatpush3.bf16.msra.mxu1 %v6833_v38  ;;  %15156 = vmatprep.mubr.msk.bf16.mxu1 %vm16146_vm1, %v22023_v36  ;;  %v6163_v9 = vmul.f32 %v15880_v21, %v18459_v47  ;;  %v6977_v47 = vpop.permute.xlu0 %6976 }
 0x89c   :  { %8550 = vrot.lane.b32.xlu0 %v22227_v49, %s16149_s30  ;;  %15166 = vmatprep.subr.bf16.mxu1 %v22023_v36 }
 0x89d   :  { %v15882_v45 = vpop.eup %15881  ;;  %v6187_v30 = vpack.c.bf16 %v6165_v16, %v6163_v9 }
 0x89e   :  { %15151 = vmatmul.mubr.msk.bf16.vlgmr.msra.gmra.mrb[208].mxu0 %vm1867_vm4, %v6186_v2  ;;  %v15884_v50 = vpop.eup %15883  ;;  %v6169_v24 = vmul.f32 %v15882_v45, %v18473_v14  ;;  %v6982_v14 = vsel %vm1114_vm2, %v6977_v47, 0 }
 0x89f   :  { %15161 = vmatpush3.bf16.msra.mxu0 %v6882_v40  ;;  %15162 = vmatprep.mubr.msk.bf16.mxu0 %vm16146_vm1, %v22023_v36  ;;  %v6167_v19 = vmul.f32 %v15884_v50, %v18467_v17  ;;  %v6975_v17 = vpop.permute.xlu1 %6974 }
 0x8a0   :  { %15172 = vmatprep.subr.bf16.mxu0 %v22023_v36 }
 0x8a1   :  { %v6188_v27 = vpack.c.bf16 %v6169_v24, %v6167_v19 }
 0x8a2   :  { %15157 = vmatmul.mubr.msk.bf16.vlgmr.msra.gmra.mrb[232].mxu1 %vm1867_vm4, %v6187_v30 }
 0x8a3   :  { %15167 = vmatpush3.bf16.msra.mxu1 %v6931_v23  ;;  %15168 = vmatprep.mubr.msk.bf16.mxu1 %vm16146_vm1, %v22023_v36 }
 0x8a4   :  { %15178 = vmatprep.subr.bf16.mxu1 %v22023_v36 }
 0x8a6   :  { %15163 = vmatmul.mubr.msk.bf16.vlgmr.msra.gmra.mrb[212].mxu0 %vm1867_vm4, %v6188_v27 }
 0x8a7   :  { %15174 = vmatprep.mubr.msk.bf16.mxu0 %vm16146_vm1, %v22023_v36 }
 0x8a8   :  { %15173 = vmatpush3.bf16.xpose.msra.mxu0 %v6982_v14 }
 0x8a9   :  { %15184 = vmatprep.subr.bf16.mxu0 %v22023_v36 }
 0x8af   :  { %15175 = vmatmul.mubr.msk.bf16.vlgmr.msra.gmra.mrb[216].mxu0 %vm1114_vm2, %v6975_v17 }
 0x8b0   :  { %15186 = vmatprep.mubr.msk.bf16.mxu0 %vm16146_vm1, %v22023_v36 }
 0x8c3   :  { %v6106_v6 = vpop.xlane.xlu1 %6105 }
 0x8c4   :  { %15885 = vrcp.f32 %v6106_v6 }
 0x8c7   :  { %v6109_v32 = vpop.xlane.xlu0 %6108  ;;  %v7079_v25 = vpop.permute.xlu1 %7078 }
 0x8c8   :  { %15887 = vrcp.f32 %v6109_v32  ;;  %v7084_v10 = vsel %vm1114_vm2, %v7079_v25, 0 }
 0x8c9   :  { %15185 = vmatpush3.bf16.xpose.msra.mxu0 %v7084_v10 }
 0x8ca   :  { %15196 = vmatprep.subr.bf16.mxu0 %v22023_v36 }
 0x8cb   :  { %v7028_v7 = vpop.permute.xlu0 %7027  ;;  %v7077_v5 = vpop.permute.xlu1 %7076 }
 0x8cc   :  { %v7033_v12 = vsel %vm1114_vm2, %v7028_v7, 0 }
 0x8ce   :  { %v15886_v55 = vpop.eup %15885 }
 0x8cf   :  { %v7026_v61 = vpop.permute.xlu0 %7025  ;;  %v7181_v57 = vpop.permute.xlu1 %7180  ;;  %v6171_v60 = vmul.f32 %v15886_v55, %v18485_v1 }
 0x8d0   :  { %v7186_v44 = vsel %vm1114_vm2, %v7181_v57, 0  ;;  %15187 = vmatmul.mubr.msk.bf16.vlgmr.msra.gmra.mrb[220].mxu0 %vm1114_vm2, %v7077_v5 }
 0x8d1   :  { %15197 = vmatpush3.bf16.xpose.msra.mxu0 %v7186_v44  ;;  %15198 = vmatprep.mubr.msk.bf16.mxu0 %vm16146_vm1, %v22023_v36 }
 0x8d2   :  { %v15888_v22 = vpop.eup %15887  ;;  %15208 = vmatprep.subr.bf16.mxu0 %v22023_v36 }
 0x8d3   :  { %v6173_v51 = vmul.f32 %v15888_v22, %v18492_v63  ;;  %v7130_v18 = vpop.permute.xlu0 %7129  ;;  %v7232_v20 = vpop.permute.xlu1 %7231 }
 0x8d4   :  { %v7135_v1 = vsel %vm1114_vm2, %v7130_v18, 0  ;;  %v7237_v48 = vsel %vm1114_vm2, %v7232_v20, 0 }
 0x8d5   :  { %v6189_v26 = vpack.c.bf16 %v6173_v51, %v6171_v60 }
 0x8d7   :  { %v7128_v59 = vpop.permute.xlu0 %7127  ;;  %15169 = vmatmul.mubr.msk.bf16.vlgmr.msra.gmra.mrb[236].mxu1 %vm1867_vm4, %v6189_v26  ;;  %v7230_v28 = vpop.permute.xlu1 %7229 }
 0x8d8   :  { %15179 = vmatpush3.bf16.xpose.msra.mxu1 %v7033_v12  ;;  %15180 = vmatprep.mubr.msk.bf16.mxu1 %vm16146_vm1, %v22023_v36 }
 0x8d9   :  { %15190 = vmatprep.subr.bf16.mxu1 %v22023_v36 }
 0x8db   :  { %v7179_v37 = vpop.permute.xlu0 %7178  ;;  %v7334_v54 = vpop.permute.xlu1 %7333 }
 0x8dc   :  { %15199 = vmatmul.mubr.msk.bf16.vlgmr.msra.gmra.mrb[224].mxu0 %vm1114_vm2, %v7179_v37  ;;  %v7339_v4 = vsel %vm1114_vm2, %v7334_v54, 0 }
 0x8dd   :  { %15210 = vmatprep.mubr.msk.bf16.mxu0 %vm16146_vm1, %v22023_v36 }
 0x8df   :  { %v7283_v63 = vpop.permute.xlu0 %7282  ;;  %15181 = vmatmul.mubr.msk.bf16.vlgmr.msra.gmra.mrb[240].mxu1 %vm1114_vm2, %v7026_v61  ;;  %v7332_v41 = vpop.permute.xlu1 %7331 }
 0x8e0   :  { %v7288_v52 = vsel %vm1114_vm2, %v7283_v63, 0  ;;  %15191 = vmatpush3.bf16.xpose.msra.mxu1 %v7135_v1  ;;  %15192 = vmatprep.mubr.msk.bf16.mxu1 %vm16146_vm1, %v22023_v36 }
 0x8e1   :  { %15209 = vmatpush3.bf16.xpose.msra.mxu0 %v7288_v52  ;;  %15202 = vmatprep.subr.bf16.mxu1 %v22023_v36 }
 0x8e2   :  { %15220 = vmatprep.subr.bf16.mxu0 %v22023_v36 }
 0x8e3   :  { %v7281_v53 = vpop.permute.xlu0 %7280  ;;  %v7383_v15 = vpop.permute.xlu1 %7382 }
 0x8e7   :  { %v7385_v3 = vpop.permute.xlu0 %7384  ;;  %15193 = vmatmul.mubr.msk.bf16.vlgmr.msra.gmra.mrb[244].mxu1 %vm1114_vm2, %v7128_v59  ;;  %v7487_v34 = vpop.permute.xlu1 %7486 }
 0x8e8   :  { %v7390_v58 = vsel %vm1114_vm2, %v7385_v3, 0  ;;  %15203 = vmatpush3.bf16.xpose.msra.mxu1 %v7237_v48  ;;  %15211 = vmatmul.mubr.msk.bf16.vlgmr.msra.gmra.mrb[228].mxu0 %vm1114_vm2, %v7281_v53  ;;  %v7492_v31 = vsel %vm1114_vm2, %v7487_v34, 0 }
 0x8e9   :  { %15221 = vmatpush3.bf16.xpose.msra.mxu0 %v7390_v58  ;;  %15204 = vmatprep.mubr.msk.bf16.mxu1 %vm16146_vm1, %v22023_v36 }
 0x8ea   :  { %15214 = vmatprep.subr.bf16.mxu1 %v22023_v36  ;;  %15222 = vmatprep.mubr.msk.bf16.mxu0 %vm16146_vm1, %v22023_v36 }
 0x8eb   :  { %v7436_v46 = vpop.permute.xlu0 %7435  ;;  %15232 = vmatprep.subr.bf16.mxu0 %v22023_v36  ;;  %v7485_v56 = vpop.permute.xlu1 %7484 }
 0x8ec   :  { %v7441_v39 = vsel %vm1114_vm2, %v7436_v46, 0 }
 0x8ef   :  { %v7434_v33 = vpop.permute.xlu0 %7433  ;;  %15205 = vmatmul.mubr.msk.bf16.vlgmr.msra.gmra.mrb[248].mxu1 %vm1114_vm2, %v7230_v28  ;;  %v7589_v8 = vpop.permute.xlu1 %7588 }
 0x8f0   :  { %15215 = vmatpush3.bf16.xpose.msra.mxu1 %v7339_v4  ;;  %15223 = vmatmul.mubr.msk.bf16.vlgmr.msra.gmra.mrb[232].mxu0 %vm1114_vm2, %v7383_v15  ;;  %v7594_v29 = vsel %vm1114_vm2, %v7589_v8, 0 }
 0x8f1   :  { %15233 = vmatpush3.bf16.xpose.msra.mxu0 %v7492_v31  ;;  %15216 = vmatprep.mubr.msk.bf16.mxu1 %vm16146_vm1, %v22023_v36 }
 0x8f2   :  { %15226 = vmatprep.subr.bf16.mxu1 %v22023_v36  ;;  %15234 = vmatprep.mubr.msk.bf16.mxu0 %vm16146_vm1, %v22023_v36 }
 0x8f3   :  { %v7538_v35 = vpop.permute.xlu0 %7537  ;;  %15244 = vmatprep.subr.bf16.mxu0 %v22023_v36  ;;  %v7640_v62 = vpop.permute.xlu1 %7639 }
 0x8f4   :  { %v7543_v38 = vsel %vm1114_vm2, %v7538_v35, 0  ;;  %v7645_v2 = vsel %vm1114_vm2, %v7640_v62, 0 }
 0x8f7   :  { %v7536_v11 = vpop.permute.xlu0 %7535  ;;  %15217 = vmatmul.mubr.msk.bf16.vlgmr.msra.gmra.mrb[252].mxu1 %vm1114_vm2, %v7332_v41  ;;  %v7638_v49 = vpop.permute.xlu1 %7637 }
 0x8f8   :  { %15227 = vmatpush3.bf16.xpose.msra.mxu1 %v7441_v39  ;;  %15235 = vmatmul.mubr.msk.bf16.vlgmr.msra.gmra.mrb[236].mxu0 %vm1114_vm2, %v7485_v56 }
 0x8f9   :  { %15245 = vmatpush3.bf16.xpose.msra.mxu0 %v7594_v29  ;;  %15228 = vmatprep.mubr.msk.bf16.mxu1 %vm16146_vm1, %v22023_v36 }
 0x8fa   :  { %15238 = vmatprep.subr.bf16.mxu1 %v22023_v36  ;;  %15246 = vmatprep.mubr.msk.bf16.mxu0 %vm16146_vm1, %v22023_v36 }
 0x8fb   :  { %v7587_v43 = vpop.permute.xlu0 %7586  ;;  %15256 = vmatprep.subr.bf16.mxu0 %v22023_v36  ;;  %v7742_v0 = vpop.permute.xlu1 %7741 }
 0x8fc   :  { %v7747_v23 = vsel %vm1114_vm2, %v7742_v0, 0 }
 0x8ff   :  { %v7691_v13 = vpop.permute.xlu0 %7690  ;;  %15229 = vmatmul.mubr.msk.bf16.vlgmr.msra.gmra.mrb[0].mxu1 %vm1114_vm2, %v7434_v33  ;;  %v7740_v42 = vpop.permute.xlu1 %7739 }
 0x900   :  { %v7696_v21 = vsel %vm1114_vm2, %v7691_v13, 0  ;;  %15239 = vmatpush3.bf16.xpose.msra.mxu1 %v7543_v38  ;;  %15247 = vmatmul.mubr.msk.bf16.vlgmr.msra.gmra.mrb[240].mxu0 %vm1114_vm2, %v7587_v43 }
 0x901   :  { %15257 = vmatpush3.bf16.xpose.msra.mxu0 %v7696_v21  ;;  %15240 = vmatprep.mubr.msk.bf16.mxu1 %vm16146_vm1, %v22023_v36 }
 0x902   :  { %15250 = vmatprep.subr.bf16.mxu1 %v22023_v36  ;;  %15258 = vmatprep.mubr.msk.bf16.mxu0 %vm16146_vm1, %v22023_v36 }
 0x903   :  { %v7689_v16 = vpop.permute.xlu0 %7688  ;;  %15268 = vmatprep.subr.bf16.mxu0 %v22023_v36  ;;  %v8208_v19 = vpop.permute.xlu1 %8207 }
 0x904   :  { %v8213_v47 = vsel %vm2240_vm3, %v8208_v19, 0 }
 0x907   :  { %v8159_v45 = vpop.permute.xlu0 %8158  ;;  %15241 = vmatmul.mubr.msk.bf16.vlgmr.msra.gmra.mrb[4].mxu1 %vm1114_vm2, %v7536_v11  ;;  %v18759_v40 = vpop.f32.mrb[184].mxu0 }
 0x908   :  { %v8164_v9 = vsel %vm2240_vm3, %v8159_v45, 0  ;;  %15251 = vmatpush3.bf16.xpose.msra.mxu1 %v7645_v2  ;;  %15259 = vmatmul.mubr.msk.bf16.vlgmr.msra.gmra.mrb[244].mxu0 %vm1114_vm2, %v7689_v16  ;;  %v15080_v50 = vpop.f32.mrb[185].mxu0 }
 0x909   :  { %15269 = vmatpush3.bf16.msra.mxu0 %v8164_v9  ;;  %15252 = vmatprep.mubr.msk.bf16.mxu1 %vm16146_vm1, %v22023_v36  ;;  %v18765_v24 = vpop.f32.mrb[186].mxu0 }
 0x90a   :  { %15262 = vmatprep.subr.bf16.mxu1 %v22023_v36  ;;  %15270 = vmatprep.mubr.msk.bf16.mxu0 %vm16146_vm1, %v22023_v36  ;;  %v15081_v30 = vpop.f32.mrb[187].mxu0 }
 0x90b   :  { %15280 = vmatprep.subr.bf16.mxu0 %v22023_v36 }
 0x90f   :  { %15253 = vmatmul.mubr.msk.bf16.vlgmr.msra.gmra.mrb[8].mxu1 %vm1114_vm2, %v7638_v49 }
 0x910   :  { %15263 = vmatpush3.bf16.xpose.msra.mxu1 %v7747_v23  ;;  %15264 = vmatprep.mubr.msk.bf16.mxu1 %vm16146_vm1, %v22023_v36 }
 0x911   :  { %15274 = vmatprep.subr.bf16.mxu1 %v22023_v36 }
 0x917   :  { %15265 = vmatmul.mubr.msk.bf16.vlgmr.msra.gmra.mrb[12].mxu1 %vm1114_vm2, %v7740_v42 }
 0x918   :  { %15275 = vmatpush3.bf16.msra.mxu1 %v8213_v47  ;;  %15276 = vmatprep.mubr.msk.bf16.mxu1 %vm16146_vm1, %v22023_v36 }
 0x919   :  { %15286 = vmatprep.subr.bf16.mxu1 %v22023_v36 }
 0x93d   :  { %v18781_v27 = vpop.f32.mrb[208].mxu1 }
 0x93e   :  { %v15086_v14 = vpop.f32.mrb[209].mxu1 }
 0x93f   :  { %v18783_v17 = vpop.f32.mrb[210].mxu1 }
 0x940   :  { %v15087_v6 = vpop.f32.mrb[211].mxu1 }
 0x941   :  { %v18785_v32 = vpop.f32.mrb[188].mxu0 }
 0x942   :  { %v15092_v25 = vpop.f32.mrb[189].mxu0 }
 0x943   :  { %v18787_v10 = vpop.f32.mrb[190].mxu0 }
 0x944   :  { %v15093_v7 = vpop.f32.mrb[191].mxu0 }
 0x945   :  { %v18789_v5 = vpop.f32.mrb[212].mxu1 }
 0x946   :  { %v15098_v61 = vpop.f32.mrb[213].mxu1 }
 0x947   :  { %v18791_v57 = vpop.f32.mrb[214].mxu1 }
 0x948   :  { %v15099_v55 = vpop.f32.mrb[215].mxu1 }
 0x949   :  { %v18793_v44 = vpop.f32.mrb[192].mxu0 }
 0x94a   :  { %v15104_v22 = vpop.f32.mrb[193].mxu0 }
 0x94b   :  { %v18795_v60 = vpop.f32.mrb[194].mxu0 }
 0x94c   :  { %v15105_v51 = vpop.f32.mrb[195].mxu0 }
 0x94d   :  { %v18797_v18 = vpop.f32.mrb[216].mxu1 }
 0x94e   :  { %v15110_v20 = vpop.f32.mrb[217].mxu1 }
 0x94f   :  { %v18799_v26 = vpop.f32.mrb[218].mxu1 }
 0x950   :  { %22230 = vst [vmem:[#allocation32_spill] sm:$0xff] %v18799_v26  ;;  %v15111_v12 = vpop.f32.mrb[219].mxu1 }
 0x951   :  { %v18801_v59 = vpop.f32.mrb[196].mxu0 }
 0x952   :  { %v15116_v28 = vpop.f32.mrb[197].mxu0 }
 0x953   :  { %v18803_v37 = vpop.f32.mrb[198].mxu0 }
 0x954   :  { %22231 = vst [vmem:[#allocation35_spill] sm:$0xff] %v18803_v37  ;;  %v15117_v54 = vpop.f32.mrb[199].mxu0 }
 0x95d   :  { %v18805_v1 = vpop.f32.mrb[220].mxu1 }
 0x95e   :  { %v15122_v63 = vpop.f32.mrb[221].mxu1 }
 0x95f   :  { %v18807_v41 = vpop.f32.mrb[222].mxu1 }
 0x960   :  { %22232 = vst [vmem:[#allocation29_spill] sm:$0xff] %v18807_v41  ;;  %v15123_v52 = vpop.f32.mrb[223].mxu1 }
 0x961   :  { %v18809_v53 = vpop.f32.mrb[200].mxu0 }
 0x962   :  { %22233 = vst [vmem:[#allocation118_spill] sm:$0xff] %v18809_v53  ;;  %v15128_v15 = vpop.f32.mrb[201].mxu0 }
 0x963   :  { %v18811_v48 = vpop.f32.mrb[202].mxu0 }
 0x964   :  { %22234 = vst [vmem:[#allocation20_spill] sm:$0xff] %v18811_v48  ;;  %v15129_v3 = vpop.f32.mrb[203].mxu0 }
 0x965   :  { %v18813_v58 = vpop.f32.mrb[224].mxu1 }
 0x966   :  { %22235 = vst [vmem:[#allocation33_spill] sm:$0xff] %v18813_v58  ;;  %v15134_v34 = vpop.f32.mrb[225].mxu1 }
 0x967   :  { %v18815_v46 = vpop.f32.mrb[226].mxu1 }
 0x968   :  { %22236 = vst [vmem:[#allocation115_spill] sm:$0xff] %v18815_v46  ;;  %v15135_v4 = vpop.f32.mrb[227].mxu1 }
 0x969   :  { %v18817_v56 = vpop.f32.mrb[204].mxu0 }
 0x96a   :  { %22237 = vst [vmem:[#allocation36_spill] sm:$0xff] %v18817_v56  ;;  %v15140_v33 = vpop.f32.mrb[205].mxu0 }
 0x96b   :  { %v18819_v31 = vpop.f32.mrb[206].mxu0 }
 0x96c   :  { %22238 = vst [vmem:[#allocation34_spill] sm:$0xff] %v18819_v31  ;;  %v15141_v35 = vpop.f32.mrb[207].mxu0  ;;  %v18969_v31 = vpop.permute.xlu0 %8256 }
 0x96d   :  { %v18821_v8 = vpop.f32.mrb[228].mxu1 }
 0x96e   :  { %22239 = vst [vmem:[#allocation116_spill] sm:$0xff] %v18821_v8  ;;  %v15146_v39 = vpop.f32.mrb[229].mxu1 }
 0x96f   :  { %v18823_v11 = vpop.f32.mrb[230].mxu1 }
 0x970   :  { %22240 = vst [vmem:[#allocation38_spill] sm:$0xff] %v18823_v11  ;;  %v15147_v29 = vpop.f32.mrb[231].mxu1 }
 0x971   :  { %v18825_v43 = vpop.f32.mrb[208].mxu0 }
 0x972   :  { %22241 = vst [vmem:[#allocation19_spill] sm:$0xff] %v18825_v43  ;;  %v15152_v62 = vpop.f32.mrb[209].mxu0 }
 0x973   :  { %v18827_v38 = vpop.f32.mrb[210].mxu0 }
 0x974   :  { %22242 = vst [vmem:[#allocation120_spill] sm:$0xff] %v18827_v38  ;;  %v15153_v13 = vpop.f32.mrb[211].mxu0 }
 0x975   :  { %v18829_v21 = vpop.f32.mrb[232].mxu1 }
 0x976   :  { %22243 = vst [vmem:[#allocation24_spill] sm:$0xff] %v18829_v21  ;;  %v15158_v49 = vpop.f32.mrb[233].mxu1 }
 0x977   :  { %v18831_v16 = vpop.f32.mrb[234].mxu1 }
 0x978   :  { %22244 = vst [vmem:[#allocation37_spill] sm:$0xff] %v18831_v16  ;;  %v15159_v2 = vpop.f32.mrb[235].mxu1 }
 0x979   :  { %v18833_v45 = vpop.f32.mrb[212].mxu0 }
 0x97a   :  { %22245 = vst [vmem:[#allocation117_spill] sm:$0xff] %v18833_v45  ;;  %v15164_v0 = vpop.f32.mrb[213].mxu0 }
 0x97b   :  { %v18835_v9 = vpop.f32.mrb[214].mxu0 }
 0x97c   :  { %22246 = vst [vmem:[#allocation39_spill] sm:$0xff] %v18835_v9  ;;  %v15165_v50 = vpop.f32.mrb[215].mxu0 }
 0x982   :  { %v18837_v30 = vpop.f32.mrb[216].mxu0 }
 0x983   :  { %v15176_v42 = vpop.f32.mrb[217].mxu0  ;;  %v7790_v23 = vsel %vm1867_vm4, %v18837_v30, -inf }
 0x984   :  { %7791 = vmax.xlane.f32.xlu0 %v7790_v23  ;;  %v18841_v19 = vpop.f32.mrb[218].mxu0 }
 0x985   :  { %v15177_v47 = vpop.f32.mrb[219].mxu0  ;;  %v7793_v14 = vsel %vm1871_vm5, %v18841_v19, -inf }
 0x986   :  { %7794 = vmax.xlane.f32.xlu1 %v7793_v14 }
 0x9a3   :  { %v18845_v6 = vpop.f32.mrb[220].mxu0 }
 0x9a4   :  { %v15188_v25 = vpop.f32.mrb[221].mxu0  ;;  %v7802_v35 = vsel %vm1867_vm4, %v18845_v6, -inf }
 0x9a5   :  { %v18847_v7 = vpop.f32.mrb[222].mxu0 }
 0x9a6   :  { %v15189_v61 = vpop.f32.mrb[223].mxu0  ;;  %v7805_v55 = vsel %vm1871_vm5, %v18847_v7, -inf }
 0x9a7   :  { %7806 = vmax.xlane.f32.xlu1 %v7805_v55 }
 0x9aa   :  { %v18851_v22 = vpop.f32.mrb[236].mxu1 }
 0x9ab   :  { %22247 = vst [vmem:[#allocation22_spill] sm:$0xff] %v18851_v22  ;;  %v15170_v51 = vpop.f32.mrb[237].mxu1 }
 0x9ac   :  { %v18853_v20 = vpop.f32.mrb[238].mxu1 }
 0x9ad   :  { %22248 = vst [vmem:[#allocation122_spill] sm:$0xff] %v18853_v20  ;;  %v15171_v12 = vpop.f32.mrb[239].mxu1 }
 0x9af   :  { %v18855_v28 = vpop.f32.mrb[224].mxu0 }
 0x9b0   :  { %v15200_v54 = vpop.f32.mrb[225].mxu0  ;;  %v7814_v51 = vsel %vm1867_vm4, %v18855_v28, -inf }
 0x9b1   :  { %v18857_v63 = vpop.f32.mrb[226].mxu0 }
 0x9b2   :  { %v18859_v52 = vpop.f32.mrb[240].mxu1  ;;  %v15201_v15 = vpop.f32.mrb[227].mxu0  ;;  %v7817_v14 = vsel %vm1871_vm5, %v18857_v63, -inf }
 0x9b3   :  { %v15182_v3 = vpop.f32.mrb[241].mxu1  ;;  %v7796_v34 = vsel %vm1867_vm4, %v18859_v52, -inf }
 0x9b4   :  { %7797 = vmax.xlane.f32.xlu0 %v7796_v34  ;;  %v18863_v4 = vpop.f32.mrb[242].mxu1 }
 0x9b5   :  { %v15183_v33 = vpop.f32.mrb[243].mxu1  ;;  %v7799_v13 = vsel %vm1871_vm5, %v18863_v4, -inf }
 0x9b8   :  { %7803 = vmax.xlane.f32.xlu0 %v7802_v35 }
 0x9ba   :  { %v18867_v39 = vpop.f32.mrb[244].mxu1 }
 0x9bb   :  { %v15194_v29 = vpop.f32.mrb[245].mxu1  ;;  %v18869_v62 = vpop.f32.mrb[228].mxu0  ;;  %v7808_v47 = vsel %vm1867_vm4, %v18867_v39, -inf }
 0x9bc   :  { %v15212_v49 = vpop.f32.mrb[229].mxu0  ;;  %7800 = vmax.xlane.f32.xlu0 %v7799_v13  ;;  %v18873_v2 = vpop.f32.mrb[246].mxu1 }
 0x9bd   :  { %v15195_v0 = vpop.f32.mrb[247].mxu1  ;;  %v18875_v50 = vpop.f32.mrb[230].mxu0  ;;  %v7811_v42 = vsel %vm1871_vm5, %v18873_v2, -inf }
 0x9be   :  { %v15213_v23 = vpop.f32.mrb[231].mxu0  ;;  %7812 = vmax.xlane.f32.xlu1 %v7811_v42  ;;  %v7829_v29 = vsel %vm1871_vm5, %v18875_v50, -inf  ;;  %v7826_v42 = vsel %vm1867_vm4, %v18869_v62, -inf }
 0x9c0   :  { %7809 = vmax.xlane.f32.xlu0 %v7808_v47 }
 0x9c2   :  { %7818 = vmax.xlane.f32.xlu1 %v7817_v14  ;;  %v18883_v25 = vpop.f32.mrb[248].mxu1 }
 0x9c3   :  { %v15206_v61 = vpop.f32.mrb[249].mxu1  ;;  %v18885_v55 = vpop.f32.mrb[232].mxu0  ;;  %v7820_v35 = vsel %vm1867_vm4, %v18883_v25, -inf }
 0x9c4   :  { %v15224_v12 = vpop.f32.mrb[233].mxu0  ;;  %7815 = vmax.xlane.f32.xlu0 %v7814_v51  ;;  %v18889_v54 = vpop.f32.mrb[250].mxu1 }
 0x9c5   :  { %v15207_v15 = vpop.f32.mrb[251].mxu1  ;;  %v18891_v3 = vpop.f32.mrb[234].mxu0  ;;  %v7823_v34 = vsel %vm1871_vm5, %v18889_v54, -inf }
 0x9c6   :  { %v15225_v33 = vpop.f32.mrb[235].mxu0  ;;  %7824 = vmax.xlane.f32.xlu1 %v7823_v34  ;;  %v7841_v34 = vsel %vm1871_vm5, %v18891_v3, -inf }
 0x9c8   :  { %7821 = vmax.xlane.f32.xlu0 %v7820_v35 }
 0x9ca   :  { %7830 = vmax.xlane.f32.xlu1 %v7829_v29  ;;  %v18899_v13 = vpop.f32.mrb[252].mxu1 }
 0x9cb   :  { %v15218_v49 = vpop.f32.mrb[253].mxu1  ;;  %v18901_v0 = vpop.f32.mrb[236].mxu0  ;;  %v7832_v15 = vsel %vm1867_vm4, %v18899_v13, -inf }
 0x9cc   :  { %v15236_v23 = vpop.f32.mrb[237].mxu0  ;;  %7827 = vmax.xlane.f32.xlu0 %v7826_v42  ;;  %v18905_v47 = vpop.f32.mrb[254].mxu1  ;;  %v7838_v49 = vsel %vm1867_vm4, %v18885_v55, -inf }
 0x9cd   :  { %v15219_v14 = vpop.f32.mrb[255].mxu1  ;;  %v18907_v61 = vpop.f32.mrb[238].mxu0  ;;  %v7835_v51 = vsel %vm1871_vm5, %v18905_v47, -inf }
 0x9ce   :  { %v15237_v12 = vpop.f32.mrb[239].mxu0  ;;  %7836 = vmax.xlane.f32.xlu1 %v7835_v51 }
 0x9d0   :  { %7833 = vmax.xlane.f32.xlu0 %v7832_v15 }
 0x9d2   :  { %7842 = vmax.xlane.f32.xlu1 %v7841_v34  ;;  %v18915_v33 = vpop.f32.mrb[0].mxu1 }
 0x9d3   :  { %v15230_v35 = vpop.f32.mrb[1].mxu1  ;;  %v18917_v29 = vpop.f32.mrb[240].mxu0  ;;  %v7844_v34 = vsel %vm1867_vm4, %v18915_v33, -inf }
 0x9d4   :  { %v15248_v42 = vpop.f32.mrb[241].mxu0  ;;  %7839 = vmax.xlane.f32.xlu0 %v7838_v49  ;;  %v18921_v23 = vpop.f32.mrb[2].mxu1  ;;  %v7853_v35 = vsel %vm1871_vm5, %v18907_v61, -inf }
 0x9d5   :  { %v15231_v14 = vpop.f32.mrb[3].mxu1  ;;  %v18923_v51 = vpop.f32.mrb[242].mxu0  ;;  %v7847_v12 = vsel %vm1871_vm5, %v18921_v23, -inf }
 0x9d6   :  { %v15249_v15 = vpop.f32.mrb[243].mxu0  ;;  %7848 = vmax.xlane.f32.xlu1 %v7847_v12  ;;  %v7850_v14 = vsel %vm1867_vm4, %v18901_v0, -inf }
 0x9d8   :  { %7845 = vmax.xlane.f32.xlu0 %v7844_v34 }
 0x9da   :  { %7854 = vmax.xlane.f32.xlu1 %v7853_v35  ;;  %v18931_v42 = vpop.f32.mrb[4].mxu1 }
 0x9db   :  { %v15242_v49 = vpop.f32.mrb[5].mxu1  ;;  %v18933_v9 = vpop.f32.mrb[244].mxu0  ;;  %v7856_v35 = vsel %vm1867_vm4, %v18931_v42, -inf }
 0x9dc   :  { %v15260_v20 = vpop.f32.mrb[245].mxu0  ;;  %7851 = vmax.xlane.f32.xlu0 %v7850_v14  ;;  %v18937_v15 = vpop.f32.mrb[6].mxu1  ;;  %v7865_v49 = vsel %vm1871_vm5, %v18923_v51, -inf }
 0x9dd   :  { %v15243_v12 = vpop.f32.mrb[7].mxu1  ;;  %v18939_v16 = vpop.f32.mrb[246].mxu0  ;;  %v7859_v34 = vsel %vm1871_vm5, %v18937_v15, -inf }
 0x9de   :  { %v15261_v22 = vpop.f32.mrb[247].mxu0  ;;  %7860 = vmax.xlane.f32.xlu1 %v7859_v34  ;;  %v7862_v12 = vsel %vm1867_vm4, %v18917_v29, -inf }
 0x9e0   :  { %7857 = vmax.xlane.f32.xlu0 %v7856_v35  ;;  %v7877_v35 = vsel %vm1871_vm5, %v18939_v16, -inf }
 0x9e2   :  { %7866 = vmax.xlane.f32.xlu1 %v7865_v49  ;;  %v18947_v20 = vpop.f32.mrb[8].mxu1 }
 0x9e3   :  { %v15254_v14 = vpop.f32.mrb[9].mxu1  ;;  %v7868_v34 = vsel %vm1867_vm4, %v18947_v20, -inf }
 0x9e4   :  { %7863 = vmax.xlane.f32.xlu0 %v7862_v12  ;;  %v18951_v45 = vpop.f32.mrb[10].mxu1  ;;  %v7874_v12 = vsel %vm1867_vm4, %v18933_v9, -inf }
 0x9e5   :  { %v15255_v21 = vpop.f32.mrb[11].mxu1  ;;  %v7871_v22 = vsel %vm1871_vm5, %v18951_v45, -inf }
 0x9e6   :  { %7872 = vmax.xlane.f32.xlu1 %v7871_v22 }
 0x9e8   :  { %7869 = vmax.xlane.f32.xlu0 %v7868_v34 }
 0x9ea   :  { %7878 = vmax.xlane.f32.xlu1 %v7877_v35  ;;  %v18959_v49 = vpop.f32.mrb[12].mxu1  ;;  %v18971_v35 = vpop.permute.xlu1 %8305 }
 0x9eb   :  { %v15266_v14 = vpop.f32.mrb[13].mxu1  ;;  %v7880_v34 = vsel %vm1867_vm4, %v18959_v49, -inf }
 0x9ec   :  { %7875 = vmax.xlane.f32.xlu0 %v7874_v12  ;;  %v18963_v21 = vpop.f32.mrb[14].mxu1  ;;  %v18973_v14 = vpop.permute.xlu0 %8354 }
 0x9ed   :  { %v15267_v38 = vpop.f32.mrb[15].mxu1  ;;  %v7883_v22 = vsel %vm1871_vm5, %v18963_v21, -inf }
 0x9ee   :  { %7884 = vmax.xlane.f32.xlu1 %v7883_v22  ;;  %v18975_v11 = vpop.permute.xlu1 %8403 }
 0x9ef   :  { %22249 = vst [vmem:[#allocation25_spill] sm:$0xff] %v18975_v11 }
 0x9f0   :  { %7881 = vmax.xlane.f32.xlu0 %v7880_v34  ;;  %v18977_v12 = vpop.permute.xlu0 %8452 }
 0x9f1   :  { %22250 = vst [vmem:[#allocation21_spill] sm:$0xff] %v18977_v12 }
 0x9f2   :  { %v18979_v43 = vpop.permute.xlu1 %8501 }
 0x9f3   :  { %22251 = vst [vmem:[#allocation42_spill] sm:$0xff] %v18979_v43 }
 0x9f4   :  { %v18981_v38 = vpop.permute.xlu0 %8550 }
 0x9f5   :  { %22252 = vst [vmem:[#allocation40_spill] sm:$0xff] %v18981_v38 }
 0x9f6   :  { %v18983_v8 = vpop.permute.xlu1 %8599 }
 0x9f7   :  { %22253 = vst [vmem:[#allocation45_spill] sm:$0xff] %v18983_v8 }
 0xa11   :  { %v7792_v22 = vpop.xlane.xlu0 %7791 }
 0xa12   :  { %v7886_v48 = vsub.f32 %v18837_v30, %v7792_v22 }
 0xa13   :  { %v7795_v34 = vpop.xlane.xlu1 %7794 }
 0xa14   :  { %v7918_v46 = vmul.f32 1.442695, %v7886_v48  ;;  %v7887_v58 = vsub.f32 %v18841_v19, %v7795_v34 }
 0xa16   :  { %15889 = vpow2.f32 %v7918_v46  ;;  %v7920_v53 = vmul.f32 1.442695, %v7887_v58 }
 0xa18   :  { %15891 = vpow2.f32 %v7920_v53 }
 0xa20   :  { %v18987_v56 = vpop.eup %15889 }
 0xa21   :  { %v7982_v12 = vsel %vm1867_vm4, %v18987_v56, 0.0 }
 0xa22   :  { %v18991_v43 = vpop.eup %15891  ;;  %7983 = vadd.xlane.f32.xlu0 %v7982_v12 }
 0xa23   :  { %v7985_v8 = vsel %vm1871_vm5, %v18991_v43, 0.0 }
 0xa24   :  { %7986 = vadd.xlane.f32.xlu1 %v7985_v8 }
 0xa34   :  { %v7807_v19 = vpop.xlane.xlu1 %7806 }
 0xa35   :  { %v7891_v58 = vsub.f32 %v18847_v7, %v7807_v19 }
 0xa37   :  { %v7928_v37 = vmul.f32 1.442695, %v7891_v58 }
 0xa41   :  { %v7798_v30 = vpop.xlane.xlu0 %7797 }
 0xa42   :  { %v7888_v48 = vsub.f32 %v18859_v52, %v7798_v30 }
 0xa44   :  { %v7922_v22 = vmul.f32 1.442695, %v7888_v48 }
 0xa45   :  { %v7804_v46 = vpop.xlane.xlu0 %7803 }
 0xa46   :  { %15893 = vpow2.f32 %v7922_v22  ;;  %v7890_v53 = vsub.f32 %v18845_v6, %v7804_v46 }
 0xa48   :  { %v7926_v34 = vmul.f32 1.442695, %v7890_v53 }
 0xa49   :  { %v7801_v38 = vpop.xlane.xlu0 %7800 }
 0xa4a   :  { %15895 = vpow2.f32 %v7926_v34  ;;  %v7889_v12 = vsub.f32 %v18863_v4, %v7801_v38 }
 0xa4b   :  { %v7813_v11 = vpop.xlane.xlu1 %7812 }
 0xa4c   :  { %v7924_v26 = vmul.f32 1.442695, %v7889_v12  ;;  %v7893_v8 = vsub.f32 %v18873_v2, %v7813_v11 }
 0xa4d   :  { %v7810_v41 = vpop.xlane.xlu0 %7809 }
 0xa4e   :  { %15897 = vpow2.f32 %v7924_v26  ;;  %v7932_v48 = vmul.f32 1.442695, %v7893_v8 }
 0xa4f   :  { %v7819_v52 = vpop.xlane.xlu1 %7818  ;;  %15899 = vpow2.f32 %v7928_v37 }
 0xa50   :  { %v19000_v30 = vpop.eup %15893  ;;  %v7895_v6 = vsub.f32 %v18857_v63, %v7819_v52  ;;  %15901 = vpow2.f32 %v7932_v48 }
 0xa51   :  { %v7816_v7 = vpop.xlane.xlu0 %7815  ;;  %v7988_v22 = vsel %vm1867_vm4, %v19000_v30, 0.0 }
 0xa52   :  { %7989 = vadd.xlane.f32.xlu0 %v7988_v22  ;;  %v7936_v38 = vmul.f32 1.442695, %v7895_v6 }
 0xa53   :  { %v7825_v2 = vpop.xlane.xlu1 %7824 }
 0xa54   :  { %v19005_v4 = vpop.eup %15895  ;;  %15903 = vpow2.f32 %v7936_v38  ;;  %v7897_v12 = vsub.f32 %v18889_v54, %v7825_v2 }
 0xa55   :  { %v7822_v19 = vpop.xlane.xlu0 %7821  ;;  %v7994_v26 = vsel %vm1867_vm4, %v19005_v4, 0.0 }
 0xa56   :  { %v7896_v11 = vsub.f32 %v18883_v25, %v7822_v19  ;;  %7995 = vadd.xlane.f32.xlu0 %v7994_v26  ;;  %v7940_v48 = vmul.f32 1.442695, %v7897_v12 }
 0xa57   :  { %v7831_v26 = vpop.xlane.xlu1 %7830 }
 0xa58   :  { %v19010_v37 = vpop.eup %15897  ;;  %v7938_v63 = vmul.f32 1.442695, %v7896_v11  ;;  %v22257_v11 = vld [vmem:[#allocation51_spill] sm:$0xff] }
 0xa59   :  { %v7828_v46 = vpop.xlane.xlu0 %7827  ;;  %v7991_v53 = vsel %vm1871_vm5, %v19010_v37, 0.0  ;;  %v19014_v58 = vpop.eup %15899 }
 0xa5a   :  { %v7898_v34 = vsub.f32 %v18869_v62, %v7828_v46  ;;  %7992 = vadd.xlane.f32.xlu1 %v7991_v53  ;;  %15905 = vpow2.f32 %v7938_v63  ;;  %v7997_v25 = vsel %vm1871_vm5, %v19014_v58, 0.0  ;;  %v19020_v52 = vpop.eup %15901 }
 0xa5b   :  { %v8003_v6 = vsel %vm1871_vm5, %v19020_v52, 0.0  ;;  %v7837_v53 = vpop.xlane.xlu1 %7836 }
 0xa5c   :  { %v7942_v8 = vmul.f32 1.442695, %v7898_v34 }
 0xa5d   :  { %v7834_v46 = vpop.xlane.xlu0 %7833 }
 0xa5e   :  { %7998 = vadd.xlane.f32.xlu1 %v7997_v25  ;;  %15907 = vpow2.f32 %v7942_v8  ;;  %v19024_v22 = vpop.eup %15903  ;;  %v7892_v8 = vsub.f32 %v18867_v39, %v7810_v41 }
 0xa5f   :  { %22254 = vst [vmem:[#allocation28_spill] sm:$0xff] %v19024_v22  ;;  %15909 = vpow2.f32 %v7940_v48  ;;  %v8009_v62 = vsel %vm1871_vm5, %v19024_v22, 0.0  ;;  %v7843_v25 = vpop.xlane.xlu1 %7842  ;;  %v7900_v22 = vsub.f32 %v18899_v13, %v7834_v46 }
 0xa60   :  { %v7930_v48 = vmul.f32 1.442695, %v7892_v8 }
 0xa61   :  { %v7840_v12 = vpop.xlane.xlu0 %7839  ;;  %v7946_v41 = vmul.f32 1.442695, %v7900_v22  ;;  %v7903_v22 = vsub.f32 %v18891_v3, %v7843_v25 }
 0xa62   :  { %8004 = vadd.xlane.f32.xlu1 %v8003_v6  ;;  %v7894_v6 = vsub.f32 %v18855_v28, %v7816_v7  ;;  %15911 = vpow2.f32 %v7930_v48  ;;  %v7902_v39 = vsub.f32 %v18885_v55, %v7840_v12  ;;  %v7901_v48 = vsub.f32 %v18905_v47, %v7837_v53 }
 0xa63   :  { %v7952_v53 = vmul.f32 1.442695, %v7903_v22 }
 0xa64   :  { %v19028_v54 = vpop.eup %15905  ;;  %v7948_v46 = vmul.f32 1.442695, %v7901_v48 }
 0xa65   :  { %22255 = vst [vmem:[#allocation119_spill] sm:$0xff] %v19028_v54  ;;  %v8012_v38 = vsel %vm1867_vm4, %v19028_v54, 0.0 }
 0xa66   :  { %8010 = vadd.xlane.f32.xlu1 %v8009_v62  ;;  %v7846_v62 = vpop.xlane.xlu0 %7845 }
 0xa68   :  { %v19032_v19 = vpop.eup %15907 }
 0xa69   :  { %22256 = vst [vmem:[#allocation46_spill] sm:$0xff] %v19032_v19  ;;  %v8018_v63 = vsel %vm1867_vm4, %v19032_v19, 0.0  ;;  %v19038_v2 = vpop.eup %15909  ;;  %v7899_v19 = vsub.f32 %v18875_v50, %v7831_v26  ;;  %v7950_v50 = vmul.f32 1.442695, %v7902_v39 }
 0xa6a   :  { %8013 = vadd.xlane.f32.xlu1 %v8012_v38  ;;  %22258 = vst [vmem:[#allocation41_spill] sm:$0xff] %v19038_v2  ;;  %v8015_v34 = vsel %vm1871_vm5, %v19038_v2, 0.0  ;;  %v7849_v38 = vpop.xlane.xlu1 %7848  ;;  %v7852_v54 = vpop.xlane.xlu0 %7851 }
 0xa6b   :  { %v7905_v47 = vsub.f32 %v18921_v23, %v7849_v38  ;;  %v7906_v25 = vsub.f32 %v18901_v0, %v7852_v54 }
 0xa6c   :  { %8648 = vrot.lane.b32.xlu0 %v22257_v11, %s16149_s30  ;;  %v7934_v11 = vmul.f32 1.442695, %v7894_v6  ;;  %v19049_v7 = vpop.eup %15911 }
 0xa6d   :  { %v7956_v3 = vmul.f32 1.442695, %v7905_v47 }
 0xa6e   :  { %8019 = vadd.xlane.f32.xlu1 %v8018_v63  ;;  %15913 = vpow2.f32 %v7934_v11  ;;  %v7944_v63 = vmul.f32 1.442695, %v7899_v19  ;;  %v7855_v2 = vpop.xlane.xlu1 %7854  ;;  %v7858_v28 = vpop.xlane.xlu0 %7857  ;;  %v8000_v19 = vsel %vm1867_vm4, %v19049_v7, 0.0  ;;  %v7904_v11 = vsub.f32 %v18915_v33, %v7846_v62 }
 0xa6f   :  { %v7907_v62 = vsub.f32 %v18907_v61, %v7855_v2 }
 0xa70   :  { %15915 = vpow2.f32 %v7944_v63  ;;  %v7954_v48 = vmul.f32 1.442695, %v7904_v11 }
 0xa71   :  { %15917 = vpow2.f32 %v7946_v41 }
 0xa72   :  { %8016 = vadd.xlane.f32.xlu1 %v8015_v34  ;;  %v22259_v34 = vld [vmem:[#allocation53_spill] sm:$0xff]  ;;  %v7861_v8 = vpop.xlane.xlu1 %7860  ;;  %v7864_v26 = vpop.xlane.xlu0 %7863  ;;  %15919 = vpow2.f32 %v7950_v50  ;;  %v7958_v50 = vmul.f32 1.442695, %v7906_v25 }
 0xa73   :  { %15921 = vpow2.f32 %v7948_v46  ;;  %v7910_v23 = vsub.f32 %v18917_v29, %v7864_v26  ;;  %v7909_v0 = vsub.f32 %v18937_v15, %v7861_v8  ;;  %v7960_v26 = vmul.f32 1.442695, %v7907_v62 }
 0xa74   :  { %15923 = vpow2.f32 %v7952_v53 }
 0xa75   :  { %15925 = vpow2.f32 %v7956_v3  ;;  %v7966_v54 = vmul.f32 1.442695, %v7910_v23  ;;  %v7964_v47 = vmul.f32 1.442695, %v7909_v0 }
 0xa76   :  { %v7867_v55 = vpop.xlane.xlu1 %7866  ;;  %v7870_v63 = vpop.xlane.xlu0 %7869  ;;  %15927 = vpow2.f32 %v7954_v48 }
 0xa77   :  { %15929 = vpow2.f32 %v7958_v50  ;;  %v7911_v11 = vsub.f32 %v18923_v51, %v7867_v55  ;;  %v7912_v23 = vsub.f32 %v18947_v20, %v7870_v63 }
 0xa78   :  { %v19054_v13 = vpop.eup %15913  ;;  %15931 = vpow2.f32 %v7966_v54 }
 0xa79   :  { %v8006_v12 = vsel %vm1867_vm4, %v19054_v13, 0.0  ;;  %15933 = vpow2.f32 %v7960_v26  ;;  %v7968_v48 = vmul.f32 1.442695, %v7911_v11  ;;  %v7970_v0 = vmul.f32 1.442695, %v7912_v23 }
 0xa7a   :  { %v19059_v6 = vpop.eup %15915  ;;  %v19068_v39 = vpop.xlane.xlu1 %7872  ;;  %15935 = vpow2.f32 %v7964_v47 }
 0xa7b   :  { %v19065_v41 = vpop.eup %15917 }
 0xa7c   :  { %v8024_v38 = vsel %vm1867_vm4, %v19065_v41, 0.0  ;;  %v19073_v33 = vpop.eup %15919 }
 0xa7d   :  { %v8030_v22 = vsel %vm1867_vm4, %v19073_v33, 0.0  ;;  %v19079_v29 = vpop.eup %15921 }
 0xa7e   :  { %v7879_v46 = vpop.xlane.xlu1 %7878  ;;  %v8027_v15 = vsel %vm1871_vm5, %v19079_v29, 0.0  ;;  %v19085_v8 = vpop.eup %15923 }
 0xa7f   :  { %v7915_v61 = vsub.f32 %v18939_v16, %v7879_v46  ;;  %v8033_v16 = vsel %vm1871_vm5, %v19085_v8, 0.0 }
 0xa83   :  { %8697 = vrot.lane.b32.xlu1 %v22259_v34, %s16149_s30  ;;  %v8021_v34 = vsel %vm1871_vm5, %v19059_v6, 0.0 }
 0xa8b   :  { %8001 = vadd.xlane.f32.xlu0 %v8000_v19  ;;  %v7876_v19 = vpop.xlane.xlu0 %7875 }
 0xa8c   :  { %v7914_v20 = vsub.f32 %v18933_v9, %v7876_v19 }
 0xa8e   :  { %v7974_v26 = vmul.f32 1.442695, %v7914_v20 }
 0xa8f   :  { %8007 = vadd.xlane.f32.xlu0 %v8006_v12  ;;  %v7908_v12 = vsub.f32 %v18931_v42, %v7858_v28  ;;  %v7882_v2 = vpop.xlane.xlu0 %7881  ;;  %v19089_v42 = vpop.eup %15925 }
 0xa90   :  { %v7916_v3 = vsub.f32 %v18959_v49, %v7882_v2  ;;  %v7885_v28 = vpop.xlane.xlu1 %7884  ;;  %v19093_v25 = vpop.eup %15927  ;;  %v8039_v49 = vsel %vm1871_vm5, %v19089_v42, 0.0 }
 0xa91   :  { %v7962_v53 = vmul.f32 1.442695, %v7908_v12  ;;  %v7917_v51 = vsub.f32 %v18963_v21, %v7885_v28  ;;  %v8036_v62 = vsel %vm1867_vm4, %v19093_v25, 0.0  ;;  %v7913_v12 = vsub.f32 %v18951_v45, %v19068_v39 }
 0xa92   :  { %v7978_v55 = vmul.f32 1.442695, %v7916_v3 }
 0xa93   :  { %8022 = vadd.xlane.f32.xlu0 %v8021_v34  ;;  %v7976_v34 = vmul.f32 1.442695, %v7915_v61  ;;  %15937 = vpow2.f32 %v7962_v53  ;;  %v7980_v63 = vmul.f32 1.442695, %v7917_v51 }
 0xa95   :  { %15939 = vpow2.f32 %v7976_v34 }
 0xa96   :  { %15941 = vpow2.f32 %v7968_v48 }
 0xa97   :  { %8025 = vadd.xlane.f32.xlu0 %v8024_v38  ;;  %v19097_v38 = vpop.eup %15929  ;;  %15943 = vpow2.f32 %v7978_v55 }
 0xa98   :  { %v19103_v50 = vpop.eup %15931  ;;  %v8042_v46 = vsel %vm1867_vm4, %v19097_v38, 0.0  ;;  %15945 = vpow2.f32 %v7970_v0 }
 0xa99   :  { %v19106_v21 = vpop.eup %15933  ;;  %v8054_v54 = vsel %vm1867_vm4, %v19103_v50, 0.0  ;;  %15947 = vpow2.f32 %v7980_v63 }
 0xa9a   :  { %v8045_v47 = vsel %vm1871_vm5, %v19106_v21, 0.0  ;;  %15949 = vpow2.f32 %v7974_v26  ;;  %v8262_v26 = vsel %vm2240_vm3, %v18969_v31, 0  ;;  %v22262_v31 = vld [vmem:[#allocation26_spill] sm:$0xff] }
 0xa9b   :  { %8031 = vadd.xlane.f32.xlu0 %v8030_v22  ;;  %v19112_v22 = vpop.eup %15935 }
 0xa9c   :  { %v8051_v19 = vsel %vm1871_vm5, %v19112_v22, 0.0 }
 0xa9d   :  { %v19116_v9 = vpop.eup %15937 }
 0xa9e   :  { %v8048_v11 = vsel %vm1867_vm4, %v19116_v9, 0.0 }
 0xa9f   :  { %8028 = vadd.xlane.f32.xlu0 %v8027_v15  ;;  %v19122_v61 = vpop.eup %15939  ;;  %v7972_v15 = vmul.f32 1.442695, %v7913_v12 }
 0xaa0   :  { %v19124_v53 = vpop.eup %15941  ;;  %v8069_v39 = vsel %vm1871_vm5, %v19122_v61, 0.0 }
 0xaa1   :  { %v19130_v34 = vpop.eup %15943 }
 0xaa2   :  { %v19132_v3 = vpop.eup %15945  ;;  %v8072_v28 = vsel %vm1867_vm4, %v19130_v34, 0.0 }
 0xaa3   :  { %8034 = vadd.xlane.f32.xlu0 %v8033_v16  ;;  %v8057_v16 = vsel %vm1871_vm5, %v19124_v53, 0.0  ;;  %v19138_v48 = vpop.eup %15947  ;;  %v8060_v51 = vsel %vm1867_vm4, %v19132_v3, 0.0 }
 0xaa4   :  { %v19140_v23 = vpop.eup %15949  ;;  %v8075_v55 = vsel %vm1871_vm5, %v19138_v48, 0.0 }
 0xaa5   :  { %v8066_v63 = vsel %vm1867_vm4, %v19140_v23, 0.0 }
 0xaa7   :  { %8040 = vadd.xlane.f32.xlu0 %v8039_v49  ;;  %8037 = vadd.xlane.f32.xlu1 %v8036_v62 }
 0xaab   :  { %8055 = vadd.xlane.f32.xlu0 %v8054_v54  ;;  %8043 = vadd.xlane.f32.xlu1 %v8042_v46 }
 0xaaf   :  { %8052 = vadd.xlane.f32.xlu0 %v8051_v19  ;;  %8046 = vadd.xlane.f32.xlu1 %v8045_v47  ;;  %v7984_v2 = vpop.xlane.xlu0 %7983  ;;  %v22263_v19 = vld [vmem:[#allocation56_spill] sm:$0xff]  ;;  %v22264_v47 = vld [vmem:[#allocation86_spill] sm:$0xff] }
 0xab0   :  { %15951 = vrcp.f32 %v7984_v2  ;;  %v22265_v2 = vld [vmem:[#allocation54_spill] sm:$0xff] }
 0xab1   :  { %v7987_v45 = vpop.xlane.xlu1 %7986 }
 0xab2   :  { %15953 = vrcp.f32 %v7987_v45  ;;  %v22267_v45 = vld [vmem:[#allocation89_spill] sm:$0xff] }
 0xab3   :  { %8070 = vadd.xlane.f32.xlu0 %v8069_v39  ;;  %8049 = vadd.xlane.f32.xlu1 %v8048_v11  ;;  %15955 = vpow2.f32 %v7972_v15  ;;  %v22266_v15 = vld [vmem:[#allocation31_spill] sm:$0xff] }
 0xab4   :  { %v22268_v11 = vld [vmem:[#allocation27_spill] sm:$0xff] }
 0xab7   :  { %8073 = vadd.xlane.f32.xlu0 %v8072_v28  ;;  %8058 = vadd.xlane.f32.xlu1 %v8057_v16 }
 0xaba   :  { %v15952_v49 = vpop.eup %15951 }
 0xabb   :  { %8061 = vadd.xlane.f32.xlu1 %v8060_v51  ;;  %8076 = vadd.xlane.f32.xlu0 %v8075_v55  ;;  %v8079_v0 = vmul.f32 %v15952_v49, %v18987_v56  ;;  %v22260_v56 = vld [vmem:[#allocation52_spill] sm:$0xff]  ;;  %v22270_v55 = vld [vmem:[#allocation91_spill] sm:$0xff] }
 0xabc   :  { %v15954_v62 = vpop.eup %15953  ;;  %v22271_v49 = vld [vmem:[#allocation87_spill] sm:$0xff] }
 0xabd   :  { %v8081_v20 = vmul.f32 %v15954_v62, %v18991_v43  ;;  %v19150_v54 = vpop.eup %15955  ;;  %v22261_v43 = vld [vmem:[#allocation55_spill] sm:$0xff] }
 0xabe   :  { %v8063_v12 = vsel %vm1871_vm5, %v19150_v54, 0.0 }
 0xabf   :  { %8067 = vadd.xlane.f32.xlu1 %v8066_v63  ;;  %v8142_v46 = vpack.c.bf16 %v8081_v20, %v8079_v0  ;;  %v8311_v63 = vsel %vm2240_vm3, %v18971_v35, 0  ;;  %v22274_v35 = vld [vmem:[#allocation95_spill] sm:$0xff] }
 0xac1   :  { %15271 = vmatmul.mubr.msk.bf16.vlgmr.msra.gmra.mrb[248].mxu0 %vm1867_vm4, %v8142_v46 }
 0xac2   :  { %15281 = vmatpush3.bf16.msra.mxu0 %v8262_v26  ;;  %15282 = vmatprep.mubr.msk.bf16.mxu0 %vm16146_vm1, %v22023_v36 }
 0xac3   :  { %8064 = vadd.xlane.f32.xlu1 %v8063_v12  ;;  %15292 = vmatprep.subr.bf16.mxu0 %v22023_v36  ;;  %v22277_v12 = vld [vmem:[#allocation94_spill] sm:$0xff] }
 0xad1   :  { %8746 = vrot.lane.b32.xlu0 %v22260_v56, %s16149_s30  ;;  %v22278_v56 = vld [vmem:[#allocation98_spill] sm:$0xff] }
 0xad4   :  { %8795 = vrot.lane.b32.xlu1 %v22261_v43, %s16149_s30 }
 0xad5   :  { %8974 = vrot.lane.b32.xlu0 %v22262_v31, %s16150_s18  ;;  %v22280_v31 = vld [vmem:[#allocation97_spill] sm:$0xff] }
 0xad8   :  { %8844 = vrot.lane.b32.xlu1 %v22263_v19, %s16149_s30  ;;  %v22281_v19 = vld [vmem:[#allocation99_spill] sm:$0xff] }
 0xad9   :  { %8982 = vrot.lane.b32.xlu0 %v22264_v47, %s16150_s18  ;;  %v22282_v47 = vld [vmem:[#allocation32_spill] sm:$0xff] }
 0xadc   :  { %8893 = vrot.lane.b32.xlu1 %v22265_v2, %s16149_s30 }
 0xadd   :  { %8976 = vrot.lane.b32.xlu0 %v22266_v15, %s16150_s18 }
 0xadf   :  { %v7990_v39 = vpop.xlane.xlu0 %7989 }
 0xae0   :  { %8978 = vrot.lane.b32.xlu1 %v22267_v45, %s16150_s18  ;;  %15957 = vrcp.f32 %v7990_v39  ;;  %v22284_v45 = vld [vmem:[#allocation35_spill] sm:$0xff]  ;;  %v22285_v39 = vld [vmem:[#allocation100_spill] sm:$0xff] }
 0xae1   :  { %9110 = vrot.lane.b32.xlu0 %v18785_v32, %s16151_s0 }
 0xae3   :  { %v7996_v28 = vpop.xlane.xlu0 %7995 }
 0xae4   :  { %9102 = vrot.lane.b32.xlu1 %v18759_v40, %s16151_s0  ;;  %v22269_v40 = vld [vmem:[#allocation93_spill] sm:$0xff] }
 0xae5   :  { %8980 = vrot.lane.b32.xlu0 %v22268_v11, %s16150_s18 }
 0xae7   :  { %v7993_v16 = vpop.xlane.xlu1 %7992  ;;  %v19242_v43 = vpop.permute.xlu0 %8648 }
 0xae8   :  { %15959 = vrcp.f32 %v7993_v16  ;;  %9106 = vrot.lane.b32.xlu1 %v18781_v27, %s16151_s0 }
 0xae9   :  { %9108 = vrot.lane.b32.xlu0 %v18783_v17, %s16151_s0  ;;  %15961 = vrcp.f32 %v7996_v28  ;;  %v22286_v28 = vld [vmem:[#allocation101_spill] sm:$0xff] }
 0xaea   :  { %v15958_v32 = vpop.eup %15957 }
 0xaeb   :  { %v7999_v51 = vpop.xlane.xlu1 %7998  ;;  %v8083_v62 = vmul.f32 %v15958_v32, %v19000_v30  ;;  %v22272_v30 = vld [vmem:[#allocation88_spill] sm:$0xff] }
 0xaec   :  { %15963 = vrcp.f32 %v7999_v51  ;;  %9104 = vrot.lane.b32.xlu1 %v18765_v24, %s16151_s0  ;;  %v22287_v51 = vld [vmem:[#allocation36_spill] sm:$0xff] }
 0xaed   :  { %8990 = vrot.lane.b32.xlu0 %v22269_v40, %s16150_s18 }
 0xaf0   :  { %8986 = vrot.lane.b32.xlu1 %v22270_v55, %s16150_s18 }
 0xaf1   :  { %8984 = vrot.lane.b32.xlu0 %v22271_v49, %s16150_s18 }
 0xaf2   :  { %v15960_v27 = vpop.eup %15959 }
 0xaf3   :  { %v8085_v17 = vmul.f32 %v15960_v27, %v19010_v37  ;;  %v15962_v0 = vpop.eup %15961  ;;  %v22288_v27 = vld [vmem:[#allocation118_spill] sm:$0xff] }
 0xaf4   :  { %9114 = vrot.lane.b32.xlu1 %v18789_v5, %s16151_s0  ;;  %v8087_v46 = vmul.f32 %v15962_v0, %v19005_v4  ;;  %v22273_v5 = vld [vmem:[#allocation90_spill] sm:$0xff]  ;;  %v8005_v4 = vpop.xlane.xlu1 %8004 }
 0xaf5   :  { %v8143_v24 = vpack.c.bf16 %v8085_v17, %v8083_v62  ;;  %9118 = vrot.lane.b32.xlu0 %v18793_v44, %s16151_s0  ;;  %v8360_v44 = vsel %vm2240_vm3, %v18973_v14, 0  ;;  %v22275_v14 = vld [vmem:[#allocation96_spill] sm:$0xff]  ;;  %15965 = vrcp.f32 %v8005_v4  ;;  %v22289_v17 = vld [vmem:[#allocation102_spill] sm:$0xff] }
 0xaf6   :  { %v15964_v20 = vpop.eup %15963 }
 0xaf7   :  { %v8089_v26 = vmul.f32 %v15964_v20, %v19014_v58  ;;  %15277 = vmatmul.mubr.msk.bf16.vlgmr.msra.gmra.mrb[16].mxu1 %vm1867_vm4, %v8143_v24 }
 0xaf8   :  { %15287 = vmatpush3.bf16.msra.mxu1 %v8311_v63  ;;  %8988 = vrot.lane.b32.xlu1 %v22272_v30, %s16150_s18  ;;  %v8011_v58 = vpop.xlane.xlu1 %8010  ;;  %v22290_v63 = vld [vmem:[#allocation25_spill] sm:$0xff] }
 0xaf9   :  { %8992 = vrot.lane.b32.xlu0 %v22273_v5, %s16150_s18  ;;  %v8144_v37 = vpack.c.bf16 %v8089_v26, %v8087_v46  ;;  %15288 = vmatprep.mubr.msk.bf16.mxu1 %vm16146_vm1, %v22023_v36  ;;  %v8409_v46 = vsel %vm2240_vm3, %v22290_v63, 0  ;;  %v22291_v26 = vld [vmem:[#allocation28_spill] sm:$0xff] }
 0xafa   :  { %15298 = vmatprep.subr.bf16.mxu1 %v22023_v36 }
 0xafb   :  { %15283 = vmatmul.mubr.msk.bf16.vlgmr.msra.gmra.mrb[252].mxu0 %vm1867_vm4, %v8144_v37 }
 0xafc   :  { %15293 = vmatpush3.bf16.msra.mxu0 %v8360_v44  ;;  %8994 = vrot.lane.b32.xlu1 %v22274_v35, %s16150_s18  ;;  %v22293_v44 = vld [vmem:[#allocation115_spill] sm:$0xff]  ;;  %v22294_v35 = vld [vmem:[#allocation41_spill] sm:$0xff] }
 0xafd   :  { %9112 = vrot.lane.b32.xlu0 %v18787_v10, %s16151_s0  ;;  %15294 = vmatprep.mubr.msk.bf16.mxu0 %vm16146_vm1, %v22023_v36  ;;  %v22276_v10 = vld [vmem:[#allocation92_spill] sm:$0xff] }
 0xafe   :  { %15304 = vmatprep.subr.bf16.mxu0 %v22023_v36 }
 0xaff   :  { %v15966_v16 = vpop.eup %15965 }
 0xb00   :  { %9116 = vrot.lane.b32.xlu1 %v18791_v57, %s16151_s0  ;;  %v8014_v57 = vpop.xlane.xlu1 %8013  ;;  %v8093_v32 = vmul.f32 %v15966_v16, %v19020_v52  ;;  %v22303_v16 = vld [vmem:[#allocation40_spill] sm:$0xff] }
 0xb01   :  { %9122 = vrot.lane.b32.xlu0 %v18797_v18, %s16151_s0 }
 0xb04   :  { %9120 = vrot.lane.b32.xlu1 %v18795_v60, %s16151_s0  ;;  %v22279_v60 = vld [vmem:[#allocation29_spill] sm:$0xff]  ;;  %v8020_v18 = vpop.xlane.xlu1 %8019 }
 0xb05   :  { %9002 = vrot.lane.b32.xlu0 %v22275_v14, %s16150_s18 }
 0xb08   :  { %8998 = vrot.lane.b32.xlu1 %v22276_v10, %s16150_s18  ;;  %v8017_v2 = vpop.xlane.xlu1 %8016 }
 0xb09   :  { %8996 = vrot.lane.b32.xlu0 %v22277_v12, %s16150_s18  ;;  %v22296_v12 = vld [vmem:[#allocation119_spill] sm:$0xff] }
 0xb0c   :  { %9126 = vrot.lane.b32.xlu1 %v18801_v59, %s16151_s0 }
 0xb0d   :  { %9004 = vrot.lane.b32.xlu0 %v22278_v56, %s16150_s18 }
 0xb10   :  { %9130 = vrot.lane.b32.xlu1 %v18805_v1, %s16151_s0  ;;  %v22283_v1 = vld [vmem:[#allocation103_spill] sm:$0xff] }
 0xb11   :  { %9132 = vrot.lane.b32.xlu0 %v22279_v60, %s16151_s0  ;;  %v22297_v60 = vld [vmem:[#allocation20_spill] sm:$0xff] }
 0xb14   :  { %9000 = vrot.lane.b32.xlu1 %v22280_v31, %s16150_s18  ;;  %v22298_v31 = vld [vmem:[#allocation107_spill] sm:$0xff] }
 0xb15   :  { %9006 = vrot.lane.b32.xlu0 %v22281_v19, %s16150_s18 }
 0xb18   :  { %v8002_v59 = vpop.xlane.xlu0 %8001  ;;  %9124 = vrot.lane.b32.xlu1 %v22282_v47, %s16151_s0  ;;  %v22299_v47 = vld [vmem:[#allocation42_spill] sm:$0xff] }
 0xb19   :  { %15967 = vrcp.f32 %v8002_v59  ;;  %9014 = vrot.lane.b32.xlu0 %v22283_v1, %s16150_s18  ;;  %v22300_v1 = vld [vmem:[#allocation46_spill] sm:$0xff] }
 0xb1a   :  { %15969 = vrcp.f32 %v8011_v58  ;;  %v22295_v58 = vld [vmem:[#allocation21_spill] sm:$0xff] }
 0xb1b   :  { %15971 = vrcp.f32 %v8017_v2  ;;  %v8458_v10 = vsel %vm2240_vm3, %v22295_v58, 0  ;;  %v8507_v2 = vsel %vm2240_vm3, %v22299_v47, 0 }
 0xb1c   :  { %v8008_v15 = vpop.xlane.xlu0 %8007  ;;  %9128 = vrot.lane.b32.xlu1 %v22284_v45, %s16151_s0  ;;  %v8698_v45 = vpop.permute.xlu1 %8697 }
 0xb1d   :  { %15973 = vrcp.f32 %v8008_v15  ;;  %9008 = vrot.lane.b32.xlu0 %v22285_v39, %s16150_s18 }
 0xb1e   :  { %15975 = vrcp.f32 %v8014_v57 }
 0xb20   :  { %v8023_v11 = vpop.xlane.xlu0 %8022  ;;  %9010 = vrot.lane.b32.xlu1 %v22286_v28, %s16150_s18 }
 0xb21   :  { %15977 = vrcp.f32 %v8023_v11  ;;  %9142 = vrot.lane.b32.xlu0 %v22287_v51, %s16151_s0  ;;  %v22301_v11 = vld [vmem:[#allocation105_spill] sm:$0xff]  ;;  %v8556_v51 = vsel %vm2240_vm3, %v22303_v16, 0 }
 0xb22   :  { %15979 = vrcp.f32 %v8020_v18 }
 0xb23   :  { %v15968_v40 = vpop.eup %15967 }
 0xb24   :  { %v8091_v55 = vmul.f32 %v15968_v40, %v19049_v7  ;;  %v8026_v49 = vpop.xlane.xlu0 %8025  ;;  %9134 = vrot.lane.b32.xlu1 %v22288_v27, %s16151_s0  ;;  %v15970_v62 = vpop.eup %15969  ;;  %v22292_v7 = vld [vmem:[#allocation33_spill] sm:$0xff]  ;;  %v22305_v27 = vld [vmem:[#allocation19_spill] sm:$0xff] }
 0xb25   :  { %9012 = vrot.lane.b32.xlu0 %v22289_v17, %s16150_s18  ;;  %v15972_v0 = vpop.eup %15971  ;;  %v8097_v30 = vmul.f32 %v15970_v62, %v22291_v26  ;;  %15981 = vrcp.f32 %v8026_v49  ;;  %v22307_v26 = vld [vmem:[#allocation108_spill] sm:$0xff] }
 0xb26   :  { %v8145_v24 = vpack.c.bf16 %v8093_v32, %v8091_v55  ;;  %v8101_v4 = vmul.f32 %v15972_v0, %v22294_v35  ;;  %v22304_v32 = vld [vmem:[#allocation116_spill] sm:$0xff] }
 0xb27   :  { %v15974_v20 = vpop.eup %15973 }
 0xb28   :  { %v8095_v52 = vmul.f32 %v15974_v20, %v19054_v13  ;;  %v8032_v5 = vpop.xlane.xlu0 %8031  ;;  %9138 = vrot.lane.b32.xlu1 %v22292_v7, %s16151_s0  ;;  %15289 = vmatmul.mubr.msk.bf16.vlgmr.msra.gmra.mrb[20].mxu1 %vm1867_vm4, %v8145_v24  ;;  %v15976_v37 = vpop.eup %15975  ;;  %v22306_v20 = vld [vmem:[#allocation106_spill] sm:$0xff] }
 0xb29   :  { %15299 = vmatpush3.bf16.msra.mxu1 %v8409_v46  ;;  %9140 = vrot.lane.b32.xlu0 %v22293_v44, %s16151_s0  ;;  %v8099_v57 = vmul.f32 %v15976_v37, %v22296_v12  ;;  %v22309_v44 = vld [vmem:[#allocation109_spill] sm:$0xff] }
 0xb2a   :  { %v8146_v14 = vpack.c.bf16 %v8097_v30, %v8095_v52  ;;  %15300 = vmatprep.mubr.msk.bf16.mxu1 %vm16146_vm1, %v22023_v36  ;;  %15310 = vmatprep.subr.bf16.mxu1 %v22023_v36 }
 0xb2b   :  { %v15978_v13 = vpop.eup %15977  ;;  %v8147_v19 = vpack.c.bf16 %v8101_v4, %v8099_v57 }
 0xb2c   :  { %v8029_v56 = vpop.xlane.xlu0 %8028  ;;  %9136 = vrot.lane.b32.xlu1 %v22297_v60, %s16151_s0  ;;  %15295 = vmatmul.mubr.msk.bf16.vlgmr.msra.gmra.mrb[0].mxu0 %vm1867_vm4, %v8146_v14  ;;  %v15980_v18 = vpop.eup %15979  ;;  %v8105_v59 = vmul.f32 %v15978_v13, %v19059_v6  ;;  %v22302_v6 = vld [vmem:[#allocation104_spill] sm:$0xff] }
 0xb2d   :  { %15983 = vrcp.f32 %v8029_v56  ;;  %15305 = vmatpush3.bf16.msra.mxu0 %v8458_v10  ;;  %9022 = vrot.lane.b32.xlu0 %v22298_v31, %s16150_s18  ;;  %v8103_v15 = vmul.f32 %v15980_v18, %v22300_v1 }
 0xb2e   :  { %15306 = vmatprep.mubr.msk.bf16.mxu0 %vm16146_vm1, %v22023_v36  ;;  %15316 = vmatprep.subr.bf16.mxu0 %v22023_v36  ;;  %15985 = vrcp.f32 %v8032_v5  ;;  %v22308_v5 = vld [vmem:[#allocation45_spill] sm:$0xff] }
 0xb2f   :  { %v8148_v28 = vpack.c.bf16 %v8105_v59, %v8103_v15  ;;  %v15982_v49 = vpop.eup %15981  ;;  %v8605_v7 = vsel %vm2240_vm3, %v22308_v5, 0 }
 0xb30   :  { %v8035_v39 = vpop.xlane.xlu0 %8034  ;;  %9018 = vrot.lane.b32.xlu1 %v22301_v11, %s16150_s18  ;;  %15301 = vmatmul.mubr.msk.bf16.vlgmr.msra.gmra.mrb[24].mxu1 %vm1867_vm4, %v8147_v19  ;;  %v8107_v17 = vmul.f32 %v15982_v49, %v19065_v41 }
 0xb31   :  { %15987 = vrcp.f32 %v8035_v39  ;;  %15311 = vmatpush3.bf16.msra.mxu1 %v8507_v2  ;;  %9016 = vrot.lane.b32.xlu0 %v22302_v6, %s16150_s18 }
 0xb32   :  { %15312 = vmatprep.mubr.msk.bf16.mxu1 %vm16146_vm1, %v22023_v36  ;;  %15322 = vmatprep.subr.bf16.mxu1 %v22023_v36 }
 0xb34   :  { %v8041_v40 = vpop.xlane.xlu0 %8040  ;;  %9146 = vrot.lane.b32.xlu1 %v22304_v32, %s16151_s0  ;;  %15307 = vmatmul.mubr.msk.bf16.vlgmr.msra.gmra.mrb[4].mxu0 %vm1867_vm4, %v8148_v28  ;;  %v8038_v55 = vpop.xlane.xlu1 %8037 }
 0xb35   :  { %15989 = vrcp.f32 %v8041_v40  ;;  %15317 = vmatpush3.bf16.msra.mxu0 %v8556_v51  ;;  %9150 = vrot.lane.b32.xlu0 %v22305_v27, %s16151_s0 }
 0xb36   :  { %15991 = vrcp.f32 %v8038_v55  ;;  %15318 = vmatprep.mubr.msk.bf16.mxu0 %vm16146_vm1, %v22023_v36  ;;  %15328 = vmatprep.subr.bf16.mxu0 %v22023_v36 }
 0xb37   :  { %v15984_v62 = vpop.eup %15983 }
 0xb38   :  { %v8109_v0 = vmul.f32 %v15984_v62, %v19079_v29  ;;  %v8056_v24 = vpop.xlane.xlu0 %8055  ;;  %9020 = vrot.lane.b32.xlu1 %v22306_v20, %s16150_s18  ;;  %v8044_v63 = vpop.xlane.xlu1 %8043 }
 0xb39   :  { %v15986_v46 = vpop.eup %15985  ;;  %9024 = vrot.lane.b32.xlu0 %v22307_v26, %s16150_s18  ;;  %15993 = vrcp.f32 %v8044_v63 }
 0xb3a   :  { %v8149_v30 = vpack.c.bf16 %v8109_v0, %v8107_v17  ;;  %v8111_v37 = vmul.f32 %v15986_v46, %v19073_v33 }
 0xb3b   :  { %v15988_v52 = vpop.eup %15987 }
 0xb3c   :  { %v8113_v41 = vmul.f32 %v15988_v52, %v19085_v8  ;;  %v8053_v29 = vpop.xlane.xlu0 %8052  ;;  %9026 = vrot.lane.b32.xlu1 %v22309_v44, %s16150_s18  ;;  %15313 = vmatmul.mubr.msk.bf16.vlgmr.msra.gmra.mrb[28].mxu1 %vm1867_vm4, %v8149_v30  ;;  %v8047_v35 = vpop.xlane.xlu1 %8046  ;;  %v8654_v8 = vsel %vm2240_vm3, %v19242_v43, 0 }
 0xb3d   :  { %15323 = vmatpush3.bf16.msra.mxu1 %v8605_v7  ;;  %15324 = vmatprep.mubr.msk.bf16.mxu1 %vm16146_vm1, %v22023_v36  ;;  %15995 = vrcp.f32 %v8047_v35  ;;  %v15465_v35 = vld [vmem:[%s21815_s7] sm:$0xff]  }
 0xb3e   :  { %v8150_v4 = vpack.c.bf16 %v8113_v41, %v8111_v37  ;;  %15334 = vmatprep.subr.bf16.mxu1 %v22023_v36  ;;  %15997 = vrcp.f32 %v8053_v29 }
 0xb3f   :  { %v15990_v14 = vpop.eup %15989 }
 0xb40   :  { %v15992_v33 = vpop.eup %15991  ;;  %v8117_v13 = vmul.f32 %v15990_v14, %v19089_v42  ;;  %v8071_v58 = vpop.xlane.xlu0 %8070  ;;  %15319 = vmatmul.mubr.msk.bf16.vlgmr.msra.gmra.mrb[8].mxu0 %vm1867_vm4, %v8150_v4  ;;  %v8703_v42 = vsel %vm2240_vm3, %v8698_v45, 0 }
 0xb41   :  { %v8050_v10 = vpop.xlane.xlu1 %8049  ;;  %v8115_v12 = vmul.f32 %v15992_v33, %v19093_v25  ;;  %15329 = vmatpush3.bf16.msra.mxu0 %v8654_v8  ;;  %15330 = vmatprep.mubr.msk.bf16.mxu0 %vm16146_vm1, %v22023_v36  ;;  %v15466_v33 = vld [vmem:[%s21815_s7 + $0x8] sm:$0xff]   ;;  %v15467_v8 = vld [vmem:[%s21815_s7 + $0x10] sm:$0xff]  }
 0xb42   :  { %15999 = vrcp.f32 %v8050_v10  ;;  %15340 = vmatprep.subr.bf16.mxu0 %v22023_v36  ;;  %v15468_v10 = vld [vmem:[%s21815_s7 + $0x18] sm:$0xff]  }
 0xb43   :  { %v8151_v57 = vpack.c.bf16 %v8117_v13, %v8115_v12  ;;  %16001 = vrcp.f32 %v8056_v24  ;;  %v15994_v60 = vpop.eup %15993 }
 0xb44   :  { %v8074_v56 = vpop.xlane.xlu0 %8073  ;;  %v8119_v19 = vmul.f32 %v15994_v60, %v19097_v38  ;;  %v15470_v60 = vld [vmem:[%s21815_s7 + $0x28] sm:$0xff]  }
 0xb45   :  { %v8059_v43 = vpop.xlane.xlu1 %8058  ;;  %15325 = vmatmul.mubr.msk.bf16.vlgmr.msra.gmra.mrb[32].mxu1 %vm1867_vm4, %v8151_v57 }
 0xb46   :  { %15335 = vmatpush3.bf16.msra.mxu1 %v8703_v42  ;;  %16003 = vrcp.f32 %v8059_v43  ;;  %15336 = vmatprep.mubr.msk.bf16.mxu1 %vm16146_vm1, %v22023_v36 }
 0xb47   :  { %15346 = vmatprep.subr.bf16.mxu1 %v22023_v36  ;;  %v15996_v25 = vpop.eup %15995  ;;  %16005 = vrcp.f32 %v8071_v58 }
 0xb48   :  { %v8077_v18 = vpop.xlane.xlu0 %8076  ;;  %v8121_v59 = vmul.f32 %v15996_v25, %v19106_v21  ;;  %v15998_v47 = vpop.eup %15997 }
 0xb49   :  { %v8062_v31 = vpop.xlane.xlu1 %8061  ;;  %v8125_v39 = vmul.f32 %v15998_v47, %v19112_v22 }
 0xb4a   :  { %v8152_v2 = vpack.c.bf16 %v8121_v59, %v8119_v19 }
 0xb4c   :  { %v16000_v1 = vpop.eup %15999  ;;  %v8747_v15 = vpop.permute.xlu0 %8746  ;;  %15331 = vmatmul.mubr.msk.bf16.vlgmr.msra.gmra.mrb[12].mxu0 %vm1867_vm4, %v8152_v2 }
 0xb4d   :  { %v8068_v45 = vpop.xlane.xlu1 %8067  ;;  %v8123_v11 = vmul.f32 %v16000_v1, %v19116_v9  ;;  %v8752_v6 = vsel %vm2240_vm3, %v8747_v15, 0  ;;  %v16002_v28 = vpop.eup %16001  ;;  %15342 = vmatprep.mubr.msk.bf16.mxu0 %vm16146_vm1, %v22023_v36 }
 0xb4e   :  { %16007 = vrcp.f32 %v8068_v45  ;;  %15341 = vmatpush3.bf16.msra.mxu0 %v8752_v6  ;;  %v8127_v22 = vmul.f32 %v16002_v28, %v19103_v50  ;;  %v22310_v6 = vld [vmem:[#allocation38_spill] sm:$0xff] }
 0xb4f   :  { %v8153_v38 = vpack.c.bf16 %v8125_v39, %v8123_v11  ;;  %16009 = vrcp.f32 %v8062_v31  ;;  %15352 = vmatprep.subr.bf16.mxu0 %v22023_v36  ;;  %v22311_v28 = vld [vmem:[#allocation34_spill] sm:$0xff] }
 0xb50   :  { %v16004_v21 = vpop.eup %16003  ;;  %v19375_v29 = vpop.permute.xlu0 %8974 }
 0xb51   :  { %v8065_v16 = vpop.xlane.xlu1 %8064  ;;  %v8129_v9 = vmul.f32 %v16004_v21, %v19124_v53  ;;  %15337 = vmatmul.mubr.msk.bf16.vlgmr.msra.gmra.mrb[36].mxu1 %vm1867_vm4, %v8153_v38  ;;  %v16006_v32 = vpop.eup %16005  ;;  %v22312_v21 = vld [vmem:[#allocation120_spill] sm:$0xff] }
 0xb52   :  { %16011 = vrcp.f32 %v8065_v16  ;;  %15348 = vmatprep.mubr.msk.bf16.mxu1 %vm16146_vm1, %v22023_v36  ;;  %v8137_v53 = vmul.f32 %v16006_v32, %v19122_v61 }
 0xb53   :  { %v8154_v51 = vpack.c.bf16 %v8129_v9, %v8127_v22  ;;  %16013 = vrcp.f32 %v8077_v18 }
 0xb54   :  { %16015 = vrcp.f32 %v8074_v56  ;;  %v15469_v56 = vld [vmem:[%s21815_s7 + $0x20] sm:$0xff]  }
 0xb55   :  { %v8796_v40 = vpop.permute.xlu1 %8795  ;;  %15343 = vmatmul.mubr.msk.bf16.vlgmr.msra.gmra.mrb[16].mxu0 %vm1867_vm4, %v8154_v51 }
 0xb56   :  { %v8801_v55 = vsel %vm2240_vm3, %v8796_v40, 0  ;;  %15354 = vmatprep.mubr.msk.bf16.mxu0 %vm16146_vm1, %v22023_v36 }
 0xb57   :  { %15347 = vmatpush3.bf16.msra.mxu1 %v8801_v55 }
 0xb58   :  { %v16008_v50 = vpop.eup %16007  ;;  %15358 = vmatprep.subr.bf16.mxu1 %v22023_v36 }
 0xb59   :  { %v8135_v49 = vmul.f32 %v16008_v50, %v19140_v23  ;;  %v8845_v27 = vpop.permute.xlu1 %8844  ;;  %v16010_v62 = vpop.eup %16009 }
 0xb5a   :  { %v8850_v17 = vsel %vm2240_vm3, %v8845_v27, 0  ;;  %v8131_v20 = vmul.f32 %v16010_v62, %v19132_v3 }
 0xb5b   :  { %v8156_v0 = vpack.c.bf16 %v8137_v53, %v8135_v49  ;;  %15353 = vmatpush3.bf16.msra.mxu0 %v8850_v17 }
 0xb5c   :  { %v16012_v24 = vpop.eup %16011  ;;  %15364 = vmatprep.subr.bf16.mxu0 %v15465_v35 }
 0xb5d   :  { %v8133_v63 = vmul.f32 %v16012_v24, %v19150_v54  ;;  %v8894_v46 = vpop.permute.xlu1 %8893  ;;  %v16014_v30 = vpop.eup %16013 }
 0xb5e   :  { %15355 = vmatmul.mubr.msk.bf16.vlgmr.msra.gmra.mrb[20].mxu0 %vm1867_vm4, %v8156_v0  ;;  %v8899_v61 = vsel %vm2240_vm3, %v8894_v46, 0  ;;  %v16016_v23 = vpop.eup %16015  ;;  %v8141_v52 = vmul.f32 %v16014_v30, %v19138_v48 }
 0xb5f   :  { %v8155_v26 = vpack.c.bf16 %v8133_v63, %v8131_v20  ;;  %v8139_v3 = vmul.f32 %v16016_v23, %v19130_v34  ;;  %15365 = vmatpush3.bf16.msra.mxu0 %v15465_v35 }
 0xb60   :  { %15366 = vmatprep.subr.bf16.mxu0 %v15466_v33 }
 0xb61   :  { %15349 = vmatmul.mubr.msk.bf16.vlgmr.msra.gmra.mrb[40].mxu1 %vm1867_vm4, %v8155_v26  ;;  %v8157_v5 = vpack.c.bf16 %v8141_v52, %v8139_v3  ;;  %v19377_v44 = vpop.permute.xlu1 %8978 }
 0xb62   :  { %15359 = vmatpush3.bf16.msra.mxu1 %v8899_v61  ;;  %15360 = vmatprep.mubr.msk.bf16.mxu1 %vm16146_vm1, %v22023_v36  ;;  %v19379_v36 = vpop.permute.xlu0 %8982 }
 0xb63   :  { %15367 = vmatpush3.bf16.msra.mxu0 %v15466_v33 }
 0xb64   :  { %15368 = vmatprep.subr.bf16.mxu0 %v15467_v8 }
 0xb65   :  { %v19381_v48 = vpop.permute.xlu1 %9102 }
 0xb66   :  { %v19383_v34 = vpop.permute.xlu0 %8976 }
 0xb67   :  { %15369 = vmatpush3.bf16.msra.mxu0 %v15467_v8 }
 0xb68   :  { %15370 = vmatprep.subr.bf16.mxu0 %v15468_v10 }
 0xb69   :  { %15361 = vmatmul.mubr.msk.bf16.vlgmr.msra.gmra.mrb[44].mxu1 %vm1867_vm4, %v8157_v5  ;;  %v19388_v4 = vpop.permute.xlu1 %9106 }
 0xb6a   :  { %v19390_v14 = vpop.permute.xlu0 %9110 }
 0xb6b   :  { %15371 = vmatpush3.bf16.msra.mxu0 %v15468_v10 }
 0xb6c   :  { %15372 = vmatprep.subr.bf16.mxu0 %v15469_v56 }
 0xb6d   :  { %v19398_v13 = vpop.permute.xlu1 %9104 }
 0xb6e   :  { %v19400_v58 = vpop.permute.xlu0 %8980 }
 0xb6f   :  { %15373 = vmatpush3.bf16.msra.mxu0 %v15469_v56  ;;  %v22313_v56 = vld [vmem:[#allocation111_spill] sm:$0xff] }
 0xb70   :  { %15374 = vmatprep.subr.bf16.mxu0 %v15470_v60 }
 0xb71   :  { %v19405_v12 = vpop.permute.xlu1 %8986 }
 0xb72   :  { %v19407_v57 = vpop.permute.xlu0 %9108 }
 0xb73   :  { %15375 = vmatpush3.bf16.msra.mxu0 %v15470_v60 }
 0xb75   :  { %v19412_v43 = vpop.permute.xlu1 %9114 }
 0xb76   :  { %v19414_v42 = vpop.permute.xlu0 %8990 }
 0xb79   :  { %v19419_v18 = vpop.permute.xlu1 %8988 }
 0xb7a   :  { %v19422_v19 = vpop.permute.xlu0 %8984 }
 0xb7d   :  { %v19426_v45 = vpop.permute.xlu1 %8994 }
 0xb7e   :  { %v19428_v11 = vpop.permute.xlu0 %9118 }
 0xb81   :  { %v19434_v38 = vpop.permute.xlu1 %9116 }
 0xb82   :  { %v19438_v16 = vpop.permute.xlu0 %8992 }
 0xb85   :  { %v19441_v22 = vpop.permute.xlu1 %9120 }
 0xb86   :  { %v19443_v9 = vpop.permute.xlu0 %9112 }
 0xb89   :  { %v19445_v51 = vpop.permute.xlu1 %8998 }
 0xb8a   :  { %v19447_v40 = vpop.permute.xlu0 %9122 }
 0xb8d   :  { %v19449_v32 = vpop.permute.xlu1 %9126 }
 0xb8e   :  { %v19451_v55 = vpop.permute.xlu0 %9002 }
 0xb91   :  { %v19453_v50 = vpop.permute.xlu1 %9130 }
 0xb92   :  { %v19455_v53 = vpop.permute.xlu0 %8996 }
 0xb94   :  { %v8200_v54 = vpop.f32.mrb[248].mxu0 }
 0xb95   :  { %9230 = vrot.lane.b32.xlu1 %v8200_v54, %s16152_s20  ;;  %v15272_v7 = vpop.f32.mrb[249].mxu0  ;;  %v19457_v49 = vpop.permute.xlu1 %9000 }
 0xb96   :  { %v8203_v37 = vpop.f32.mrb[250].mxu0  ;;  %v19459_v27 = vpop.permute.xlu0 %9004 }
 0xb97   :  { %v15273_v41 = vpop.f32.mrb[251].mxu0 }
 0xb99   :  { %9232 = vrot.lane.b32.xlu1 %v8203_v37, %s16152_s20  ;;  %v19461_v62 = vpop.permute.xlu1 %9124 }
 0xb9a   :  { %v19463_v0 = vpop.permute.xlu0 %9132 }
 0xb9d   :  { %v19467_v30 = vpop.permute.xlu1 %9128 }
 0xb9e   :  { %v19469_v23 = vpop.permute.xlu0 %9006 }
 0xba1   :  { %v19474_v37 = vpop.permute.xlu1 %9010 }
 0xba2   :  { %v19476_v35 = vpop.permute.xlu0 %9014 }
 0xba5   :  { %v19482_v60 = vpop.permute.xlu1 %9134 }
 0xbca   :  { %v8249_v25 = vpop.f32.mrb[16].mxu1 }
 0xbcb   :  { %9234 = vrot.lane.b32.xlu0 %v8249_v25, %s16152_s20  ;;  %v15278_v31 = vpop.f32.mrb[17].mxu1  ;;  %v19484_v25 = vpop.permute.xlu0 %9008 }
 0xbcc   :  { %v8252_v59 = vpop.f32.mrb[18].mxu1 }
 0xbcd   :  { %v15279_v47 = vpop.f32.mrb[19].mxu1 }
 0xbce   :  { %v8298_v2 = vpop.f32.mrb[252].mxu0 }
 0xbcf   :  { %9238 = vrot.lane.b32.xlu1 %v8298_v2, %s16152_s20  ;;  %v15284_v1 = vpop.f32.mrb[253].mxu0  ;;  %9236 = vrot.lane.b32.xlu0 %v8252_v59, %s16152_s20 }
 0xbd0   :  { %v8301_v15 = vpop.f32.mrb[254].mxu0  ;;  %v19487_v1 = vpop.permute.xlu1 %9138 }
 0xbd1   :  { %v15285_v39 = vpop.f32.mrb[255].mxu0 }
 0xbd2   :  { %v19489_v39 = vpop.permute.xlu0 %9142 }
 0xbd3   :  { %9148 = vrot.lane.b32.xlu1 %v22310_v6, %s16151_s0  ;;  %9144 = vrot.lane.b32.xlu0 %v22311_v28, %s16151_s0 }
 0xbd7   :  { %9152 = vrot.lane.b32.xlu1 %v22312_v21, %s16151_s0 }
 0xbdb   :  { %9240 = vrot.lane.b32.xlu1 %v8301_v15, %s16152_s20 }
 0xbfb   :  { %v8347_v17 = vpop.f32.mrb[20].mxu1 }
 0xbfc   :  { %9242 = vrot.lane.b32.xlu1 %v8347_v17, %s16152_s20  ;;  %v15290_v24 = vpop.f32.mrb[21].mxu1 }
 0xbfd   :  { %v8350_v20 = vpop.f32.mrb[22].mxu1  ;;  %v22314_v24 = vld [vmem:[#allocation24_spill] sm:$0xff] }
 0xbfe   :  { %v15291_v63 = vpop.f32.mrb[23].mxu1 }
 0xbff   :  { %v8396_v46 = vpop.f32.mrb[0].mxu0 }
 0xc00   :  { %v15296_v26 = vpop.f32.mrb[1].mxu0  ;;  %9246 = vrot.lane.b32.xlu0 %v8396_v46, %s16152_s20  ;;  %v19498_v46 = vpop.permute.xlu0 %9012 }
 0xc01   :  { %v8399_v61 = vpop.f32.mrb[2].mxu0 }
 0xc02   :  { %v15297_v52 = vpop.f32.mrb[3].mxu0  ;;  %9248 = vrot.lane.b32.xlu1 %v8399_v61, %s16152_s20 }
 0xc03   :  { %v8445_v3 = vpop.f32.mrb[24].mxu1  ;;  %v22315_v52 = vld [vmem:[#allocation113_spill] sm:$0xff] }
 0xc04   :  { %9244 = vrot.lane.b32.xlu0 %v8350_v20, %s16152_s20  ;;  %v15302_v5 = vpop.f32.mrb[25].mxu1  ;;  %v19496_v20 = vpop.permute.xlu1 %9136 }
 0xc05   :  { %v8448_v54 = vpop.f32.mrb[26].mxu1 }
 0xc06   :  { %9252 = vrot.lane.b32.xlu1 %v8448_v54, %s16152_s20  ;;  %v15303_v7 = vpop.f32.mrb[27].mxu1  ;;  %v19506_v54 = vpop.permute.xlu0 %9140 }
 0xc07   :  { %v8494_v41 = vpop.f32.mrb[4].mxu0 }
 0xc08   :  { %v15308_v33 = vpop.f32.mrb[5].mxu0  ;;  %9250 = vrot.lane.b32.xlu0 %v8445_v3, %s16152_s20  ;;  %v22316_v3 = vld [vmem:[#allocation117_spill] sm:$0xff]  ;;  %v19504_v5 = vpop.permute.xlu1 %9018 }
 0xc09   :  { %v8497_v8 = vpop.f32.mrb[6].mxu0 }
 0xc0a   :  { %v15309_v10 = vpop.f32.mrb[7].mxu0  ;;  %9030 = vrot.lane.b32.xlu1 %v22313_v56, %s16150_s18 }
 0xc0c   :  { %9254 = vrot.lane.b32.xlu0 %v8494_v41, %s16152_s20  ;;  %v22317_v41 = vld [vmem:[#allocation110_spill] sm:$0xff] }
 0xc0f   :  { %v8543_v31 = vpop.f32.mrb[28].mxu1 }
 0xc10   :  { %9256 = vrot.lane.b32.xlu0 %v8497_v8, %s16152_s20  ;;  %v15314_v59 = vpop.f32.mrb[29].mxu1 }
 0xc11   :  { %v8546_v47 = vpop.f32.mrb[30].mxu1 }
 0xc12   :  { %v15315_v2 = vpop.f32.mrb[31].mxu1 }
 0xc13   :  { %v8592_v15 = vpop.f32.mrb[8].mxu0 }
 0xc14   :  { %v15320_v6 = vpop.f32.mrb[9].mxu0  ;;  %9262 = vrot.lane.b32.xlu1 %v8592_v15, %s16152_s20  ;;  %9258 = vrot.lane.b32.xlu0 %v8543_v31, %s16152_s20  ;;  %v19513_v31 = vpop.permute.xlu1 %9146 }
 0xc15   :  { %v8595_v28 = vpop.f32.mrb[10].mxu0 }
 0xc16   :  { %v15321_v21 = vpop.f32.mrb[11].mxu0 }
 0xc17   :  { %v22318_v21 = vld [vmem:[#allocation22_spill] sm:$0xff] }
 0xc18   :  { %v8641_v17 = vpop.f32.mrb[32].mxu1  ;;  %9154 = vrot.lane.b32.xlu0 %v22314_v24, %s16151_s0  ;;  %9260 = vrot.lane.b32.xlu1 %v8546_v47, %s16152_s20  ;;  %v19515_v47 = vpop.permute.xlu0 %9022 }
 0xc19   :  { %v15326_v63 = vpop.f32.mrb[33].mxu1 }
 0xc1a   :  { %v8644_v26 = vpop.f32.mrb[34].mxu1  ;;  %v19520_v63 = vpop.permute.xlu1 %9020 }
 0xc1b   :  { %v15327_v61 = vpop.f32.mrb[35].mxu1  ;;  %22319 = vst [vmem:[#allocation124_spill] sm:$0xff] %v19520_v63 }
 0xc1c   :  { %9034 = vrot.lane.b32.xlu0 %v22315_v52, %s16150_s18  ;;  %9158 = vrot.lane.b32.xlu1 %v22316_v3, %s16151_s0  ;;  %v19522_v52 = vpop.permute.xlu0 %9016  ;;  %v22321_v3 = vld [vmem:[#allocation114_spill] sm:$0xff] }
 0xc1f   :  { %v8690_v7 = vpop.f32.mrb[12].mxu0 }
 0xc20   :  { %9028 = vrot.lane.b32.xlu0 %v22317_v41, %s16150_s18  ;;  %9264 = vrot.lane.b32.xlu1 %v8595_v28, %s16152_s20  ;;  %v15332_v33 = vpop.f32.mrb[13].mxu0  ;;  %v19530_v41 = vpop.permute.xlu1 %9026 }
 0xc21   :  { %v8693_v8 = vpop.f32.mrb[14].mxu0  ;;  %22322 = vst [vmem:[#allocation48_spill] sm:$0xff] %v19530_v41  ;;  %v19532_v33 = vpop.permute.xlu0 %9150  ;;  %v22325_v41 = vld [vmem:[#allocation23_spill] sm:$0xff] }
 0xc22   :  { %v15333_v10 = vpop.f32.mrb[15].mxu0 }
 0xc24   :  { %v8739_v56 = vpop.f32.mrb[36].mxu1  ;;  %9270 = vrot.lane.b32.xlu1 %v8690_v7, %s16152_s20  ;;  %9266 = vrot.lane.b32.xlu0 %v8641_v17, %s16152_s20  ;;  %v22320_v17 = vld [vmem:[#allocation112_spill] sm:$0xff] }
 0xc25   :  { %v15338_v59 = vpop.f32.mrb[37].mxu1 }
 0xc26   :  { %v8742_v2 = vpop.f32.mrb[38].mxu1 }
 0xc27   :  { %v15339_v15 = vpop.f32.mrb[39].mxu1 }
 0xc28   :  { %v8788_v6 = vpop.f32.mrb[16].mxu0  ;;  %9162 = vrot.lane.b32.xlu1 %v22318_v21, %s16151_s0  ;;  %9268 = vrot.lane.b32.xlu0 %v8644_v26, %s16152_s20 }
 0xc29   :  { %v15344_v28 = vpop.f32.mrb[17].mxu0 }
 0xc2a   :  { %v8791_v24 = vpop.f32.mrb[18].mxu0  ;;  %v9231_v28 = vpop.permute.xlu1 %9230 }
 0xc2b   :  { %v15345_v61 = vpop.f32.mrb[19].mxu0 }
 0xc2c   :  { %9032 = vrot.lane.b32.xlu1 %v22320_v17, %s16150_s18  ;;  %9036 = vrot.lane.b32.xlu0 %v22321_v3, %s16150_s18 }
 0xc30   :  { %9272 = vrot.lane.b32.xlu1 %v8693_v8, %s16152_s20  ;;  %9278 = vrot.lane.b32.xlu0 %v8788_v6, %s16152_s20  ;;  %v22323_v8 = vld [vmem:[#allocation30_spill] sm:$0xff] }
 0xc31   :  { %v8886_v7 = vpop.f32.mrb[20].mxu0  ;;  %v9326_v6 = vsel %vm1114_vm2, %v22323_v8, %v19375_v29  ;;  %v9327_v29 = vsel %vm1114_vm2, %v22325_v41, %v19383_v34  ;;  %v22326_v8 = vld [vmem:[#allocation57_spill] sm:$0xff] }
 0xc32   :  { %v15356_v26 = vpop.f32.mrb[21].mxu0  ;;  %v9359_v3 = vsel %vm9358_vm7, %v9326_v6, %v19381_v48  ;;  %v22327_v48 = vld [vmem:[#allocation37_spill] sm:$0xff]  ;;  %v9360_v6 = vsel %vm9358_vm7, %v9327_v29, %v19398_v13 }
 0xc33   :  { %v8889_v10 = vpop.f32.mrb[22].mxu0  ;;  %v9392_v26 = vsel %vm9391_vm6, %v9359_v3, %v9231_v28 }
 0xc34   :  { %v8837_v59 = vpop.f32.mrb[40].mxu1  ;;  %v15357_v15 = vpop.f32.mrb[23].mxu0  ;;  %9274 = vrot.lane.b32.xlu1 %v8739_v56, %s16152_s20  ;;  %9276 = vrot.lane.b32.xlu0 %v8742_v2, %s16152_s20  ;;  %v9456_v2 = vcombine.high %v9392_v26, %v9392_v26 }
 0xc35   :  { %v15350_v21 = vpop.f32.mrb[41].mxu1  ;;  %v19544_v56 = vpop.permute.xlu0 %9024 }
 0xc36   :  { %v8840_v61 = vpop.f32.mrb[42].mxu1  ;;  %22324 = vst [vmem:[#allocation43_spill] sm:$0xff] %v19544_v56  ;;  %v9233_v15 = vpop.permute.xlu1 %9232 }
 0xc37   :  { %v15351_v17 = vpop.f32.mrb[43].mxu1  ;;  %v9393_v34 = vsel %vm9391_vm6, %v9360_v6, %v9233_v15 }
 0xc38   :  { %9280 = vrot.lane.b32.xlu1 %v8791_v24, %s16152_s20  ;;  %9282 = vrot.lane.b32.xlu0 %v8837_v59, %s16152_s20  ;;  %v9328_v17 = vsel %vm1114_vm2, %v22326_v8, %v19377_v44  ;;  %v22328_v24 = vld [vmem:[#allocation122_spill] sm:$0xff]  ;;  %v9472_v8 = vcombine.low %v9392_v26, %v9456_v2 }
 0xc39   :  { %v9361_v28 = vsel %vm9358_vm7, %v9328_v17, %v19388_v4  ;;  %v22331_v17 = vld [vmem:[#allocation39_spill] sm:$0xff] }
 0xc3c   :  { %v8935_v21 = vpop.f32.mrb[44].mxu1  ;;  %9156 = vrot.lane.b32.xlu1 %v22327_v48, %s16151_s0  ;;  %9164 = vrot.lane.b32.xlu0 %v22328_v24, %s16151_s0  ;;  %v22329_v48 = vld [vmem:[#allocation58_spill] sm:$0xff] }
 0xc3d   :  { %v15362_v59 = vpop.f32.mrb[45].mxu1  ;;  %v9235_v3 = vpop.permute.xlu0 %9234  ;;  %v9330_v24 = vsel %vm1114_vm2, %v22329_v48, %v19379_v36 }
 0xc3e   :  { %v8938_v56 = vpop.f32.mrb[46].mxu1  ;;  %v9394_v41 = vsel %vm9391_vm6, %v9361_v28, %v9235_v3  ;;  %v22330_v59 = vld [vmem:[#allocation18_spill] sm:$0xff]  ;;  %v9363_v13 = vsel %vm9358_vm7, %v9330_v24, %v19390_v14 }
 0xc3f   :  { %v15363_v44 = vpop.f32.mrb[47].mxu1  ;;  %v9473_v63 = vcombine.low %v9393_v34, %v9394_v41  ;;  %v9329_v4 = vsel %vm1114_vm2, %v22330_v59, %v19400_v58  ;;  %v9457_v2 = vcombine.high %v9394_v41, %v9394_v41  ;;  %v22332_v41 = vld [vmem:[#allocation59_spill] sm:$0xff] }
 0xc40   :  { %9160 = vrot.lane.b32.xlu1 %v22331_v17, %s16151_s0  ;;  %9286 = vrot.lane.b32.xlu0 %v8886_v7, %s16152_s20  ;;  %v9362_v26 = vsel %vm9358_vm7, %v9329_v4, %v19407_v57  ;;  %v9331_v44 = vsel %vm1114_vm2, %v22332_v41, %v19422_v19  ;;  %v22334_v19 = vld [vmem:[#allocation62_spill] sm:$0xff] }
 0xc41   :  { %v9520_v15 = vpack.c.bf16 %v9473_v63, %v9472_v8  ;;  %v9239_v29 = vpop.permute.xlu1 %9238  ;;  %v9237_v28 = vpop.permute.xlu0 %9236 }
 0xc42   :  { %v9396_v36 = vsel %vm9391_vm6, %v9363_v13, %v9239_v29  ;;  %v9395_v6 = vsel %vm9391_vm6, %v9362_v26, %v9237_v28  ;;  %v9334_v13 = vsel %vm1114_vm2, %v22334_v19, %v19414_v42  ;;  %v22335_v26 = vld [vmem:[#allocation61_spill] sm:$0xff] }
 0xc43   :  { %v9458_v58 = vcombine.high %v9396_v36, %v9396_v36  ;;  %v9474_v3 = vcombine.low %v9457_v2, %v9395_v6  ;;  %15376 = vmatprep.mubr.msk.bf16.mxu0 %vm268_vm0, %v9520_v15 }
 0xc44   :  { %9284 = vrot.lane.b32.xlu1 %v8840_v61, %s16152_s20  ;;  %9290 = vrot.lane.b32.xlu0 %v8935_v21, %s16152_s20  ;;  %v22333_v61 = vld [vmem:[#allocation60_spill] sm:$0xff] }
 0xc45   :  { %v9475_v14 = vcombine.low %v9396_v36, %v9458_v58  ;;  %v19583_v57 = vpop.permute.xlu1 %9148  ;;  %v9332_v21 = vsel %vm1114_vm2, %v22333_v61, %v19405_v12  ;;  %v19597_v8 = vpop.permute.xlu0 %9144  ;;  %v9367_v12 = vsel %vm9358_vm7, %v9334_v13, %v19428_v11  ;;  %v22336_v36 = vld [vmem:[#allocation64_spill] sm:$0xff] }
 0xc46   :  { %v9336_v6 = vsel %vm1114_vm2, %v22336_v36, %v19426_v45 }
 0xc47   :  { %v9521_v7 = vpack.c.bf16 %v9475_v14, %v9474_v3  ;;  %v22337_v3 = vld [vmem:[#allocation63_spill] sm:$0xff] }
 0xc48   :  { %9288 = vrot.lane.b32.xlu0 %v8889_v10, %s16152_s20  ;;  %9292 = vrot.lane.b32.xlu1 %v8938_v56, %s16152_s20  ;;  %v9365_v10 = vsel %vm9358_vm7, %v9332_v21, %v19412_v43  ;;  %v9364_v56 = vsel %vm9358_vm7, %v9331_v44, %v19443_v9  ;;  %v9333_v9 = vsel %vm1114_vm2, %v22335_v26, %v19419_v18  ;;  %v22338_v44 = vld [vmem:[#allocation66_spill] sm:$0xff] }
 0xc49   :  { %15377 = vmatmul.mubr.msk.bf16.vlgmr.msra.gmra.mrb[24].mxu0 %vm268_vm0, %v9521_v7  ;;  %v19585_v63 = vpop.permute.xlu1 %9152  ;;  %v9366_v15 = vsel %vm9358_vm7, %v9333_v9, %v19434_v38  ;;  %v9335_v14 = vsel %vm1114_vm2, %v22337_v3, %v19438_v16  ;;  %v9369_v38 = vsel %vm9358_vm7, %v9336_v6, %v19447_v40  ;;  %v9337_v45 = vsel %vm1114_vm2, %v22338_v44, %v19455_v53 }
 0xc4a   :  { %v9368_v18 = vsel %vm9358_vm7, %v9335_v14, %v19441_v22  ;;  %v9370_v16 = vsel %vm9358_vm7, %v9337_v45, %v19461_v62 }
 0xc4d   :  { %v9241_v34 = vpop.permute.xlu1 %9240 }
 0xc4e   :  { %v9397_v24 = vsel %vm9391_vm6, %v9364_v56, %v9241_v34 }
 0xc6e   :  { %v9243_v48 = vpop.permute.xlu1 %9242 }
 0xc6f   :  { %v9398_v59 = vsel %vm9391_vm6, %v9365_v10, %v9243_v48  ;;  %v22339_v48 = vld [vmem:[#allocation65_spill] sm:$0xff] }
 0xc70   :  { %v9476_v4 = vcombine.low %v9397_v24, %v9398_v59  ;;  %v9459_v29 = vcombine.high %v9398_v59, %v9398_v59  ;;  %v9338_v40 = vsel %vm1114_vm2, %v22339_v48, %v19445_v51  ;;  %v22340_v51 = vld [vmem:[#allocation68_spill] sm:$0xff] }
 0xc71   :  { %v9371_v53 = vsel %vm9358_vm7, %v9338_v40, %v19449_v32  ;;  %v9340_v9 = vsel %vm1114_vm2, %v22340_v51, %v19451_v55  ;;  %v22342_v55 = vld [vmem:[#allocation70_spill] sm:$0xff] }
 0xc72   :  { %v9247_v17 = vpop.permute.xlu0 %9246 }
 0xc73   :  { %v9400_v2 = vsel %vm9391_vm6, %v9367_v12, %v9247_v17 }
 0xc74   :  { %v9249_v43 = vpop.permute.xlu1 %9248  ;;  %v9460_v58 = vcombine.high %v9400_v2, %v9400_v2 }
 0xc75   :  { %v9401_v61 = vsel %vm9391_vm6, %v9368_v18, %v9249_v43 }
 0xc76   :  { %v9245_v28 = vpop.permute.xlu0 %9244  ;;  %v9478_v10 = vcombine.low %v9400_v2, %v9460_v58  ;;  %v22341_v2 = vld [vmem:[#allocation67_spill] sm:$0xff] }
 0xc77   :  { %v9399_v42 = vsel %vm9391_vm6, %v9366_v15, %v9245_v28  ;;  %v9339_v32 = vsel %vm1114_vm2, %v22341_v2, %v19457_v49  ;;  %v9373_v15 = vsel %vm9358_vm7, %v9340_v9, %v19453_v50 }
 0xc78   :  { %v9477_v11 = vcombine.low %v9459_v29, %v9399_v42  ;;  %v9253_v34 = vpop.permute.xlu1 %9252  ;;  %v9372_v29 = vsel %vm9358_vm7, %v9339_v32, %v19467_v30 }
 0xc79   :  { %v9403_v24 = vsel %vm9391_vm6, %v9370_v16, %v9253_v34  ;;  %v22344_v16 = vld [vmem:[#allocation72_spill] sm:$0xff] }
 0xc7a   :  { %v9522_v7 = vpack.c.bf16 %v9477_v11, %v9476_v4  ;;  %v9251_v41 = vpop.permute.xlu0 %9250  ;;  %v9341_v11 = vsel %vm1114_vm2, %v22342_v55, %v19459_v27  ;;  %v22350_v55 = vld [vmem:[#allocation78_spill] sm:$0xff] }
 0xc7b   :  { %v9402_v21 = vsel %vm9391_vm6, %v9369_v38, %v9251_v41  ;;  %v9374_v49 = vsel %vm9358_vm7, %v9341_v11, %v19463_v0  ;;  %v22343_v41 = vld [vmem:[#allocation69_spill] sm:$0xff]  ;;  %v9348_v11 = vsel %vm1114_vm2, %v22350_v55, %v19504_v5 }
 0xc7c   :  { %v9461_v56 = vcombine.high %v9402_v21, %v9402_v21  ;;  %v9479_v22 = vcombine.low %v9401_v61, %v9402_v21  ;;  %15380 = vmatprep.mubr.msk.bf16.mxu0 %vm268_vm0, %v9522_v7  ;;  %v19639_v13 = vpop.permute.xlu1 %9030  ;;  %v9342_v44 = vsel %vm1114_vm2, %v22343_v41, %v19469_v23  ;;  %v22346_v23 = vld [vmem:[#allocation74_spill] sm:$0xff] }
 0xc7d   :  { %v9375_v27 = vsel %vm9358_vm7, %v9342_v44, %v19482_v60  ;;  %v9344_v60 = vsel %vm1114_vm2, %v22346_v23, %v19474_v37 }
 0xc7e   :  { %v9480_v59 = vcombine.low %v9461_v56, %v9403_v24  ;;  %v9523_v4 = vpack.c.bf16 %v9479_v22, %v9478_v10  ;;  %v9255_v17 = vpop.permute.xlu0 %9254  ;;  %v9346_v10 = vsel %vm1114_vm2, %v22344_v16, %v19476_v35  ;;  %v22345_v56 = vld [vmem:[#allocation71_spill] sm:$0xff]  ;;  %v9377_v40 = vsel %vm9358_vm7, %v9344_v60, %v19487_v1  ;;  %v22356_v16 = vld [vmem:[#allocation82_spill] sm:$0xff] }
 0xc7f   :  { %v9404_v19 = vsel %vm9391_vm6, %v9371_v53, %v9255_v17  ;;  %v9343_v22 = vsel %vm1114_vm2, %v22345_v56, %v19484_v25  ;;  %v9379_v48 = vsel %vm9358_vm7, %v9346_v10, %v19489_v39 }
 0xc80   :  { %v9462_v62 = vcombine.high %v9404_v19, %v9404_v19  ;;  %15381 = vmatmul.mubr.msk.bf16.gmra.mrb[28].mxu0 %vm268_vm0, %v9523_v4  ;;  %v9376_v24 = vsel %vm9358_vm7, %v9343_v22, %v19496_v20 }
 0xc82   :  { %v9481_v12 = vcombine.low %v9404_v19, %v9462_v62  ;;  %v9257_v43 = vpop.permute.xlu0 %9256  ;;  %v22347_v62 = vld [vmem:[#allocation75_spill] sm:$0xff] }
 0xc83   :  { %v9405_v6 = vsel %vm9391_vm6, %v9372_v29, %v9257_v43  ;;  %v9345_v39 = vsel %vm1114_vm2, %v22347_v62, %v19498_v46 }
 0xc84   :  { %v9524_v26 = vpack.c.bf16 %v9481_v12, %v9480_v59  ;;  %v9378_v1 = vsel %vm9358_vm7, %v9345_v39, %v19506_v54 }
 0xc86   :  { %15384 = vmatprep.mubr.msk.bf16.mxu0 %vm268_vm0, %v9524_v26  ;;  %v9263_v28 = vpop.permute.xlu1 %9262  ;;  %v9259_v36 = vpop.permute.xlu0 %9258 }
 0xc87   :  { %v9406_v42 = vsel %vm9391_vm6, %v9373_v15, %v9259_v36  ;;  %v9408_v0 = vsel %vm9391_vm6, %v9375_v27, %v9263_v28  ;;  %v22348_v36 = vld [vmem:[#allocation76_spill] sm:$0xff] }
 0xc88   :  { %v9482_v58 = vcombine.low %v9405_v6, %v9406_v42  ;;  %v9463_v50 = vcombine.high %v9406_v42, %v9406_v42  ;;  %v9464_v21 = vcombine.high %v9408_v0, %v9408_v0  ;;  %v9350_v54 = vsel %vm1114_vm2, %v22348_v36, %v19515_v47  ;;  %v22349_v42 = vld [vmem:[#allocation73_spill] sm:$0xff] }
 0xc89   :  { %v9383_v6 = vsel %vm9358_vm7, %v9350_v54, %v19532_v33  ;;  %v22352_v33 = vld [vmem:[#allocation79_spill] sm:$0xff] }
 0xc8a   :  { %v19659_v3 = vpop.permute.xlu0 %9154  ;;  %v9261_v30 = vpop.permute.xlu1 %9260  ;;  %v9484_v17 = vcombine.low %v9408_v0, %v9464_v21  ;;  %v22355_v21 = vld [vmem:[#allocation48_spill] sm:$0xff] }
 0xc8b   :  { %v9407_v14 = vsel %vm9391_vm6, %v9374_v49, %v9261_v30  ;;  %v9352_v10 = vsel %vm1114_vm2, %v22356_v16, %v22355_v21  ;;  %v16114_v16 = vld [vmem:[%s21964_s19 + $0x18] sm:$0xf] }
 0xc8c   :  { %v9483_v18 = vcombine.low %v9463_v50, %v9407_v14  ;;  %v9381_v50 = vsel %vm9358_vm7, %v9348_v11, %v19513_v31  ;;  %v22353_v31 = vld [vmem:[#allocation43_spill] sm:$0xff]  ;;  %v9385_v23 = vsel %vm9358_vm7, %v9352_v10, %v19659_v3 }
 0xc8e   :  { %v9525_v7 = vpack.c.bf16 %v9483_v18, %v9482_v58  ;;  %v19662_v34 = vpop.permute.xlu0 %9034  ;;  %v19664_v38 = vpop.permute.xlu1 %9158  ;;  %v9347_v58 = vsel %vm1114_vm2, %v22349_v42, %v19522_v52  ;;  %v22351_v18 = vld [vmem:[#allocation124_spill] sm:$0xff]  ;;  %v22361_v42 = vld [vmem:[#allocation85_spill] sm:$0xff] }
 0xc8f   :  { %v9380_v30 = vsel %vm9358_vm7, %v9347_v58, %v19597_v8 }
 0xc90   :  { %15385 = vmatmul.mubr.msk.bf16.gmra.mrb[32].mxu0 %vm268_vm0, %v9525_v7  ;;  %v9349_v7 = vsel %vm1114_vm2, %v22352_v33, %v22351_v18 }
 0xc91   :  { %v9382_v5 = vsel %vm9358_vm7, %v9349_v7, %v19583_v57 }
 0xc92   :  { %v19673_v45 = vpop.permute.xlu0 %9028  ;;  %v9265_v61 = vpop.permute.xlu1 %9264 }
 0xc93   :  { %v9409_v35 = vsel %vm9391_vm6, %v9376_v24, %v9265_v61  ;;  %v22354_v61 = vld [vmem:[#allocation77_spill] sm:$0xff] }
 0xc94   :  { %v9351_v8 = vsel %vm1114_vm2, %v22354_v61, %v22353_v31 }
 0xc95   :  { %v9384_v22 = vsel %vm9358_vm7, %v9351_v8, %v19585_v63  ;;  %v22357_v63 = vld [vmem:[#allocation80_spill] sm:$0xff]  ;;  %v16113_v8 = vld [vmem:[%s21964_s19] sm:$0xff] }
 0xc96   :  { %v9271_v53 = vpop.permute.xlu1 %9270  ;;  %v9267_v59 = vpop.permute.xlu0 %9266  ;;  %v9354_v3 = vsel %vm1114_vm2, %v22357_v63, %v19639_v13 }
 0xc97   :  { %v9412_v4 = vsel %vm9391_vm6, %v9379_v48, %v9271_v53  ;;  %v9410_v25 = vsel %vm9391_vm6, %v9377_v40, %v9267_v59 }
 0xc98   :  { %v9466_v19 = vcombine.high %v9412_v4, %v9412_v4  ;;  %v9485_v37 = vcombine.low %v9409_v35, %v9410_v25  ;;  %v9465_v12 = vcombine.high %v9410_v25, %v9410_v25 }
 0xc9a   :  { %v9526_v20 = vpack.c.bf16 %v9485_v37, %v9484_v17  ;;  %v9163_v43 = vpop.permute.xlu1 %9162  ;;  %v9269_v26 = vpop.permute.xlu0 %9268  ;;  %v9487_v9 = vcombine.low %v9412_v4, %v9466_v19  ;;  %v9387_v19 = vsel %vm9358_vm7, %v9354_v3, %v19664_v38 }
 0xc9b   :  { %v9411_v51 = vsel %vm9391_vm6, %v9378_v1, %v9269_v26  ;;  %v22359_v26 = vld [vmem:[#allocation83_spill] sm:$0xff] }
 0xc9c   :  { %v9486_v2 = vcombine.low %v9465_v12, %v9411_v51  ;;  %15388 = vmatprep.mubr.msk.bf16.mxu0 %vm268_vm0, %v9526_v20  ;;  %v22358_v12 = vld [vmem:[#allocation84_spill] sm:$0xff]  ;;  %v9353_v51 = vsel %vm1114_vm2, %v22359_v26, %v19673_v45 }
 0xc9d   :  { %v9356_v20 = vsel %vm1114_vm2, %v22358_v12, %v19662_v34 }
 0xc9e   :  { %v9527_v32 = vpack.c.bf16 %v9487_v9, %v9486_v2  ;;  %v9033_v15 = vpop.permute.xlu1 %9032  ;;  %v9037_v29 = vpop.permute.xlu0 %9036  ;;  %v9389_v9 = vsel %vm9358_vm7, %v9356_v20, %v9163_v43 }
 0xc9f   :  { %v9357_v58 = vsel %vm1114_vm2, %v22361_v42, %v9037_v29  ;;  %v19768_v29 = vld [vmem:[%s21816_s8] ss:$0 sm:$0xff] }
 0xca0   :  { %15389 = vmatmul.mubr.msk.bf16.gmra.mrb[36].mxu0 %vm268_vm0, %v9527_v32 }
 0xca2   :  { %v9273_v28 = vpop.permute.xlu1 %9272  ;;  %v9279_v46 = vpop.permute.xlu0 %9278 }
 0xca3   :  { %v9416_v49 = vsel %vm9391_vm6, %v9383_v6, %v9279_v46  ;;  %v9413_v52 = vsel %vm9391_vm6, %v9380_v30, %v9273_v28  ;;  %v22360_v6 = vld [vmem:[#allocation81_spill] sm:$0xff] }
 0xca4   :  { %v9468_v44 = vcombine.high %v9416_v49, %v9416_v49  ;;  %v9355_v34 = vsel %vm1114_vm2, %v22360_v6, %v9033_v15 }
 0xca6   :  { %v9275_v47 = vpop.permute.xlu1 %9274  ;;  %v9277_v14 = vpop.permute.xlu0 %9276  ;;  %v9490_v53 = vcombine.low %v9416_v49, %v9468_v44 }
 0xca7   :  { %v9414_v41 = vsel %vm9391_vm6, %v9381_v50, %v9275_v47  ;;  %v9415_v56 = vsel %vm9391_vm6, %v9382_v5, %v9277_v14 }
 0xca8   :  { %v9467_v27 = vcombine.high %v9414_v41, %v9414_v41  ;;  %v9488_v0 = vcombine.low %v9413_v52, %v9414_v41 }
 0xcaa   :  { %v9489_v57 = vcombine.low %v9467_v27, %v9415_v56  ;;  %v9281_v60 = vpop.permute.xlu1 %9280  ;;  %v9283_v48 = vpop.permute.xlu0 %9282  ;;  %v22362_v56 = vld [vmem:[#allocation6_spill] sm:$0xff] }
 0xcab   :  { %v9417_v40 = vsel %vm9391_vm6, %v9384_v22, %v9281_v60  ;;  %v9418_v24 = vsel %vm9391_vm6, %v9385_v23, %v9283_v48  ;;  %v22363_v60 = vld [vmem:[#allocation7_spill] sm:$0xff] }
 0xcac   :  { %v9528_v59 = vpack.c.bf16 %v9489_v57, %v9488_v0  ;;  %v9491_v35 = vcombine.low %v9417_v40, %v9418_v24  ;;  %v9469_v2 = vcombine.high %v9418_v24, %v9418_v24  ;;  %v16115_v40 = vld [vmem:[%s21964_s19 + $0x8] sm:$0xf] }
 0xcae   :  { %v9529_v4 = vpack.c.bf16 %v9491_v35, %v9490_v53  ;;  %v9157_v25 = vpop.permute.xlu1 %9156  ;;  %15392 = vmatprep.mubr.msk.bf16.mxu0 %vm268_vm0, %v9528_v59  ;;  %v9165_v17 = vpop.permute.xlu0 %9164  ;;  %v16116_v53 = vld [vmem:[%s21964_s19 + $0x10] sm:$0xff] }
 0xcaf   :  { %v9386_v13 = vsel %vm9358_vm7, %v9353_v51, %v9157_v25  ;;  %v9390_v45 = vsel %vm9358_vm7, %v9357_v58, %v9165_v17  ;;  %v16119_v58 = vld [vmem:[%s21964_s19 + $0x30] sm:$0xff] }
 0xcb0   :  { %15393 = vmatmul.mubr.msk.bf16.gmra.mrb[40].mxu0 %vm268_vm0, %v9529_v4  ;;  %v22364_v4 = vld [vmem:[#allocation8_spill] sm:$0xff] }
 0xcb2   :  { %v9161_v37 = vpop.permute.xlu1 %9160  ;;  %v9287_v62 = vpop.permute.xlu0 %9286 }
 0xcb3   :  { %v9420_v39 = vsel %vm9391_vm6, %v9387_v19, %v9287_v62  ;;  %v9388_v43 = vsel %vm9358_vm7, %v9355_v34, %v9161_v37  ;;  %v16117_v19 = vld [vmem:[%s21964_s19 + $0x20] sm:$0xff]  ;;  %v16118_v34 = vld [vmem:[%s21964_s19 + $0x28] sm:$0xf] }
 0xcb4   :  { %v9470_v1 = vcombine.high %v9420_v39, %v9420_v39 }
 0xcb6   :  { %v9285_v32 = vpop.permute.xlu1 %9284  ;;  %v9291_v38 = vpop.permute.xlu0 %9290  ;;  %v9493_v36 = vcombine.low %v9420_v39, %v9470_v1 }
 0xcb7   :  { %v9419_v28 = vsel %vm9391_vm6, %v9386_v13, %v9285_v32  ;;  %v9422_v46 = vsel %vm9391_vm6, %v9389_v9, %v9291_v38 }
 0xcb8   :  { %v9492_v54 = vcombine.low %v9469_v2, %v9419_v28  ;;  %v9471_v11 = vcombine.high %v9422_v46, %v9422_v46 }
 0xcba   :  { %v9530_v55 = vpack.c.bf16 %v9493_v36, %v9492_v54  ;;  %v9289_v49 = vpop.permute.xlu0 %9288  ;;  %v9293_v50 = vpop.permute.xlu1 %9292  ;;  %v22365_v54 = vld [vmem:[#allocation13_spill] sm:$0xff] }
 0xcbb   :  { %v9421_v30 = vsel %vm9391_vm6, %v9388_v43, %v9289_v49  ;;  %v9423_v47 = vsel %vm9391_vm6, %v9390_v45, %v9293_v50  ;;  %v16121_v49 = vld [vmem:[%s21964_s19 + $0x50] sm:$0xff] }
 0xcbc   :  { %v9494_v14 = vcombine.low %v9421_v30, %v9422_v46  ;;  %v9495_v18 = vcombine.low %v9471_v11, %v9423_v47  ;;  %15396 = vmatprep.mubr.msk.bf16.mxu0 %vm268_vm0, %v9530_v55  ;;  %v16120_v55 = vld [vmem:[%s21964_s19 + $0x40] sm:$0xff]  ;;  %v22366_v30 = vld [vmem:[#allocation9_spill] sm:$0xff] }
 0xcbe   :  { %v9531_v15 = vpack.c.bf16 %v9495_v18, %v9494_v14  ;;  %v16122_v14 = vld [vmem:[%s21964_s19 + $0x38] sm:$0xf] }
 0xcc0   :  { %15397 = vmatmul.mubr.msk.bf16.gmra.mrb[44].mxu0 %vm268_vm0, %v9531_v15 }
 0xd1c   :  { %v15378_v33 = vpop.f32.mrb[24].mxu0 }
 0xd1d   :  { %v9666_v7 = vadd.f32 %v15378_v33, %v19768_v29  ;;  %v9657_v52 = vpop.f32.mrb[25].mxu0  ;;  %v16123_v33 = vld [vmem:[%s21964_s19 + $0x48] sm:$0xf] }
 0xd1e   :  { %v9658_v41 = vadd.f32 %v19768_v29, %v9657_v52  ;;  %v15379_v5 = vpop.f32.mrb[26].mxu0 }
 0xd1f   :  { %v9778_v44 = vcombine.high %v9666_v7, %v9666_v7  ;;  %v9669_v27 = vadd.f32 %v15379_v5, %v19768_v29  ;;  %v9660_v0 = vpop.f32.mrb[27].mxu0  ;;  %v19788_v48 = vadd.f32 %v9666_v7, %v22363_v60 }
 0xd20   :  { %v9776_v31 = vcombine.high %v9658_v41, %v9658_v41  ;;  %v9661_v61 = vadd.f32 %v19768_v29, %v9660_v0  ;;  %v19777_v21 = vadd.f32 %v16113_v8, %v9658_v41 }
 0xd21   :  { %v19782_v10 = vadd.f32 %v16114_v16, %v9778_v44  ;;  %v9779_v23 = vcombine.high %v9669_v27, %v9669_v27  ;;  %v19813_v37 = vadd.f32 %v16117_v19, %v9669_v27 }
 0xd22   :  { %v19785_v22 = vadd.f32 %v9776_v31, %v22362_v56  ;;  %v9777_v57 = vcombine.high %v9661_v61, %v9661_v61  ;;  %v19793_v24 = vadd.f32 %v16115_v40, %v9661_v61 }
 0xd23   :  { %v19803_v25 = vadd.f32 %v9779_v23, %v22364_v4  ;;  %v9922_v3 = vcombine.low %v19788_v48, %v19782_v10 }
 0xd24   :  { %v19798_v59 = vadd.f32 %v16116_v53, %v9777_v57  ;;  %v9920_v35 = vcombine.low %v19777_v21, %v19785_v22 }
 0xd25   :  { %v9974_v39 = vsel %vm268_vm0, %v9922_v3, 0.0  ;;  %v9923_v1 = vcombine.low %v19813_v37, %v19803_v25  ;;  %v22367_v3 = vld [vmem:[#allocation14_spill] sm:$0xff] }
 0xd26   :  { %v9968_v17 = vsel %vm268_vm0, %v9920_v35, 0.0  ;;  %v9921_v63 = vcombine.low %v19793_v24, %v19798_v59 }
 0xd27   :  { %9969 = vadd.xlane.f32.xlu0 %v9968_v17  ;;  %v9977_v12 = vsel %vm268_vm0, %v9923_v1, 0.0  ;;  %v16124_v17 = vld [vmem:[%s21964_s19 + $0x70] sm:$0xff] }
 0xd28   :  { %v9971_v62 = vsel %vm268_vm0, %v9921_v63, 0.0 }
 0xd29   :  { %9972 = vadd.xlane.f32.xlu1 %v9971_v62  ;;  %v16125_v62 = vld [vmem:[%s21964_s19 + $0x58] sm:$0xf] }
 0xd2b   :  { %9975 = vadd.xlane.f32.xlu0 %v9974_v39 }
 0xd2f   :  { %9978 = vadd.xlane.f32.xlu0 %v9977_v12  ;;  %v16126_v12 = vld [vmem:[%s21964_s19 + $0x68] sm:$0xf] }
 0xd53   :  { %v15382_v20 = vpop.f32.mrb[28].mxu0 }
 0xd54   :  { %v9682_v26 = vadd.f32 %v15382_v20, %v19768_v29  ;;  %v9673_v51 = vpop.f32.mrb[29].mxu0 }
 0xd55   :  { %v9674_v9 = vadd.f32 %v19768_v29, %v9673_v51  ;;  %v15383_v2 = vpop.f32.mrb[30].mxu0 }
 0xd56   :  { %v9782_v13 = vcombine.high %v9682_v26, %v9682_v26  ;;  %v9685_v32 = vadd.f32 %v15383_v2, %v19768_v29  ;;  %v9676_v38 = vpop.f32.mrb[31].mxu0  ;;  %v19840_v11 = vadd.f32 %v16120_v55, %v9682_v26  ;;  %v16127_v26 = vld [vmem:[%s21964_s19 + $0x78] sm:$0xf] }
 0xd57   :  { %v9780_v28 = vcombine.high %v9674_v9, %v9674_v9  ;;  %v9677_v46 = vadd.f32 %v19768_v29, %v9676_v38  ;;  %v19830_v42 = vadd.f32 %v16118_v34, %v9674_v9  ;;  %v16128_v9 = vld [vmem:[%s21964_s19 + $0x60] sm:$0xff] }
 0xd58   :  { %v9783_v36 = vcombine.high %v9685_v32, %v9685_v32  ;;  %v19825_v6 = vadd.f32 %v9782_v13, %v22365_v54  ;;  %v19860_v7 = vadd.f32 %v16123_v33, %v9685_v32  ;;  %v22368_v13 = vld [vmem:[#allocation15_spill] sm:$0xff] }
 0xd59   :  { %v19835_v45 = vadd.f32 %v16119_v58, %v9780_v28  ;;  %v9781_v43 = vcombine.high %v9677_v46, %v9677_v46  ;;  %v19848_v47 = vadd.f32 %v9677_v46, %v22366_v30  ;;  %v22369_v28 = vld [vmem:[#allocation17_spill] sm:$0xff] }
 0xd5a   :  { %v19845_v50 = vadd.f32 %v16121_v49, %v9783_v36  ;;  %v9926_v5 = vcombine.low %v19840_v11, %v19825_v6 }
 0xd5b   :  { %v19853_v18 = vadd.f32 %v16122_v14, %v9781_v43  ;;  %v9924_v15 = vcombine.low %v19830_v42, %v19835_v45 }
 0xd5c   :  { %v9927_v27 = vcombine.low %v19860_v7, %v19845_v50  ;;  %v9986_v0 = vsel %vm268_vm0, %v9926_v5, 0.0 }
 0xd5d   :  { %v9980_v52 = vsel %vm268_vm0, %v9924_v15, 0.0  ;;  %v9925_v41 = vcombine.low %v19848_v47, %v19853_v18 }
 0xd5e   :  { %9981 = vadd.xlane.f32.xlu0 %v9980_v52  ;;  %v9989_v61 = vsel %vm268_vm0, %v9927_v27, 0.0 }
 0xd5f   :  { %v9983_v44 = vsel %vm268_vm0, %v9925_v41, 0.0 }
 0xd60   :  { %9984 = vadd.xlane.f32.xlu1 %v9983_v44 }
 0xd62   :  { %9987 = vadd.xlane.f32.xlu0 %v9986_v0 }
 0xd63   :  { %v15386_v31 = vpop.f32.mrb[32].mxu0 }
 0xd64   :  { %v9698_v8 = vadd.f32 %v15386_v31, %v19768_v29  ;;  %v9689_v16 = vpop.f32.mrb[33].mxu0  ;;  %9990 = vadd.xlane.f32.xlu1 %v9989_v61  ;;  %v16129_v61 = vld [vmem:[%s21964_s19 + $0x98] sm:$0xf] }
 0xd65   :  { %v9690_v56 = vadd.f32 %v19768_v29, %v9689_v16  ;;  %v15387_v23 = vpop.f32.mrb[34].mxu0  ;;  %v16130_v16 = vld [vmem:[%s21964_s19 + $0x80] sm:$0xff] }
 0xd66   :  { %v9786_v57 = vcombine.high %v9698_v8, %v9698_v8  ;;  %v9701_v60 = vadd.f32 %v15387_v23, %v19768_v29  ;;  %v9692_v40 = vpop.f32.mrb[35].mxu0  ;;  %v19892_v20 = vadd.f32 %v16126_v12, %v9698_v8  ;;  %v22370_v23 = vld [vmem:[#allocation2_spill] sm:$0xff] }
 0xd67   :  { %v9784_v53 = vcombine.high %v9690_v56, %v9690_v56  ;;  %v9693_v35 = vadd.f32 %v19768_v29, %v9692_v40  ;;  %v19882_v19 = vadd.f32 %v9690_v56, %v22367_v3  ;;  %v22371_v40 = vld [vmem:[#allocation3_spill] sm:$0xff] }
 0xd68   :  { %v9787_v4 = vcombine.high %v9701_v60, %v9701_v60  ;;  %v19879_v63 = vadd.f32 %v16124_v17, %v9786_v57  ;;  %v19910_v46 = vadd.f32 %v9701_v60, %v22369_v28  ;;  %v16131_v17 = vld [vmem:[%s21964_s19 + $0x88] sm:$0xf] }
 0xd69   :  { %v19887_v39 = vadd.f32 %v16125_v62, %v9784_v53  ;;  %v9785_v1 = vcombine.high %v9693_v35, %v9693_v35  ;;  %v19902_v2 = vadd.f32 %v16128_v9, %v9693_v35  ;;  %v22372_v35 = vld [vmem:[#allocation4_spill] sm:$0xff] }
 0xd6a   :  { %v19897_v51 = vadd.f32 %v16127_v26, %v9787_v4  ;;  %v9930_v34 = vcombine.low %v19892_v20, %v19879_v63  ;;  %v16132_v62 = vld [vmem:[%s21964_s19 + $0x90] sm:$0xff]  ;;  %v16133_v26 = vld [vmem:[%s21964_s19 + $0xa0] sm:$0xff] }
 0xd6b   :  { %v19905_v32 = vadd.f32 %v9785_v1, %v22368_v13  ;;  %v9928_v38 = vcombine.low %v19882_v19, %v19887_v39 }
 0xd6c   :  { %v9931_v43 = vcombine.low %v19910_v46, %v19897_v51  ;;  %v9998_v55 = vsel %vm268_vm0, %v9930_v34, 0.0 }
 0xd6d   :  { %v9992_v36 = vsel %vm268_vm0, %v9928_v38, 0.0  ;;  %v9929_v54 = vcombine.low %v19902_v2, %v19905_v32 }
 0xd6e   :  { %9993 = vadd.xlane.f32.xlu0 %v9992_v36  ;;  %v10001_v30 = vsel %vm268_vm0, %v9931_v43, 0.0 }
 0xd6f   :  { %v9995_v58 = vsel %vm268_vm0, %v9929_v54, 0.0 }
 0xd70   :  { %9996 = vadd.xlane.f32.xlu1 %v9995_v58 }
 0xd72   :  { %9999 = vadd.xlane.f32.xlu0 %v9998_v55 }
 0xd73   :  { %v15390_v49 = vpop.f32.mrb[36].mxu0 }
 0xd74   :  { %v9714_v14 = vadd.f32 %v15390_v49, %v19768_v29  ;;  %v9705_v15 = vpop.f32.mrb[37].mxu0  ;;  %10002 = vadd.xlane.f32.xlu1 %v10001_v30 }
 0xd75   :  { %v9706_v33 = vadd.f32 %v19768_v29, %v9705_v15  ;;  %v15391_v52 = vpop.f32.mrb[38].mxu0 }
 0xd76   :  { %v9790_v41 = vcombine.high %v9714_v14, %v9714_v14  ;;  %v9717_v5 = vadd.f32 %v15391_v52, %v19768_v29  ;;  %v9708_v44 = vpop.f32.mrb[39].mxu0  ;;  %v19940_v53 = vadd.f32 %v9714_v14, %v22371_v40  ;;  %v16136_v40 = vld [vmem:[%s21964_s19 + $0xc0] sm:$0xff] }
 0xd77   :  { %v9788_v27 = vcombine.high %v9706_v33, %v9706_v33  ;;  %v9709_v0 = vadd.f32 %v19768_v29, %v9708_v44  ;;  %v19934_v56 = vadd.f32 %v16130_v16, %v9706_v33  ;;  %v16135_v16 = vld [vmem:[%s21964_s19 + $0xb0] sm:$0xff] }
 0xd78   :  { %v9791_v31 = vcombine.high %v9717_v5, %v9717_v5  ;;  %v19929_v8 = vadd.f32 %v16129_v61, %v9790_v41  ;;  %v19960_v9 = vadd.f32 %v16133_v26, %v9717_v5 }
 0xd79   :  { %v19937_v57 = vadd.f32 %v9788_v27, %v22370_v23  ;;  %v9789_v60 = vcombine.high %v9709_v0, %v9709_v0  ;;  %v19948_v3 = vadd.f32 %v16131_v17, %v9709_v0  ;;  %v22373_v27 = vld [vmem:[#allocation10_spill] sm:$0xff]  ;;  %v16137_v17 = vld [vmem:[%s21964_s19 + $0xd0] sm:$0xff] }
 0xd7a   :  { %v19943_v4 = vadd.f32 %v9791_v31, %v22372_v35  ;;  %v9934_v28 = vcombine.low %v19940_v53, %v19929_v8  ;;  %v16134_v31 = vld [vmem:[%s21964_s19 + $0xa8] sm:$0xf] }
 0xd7b   :  { %v19953_v1 = vadd.f32 %v16132_v62, %v9789_v60  ;;  %v9932_v12 = vcombine.low %v19934_v56, %v19937_v57 }
 0xd7c   :  { %v9935_v54 = vcombine.low %v19960_v9, %v19943_v4  ;;  %v10010_v34 = vsel %vm268_vm0, %v9934_v28, 0.0 }
 0xd7d   :  { %v10004_v13 = vsel %vm268_vm0, %v9932_v12, 0.0  ;;  %v9933_v38 = vcombine.low %v19948_v3, %v19953_v1  ;;  %v22374_v12 = vld [vmem:[#allocation5_spill] sm:$0xff] }
 0xd7e   :  { %10005 = vadd.xlane.f32.xlu0 %v10004_v13  ;;  %v10013_v43 = vsel %vm268_vm0, %v9935_v54, 0.0  ;;  %v16138_v13 = vld [vmem:[%s21964_s19 + $0xb8] sm:$0xf] }
 0xd7f   :  { %v10007_v36 = vsel %vm268_vm0, %v9933_v38, 0.0 }
 0xd80   :  { %10008 = vadd.xlane.f32.xlu1 %v10007_v36  ;;  %v16139_v36 = vld [vmem:[%s21964_s19 + $0xc8] sm:$0xf] }
 0xd82   :  { %10011 = vadd.xlane.f32.xlu0 %v10010_v34 }
 0xd83   :  { %v15394_v58 = vpop.f32.mrb[40].mxu0 }
 0xd84   :  { %v9730_v55 = vadd.f32 %v15394_v58, %v19768_v29  ;;  %v9721_v49 = vpop.f32.mrb[41].mxu0  ;;  %10014 = vadd.xlane.f32.xlu1 %v10013_v43 }
 0xd85   :  { %v9722_v30 = vadd.f32 %v19768_v29, %v9721_v49  ;;  %v15395_v14 = vpop.f32.mrb[42].mxu0 }
 0xd86   :  { %v9794_v15 = vcombine.high %v9730_v55, %v9730_v55  ;;  %v9733_v33 = vadd.f32 %v15395_v14, %v19768_v29  ;;  %v9724_v52 = vpop.f32.mrb[43].mxu0  ;;  %v19992_v35 = vadd.f32 %v16136_v40, %v9730_v55 }
 0xd87   :  { %v9792_v41 = vcombine.high %v9722_v30, %v9722_v30  ;;  %v9725_v5 = vadd.f32 %v19768_v29, %v9724_v52  ;;  %v19982_v61 = vadd.f32 %v16134_v31, %v9722_v30  ;;  %v22375_v31 = vld [vmem:[#allocation11_spill] sm:$0xff] }
 0xd88   :  { %v9795_v44 = vcombine.high %v9733_v33, %v9733_v33  ;;  %v19977_v0 = vadd.f32 %v9794_v15, %v22373_v27  ;;  %v20012_v54 = vadd.f32 %v16139_v36, %v9733_v33 }
 0xd89   :  { %v19987_v23 = vadd.f32 %v16135_v16, %v9792_v41  ;;  %v9793_v60 = vcombine.high %v9725_v5, %v9725_v5  ;;  %v20000_v26 = vadd.f32 %v9725_v5, %v22374_v12  ;;  %v16141_v12 = vld [vmem:[%s21964_s19 + $0xe0] sm:$0xff] }
 0xd8a   :  { %v19997_v62 = vadd.f32 %v16137_v17, %v9795_v44  ;;  %v9938_v43 = vcombine.low %v19992_v35, %v19977_v0 }
 0xd8b   :  { %v20005_v38 = vadd.f32 %v16138_v13, %v9793_v60  ;;  %v9936_v28 = vcombine.low %v19982_v61, %v19987_v23  ;;  %v16140_v60 = vld [vmem:[%s21964_s19 + $0xd8] sm:$0xf] }
 0xd8c   :  { %v9939_v49 = vcombine.low %v20012_v54, %v19997_v62  ;;  %v10022_v30 = vsel %vm268_vm0, %v9938_v43, 0.0 }
 0xd8d   :  { %v10016_v34 = vsel %vm268_vm0, %v9936_v28, 0.0  ;;  %v9937_v58 = vcombine.low %v20000_v26, %v20005_v38  ;;  %v22376_v28 = vld [vmem:[#allocation12_spill] sm:$0xff] }
 0xd8e   :  { %10017 = vadd.xlane.f32.xlu0 %v10016_v34  ;;  %v10025_v15 = vsel %vm268_vm0, %v9939_v49, 0.0  ;;  %v16153_v49 = vmov 839922192  }
 0xd8f   :  { %v10019_v55 = vsel %vm268_vm0, %v9937_v58, 0.0 }
 0xd90   :  { %10020 = vadd.xlane.f32.xlu1 %v10019_v55 }
 0xd92   :  { %10023 = vadd.xlane.f32.xlu0 %v10022_v30  ;;  %v10090_v30 = vunpack.c.l.s4 %v16153_v49 }
 0xd93   :  { %v15398_v14 = vpop.f32.mrb[44].mxu0 }
 0xd94   :  { %10026 = vadd.xlane.f32.xlu1 %v10025_v15  ;;  %v9737_v33 = vpop.f32.mrb[45].mxu0  ;;  %v10092_v15 = vlaneseq }
 0xd95   :  { %v9738_v52 = vadd.f32 %v19768_v29, %v9737_v33  ;;  %v15399_v41 = vpop.f32.mrb[46].mxu0  ;;  %v16154_v33 = vmov 1985246804  }
 0xd96   :  { %v9740_v5 = vpop.f32.mrb[47].mxu0 }
 0xd97   :  { %v9796_v44 = vcombine.high %v9738_v52, %v9738_v52  ;;  %v9741_v27 = vadd.f32 %v19768_v29, %v9740_v5  ;;  %v20027_v16 = vadd.f32 %v9738_v52, %v22375_v31  ;;  %v10097_v52 = vunpack.c.l.s4 %v16154_v33 }
 0xd98   :  { %v10091_v5 = vunpack.c.0.s8 %v10090_v30  ;;  %v9746_v31 = vadd.f32 %v15398_v14, %v19768_v29 }
 0xd99   :  { %v20032_v40 = vadd.f32 %v16140_v60, %v9796_v44  ;;  %v9797_v17 = vcombine.high %v9741_v27, %v9741_v27  ;;  %v20037_v13 = vadd.f32 %v16141_v12, %v9741_v27  ;;  %v20048_v44 = vshrl.u32 %v10092_v15, 7 }
 0xd9a   :  { %v10098_v27 = vunpack.c.0.s8 %v10097_v52  ;;  %v9749_v12 = vadd.f32 %v15399_v41, %v19768_v29  ;;  %v16142_v41 = vld [vmem:[%s21964_s19 + $0xf0] sm:$0xff] }
 0xd9b   :  { %v20040_v36 = vadd.f32 %v9797_v17, %v22376_v28  ;;  %v9940_v34 = vcombine.low %v20027_v16, %v20032_v40  ;;  %22377 = vst [vmem:[#allocation123_spill] sm:$0xff] %v20048_v44  ;;  %v20052_v60 = vsub.s32 %v10091_v5, %v20048_v44 }
 0xd9c   :  { %v20055_v17 = vsub.s32 %v10098_v27, %v20048_v44  ;;  %v9799_v15 = vcombine.high %v9749_v12, %v9749_v12 }
 0xd9d   :  { %v10028_v58 = vsel %vm268_vm0, %v9940_v34, 0.0  ;;  %v9941_v43 = vcombine.low %v20037_v13, %v20040_v36 }
 0xd9e   :  { %10029 = vadd.xlane.f32.xlu0 %v10028_v58  ;;  %v9798_v58 = vcombine.high %v9746_v31, %v9746_v31 }
 0xd9f   :  { %v10031_v55 = vsel %vm268_vm0, %v9941_v43, 0.0 }
 0xda0   :  { %10032 = vadd.xlane.f32.xlu1 %v10031_v55  ;;  %v20071_v27 = vadd.f32 %v16142_v41, %v9798_v58 }
 0xdb4   :  { %v9970_v28 = vpop.xlane.xlu0 %9969 }
 0xdb5   :  { %v10041_v34 = vmul.f32 0.010416667, %v9970_v28 }
 0xdb6   :  { %v9973_v43 = vpop.xlane.xlu1 %9972 }
 0xdb7   :  { %v10095_v55 = vrot.slane %v10041_v34, %v20052_v60  ;;  %v10102_v49 = vrot.slane %v10041_v34, %v20055_v17  ;;  %v10042_v30 = vmul.f32 0.010416667, %v9973_v43 }
 0xdb8   :  { %v9976_v33 = vpop.xlane.xlu0 %9975 }
 0xdb9   :  { %v20061_v14 = vsub.f32 %v19777_v21, %v10095_v55  ;;  %v20064_v52 = vsub.f32 %v19785_v22, %v10102_v49  ;;  %v10109_v5 = vrot.slane %v10042_v30, %v20052_v60  ;;  %v10116_v29 = vrot.slane %v10042_v30, %v20055_v17  ;;  %v16143_v55 = vld [vmem:[%s21964_s19 + $0xe8] sm:$0xf] }
 0xdba   :  { %v10043_v28 = vmul.f32 0.010416667, %v9976_v33  ;;  %v20086_v49 = vadd.f32 %v16143_v55, %v9746_v31  ;;  %v22379_v55 = vld [vmem:[#allocation16_spill] sm:$0xff] }
 0xdbb   :  { %22378 = vst [vmem:[#allocation50_spill] sm:$0xff] %v20064_v52  ;;  %v20074_v34 = vsub.f32 %v19793_v24, %v10109_v5  ;;  %v20077_v21 = vsub.f32 %v19798_v59, %v10116_v29  ;;  %v10521_v22 = vmul.f32 %v20061_v14, %v20061_v14  ;;  %v10522_v43 = vmul.f32 %v20064_v52, %v20064_v52  ;;  %v16144_v24 = vld [vmem:[%s21964_s19 + $0xf8] sm:$0xf] }
 0xdbc   :  { %v20091_v58 = vadd.f32 %v16144_v24, %v9799_v15  ;;  %v10123_v59 = vrot.slane %v10043_v28, %v20052_v60  ;;  %v10130_v30 = vrot.slane %v10043_v28, %v20055_v17  ;;  %v9979_v33 = vpop.xlane.xlu0 %9978  ;;  %v20100_v44 = vadd.f32 %v9749_v12, %v22379_v55 }
 0xdbd   :  { %v10044_v5 = vmul.f32 0.010416667, %v9979_v33  ;;  %v10617_v29 = vcombine.low %v10521_v22, %v10522_v43  ;;  %v10523_v41 = vmul.f32 %v20074_v34, %v20074_v34  ;;  %v10524_v31 = vmul.f32 %v20077_v21, %v20077_v21 }
 0xdbe   :  { %v20103_v52 = vsub.f32 %v19788_v48, %v10123_v59  ;;  %v20106_v15 = vsub.f32 %v19782_v10, %v10130_v30  ;;  %v9942_v28 = vcombine.low %v20086_v49, %v20071_v27 }
 0xdbf   :  { %v10137_v22 = vrot.slane %v10044_v5, %v20052_v60  ;;  %v10144_v43 = vrot.slane %v10044_v5, %v20055_v17  ;;  %v10665_v24 = vsel %vm268_vm0, %v10617_v29, 0.0  ;;  %v10618_v33 = vcombine.low %v10523_v41, %v10524_v31 }
 0xdc0   :  { %10666 = vadd.xlane.f32.xlu0 %v10665_v24  ;;  %v10525_v12 = vmul.f32 %v20103_v52, %v20103_v52  ;;  %v10526_v48 = vmul.f32 %v20106_v15, %v20106_v15  ;;  %v9943_v5 = vcombine.low %v20100_v44, %v20091_v58  ;;  %v10034_v29 = vsel %vm268_vm0, %v9942_v28, 0.0  ;;  %v15473_v28 = vld [vmem:[%s21817_s9 + $0x4] ss:$8 sps:$4 sm:$0xff]   ;;  %v15471_v24 = vld [vmem:[%s21817_s9] ss:$8 sps:$4 sm:$0xff]  }
 0xdc1   :  { %v20118_v10 = vsub.f32 %v19813_v37, %v10137_v22  ;;  %v20121_v59 = vsub.f32 %v19803_v25, %v10144_v43  ;;  %v10668_v30 = vsel %vm268_vm0, %v10618_v33, 0.0  ;;  %11607 = vmatprep.subr.bf16.mxu1 %v15473_v28  ;;  %v15476_v33 = vld [vmem:[%s21817_s9 + $0x14] ss:$8 sps:$4 sm:$0xff]   ;;  %v21936_v28 = vmov 0  }
 0xdc2   :  { %10669 = vadd.xlane.f32.xlu1 %v10668_v30  ;;  %v10619_v41 = vcombine.low %v10525_v12, %v10526_v48  ;;  %v10037_v37 = vsel %vm268_vm0, %v9943_v5, 0.0  ;;  %11608 = vmatpush1.bf16.msra.mxu1 %v15471_v24  ;;  %v15474_v12 = vld [vmem:[%s21817_s9 + $0x10] ss:$8 sps:$4 sm:$0xff]   ;;  %v15479_v48 = vld [vmem:[%s21817_s9 + $0x24] ss:$8 sps:$4 sm:$0xff]  }
 0xdc3   :  { %v10527_v31 = vmul.f32 %v20118_v10, %v20118_v10  ;;  %v10528_v55 = vmul.f32 %v20121_v59, %v20121_v59  ;;  %11609 = vmatprep.subr.bf16.mxu1 %v15476_v33  ;;  %v15477_v30 = vld [vmem:[%s21817_s9 + $0x20] ss:$8 sps:$4 sm:$0xff]   ;;  %v15482_v5 = vld [vmem:[%s21817_s9 + $0x34] ss:$8 sps:$4 sm:$0xff]   ;;  %11639 = vmatprep.mubr.bf16.mxu1 %v21936_v28 }
 0xdc4   :  { %10035 = vadd.xlane.f32.xlu0 %v10034_v29  ;;  %v10671_v22 = vsel %vm268_vm0, %v10619_v41, 0.0  ;;  %v15480_v29 = vld [vmem:[%s21817_s9 + $0x30] ss:$8 sps:$4 sm:$0xff]   ;;  %v15485_v41 = vld [vmem:[%s21817_s9 + $0x44] ss:$8 sps:$4 sm:$0xff]  }
 0xdc5   :  { %v10620_v25 = vcombine.low %v10527_v31, %v10528_v55  ;;  %v15483_v31 = vld [vmem:[%s21817_s9 + $0x40] ss:$8 sps:$4 sm:$0xff]   ;;  %v15488_v55 = vld [vmem:[%s21817_s9 + $0x54] ss:$8 sps:$4 sm:$0xff]  }
 0xdc6   :  { %10038 = vadd.xlane.f32.xlu1 %v10037_v37  ;;  %11610 = vmatpush1.bf16.msra.mxu1 %v15474_v12  ;;  %v15486_v37 = vld [vmem:[%s21817_s9 + $0x50] ss:$8 sps:$4 sm:$0xff]  }
 0xdc7   :  { %v10674_v43 = vsel %vm268_vm0, %v10620_v25, 0.0  ;;  %11611 = vmatprep.subr.bf16.mxu1 %v15479_v48 }
 0xdc8   :  { %10672 = vadd.xlane.f32.xlu0 %v10671_v22 }
 0xdca   :  { %10675 = vadd.xlane.f32.xlu1 %v10674_v43  ;;  %11612 = vmatpush1.bf16.msra.mxu1 %v15477_v30 }
 0xdcb   :  { %11613 = vmatprep.subr.bf16.mxu1 %v15482_v5 }
 0xdce   :  { %11614 = vmatpush1.bf16.msra.mxu1 %v15480_v29 }
 0xdcf   :  { %11615 = vmatprep.subr.bf16.mxu1 %v15485_v41 }
 0xdd2   :  { %11616 = vmatpush1.bf16.msra.mxu1 %v15483_v31 }
 0xdd3   :  { %11617 = vmatprep.subr.bf16.mxu1 %v15488_v55 }
 0xdd6   :  { %11618 = vmatpush1.bf16.msra.mxu1 %v15486_v37 }
 0xdeb   :  { %v9982_v25 = vpop.xlane.xlu0 %9981 }
 0xdec   :  { %v10045_v22 = vmul.f32 0.010416667, %v9982_v25 }
 0xded   :  { %v9985_v43 = vpop.xlane.xlu1 %9984 }
 0xdee   :  { %v10151_v24 = vrot.slane %v10045_v22, %v20052_v60  ;;  %v10158_v33 = vrot.slane %v10045_v22, %v20055_v17  ;;  %v10046_v12 = vmul.f32 0.010416667, %v9985_v43 }
 0xdef   :  { %v9988_v48 = vpop.xlane.xlu0 %9987 }
 0xdf0   :  { %v20174_v30 = vsub.f32 %v19830_v42, %v10151_v24  ;;  %v20177_v5 = vsub.f32 %v19835_v45, %v10158_v33  ;;  %v10165_v29 = vrot.slane %v10046_v12, %v20052_v60  ;;  %v10172_v41 = vrot.slane %v10046_v12, %v20055_v17 }
 0xdf1   :  { %v10047_v31 = vmul.f32 0.010416667, %v9988_v48  ;;  %v9991_v55 = vpop.xlane.xlu1 %9990 }
 0xdf2   :  { %v20182_v37 = vsub.f32 %v19848_v47, %v10165_v29  ;;  %v20185_v25 = vsub.f32 %v19853_v18, %v10172_v41  ;;  %v10048_v22 = vmul.f32 0.010416667, %v9991_v55  ;;  %v10529_v42 = vmul.f32 %v20174_v30, %v20174_v30 }
 0xdf3   :  { %v10179_v43 = vrot.slane %v10047_v31, %v20052_v60  ;;  %v10186_v45 = vrot.slane %v10047_v31, %v20055_v17  ;;  %v10530_v24 = vmul.f32 %v20177_v5, %v20177_v5 }
 0xdf4   :  { %22380 = vst [vmem:[#allocation44_spill] sm:$0xff] %v20182_v37  ;;  %v10193_v33 = vrot.slane %v10048_v22, %v20052_v60  ;;  %v10200_v12 = vrot.slane %v10048_v22, %v20055_v17  ;;  %v10531_v47 = vmul.f32 %v20182_v37, %v20182_v37  ;;  %v10532_v18 = vmul.f32 %v20185_v25, %v20185_v25 }
 0xdf5   :  { %v20200_v48 = vsub.f32 %v19840_v11, %v10179_v43  ;;  %v20203_v29 = vsub.f32 %v19825_v6, %v10186_v45  ;;  %v10621_v41 = vcombine.low %v10529_v42, %v10530_v24 }
 0xdf6   :  { %v20206_v31 = vsub.f32 %v19860_v7, %v10193_v33  ;;  %v20209_v55 = vsub.f32 %v19845_v50, %v10200_v12  ;;  %v10622_v22 = vcombine.low %v10531_v47, %v10532_v18 }
 0xdf7   :  { %v10677_v28 = vsel %vm268_vm0, %v10621_v41, 0.0  ;;  %v10533_v37 = vmul.f32 %v20200_v48, %v20200_v48  ;;  %v10534_v11 = vmul.f32 %v20203_v29, %v20203_v29 }
 0xdf8   :  { %22381 = vst [vmem:[#allocation121_spill] sm:$0xff] %v20209_v55  ;;  %10678 = vadd.xlane.f32.xlu0 %v10677_v28  ;;  %v10680_v6 = vsel %vm268_vm0, %v10622_v22, 0.0  ;;  %v10535_v42 = vmul.f32 %v20206_v31, %v20206_v31  ;;  %v10536_v7 = vmul.f32 %v20209_v55, %v20209_v55 }
 0xdf9   :  { %10681 = vadd.xlane.f32.xlu1 %v10680_v6  ;;  %v10623_v50 = vcombine.low %v10533_v37, %v10534_v11 }
 0xdfa   :  { %v10624_v43 = vcombine.low %v10535_v42, %v10536_v7 }
 0xdfb   :  { %v9994_v45 = vpop.xlane.xlu0 %9993  ;;  %v10683_v24 = vsel %vm268_vm0, %v10623_v50, 0.0 }
 0xdfc   :  { %v10049_v33 = vmul.f32 0.010416667, %v9994_v45  ;;  %10684 = vadd.xlane.f32.xlu0 %v10683_v24  ;;  %v10686_v12 = vsel %vm268_vm0, %v10624_v43, 0.0 }
 0xdfd   :  { %10687 = vadd.xlane.f32.xlu1 %v10686_v12  ;;  %v9997_v28 = vpop.xlane.xlu1 %9996 }
 0xdfe   :  { %v10207_v47 = vrot.slane %v10049_v33, %v20052_v60  ;;  %v10214_v18 = vrot.slane %v10049_v33, %v20055_v17  ;;  %v10050_v41 = vmul.f32 0.010416667, %v9997_v28 }
 0xdff   :  { %v10000_v22 = vpop.xlane.xlu0 %9999 }
 0xe00   :  { %v20226_v55 = vsub.f32 %v19882_v19, %v10207_v47  ;;  %v20229_v37 = vsub.f32 %v19887_v39, %v10214_v18  ;;  %v10221_v11 = vrot.slane %v10050_v41, %v20052_v60  ;;  %v10228_v6 = vrot.slane %v10050_v41, %v20055_v17 }
 0xe01   :  { %v10051_v42 = vmul.f32 0.010416667, %v10000_v22  ;;  %v10003_v7 = vpop.xlane.xlu1 %10002 }
 0xe02   :  { %v20234_v50 = vsub.f32 %v19902_v2, %v10221_v11  ;;  %v20237_v43 = vsub.f32 %v19905_v32, %v10228_v6  ;;  %v10052_v45 = vmul.f32 0.010416667, %v10003_v7  ;;  %v10537_v19 = vmul.f32 %v20226_v55, %v20226_v55 }
 0xe03   :  { %v10235_v24 = vrot.slane %v10051_v42, %v20052_v60  ;;  %v10242_v39 = vrot.slane %v10051_v42, %v20055_v17  ;;  %v10538_v33 = vmul.f32 %v20229_v37, %v20229_v37 }
 0xe04   :  { %v10249_v12 = vrot.slane %v10052_v45, %v20052_v60  ;;  %v10256_v28 = vrot.slane %v10052_v45, %v20055_v17  ;;  %v10539_v2 = vmul.f32 %v20234_v50, %v20234_v50  ;;  %v10540_v32 = vmul.f32 %v20237_v43, %v20237_v43 }
 0xe05   :  { %v20252_v47 = vsub.f32 %v19892_v20, %v10235_v24  ;;  %v20255_v18 = vsub.f32 %v19879_v63, %v10242_v39  ;;  %v10625_v41 = vcombine.low %v10537_v19, %v10538_v33 }
 0xe06   :  { %v20258_v22 = vsub.f32 %v19910_v46, %v10249_v12  ;;  %v20261_v11 = vsub.f32 %v19897_v51, %v10256_v28  ;;  %v10626_v6 = vcombine.low %v10539_v2, %v10540_v32 }
 0xe07   :  { %v10689_v42 = vsel %vm268_vm0, %v10625_v41, 0.0  ;;  %v10541_v7 = vmul.f32 %v20252_v47, %v20252_v47  ;;  %v10542_v20 = vmul.f32 %v20255_v18, %v20255_v18 }
 0xe08   :  { %10690 = vadd.xlane.f32.xlu0 %v10689_v42  ;;  %v10692_v63 = vsel %vm268_vm0, %v10626_v6, 0.0  ;;  %v10543_v45 = vmul.f32 %v20258_v22, %v20258_v22  ;;  %v10544_v46 = vmul.f32 %v20261_v11, %v20261_v11 }
 0xe09   :  { %10693 = vadd.xlane.f32.xlu1 %v10692_v63  ;;  %v10627_v51 = vcombine.low %v10541_v7, %v10542_v20 }
 0xe0a   :  { %v10628_v19 = vcombine.low %v10543_v45, %v10544_v46 }
 0xe0b   :  { %v10006_v24 = vpop.xlane.xlu0 %10005  ;;  %v10695_v39 = vsel %vm268_vm0, %v10627_v51, 0.0 }
 0xe0c   :  { %v10053_v33 = vmul.f32 0.010416667, %v10006_v24  ;;  %10696 = vadd.xlane.f32.xlu0 %v10695_v39  ;;  %v10698_v12 = vsel %vm268_vm0, %v10628_v19, 0.0 }
 0xe0d   :  { %10699 = vadd.xlane.f32.xlu1 %v10698_v12  ;;  %v10009_v28 = vpop.xlane.xlu1 %10008 }
 0xe0e   :  { %v10263_v2 = vrot.slane %v10053_v33, %v20052_v60  ;;  %v10270_v32 = vrot.slane %v10053_v33, %v20055_v17  ;;  %v10054_v41 = vmul.f32 0.010416667, %v10009_v28 }
 0xe0f   :  { %v10012_v6 = vpop.xlane.xlu0 %10011 }
 0xe10   :  { %v20278_v42 = vsub.f32 %v19934_v56, %v10263_v2  ;;  %v20281_v7 = vsub.f32 %v19937_v57, %v10270_v32  ;;  %v10277_v20 = vrot.slane %v10054_v41, %v20052_v60  ;;  %v10284_v63 = vrot.slane %v10054_v41, %v20055_v17 }
 0xe11   :  { %v10055_v45 = vmul.f32 0.010416667, %v10012_v6  ;;  %v10015_v46 = vpop.xlane.xlu1 %10014 }
 0xe12   :  { %v20286_v51 = vsub.f32 %v19948_v3, %v10277_v20  ;;  %v20289_v19 = vsub.f32 %v19953_v1, %v10284_v63  ;;  %v10056_v24 = vmul.f32 0.010416667, %v10015_v46  ;;  %v10545_v56 = vmul.f32 %v20278_v42, %v20278_v42 }
 0xe13   :  { %v10291_v39 = vrot.slane %v10055_v45, %v20052_v60  ;;  %v10298_v57 = vrot.slane %v10055_v45, %v20055_v17  ;;  %v10546_v33 = vmul.f32 %v20281_v7, %v20281_v7 }
 0xe14   :  { %v10305_v12 = vrot.slane %v10056_v24, %v20052_v60  ;;  %v10312_v28 = vrot.slane %v10056_v24, %v20055_v17  ;;  %v10547_v3 = vmul.f32 %v20286_v51, %v20286_v51  ;;  %v10548_v1 = vmul.f32 %v20289_v19, %v20289_v19 }
 0xe15   :  { %v20304_v2 = vsub.f32 %v19940_v53, %v10291_v39  ;;  %v20307_v32 = vsub.f32 %v19929_v8, %v10298_v57  ;;  %v10629_v41 = vcombine.low %v10545_v56, %v10546_v33 }
 0xe16   :  { %v20310_v6 = vsub.f32 %v19960_v9, %v10305_v12  ;;  %v20313_v20 = vsub.f32 %v19943_v4, %v10312_v28  ;;  %v10630_v63 = vcombine.low %v10547_v3, %v10548_v1 }
 0xe17   :  { %v10701_v45 = vsel %vm268_vm0, %v10629_v41, 0.0  ;;  %v10549_v46 = vmul.f32 %v20304_v2, %v20304_v2  ;;  %v10550_v53 = vmul.f32 %v20307_v32, %v20307_v32 }
 0xe18   :  { %10702 = vadd.xlane.f32.xlu0 %v10701_v45  ;;  %v10704_v8 = vsel %vm268_vm0, %v10630_v63, 0.0  ;;  %v10551_v24 = vmul.f32 %v20310_v6, %v20310_v6  ;;  %v10552_v9 = vmul.f32 %v20313_v20, %v20313_v20 }
 0xe19   :  { %10705 = vadd.xlane.f32.xlu1 %v10704_v8  ;;  %v10631_v4 = vcombine.low %v10549_v46, %v10550_v53 }
 0xe1a   :  { %v10632_v56 = vcombine.low %v10551_v24, %v10552_v9 }
 0xe1b   :  { %v10018_v39 = vpop.xlane.xlu0 %10017  ;;  %v10707_v57 = vsel %vm268_vm0, %v10631_v4, 0.0 }
 0xe1c   :  { %v10057_v33 = vmul.f32 0.010416667, %v10018_v39  ;;  %10708 = vadd.xlane.f32.xlu0 %v10707_v57  ;;  %v10710_v12 = vsel %vm268_vm0, %v10632_v56, 0.0 }
 0xe1d   :  { %10711 = vadd.xlane.f32.xlu1 %v10710_v12  ;;  %v10021_v28 = vpop.xlane.xlu1 %10020 }
 0xe1e   :  { %v10319_v3 = vrot.slane %v10057_v33, %v20052_v60  ;;  %v10326_v1 = vrot.slane %v10057_v33, %v20055_v17  ;;  %v10058_v41 = vmul.f32 0.010416667, %v10021_v28 }
 0xe1f   :  { %v10024_v63 = vpop.xlane.xlu0 %10023 }
 0xe20   :  { %v20330_v45 = vsub.f32 %v19982_v61, %v10319_v3  ;;  %v20333_v46 = vsub.f32 %v19987_v23, %v10326_v1  ;;  %v10333_v53 = vrot.slane %v10058_v41, %v20052_v60  ;;  %v10340_v8 = vrot.slane %v10058_v41, %v20055_v17 }
 0xe21   :  { %v10059_v24 = vmul.f32 0.010416667, %v10024_v63  ;;  %v10027_v9 = vpop.xlane.xlu1 %10026 }
 0xe22   :  { %v20338_v4 = vsub.f32 %v20000_v26, %v10333_v53  ;;  %v20341_v56 = vsub.f32 %v20005_v38, %v10340_v8  ;;  %v10060_v39 = vmul.f32 0.010416667, %v10027_v9  ;;  %v10553_v61 = vmul.f32 %v20330_v45, %v20330_v45 }
 0xe23   :  { %v10347_v57 = vrot.slane %v10059_v24, %v20052_v60  ;;  %v10354_v23 = vrot.slane %v10059_v24, %v20055_v17  ;;  %v10554_v33 = vmul.f32 %v20333_v46, %v20333_v46 }
 0xe24   :  { %v10361_v12 = vrot.slane %v10060_v39, %v20052_v60  ;;  %v10368_v28 = vrot.slane %v10060_v39, %v20055_v17  ;;  %v10555_v26 = vmul.f32 %v20338_v4, %v20338_v4  ;;  %v10556_v38 = vmul.f32 %v20341_v56, %v20341_v56 }
 0xe25   :  { %v20356_v3 = vsub.f32 %v19992_v35, %v10347_v57  ;;  %v20359_v1 = vsub.f32 %v19977_v0, %v10354_v23  ;;  %v10633_v41 = vcombine.low %v10553_v61, %v10554_v33 }
 0xe26   :  { %v20362_v63 = vsub.f32 %v20012_v54, %v10361_v12  ;;  %v20365_v53 = vsub.f32 %v19997_v62, %v10368_v28  ;;  %v10634_v8 = vcombine.low %v10555_v26, %v10556_v38 }
 0xe27   :  { %v10713_v24 = vsel %vm268_vm0, %v10633_v41, 0.0  ;;  %v10557_v9 = vmul.f32 %v20356_v3, %v20356_v3  ;;  %v10558_v35 = vmul.f32 %v20359_v1, %v20359_v1 }
 0xe28   :  { %10714 = vadd.xlane.f32.xlu0 %v10713_v24  ;;  %v10716_v0 = vsel %vm268_vm0, %v10634_v8, 0.0  ;;  %v10559_v39 = vmul.f32 %v20362_v63, %v20362_v63  ;;  %v10560_v54 = vmul.f32 %v20365_v53, %v20365_v53 }
 0xe29   :  { %10717 = vadd.xlane.f32.xlu1 %v10716_v0  ;;  %v10635_v62 = vcombine.low %v10557_v9, %v10558_v35 }
 0xe2a   :  { %v10636_v61 = vcombine.low %v10559_v39, %v10560_v54 }
 0xe2b   :  { %v10719_v57 = vsel %vm268_vm0, %v10635_v62, 0.0  ;;  %v10030_v23 = vpop.xlane.xlu0 %10029 }
 0xe2c   :  { %10720 = vadd.xlane.f32.xlu0 %v10719_v57  ;;  %v10061_v33 = vmul.f32 0.010416667, %v10030_v23  ;;  %v10722_v12 = vsel %vm268_vm0, %v10636_v61, 0.0 }
 0xe2d   :  { %10723 = vadd.xlane.f32.xlu1 %v10722_v12  ;;  %v10033_v28 = vpop.xlane.xlu1 %10032 }
 0xe2e   :  { %v10375_v26 = vrot.slane %v10061_v33, %v20052_v60  ;;  %v10382_v38 = vrot.slane %v10061_v33, %v20055_v17  ;;  %v10062_v41 = vmul.f32 0.010416667, %v10033_v28 }
 0xe30   :  { %v20382_v8 = vsub.f32 %v20027_v16, %v10375_v26  ;;  %v20385_v24 = vsub.f32 %v20032_v40, %v10382_v38  ;;  %v10389_v9 = vrot.slane %v10062_v41, %v20052_v60  ;;  %v10396_v35 = vrot.slane %v10062_v41, %v20055_v17 }
 0xe32   :  { %v20390_v0 = vsub.f32 %v20037_v13, %v10389_v9  ;;  %v20393_v39 = vsub.f32 %v20040_v36, %v10396_v35  ;;  %v10561_v54 = vmul.f32 %v20382_v8, %v20382_v8  ;;  %v10562_v16 = vmul.f32 %v20385_v24, %v20385_v24 }
 0xe34   :  { %v10637_v62 = vcombine.low %v10561_v54, %v10562_v16  ;;  %v10563_v40 = vmul.f32 %v20390_v0, %v20390_v0  ;;  %v10564_v61 = vmul.f32 %v20393_v39, %v20393_v39 }
 0xe36   :  { %v10725_v57 = vsel %vm268_vm0, %v10637_v62, 0.0  ;;  %v10638_v13 = vcombine.low %v10563_v40, %v10564_v61 }
 0xe37   :  { %10726 = vadd.xlane.f32.xlu0 %v10725_v57 }
 0xe38   :  { %v10728_v36 = vsel %vm268_vm0, %v10638_v13, 0.0 }
 0xe39   :  { %10729 = vadd.xlane.f32.xlu1 %v10728_v36 }
 0xe4d   :  { %v10667_v23 = vpop.xlane.xlu0 %10666 }
 0xe4e   :  { %v10737_v33 = vmul.f32 0.010416667, %v10667_v23 }
 0xe4f   :  { %v10670_v12 = vpop.xlane.xlu1 %10669 }
 0xe50   :  { %v10761_v28 = vadd.f32 1e-05, %v10737_v33  ;;  %v10738_v26 = vmul.f32 0.010416667, %v10670_v12 }
 0xe51   :  { %v10036_v38 = vpop.xlane.xlu0 %10035 }
 0xe52   :  { %16017 = vrsqrt.f32 %v10761_v28  ;;  %v10762_v41 = vadd.f32 1e-05, %v10738_v26  ;;  %v10063_v9 = vmul.f32 0.010416667, %v10036_v38 }
 0xe53   :  { %v10039_v35 = vpop.xlane.xlu1 %10038 }
 0xe54   :  { %16019 = vrsqrt.f32 %v10762_v41  ;;  %v10403_v54 = vrot.slane %v10063_v9, %v20052_v60  ;;  %v10410_v16 = vrot.slane %v10063_v9, %v20055_v17  ;;  %v10064_v62 = vmul.f32 0.010416667, %v10039_v35  ;;  %v20428_v41 = vld [vmem:[%s21818_s13] ss:$0 sm:$0xff] }
 0xe55   :  { %v10673_v40 = vpop.xlane.xlu0 %10672  ;;  %v20437_v35 = vld [vmem:[%s21819_s14] ss:$0 sm:$0xff] }
 0xe56   :  { %v20408_v61 = vsub.f32 %v20086_v49, %v10403_v54  ;;  %v20411_v57 = vsub.f32 %v20071_v27, %v10410_v16  ;;  %v10417_v13 = vrot.slane %v10064_v62, %v20052_v60  ;;  %v10424_v36 = vrot.slane %v10064_v62, %v20055_v17 }
 0xe57   :  { %v10739_v23 = vmul.f32 0.010416667, %v10673_v40  ;;  %v10676_v33 = vpop.xlane.xlu1 %10675  ;;  %v20441_v40 = vcombine.high %v20428_v41, %v20428_v41 }
 0xe58   :  { %22382 = vst [vmem:[#allocation47_spill] sm:$0xff] %v20411_v57  ;;  %v20416_v12 = vsub.f32 %v20100_v44, %v10417_v13  ;;  %v20419_v28 = vsub.f32 %v20091_v58, %v10424_v36  ;;  %v10740_v26 = vmul.f32 0.010416667, %v10676_v33  ;;  %v10565_v49 = vmul.f32 %v20408_v61, %v20408_v61 }
 0xe59   :  { %v10763_v38 = vadd.f32 1e-05, %v10739_v23  ;;  %v10566_v27 = vmul.f32 %v20411_v57, %v20411_v57 }
 0xe5a   :  { %22383 = vst [vmem:[#allocation126_spill] sm:$0xff] %v20416_v12  ;;  %22384 = vst [vmem:[#allocation49_spill] sm:$0xff] %v20419_v28  ;;  %v10764_v9 = vadd.f32 1e-05, %v10740_v26  ;;  %v10567_v44 = vmul.f32 %v20416_v12, %v20416_v12  ;;  %v10568_v58 = vmul.f32 %v20419_v28, %v20419_v28  ;;  %v20448_v26 = vcombine.high %v20437_v35, %v20437_v35 }
 0xe5b   :  { %16021 = vrsqrt.f32 %v10763_v38  ;;  %v10639_v54 = vcombine.low %v10565_v49, %v10566_v27  ;;  %v22385_v27 = vld [vmem:[#allocation50_spill] sm:$0xff] }
 0xe5c   :  { %v16018_v16 = vpop.eup %16017  ;;  %16023 = vrsqrt.f32 %v10764_v9  ;;  %v10640_v62 = vcombine.low %v10567_v44, %v10568_v58 }
 0xe5d   :  { %v10839_v13 = vrot.slane %v16018_v16, %v20052_v60  ;;  %v10846_v36 = vrot.slane %v16018_v16, %v20055_v17  ;;  %v10731_v23 = vsel %vm268_vm0, %v10639_v54, 0.0 }
 0xe5e   :  { %v16020_v33 = vpop.eup %16019  ;;  %10732 = vadd.xlane.f32.xlu0 %v10731_v23  ;;  %v10734_v49 = vsel %vm268_vm0, %v10640_v62, 0.0 }
 0xe5f   :  { %v11217_v38 = vmul.f32 %v10839_v13, %v20061_v14  ;;  %v11218_v9 = vmul.f32 %v10846_v36, %v22385_v27  ;;  %v10853_v44 = vrot.slane %v16020_v33, %v20052_v60  ;;  %v10860_v58 = vrot.slane %v16020_v33, %v20055_v17  ;;  %10735 = vadd.xlane.f32.xlu1 %v10734_v49 }
 0xe61   :  { %v11274_v16 = vmul.f32 %v20428_v41, %v11217_v38  ;;  %v11275_v54 = vmul.f32 %v20441_v40, %v11218_v9  ;;  %v11219_v28 = vmul.f32 %v10853_v44, %v20074_v34  ;;  %v11220_v12 = vmul.f32 %v10860_v58, %v20077_v21 }
 0xe63   :  { %v20460_v23 = vadd.f32 %v20437_v35, %v11274_v16  ;;  %v20463_v14 = vadd.f32 %v20448_v26, %v11275_v54  ;;  %v11276_v62 = vmul.f32 %v20428_v41, %v11219_v28  ;;  %v11277_v13 = vmul.f32 %v20441_v40, %v11220_v12 }
 0xe65   :  { %22386 = vst [vmem:[#allocation125_spill] sm:$0xff] %v20460_v23  ;;  %22387 = vst [vmem:[#allocation127_spill] sm:$0xff] %v20463_v14  ;;  %v16022_v36 = vpop.eup %16021  ;;  %v20468_v33 = vadd.f32 %v20437_v35, %v11276_v62  ;;  %v20471_v49 = vadd.f32 %v20448_v26, %v11277_v13  ;;  %v11427_v27 = vcombine.low %v20460_v23, %v20463_v14 }
 0xe66   :  { %v16024_v34 = vpop.eup %16023  ;;  %v10867_v21 = vrot.slane %v16022_v36, %v20052_v60  ;;  %v10874_v38 = vrot.slane %v16022_v36, %v20055_v17 }
 0xe67   :  { %22388 = vst [vmem:[#allocation51_spill] sm:$0xff] %v20468_v33  ;;  %22389 = vst [vmem:[#allocation53_spill] sm:$0xff] %v20471_v49  ;;  %v11428_v28 = vcombine.low %v20468_v33, %v20471_v49  ;;  %v10881_v12 = vrot.slane %v16024_v34, %v20052_v60  ;;  %v10888_v9 = vrot.slane %v16024_v34, %v20055_v17 }
 0xe68   :  { %v11221_v44 = vmul.f32 %v10867_v21, %v20103_v52  ;;  %v11222_v58 = vmul.f32 %v10874_v38, %v20106_v15  ;;  %v22392_v15 = vmov 0  }
 0xe69   :  { %v11475_v16 = vpack.c.bf16 %v11428_v28, %v11427_v27  ;;  %v11223_v54 = vmul.f32 %v10881_v12, %v20118_v10  ;;  %v11224_v62 = vmul.f32 %v10888_v9, %v20121_v59 }
 0xe6a   :  { %v11278_v13 = vmul.f32 %v20428_v41, %v11221_v44  ;;  %v11279_v36 = vmul.f32 %v20441_v40, %v11222_v58 }
 0xe6b   :  { %v11280_v14 = vmul.f32 %v20428_v41, %v11223_v54  ;;  %v11281_v49 = vmul.f32 %v20441_v40, %v11224_v62  ;;  %14041 = vmatmul.mubr.msk.bf16.vlgmr.msra.gmra.mrb[48].mxu1 %vm268_vm0, %v11475_v16  ;;  %v15489_v62 = vld [vmem:[%s21820_s11 + $0x40] sm:$0xff]  }
 0xe6c   :  { %v20491_v34 = vadd.f32 %v20437_v35, %v11278_v13  ;;  %v20494_v52 = vadd.f32 %v20448_v26, %v11279_v36  ;;  %11649 = vmatprep.mubr.bf16.mxu1 %v22392_v15  ;;  %v15490_v13 = vld [vmem:[%s21820_s11] sm:$0xff]   ;;  %14400 = vmatprep.subr.bf16.mxu0 %v15489_v62 }
 0xe6d   :  { %v20498_v10 = vadd.f32 %v20437_v35, %v11280_v14  ;;  %v20501_v59 = vadd.f32 %v20448_v26, %v11281_v49  ;;  %14401 = vmatpush3.bf16.msra.mxu0 %v15490_v13  ;;  %v15497_v13 = vld [vmem:[%s21820_s11 + $0x60] sm:$0xff]  }
 0xe6e   :  { %22390 = vst [vmem:[#allocation52_spill] sm:$0xff] %v20491_v34  ;;  %22391 = vst [vmem:[#allocation55_spill] sm:$0xff] %v20494_v52  ;;  %v11429_v21 = vcombine.low %v20491_v34, %v20494_v52 }
 0xe6f   :  { %22393 = vst [vmem:[#allocation26_spill] sm:$0xff] %v20498_v10  ;;  %22394 = vst [vmem:[#allocation56_spill] sm:$0xff] %v20501_v59  ;;  %v11430_v38 = vcombine.low %v20498_v10, %v20501_v59 }
 0xe71   :  { %v11476_v27 = vpack.c.bf16 %v11430_v38, %v11429_v21  ;;  %v15491_v38 = vld [vmem:[%s21820_s11 + $0x48] sm:$0xff]  }
 0xe72   :  { %14402 = vmatprep.subr.bf16.mxu0 %v15491_v38 }
 0xe73   :  { %14042 = vmatmul.mubr.msk.bf16.gmra.mrb[52].mxu1 %vm268_vm0, %v11476_v27  ;;  %v15492_v27 = vld [vmem:[%s21820_s11 + $0x8] sm:$0xff]  }
 0xe74   :  { %11659 = vmatprep.mubr.bf16.mxu1 %v22392_v15  ;;  %14403 = vmatpush3.bf16.msra.mxu0 %v15492_v27 }
 0xe85   :  { %v10679_v28 = vpop.xlane.xlu0 %10678 }
 0xe86   :  { %v10741_v12 = vmul.f32 0.010416667, %v10679_v28  ;;  %v10682_v9 = vpop.xlane.xlu1 %10681 }
 0xe87   :  { %v10742_v44 = vmul.f32 0.010416667, %v10682_v9  ;;  %v15494_v9 = vld [vmem:[%s21820_s11 + $0x10] sm:$0xff]  }
 0xe88   :  { %v10765_v14 = vadd.f32 1e-05, %v10741_v12  ;;  %v15493_v12 = vld [vmem:[%s21820_s11 + $0x50] sm:$0xff]  }
 0xe89   :  { %v10766_v58 = vadd.f32 1e-05, %v10742_v44  ;;  %v10685_v16 = vpop.xlane.xlu0 %10684  ;;  %14404 = vmatprep.subr.bf16.mxu0 %v15493_v12  ;;  %v15495_v44 = vld [vmem:[%s21820_s11 + $0x58] sm:$0xff]  }
 0xe8a   :  { %16025 = vrsqrt.f32 %v10765_v14  ;;  %v10743_v49 = vmul.f32 0.010416667, %v10685_v16  ;;  %v10688_v54 = vpop.xlane.xlu1 %10687  ;;  %14405 = vmatpush3.bf16.msra.mxu0 %v15494_v9 }
 0xe8b   :  { %16027 = vrsqrt.f32 %v10766_v58  ;;  %v10744_v36 = vmul.f32 0.010416667, %v10688_v54  ;;  %v15496_v58 = vld [vmem:[%s21820_s11 + $0x18] sm:$0xff]   ;;  %14406 = vmatprep.subr.bf16.mxu0 %v15495_v44 }
 0xe8c   :  { %v10767_v21 = vadd.f32 1e-05, %v10743_v49 }
 0xe8d   :  { %v10768_v28 = vadd.f32 1e-05, %v10744_v36 }
 0xe8e   :  { %16029 = vrsqrt.f32 %v10767_v21  ;;  %14407 = vmatpush3.bf16.msra.mxu0 %v15496_v58 }
 0xe8f   :  { %16031 = vrsqrt.f32 %v10768_v28  ;;  %14408 = vmatprep.subr.bf16.mxu0 %v15497_v13 }
 0xe94   :  { %v16026_v14 = vpop.eup %16025 }
 0xe95   :  { %v16028_v16 = vpop.eup %16027  ;;  %v10895_v49 = vrot.slane %v16026_v14, %v20052_v60  ;;  %v10902_v54 = vrot.slane %v16026_v14, %v20055_v17  ;;  %v10691_v62 = vpop.xlane.xlu0 %10690  ;;  %v22395_v14 = vld [vmem:[#allocation44_spill] sm:$0xff] }
 0xe96   :  { %v10909_v36 = vrot.slane %v16028_v16, %v20052_v60  ;;  %v10916_v21 = vrot.slane %v16028_v16, %v20055_v17  ;;  %v10745_v38 = vmul.f32 0.010416667, %v10691_v62  ;;  %v10694_v27 = vpop.xlane.xlu1 %10693  ;;  %v15499_v62 = vld [vmem:[%s21820_s11 + $0x68] sm:$0xff]  }
 0xe97   :  { %v11225_v28 = vmul.f32 %v10895_v49, %v20174_v30  ;;  %v11226_v12 = vmul.f32 %v10902_v54, %v20177_v5  ;;  %v10746_v59 = vmul.f32 0.010416667, %v10694_v27  ;;  %v15498_v30 = vld [vmem:[%s21820_s11 + $0x20] sm:$0xff]  }
 0xe98   :  { %v16030_v10 = vpop.eup %16029  ;;  %v11227_v52 = vmul.f32 %v10909_v36, %v22395_v14  ;;  %v11228_v9 = vmul.f32 %v10916_v21, %v20185_v25  ;;  %v10769_v34 = vadd.f32 1e-05, %v10745_v38  ;;  %v22396_v38 = vld [vmem:[#allocation121_spill] sm:$0xff]  ;;  %14409 = vmatpush3.bf16.msra.mxu0 %v15498_v30 }
 0xe99   :  { %v16032_v33 = vpop.eup %16031  ;;  %v11282_v23 = vmul.f32 %v20428_v41, %v11225_v28  ;;  %v11283_v57 = vmul.f32 %v20441_v40, %v11226_v12  ;;  %v10923_v16 = vrot.slane %v16030_v10, %v20052_v60  ;;  %v10930_v44 = vrot.slane %v16030_v10, %v20055_v17  ;;  %v10697_v28 = vpop.xlane.xlu0 %10696  ;;  %14410 = vmatprep.subr.bf16.mxu0 %v15499_v62 }
 0xe9a   :  { %v11284_v5 = vmul.f32 %v20428_v41, %v11227_v52  ;;  %v11285_v49 = vmul.f32 %v20441_v40, %v11228_v9  ;;  %v10937_v25 = vrot.slane %v16032_v33, %v20052_v60  ;;  %v10944_v54 = vrot.slane %v16032_v33, %v20055_v17 }
 0xe9b   :  { %v20559_v10 = vadd.f32 %v20437_v35, %v11282_v23  ;;  %v20562_v58 = vadd.f32 %v20448_v26, %v11283_v57  ;;  %v11229_v36 = vmul.f32 %v10923_v16, %v20200_v48  ;;  %v11230_v52 = vmul.f32 %v10930_v44, %v20203_v29  ;;  %v10700_v23 = vpop.xlane.xlu1 %10699 }
 0xe9c   :  { %v20567_v21 = vadd.f32 %v20437_v35, %v11284_v5  ;;  %v20570_v33 = vadd.f32 %v20448_v26, %v11285_v49  ;;  %v11231_v13 = vmul.f32 %v10937_v25, %v20206_v31  ;;  %v11232_v27 = vmul.f32 %v10944_v54, %v22396_v38 }
 0xe9d   :  { %v11431_v57 = vcombine.low %v20559_v10, %v20562_v58  ;;  %v11286_v12 = vmul.f32 %v20428_v41, %v11229_v36  ;;  %v11287_v48 = vmul.f32 %v20441_v40, %v11230_v52  ;;  %16033 = vrsqrt.f32 %v10769_v34 }
 0xe9e   :  { %v11432_v29 = vcombine.low %v20567_v21, %v20570_v33  ;;  %v11288_v14 = vmul.f32 %v20428_v41, %v11231_v13  ;;  %v11289_v31 = vmul.f32 %v20441_v40, %v11232_v27  ;;  %v10770_v9 = vadd.f32 1e-05, %v10746_v59 }
 0xe9f   :  { %v10747_v16 = vmul.f32 0.010416667, %v10697_v28  ;;  %v10748_v44 = vmul.f32 0.010416667, %v10700_v23  ;;  %v20589_v54 = vadd.f32 %v20437_v35, %v11286_v12  ;;  %v20592_v36 = vadd.f32 %v20448_v26, %v11287_v48 }
 0xea0   :  { %v11477_v5 = vpack.c.bf16 %v11432_v29, %v11431_v57  ;;  %v20583_v49 = vadd.f32 %v20437_v35, %v11288_v14  ;;  %v20586_v25 = vadd.f32 %v20448_v26, %v11289_v31  ;;  %16035 = vrsqrt.f32 %v10770_v9 }
 0xea1   :  { %v10771_v34 = vadd.f32 1e-05, %v10747_v16  ;;  %v10772_v30 = vadd.f32 1e-05, %v10748_v44  ;;  %v11433_v52 = vcombine.low %v20589_v54, %v20592_v36 }
 0xea2   :  { %14043 = vmatmul.mubr.msk.bf16.gmra.mrb[56].mxu1 %vm268_vm0, %v11477_v5  ;;  %v11434_v59 = vcombine.low %v20583_v49, %v20586_v25 }
 0xea3   :  { %16037 = vrsqrt.f32 %v10771_v34  ;;  %11669 = vmatprep.mubr.bf16.mxu1 %v22392_v15 }
 0xea4   :  { %16039 = vrsqrt.f32 %v10772_v30  ;;  %v11478_v23 = vpack.c.bf16 %v11434_v59, %v11433_v52 }
 0xea5   :  { %v10703_v62 = vpop.xlane.xlu0 %10702 }
 0xea6   :  { %v10749_v13 = vmul.f32 0.010416667, %v10703_v62  ;;  %v10706_v38 = vpop.xlane.xlu1 %10705 }
 0xea7   :  { %v16034_v27 = vpop.eup %16033  ;;  %v10750_v28 = vmul.f32 0.010416667, %v10706_v38 }
 0xea8   :  { %v10951_v57 = vrot.slane %v16034_v27, %v20052_v60  ;;  %v10958_v12 = vrot.slane %v16034_v27, %v20055_v17  ;;  %v10773_v48 = vadd.f32 1e-05, %v10749_v13 }
 0xea9   :  { %v10774_v29 = vadd.f32 1e-05, %v10750_v28  ;;  %v10709_v14 = vpop.xlane.xlu0 %10708 }
 0xeaa   :  { %v16036_v31 = vpop.eup %16035  ;;  %v11233_v9 = vmul.f32 %v10951_v57, %v20226_v55  ;;  %v11234_v16 = vmul.f32 %v10958_v12, %v20229_v37  ;;  %16041 = vrsqrt.f32 %v10773_v48  ;;  %v10751_v44 = vmul.f32 0.010416667, %v10709_v14  ;;  %14044 = vmatmul.mubr.msk.bf16.gmra.mrb[60].mxu1 %vm268_vm0, %v11478_v23  ;;  %v10712_v5 = vpop.xlane.xlu1 %10711 }
 0xeab   :  { %v10965_v34 = vrot.slane %v16036_v31, %v20052_v60  ;;  %v10972_v30 = vrot.slane %v16036_v31, %v20055_v17  ;;  %16043 = vrsqrt.f32 %v10774_v29  ;;  %v10752_v59 = vmul.f32 0.010416667, %v10712_v5  ;;  %11679 = vmatprep.mubr.bf16.mxu1 %v22392_v15 }
 0xeac   :  { %v11290_v62 = vmul.f32 %v20428_v41, %v11233_v9  ;;  %v11291_v52 = vmul.f32 %v20441_v40, %v11234_v16  ;;  %v10775_v55 = vadd.f32 1e-05, %v10751_v44 }
 0xead   :  { %v16038_v13 = vpop.eup %16037  ;;  %v11235_v37 = vmul.f32 %v10965_v34, %v20234_v50  ;;  %v11236_v38 = vmul.f32 %v10972_v30, %v20237_v43  ;;  %v10776_v27 = vadd.f32 1e-05, %v10752_v59 }
 0xeae   :  { %v16040_v28 = vpop.eup %16039  ;;  %v20613_v23 = vadd.f32 %v20437_v35, %v11290_v62  ;;  %v20616_v57 = vadd.f32 %v20448_v26, %v11291_v52  ;;  %v10979_v12 = vrot.slane %v16038_v13, %v20052_v60  ;;  %v10986_v48 = vrot.slane %v16038_v13, %v20055_v17 }
 0xeaf   :  { %v11292_v29 = vmul.f32 %v20428_v41, %v11235_v37  ;;  %v11293_v14 = vmul.f32 %v20441_v40, %v11236_v38  ;;  %v10993_v50 = vrot.slane %v16040_v28, %v20052_v60  ;;  %v11000_v43 = vrot.slane %v16040_v28, %v20055_v17 }
 0xeb0   :  { %v11237_v31 = vmul.f32 %v10979_v12, %v20252_v47  ;;  %v11238_v9 = vmul.f32 %v10986_v48, %v20255_v18  ;;  %16045 = vrsqrt.f32 %v10775_v55  ;;  %v11435_v47 = vcombine.low %v20613_v23, %v20616_v57 }
 0xeb1   :  { %v20627_v16 = vadd.f32 %v20437_v35, %v11292_v29  ;;  %v20630_v44 = vadd.f32 %v20448_v26, %v11293_v14  ;;  %v11239_v5 = vmul.f32 %v10993_v50, %v20258_v22  ;;  %v11240_v34 = vmul.f32 %v11000_v43, %v20261_v11 }
 0xeb2   :  { %v11294_v30 = vmul.f32 %v20428_v41, %v11237_v31  ;;  %v11295_v59 = vmul.f32 %v20441_v40, %v11238_v9  ;;  %16047 = vrsqrt.f32 %v10776_v27 }
 0xeb3   :  { %v11436_v18 = vcombine.low %v20627_v16, %v20630_v44  ;;  %v11296_v62 = vmul.f32 %v20428_v41, %v11239_v5  ;;  %v11297_v52 = vmul.f32 %v20441_v40, %v11240_v34 }
 0xeb4   :  { %v16042_v55 = vpop.eup %16041  ;;  %v20643_v22 = vadd.f32 %v20437_v35, %v11294_v30  ;;  %v20646_v11 = vadd.f32 %v20448_v26, %v11295_v59 }
 0xeb5   :  { %v16044_v13 = vpop.eup %16043  ;;  %v11479_v37 = vpack.c.bf16 %v11436_v18, %v11435_v47  ;;  %v20649_v38 = vadd.f32 %v20437_v35, %v11296_v62  ;;  %v20652_v27 = vadd.f32 %v20448_v26, %v11297_v52  ;;  %v11007_v28 = vrot.slane %v16042_v55, %v20052_v60  ;;  %v10715_v12 = vpop.xlane.xlu0 %10714 }
 0xeb6   :  { %v11014_v48 = vrot.slane %v16042_v55, %v20055_v17  ;;  %v11021_v29 = vrot.slane %v16044_v13, %v20052_v60  ;;  %v11028_v14 = vrot.slane %v16044_v13, %v20055_v17  ;;  %v10718_v50 = vpop.xlane.xlu1 %10717  ;;  %v10753_v31 = vmul.f32 0.010416667, %v10715_v12 }
 0xeb7   :  { %v11241_v43 = vmul.f32 %v11007_v28, %v20278_v42  ;;  %14045 = vmatmul.mubr.msk.bf16.gmra.mrb[64].mxu1 %vm268_vm0, %v11479_v37  ;;  %v10754_v9 = vmul.f32 0.010416667, %v10718_v50  ;;  %v11438_v5 = vcombine.low %v20649_v38, %v20652_v27  ;;  %v11437_v47 = vcombine.low %v20643_v22, %v20646_v11 }
 0xeb8   :  { %v11242_v34 = vmul.f32 %v11014_v48, %v20281_v7  ;;  %v11243_v30 = vmul.f32 %v11021_v29, %v20286_v51  ;;  %v11244_v59 = vmul.f32 %v11028_v14, %v20289_v19  ;;  %11689 = vmatprep.mubr.bf16.mxu1 %v22392_v15  ;;  %v10777_v18 = vadd.f32 1e-05, %v10753_v31 }
 0xeb9   :  { %v11298_v42 = vmul.f32 %v20428_v41, %v11241_v43  ;;  %v10778_v62 = vadd.f32 1e-05, %v10754_v9  ;;  %v10721_v52 = vpop.xlane.xlu0 %10720  ;;  %v11480_v29 = vpack.c.bf16 %v11438_v5, %v11437_v47 }
 0xeba   :  { %v16046_v55 = vpop.eup %16045  ;;  %v11299_v13 = vmul.f32 %v20441_v40, %v11242_v34  ;;  %v11300_v37 = vmul.f32 %v20428_v41, %v11243_v30  ;;  %v11301_v7 = vmul.f32 %v20441_v40, %v11244_v59  ;;  %v10755_v51 = vmul.f32 0.010416667, %v10721_v52  ;;  %v10724_v12 = vpop.xlane.xlu1 %10723 }
 0xebb   :  { %v11035_v19 = vrot.slane %v16046_v55, %v20052_v60  ;;  %v11042_v28 = vrot.slane %v16046_v55, %v20055_v17  ;;  %16049 = vrsqrt.f32 %v10777_v18  ;;  %v20681_v43 = vadd.f32 %v20437_v35, %v11298_v42 }
 0xebc   :  { %v16048_v48 = vpop.eup %16047  ;;  %v20675_v14 = vadd.f32 %v20437_v35, %v11300_v37  ;;  %v20678_v50 = vadd.f32 %v20448_v26, %v11301_v7  ;;  %16051 = vrsqrt.f32 %v10778_v62  ;;  %v20684_v31 = vadd.f32 %v20448_v26, %v11299_v13  ;;  %v15500_v13 = vld [vmem:[%s21820_s11 + $0x28] sm:$0xff]  }
 0xebd   :  { %v11049_v9 = vrot.slane %v16048_v48, %v20052_v60  ;;  %v11056_v34 = vrot.slane %v16048_v48, %v20055_v17  ;;  %v11245_v30 = vmul.f32 %v11035_v19, %v20304_v2  ;;  %v11246_v5 = vmul.f32 %v11042_v28, %v20307_v32  ;;  %14411 = vmatpush3.bf16.msra.mxu0 %v15500_v13  ;;  %v15501_v48 = vld [vmem:[%s21820_s11 + $0x70] sm:$0xff]  }
 0xebe   :  { %v10779_v59 = vadd.f32 1e-05, %v10755_v51  ;;  %v10756_v47 = vmul.f32 0.010416667, %v10724_v12  ;;  %v11440_v18 = vcombine.low %v20675_v14, %v20678_v50  ;;  %v11439_v2 = vcombine.low %v20681_v43, %v20684_v31  ;;  %14412 = vmatprep.subr.bf16.mxu0 %v15501_v48 }
 0xebf   :  { %v11247_v62 = vmul.f32 %v11049_v9, %v20310_v6  ;;  %v11248_v42 = vmul.f32 %v11056_v34, %v20313_v20  ;;  %14046 = vmatmul.mubr.msk.bf16.gmra.mrb[68].mxu1 %vm268_vm0, %v11480_v29  ;;  %v11302_v6 = vmul.f32 %v20428_v41, %v11245_v30  ;;  %v11303_v20 = vmul.f32 %v20441_v40, %v11246_v5 }
 0xec0   :  { %16053 = vrsqrt.f32 %v10779_v59  ;;  %v10780_v52 = vadd.f32 1e-05, %v10756_v47  ;;  %11699 = vmatprep.mubr.bf16.mxu1 %v22392_v15  ;;  %v11481_v37 = vpack.c.bf16 %v11440_v18, %v11439_v2  ;;  %v15502_v47 = vld [vmem:[%s21820_s11 + $0x30] sm:$0xff]   ;;  %v15503_v18 = vld [vmem:[%s21820_s11 + $0x78] sm:$0xff]  }
 0xec1   :  { %v11304_v32 = vmul.f32 %v20428_v41, %v11247_v62  ;;  %v11305_v55 = vmul.f32 %v20441_v40, %v11248_v42  ;;  %v20715_v9 = vadd.f32 %v20437_v35, %v11302_v6  ;;  %v20718_v34 = vadd.f32 %v20448_v26, %v11303_v20  ;;  %14413 = vmatpush3.bf16.msra.mxu0 %v15502_v47 }
 0xec2   :  { %16055 = vrsqrt.f32 %v10780_v52  ;;  %14414 = vmatprep.subr.bf16.mxu0 %v15503_v18 }
 0xec3   :  { %v20706_v7 = vadd.f32 %v20437_v35, %v11304_v32  ;;  %v20709_v51 = vadd.f32 %v20448_v26, %v11305_v55 }
 0xec4   :  { %v10727_v19 = vpop.xlane.xlu0 %10726 }
 0xec5   :  { %v16050_v28 = vpop.eup %16049  ;;  %v10757_v12 = vmul.f32 0.010416667, %v10727_v19  ;;  %v11442_v2 = vcombine.low %v20706_v7, %v20709_v51 }
 0xec6   :  { %v16052_v29 = vpop.eup %16051  ;;  %v11063_v30 = vrot.slane %v16050_v28, %v20052_v60  ;;  %v11070_v5 = vrot.slane %v16050_v28, %v20055_v17  ;;  %v10730_v59 = vpop.xlane.xlu1 %10729 }
 0xec7   :  { %v11077_v62 = vrot.slane %v16052_v29, %v20052_v60  ;;  %v11084_v42 = vrot.slane %v16052_v29, %v20055_v17  ;;  %14047 = vmatmul.mubr.msk.bf16.gmra.mrb[72].mxu1 %vm268_vm0, %v11481_v37  ;;  %v10781_v52 = vadd.f32 1e-05, %v10757_v12  ;;  %v10758_v13 = vmul.f32 0.010416667, %v10730_v59  ;;  %v15504_v37 = vld [vmem:[%s21820_s11 + $0x38] sm:$0xff]  }
 0xec8   :  { %v11249_v32 = vmul.f32 %v11063_v30, %v20330_v45  ;;  %v11250_v55 = vmul.f32 %v11070_v5, %v20333_v46  ;;  %11709 = vmatprep.mubr.bf16.mxu1 %v22392_v15  ;;  %v11441_v45 = vcombine.low %v20715_v9, %v20718_v34  ;;  %14415 = vmatpush3.bf16.msra.mxu0 %v15504_v37 }
 0xec9   :  { %v11251_v6 = vmul.f32 %v11077_v62, %v20338_v4  ;;  %v11252_v20 = vmul.f32 %v11084_v42, %v20341_v56  ;;  %16057 = vrsqrt.f32 %v10781_v52  ;;  %v10782_v12 = vadd.f32 1e-05, %v10758_v13 }
 0xeca   :  { %v16054_v19 = vpop.eup %16053  ;;  %v11306_v46 = vmul.f32 %v20428_v41, %v11249_v32  ;;  %v11307_v28 = vmul.f32 %v20441_v40, %v11250_v55  ;;  %v11482_v5 = vpack.c.bf16 %v11442_v2, %v11441_v45 }
 0xecb   :  { %v11308_v48 = vmul.f32 %v20428_v41, %v11251_v6  ;;  %v11309_v4 = vmul.f32 %v20441_v40, %v11252_v20  ;;  %v11091_v56 = vrot.slane %v16054_v19, %v20052_v60  ;;  %v11098_v29 = vrot.slane %v16054_v19, %v20055_v17 }
 0xecc   :  { %v16056_v30 = vpop.eup %16055  ;;  %16059 = vrsqrt.f32 %v10782_v12  ;;  %v20750_v59 = vadd.f32 %v20437_v35, %v11306_v46  ;;  %v20753_v47 = vadd.f32 %v20448_v26, %v11307_v28 }
 0xecd   :  { %v20756_v18 = vadd.f32 %v20437_v35, %v11308_v48  ;;  %v20759_v62 = vadd.f32 %v20448_v26, %v11309_v4  ;;  %v11253_v42 = vmul.f32 %v11091_v56, %v20356_v3  ;;  %v11254_v52 = vmul.f32 %v11098_v29, %v20359_v1 }
 0xece   :  { %v11105_v2 = vrot.slane %v16056_v30, %v20052_v60  ;;  %v11112_v32 = vrot.slane %v16056_v30, %v20055_v17  ;;  %v11443_v3 = vcombine.low %v20750_v59, %v20753_v47 }
 0xecf   :  { %v11444_v55 = vcombine.low %v20756_v18, %v20759_v62  ;;  %14048 = vmatmul.mubr.msk.bf16.gmra.mrb[76].mxu1 %vm268_vm0, %v11482_v5  ;;  %v11310_v1 = vmul.f32 %v20428_v41, %v11253_v42  ;;  %v11311_v20 = vmul.f32 %v20441_v40, %v11254_v52 }
 0xed0   :  { %v11255_v13 = vmul.f32 %v11105_v2, %v20362_v63  ;;  %v11256_v6 = vmul.f32 %v11112_v32, %v20365_v53  ;;  %11719 = vmatprep.mubr.bf16.mxu1 %v22392_v15 }
 0xed1   :  { %v11483_v46 = vpack.c.bf16 %v11444_v55, %v11443_v3  ;;  %v20786_v4 = vadd.f32 %v20437_v35, %v11310_v1  ;;  %v20789_v56 = vadd.f32 %v20448_v26, %v11311_v20 }
 0xed2   :  { %v11312_v37 = vmul.f32 %v20428_v41, %v11255_v13  ;;  %v11313_v19 = vmul.f32 %v20441_v40, %v11256_v6 }
 0xed3   :  { %v16058_v45 = vpop.eup %16057 }
 0xed4   :  { %v20778_v28 = vadd.f32 %v20437_v35, %v11312_v37  ;;  %v20781_v63 = vadd.f32 %v20448_v26, %v11313_v19  ;;  %v11119_v53 = vrot.slane %v16058_v45, %v20052_v60  ;;  %v11126_v12 = vrot.slane %v16058_v45, %v20055_v17 }
 0xed6   :  { %v16060_v48 = vpop.eup %16059  ;;  %v11257_v29 = vmul.f32 %v11119_v53, %v20382_v8  ;;  %v11258_v30 = vmul.f32 %v11126_v12, %v20385_v24  ;;  %v11446_v52 = vcombine.low %v20778_v28, %v20781_v63  ;;  %v11445_v24 = vcombine.low %v20786_v4, %v20789_v56 }
 0xed7   :  { %v11133_v5 = vrot.slane %v16060_v48, %v20052_v60  ;;  %v11140_v42 = vrot.slane %v16060_v48, %v20055_v17  ;;  %14049 = vmatmul.mubr.msk.bf16.gmra.mrb[80].mxu1 %vm268_vm0, %v11483_v46 }
 0xed8   :  { %11729 = vmatprep.mubr.bf16.mxu1 %v22392_v15  ;;  %v11314_v2 = vmul.f32 %v20428_v41, %v11257_v29  ;;  %v11315_v32 = vmul.f32 %v20441_v40, %v11258_v30  ;;  %v11484_v3 = vpack.c.bf16 %v11446_v52, %v11445_v24 }
 0xed9   :  { %v11259_v55 = vmul.f32 %v11133_v5, %v20390_v0  ;;  %v11260_v8 = vmul.f32 %v11140_v42, %v20393_v39 }
 0xeda   :  { %v20808_v1 = vadd.f32 %v20437_v35, %v11314_v2  ;;  %v20811_v20 = vadd.f32 %v20448_v26, %v11315_v32 }
 0xedb   :  { %v11316_v13 = vmul.f32 %v20428_v41, %v11259_v55  ;;  %v11317_v6 = vmul.f32 %v20441_v40, %v11260_v8  ;;  %v22397_v8 = vld [vmem:[#allocation47_spill] sm:$0xff] }
 0xedc   :  { %v11447_v19 = vcombine.low %v20808_v1, %v20811_v20 }
 0xedd   :  { %v20814_v37 = vadd.f32 %v20437_v35, %v11316_v13  ;;  %v20817_v0 = vadd.f32 %v20448_v26, %v11317_v6  ;;  %v22398_v13 = vld [vmem:[#allocation126_spill] sm:$0xff] }
 0xedf   :  { %v11448_v39 = vcombine.low %v20814_v37, %v20817_v0  ;;  %14050 = vmatmul.mubr.msk.bf16.gmra.mrb[84].mxu1 %vm268_vm0, %v11484_v3  ;;  %v22399_v3 = vld [vmem:[#allocation49_spill] sm:$0xff] }
 0xee0   :  { %11739 = vmatprep.mubr.bf16.mxu1 %v22392_v15 }
 0xee1   :  { %v11485_v45 = vpack.c.bf16 %v11448_v39, %v11447_v19 }
 0xee7   :  { %14051 = vmatmul.mubr.msk.bf16.gmra.mrb[88].mxu1 %vm268_vm0, %v11485_v45 }
 0xee8   :  { %11749 = vmatprep.mubr.bf16.mxu1 %v22392_v15 }
 0xeeb   :  { %v10733_v46 = vpop.xlane.xlu0 %10732 }
 0xeec   :  { %v10759_v53 = vmul.f32 0.010416667, %v10733_v46  ;;  %v10736_v12 = vpop.xlane.xlu1 %10735 }
 0xeed   :  { %v10760_v48 = vmul.f32 0.010416667, %v10736_v12 }
 0xeee   :  { %v10783_v29 = vadd.f32 1e-05, %v10759_v53 }
 0xeef   :  { %v10784_v30 = vadd.f32 1e-05, %v10760_v48 }
 0xef0   :  { %16061 = vrsqrt.f32 %v10783_v29 }
 0xef1   :  { %16063 = vrsqrt.f32 %v10784_v30 }
 0xefa   :  { %v16062_v5 = vpop.eup %16061 }
 0xefb   :  { %v16064_v42 = vpop.eup %16063  ;;  %v11147_v52 = vrot.slane %v16062_v5, %v20052_v60  ;;  %v11154_v2 = vrot.slane %v16062_v5, %v20055_v17 }
 0xefc   :  { %v11161_v32 = vrot.slane %v16064_v42, %v20052_v60  ;;  %v11168_v55 = vrot.slane %v16064_v42, %v20055_v17 }
 0xefd   :  { %v11261_v15 = vmul.f32 %v11147_v52, %v20408_v61  ;;  %v11262_v24 = vmul.f32 %v11154_v2, %v22397_v8  ;;  %v11499_v52 = vld [vmem:[%s21821_s10] sm:$0x3] }
 0xefe   :  { %v11263_v6 = vmul.f32 %v11161_v32, %v22398_v13  ;;  %v11264_v39 = vmul.f32 %v11168_v55, %v22399_v3 }
 0xeff   :  { %v11318_v19 = vmul.f32 %v20428_v41, %v11261_v15  ;;  %v11319_v45 = vmul.f32 %v20441_v40, %v11262_v24 }
 0xf00   :  { %v11320_v46 = vmul.f32 %v20428_v41, %v11263_v6  ;;  %v11321_v53 = vmul.f32 %v20441_v40, %v11264_v39  ;;  %v22401_v40 = vld [vmem:[#allocation123_spill] sm:$0xff] }
 0xf01   :  { %v20840_v12 = vadd.f32 %v20437_v35, %v11318_v19  ;;  %v20843_v48 = vadd.f32 %v20448_v26, %v11319_v45  ;;  %v11503_v42 = vsub.s32 0, %v22401_v40 }
 0xf02   :  { %v20846_v61 = vadd.f32 %v20437_v35, %v11320_v46  ;;  %v20849_v29 = vadd.f32 %v20448_v26, %v11321_v53  ;;  %v11507_v35 = vsub.s32 1, %v22401_v40 }
 0xf03   :  { %v11449_v30 = vcombine.low %v20840_v12, %v20843_v48  ;;  %v20861_v2 = vrot.slane %v11499_v52, %v11503_v42 }
 0xf04   :  { %22400 = vst [vmem:[#allocation86_spill] sm:$0xff] %v20849_v29  ;;  %v11450_v41 = vcombine.low %v20846_v61, %v20849_v29  ;;  %v20863_v26 = vrot.slane %v11499_v52, %v11507_v35 }
 0xf06   :  { %v11486_v5 = vpack.c.bf16 %v11450_v41, %v11449_v30 }
 0xf08   :  { %14052 = vmatmul.mubr.msk.bf16.gmra.mrb[92].mxu1 %vm268_vm0, %v11486_v5 }
 0xf3e   :  { %v11641_v32 = vpop.f32.mrb[48].mxu1 }
 0xf3f   :  { %v11642_v55 = vadd.f32 %v11641_v32, %v20861_v2  ;;  %v11643_v15 = vpop.f32.mrb[49].mxu1 }
 0xf40   :  { %v11644_v8 = vadd.f32 %v11643_v15, %v20863_v26  ;;  %v11645_v24 = vpop.f32.mrb[50].mxu1 }
 0xf41   :  { %v11646_v13 = vadd.f32 %v11645_v24, %v20861_v2  ;;  %v11647_v6 = vpop.f32.mrb[51].mxu1  ;;  %v11760_v39 = vmax.f32 %v11642_v55, 0.0 }
 0xf42   :  { %v11648_v3 = vadd.f32 %v11647_v6, %v20863_v26  ;;  %v11761_v45 = vmax.f32 %v11644_v8, 0.0 }
 0xf43   :  { %v11762_v19 = vmax.f32 %v11646_v13, 0.0 }
 0xf44   :  { %v11763_v46 = vmax.f32 %v11648_v3, 0.0 }
 0xf45   :  { %v11808_v53 = vpack.c.bf16 %v11762_v19, %v11760_v39 }
 0xf46   :  { %v11809_v30 = vpack.c.bf16 %v11763_v46, %v11761_v45  ;;  %v11651_v41 = vpop.f32.mrb[52].mxu1 }
 0xf47   :  { %v11652_v5 = vadd.f32 %v11651_v41, %v20861_v2  ;;  %v11653_v40 = vpop.f32.mrb[53].mxu1 }
 0xf48   :  { %v11654_v42 = vadd.f32 %v11653_v40, %v20863_v26  ;;  %v11655_v52 = vpop.f32.mrb[54].mxu1  ;;  %11999 = vmatprep.mubr.bf16.mxu0 %v11809_v30 }
 0xf49   :  { %v11656_v35 = vadd.f32 %v11655_v52, %v20861_v2  ;;  %v11657_v32 = vpop.f32.mrb[55].mxu1  ;;  %12000 = vmatmul.mubr.bf16.vlgmr.msra.gmra.mrb[48].mxu0 %v11808_v53  ;;  %v11764_v55 = vmax.f32 %v11652_v5, 0.0 }
 0xf4a   :  { %v11658_v15 = vadd.f32 %v11657_v32, %v20863_v26  ;;  %v11765_v8 = vmax.f32 %v11654_v42, 0.0 }
 0xf4b   :  { %v11766_v24 = vmax.f32 %v11656_v35, 0.0 }
 0xf4c   :  { %v11767_v13 = vmax.f32 %v11658_v15, 0.0 }
 0xf4d   :  { %v11810_v6 = vpack.c.bf16 %v11766_v24, %v11764_v55 }
 0xf4e   :  { %v11811_v3 = vpack.c.bf16 %v11767_v13, %v11765_v8 }
 0xf50   :  { %12007 = vmatprep.mubr.bf16.mxu0 %v11811_v3 }
 0xf51   :  { %12008 = vmatmul.mubr.bf16.gmra.mrb[52].mxu0 %v11810_v6 }
 0xf75   :  { %v11661_v39 = vpop.f32.mrb[56].mxu1 }
 0xf76   :  { %v11662_v19 = vadd.f32 %v11661_v39, %v20861_v2  ;;  %v11663_v45 = vpop.f32.mrb[57].mxu1 }
 0xf77   :  { %v11664_v46 = vadd.f32 %v11663_v45, %v20863_v26  ;;  %v11665_v30 = vpop.f32.mrb[58].mxu1 }
 0xf78   :  { %v11666_v41 = vadd.f32 %v11665_v30, %v20861_v2  ;;  %v11667_v53 = vpop.f32.mrb[59].mxu1  ;;  %v11768_v5 = vmax.f32 %v11662_v19, 0.0 }
 0xf79   :  { %v11668_v40 = vadd.f32 %v11667_v53, %v20863_v26  ;;  %v11769_v42 = vmax.f32 %v11664_v46, 0.0 }
 0xf7a   :  { %v11770_v52 = vmax.f32 %v11666_v41, 0.0 }
 0xf7b   :  { %v11771_v35 = vmax.f32 %v11668_v40, 0.0 }
 0xf7c   :  { %v11812_v32 = vpack.c.bf16 %v11770_v52, %v11768_v5 }
 0xf7d   :  { %v11813_v15 = vpack.c.bf16 %v11771_v35, %v11769_v42  ;;  %v11671_v55 = vpop.f32.mrb[60].mxu1 }
 0xf7e   :  { %v11672_v24 = vadd.f32 %v11671_v55, %v20861_v2  ;;  %v11673_v8 = vpop.f32.mrb[61].mxu1 }
 0xf7f   :  { %v11674_v13 = vadd.f32 %v11673_v8, %v20863_v26  ;;  %v11675_v6 = vpop.f32.mrb[62].mxu1  ;;  %12015 = vmatprep.mubr.bf16.mxu0 %v11813_v15 }
 0xf80   :  { %v11676_v3 = vadd.f32 %v11675_v6, %v20861_v2  ;;  %v11677_v39 = vpop.f32.mrb[63].mxu1  ;;  %12016 = vmatmul.mubr.bf16.gmra.mrb[56].mxu0 %v11812_v32  ;;  %v11772_v19 = vmax.f32 %v11672_v24, 0.0 }
 0xf81   :  { %v11678_v45 = vadd.f32 %v11677_v39, %v20863_v26  ;;  %v11773_v46 = vmax.f32 %v11674_v13, 0.0 }
 0xf82   :  { %v11774_v30 = vmax.f32 %v11676_v3, 0.0 }
 0xf83   :  { %v11775_v41 = vmax.f32 %v11678_v45, 0.0 }
 0xf84   :  { %v11814_v53 = vpack.c.bf16 %v11774_v30, %v11772_v19 }
 0xf85   :  { %v11815_v40 = vpack.c.bf16 %v11775_v41, %v11773_v46 }
 0xf87   :  { %12023 = vmatprep.mubr.bf16.mxu0 %v11815_v40 }
 0xf88   :  { %12024 = vmatmul.mubr.bf16.gmra.mrb[60].mxu0 %v11814_v53 }
 0xf8a   :  { %v11681_v5 = vpop.f32.mrb[64].mxu1 }
 0xf8b   :  { %v11682_v52 = vadd.f32 %v11681_v5, %v20861_v2  ;;  %v11683_v42 = vpop.f32.mrb[65].mxu1 }
 0xf8c   :  { %v11684_v35 = vadd.f32 %v11683_v42, %v20863_v26  ;;  %v11685_v15 = vpop.f32.mrb[66].mxu1 }
 0xf8d   :  { %v11686_v55 = vadd.f32 %v11685_v15, %v20861_v2  ;;  %v11687_v32 = vpop.f32.mrb[67].mxu1  ;;  %v11776_v24 = vmax.f32 %v11682_v52, 0.0 }
 0xf8e   :  { %v11688_v8 = vadd.f32 %v11687_v32, %v20863_v26  ;;  %v11777_v13 = vmax.f32 %v11684_v35, 0.0 }
 0xf8f   :  { %v11778_v6 = vmax.f32 %v11686_v55, 0.0 }
 0xf90   :  { %v11779_v3 = vmax.f32 %v11688_v8, 0.0 }
 0xf91   :  { %v11816_v39 = vpack.c.bf16 %v11778_v6, %v11776_v24 }
 0xf92   :  { %v11817_v45 = vpack.c.bf16 %v11779_v3, %v11777_v13  ;;  %v11691_v19 = vpop.f32.mrb[68].mxu1 }
 0xf93   :  { %v11692_v30 = vadd.f32 %v11691_v19, %v20861_v2  ;;  %v11693_v46 = vpop.f32.mrb[69].mxu1 }
 0xf94   :  { %v11694_v41 = vadd.f32 %v11693_v46, %v20863_v26  ;;  %v11695_v53 = vpop.f32.mrb[70].mxu1  ;;  %12031 = vmatprep.mubr.bf16.mxu0 %v11817_v45 }
 0xf95   :  { %v11696_v40 = vadd.f32 %v11695_v53, %v20861_v2  ;;  %v11697_v5 = vpop.f32.mrb[71].mxu1  ;;  %12032 = vmatmul.mubr.bf16.gmra.mrb[64].mxu0 %v11816_v39  ;;  %v11780_v52 = vmax.f32 %v11692_v30, 0.0 }
 0xf96   :  { %v11698_v42 = vadd.f32 %v11697_v5, %v20863_v26  ;;  %v11781_v35 = vmax.f32 %v11694_v41, 0.0 }
 0xf97   :  { %v11782_v15 = vmax.f32 %v11696_v40, 0.0 }
 0xf98   :  { %v11783_v55 = vmax.f32 %v11698_v42, 0.0 }
 0xf99   :  { %v11818_v32 = vpack.c.bf16 %v11782_v15, %v11780_v52 }
 0xf9a   :  { %v11819_v8 = vpack.c.bf16 %v11783_v55, %v11781_v35  ;;  %v11701_v24 = vpop.f32.mrb[72].mxu1 }
 0xf9b   :  { %v11702_v6 = vadd.f32 %v11701_v24, %v20861_v2  ;;  %v11703_v13 = vpop.f32.mrb[73].mxu1 }
 0xf9c   :  { %v11704_v3 = vadd.f32 %v11703_v13, %v20863_v26  ;;  %v11705_v19 = vpop.f32.mrb[74].mxu1  ;;  %12039 = vmatprep.mubr.bf16.mxu0 %v11819_v8 }
 0xf9d   :  { %v11706_v45 = vadd.f32 %v11705_v19, %v20861_v2  ;;  %v11707_v46 = vpop.f32.mrb[75].mxu1  ;;  %12040 = vmatmul.mubr.bf16.gmra.mrb[68].mxu0 %v11818_v32  ;;  %v11784_v30 = vmax.f32 %v11702_v6, 0.0 }
 0xf9e   :  { %v11708_v39 = vadd.f32 %v11707_v46, %v20863_v26  ;;  %v11785_v41 = vmax.f32 %v11704_v3, 0.0 }
 0xf9f   :  { %v11786_v53 = vmax.f32 %v11706_v45, 0.0 }
 0xfa0   :  { %v11787_v40 = vmax.f32 %v11708_v39, 0.0 }
 0xfa1   :  { %v11820_v5 = vpack.c.bf16 %v11786_v53, %v11784_v30 }
 0xfa2   :  { %v11821_v42 = vpack.c.bf16 %v11787_v40, %v11785_v41  ;;  %v11711_v52 = vpop.f32.mrb[76].mxu1 }
 0xfa3   :  { %v11712_v15 = vadd.f32 %v11711_v52, %v20861_v2  ;;  %v11713_v35 = vpop.f32.mrb[77].mxu1 }
 0xfa4   :  { %v11714_v55 = vadd.f32 %v11713_v35, %v20863_v26  ;;  %v11715_v24 = vpop.f32.mrb[78].mxu1  ;;  %12047 = vmatprep.mubr.bf16.mxu0 %v11821_v42 }
 0xfa5   :  { %v11716_v8 = vadd.f32 %v11715_v24, %v20861_v2  ;;  %v11717_v13 = vpop.f32.mrb[79].mxu1  ;;  %12048 = vmatmul.mubr.bf16.gmra.mrb[72].mxu0 %v11820_v5  ;;  %v11788_v6 = vmax.f32 %v11712_v15, 0.0 }
 0xfa6   :  { %v11718_v32 = vadd.f32 %v11717_v13, %v20863_v26  ;;  %v11789_v3 = vmax.f32 %v11714_v55, 0.0 }
 0xfa7   :  { %v11790_v19 = vmax.f32 %v11716_v8, 0.0 }
 0xfa8   :  { %v11791_v45 = vmax.f32 %v11718_v32, 0.0 }
 0xfa9   :  { %v11822_v46 = vpack.c.bf16 %v11790_v19, %v11788_v6 }
 0xfaa   :  { %v11823_v39 = vpack.c.bf16 %v11791_v45, %v11789_v3  ;;  %v11721_v30 = vpop.f32.mrb[80].mxu1 }
 0xfab   :  { %v11722_v53 = vadd.f32 %v11721_v30, %v20861_v2  ;;  %v11723_v41 = vpop.f32.mrb[81].mxu1 }
 0xfac   :  { %v11724_v40 = vadd.f32 %v11723_v41, %v20863_v26  ;;  %v11725_v52 = vpop.f32.mrb[82].mxu1  ;;  %12055 = vmatprep.mubr.bf16.mxu0 %v11823_v39 }
 0xfad   :  { %v11726_v42 = vadd.f32 %v11725_v52, %v20861_v2  ;;  %v11727_v35 = vpop.f32.mrb[83].mxu1  ;;  %12056 = vmatmul.mubr.bf16.gmra.mrb[76].mxu0 %v11822_v46  ;;  %v11792_v15 = vmax.f32 %v11722_v53, 0.0 }
 0xfae   :  { %v11728_v5 = vadd.f32 %v11727_v35, %v20863_v26  ;;  %v11793_v55 = vmax.f32 %v11724_v40, 0.0 }
 0xfaf   :  { %v11794_v24 = vmax.f32 %v11726_v42, 0.0 }
 0xfb0   :  { %v11795_v8 = vmax.f32 %v11728_v5, 0.0 }
 0xfb1   :  { %v11824_v13 = vpack.c.bf16 %v11794_v24, %v11792_v15 }
 0xfb2   :  { %v11825_v32 = vpack.c.bf16 %v11795_v8, %v11793_v55  ;;  %v11731_v6 = vpop.f32.mrb[84].mxu1 }
 0xfb3   :  { %v11732_v19 = vadd.f32 %v11731_v6, %v20861_v2  ;;  %v11733_v3 = vpop.f32.mrb[85].mxu1 }
 0xfb4   :  { %v11734_v45 = vadd.f32 %v11733_v3, %v20863_v26  ;;  %v11735_v30 = vpop.f32.mrb[86].mxu1  ;;  %12063 = vmatprep.mubr.bf16.mxu0 %v11825_v32 }
 0xfb5   :  { %v11736_v39 = vadd.f32 %v11735_v30, %v20861_v2  ;;  %v11737_v41 = vpop.f32.mrb[87].mxu1  ;;  %12064 = vmatmul.mubr.bf16.gmra.mrb[80].mxu0 %v11824_v13  ;;  %v11796_v53 = vmax.f32 %v11732_v19, 0.0 }
 0xfb6   :  { %v11738_v46 = vadd.f32 %v11737_v41, %v20863_v26  ;;  %v11797_v40 = vmax.f32 %v11734_v45, 0.0 }
 0xfb7   :  { %v11798_v52 = vmax.f32 %v11736_v39, 0.0 }
 0xfb8   :  { %v11799_v42 = vmax.f32 %v11738_v46, 0.0 }
 0xfb9   :  { %v11826_v35 = vpack.c.bf16 %v11798_v52, %v11796_v53 }
 0xfba   :  { %v11827_v5 = vpack.c.bf16 %v11799_v42, %v11797_v40  ;;  %v11741_v15 = vpop.f32.mrb[88].mxu1 }
 0xfbb   :  { %v11742_v24 = vadd.f32 %v11741_v15, %v20861_v2  ;;  %v11743_v55 = vpop.f32.mrb[89].mxu1 }
 0xfbc   :  { %v11744_v8 = vadd.f32 %v11743_v55, %v20863_v26  ;;  %v11745_v6 = vpop.f32.mrb[90].mxu1  ;;  %12071 = vmatprep.mubr.bf16.mxu0 %v11827_v5 }
 0xfbd   :  { %v11746_v32 = vadd.f32 %v11745_v6, %v20861_v2  ;;  %v11747_v3 = vpop.f32.mrb[91].mxu1  ;;  %12072 = vmatmul.mubr.bf16.gmra.mrb[84].mxu0 %v11826_v35  ;;  %v11800_v19 = vmax.f32 %v11742_v24, 0.0 }
 0xfbe   :  { %v11748_v13 = vadd.f32 %v11747_v3, %v20863_v26  ;;  %v11801_v45 = vmax.f32 %v11744_v8, 0.0 }
 0xfbf   :  { %v11802_v30 = vmax.f32 %v11746_v32, 0.0 }
 0xfc0   :  { %v11803_v39 = vmax.f32 %v11748_v13, 0.0 }
 0xfc1   :  { %v11828_v41 = vpack.c.bf16 %v11802_v30, %v11800_v19  ;;  %v20916_v30 = vld [vmem:[%s21822_s12] ss:$0 sm:$0xff] }
 0xfc2   :  { %v11829_v46 = vpack.c.bf16 %v11803_v39, %v11801_v45 }
 0xfc4   :  { %12079 = vmatprep.mubr.bf16.mxu0 %v11829_v46 }
 0xfc5   :  { %12080 = vmatmul.mubr.bf16.gmra.mrb[88].mxu0 %v11828_v41 }
 0xfdb   :  { %v11751_v53 = vpop.f32.mrb[92].mxu1 }
 0xfdc   :  { %v11752_v52 = vadd.f32 %v11751_v53, %v20861_v2  ;;  %v11753_v40 = vpop.f32.mrb[93].mxu1 }
 0xfdd   :  { %v11754_v42 = vadd.f32 %v11753_v40, %v20863_v26  ;;  %v11755_v5 = vpop.f32.mrb[94].mxu1  ;;  %v22402_v40 = vld [vmem:[#allocation125_spill] sm:$0xff] }
 0xfde   :  { %v11756_v15 = vadd.f32 %v11755_v5, %v20861_v2  ;;  %v11757_v35 = vpop.f32.mrb[95].mxu1  ;;  %v11804_v24 = vmax.f32 %v11752_v52, 0.0 }
 0xfdf   :  { %v11758_v55 = vadd.f32 %v11757_v35, %v20863_v26  ;;  %v11805_v8 = vmax.f32 %v11754_v42, 0.0  ;;  %v22403_v35 = vld [vmem:[#allocation127_spill] sm:$0xff] }
 0xfe0   :  { %v11806_v6 = vmax.f32 %v11756_v15, 0.0 }
 0xfe1   :  { %v11807_v32 = vmax.f32 %v11758_v55, 0.0 }
 0xfe2   :  { %v11830_v3 = vpack.c.bf16 %v11806_v6, %v11804_v24  ;;  %v22404_v6 = vld [vmem:[#allocation51_spill] sm:$0xff] }
 0xfe3   :  { %v11831_v13 = vpack.c.bf16 %v11807_v32, %v11805_v8 }
 0xfe5   :  { %12087 = vmatprep.mubr.bf16.mxu0 %v11831_v13 }
 0xfe6   :  { %12088 = vmatmul.mubr.bf16.gmra.mrb[92].mxu0 %v11830_v3 }
0x101c   :  { %v14416_v19 = vpop.f32.mrb[48].mxu0 }
0x101d   :  { %v14417_v45 = vpop.f32.mrb[49].mxu0 }
0x101e   :  { %v14418_v39 = vadd.f32 %v14417_v45, %v14416_v19  ;;  %v14419_v2 = vpop.f32.mrb[50].mxu0  ;;  %v22405_v19 = vld [vmem:[#allocation53_spill] sm:$0xff] }
0x101f   :  { %v14420_v41 = vpop.f32.mrb[51].mxu0 }
0x1020   :  { %v12002_v26 = vadd.f32 %v14418_v39, %v20916_v30  ;;  %v14421_v46 = vadd.f32 %v14420_v41, %v14419_v2 }
0x1022   :  { %v12120_v53 = vcombine.high %v12002_v26, %v12002_v26  ;;  %v12005_v52 = vadd.f32 %v14421_v46, %v20916_v30  ;;  %v20921_v42 = vadd.f32 %v12002_v26, %v22402_v40 }
0x1024   :  { %v12121_v5 = vcombine.high %v12005_v52, %v12005_v52  ;;  %v14422_v15 = vpop.f32.mrb[52].mxu0  ;;  %v20924_v55 = vadd.f32 %v12120_v53, %v22403_v35  ;;  %v20927_v8 = vadd.f32 %v12005_v52, %v22404_v6 }
0x1025   :  { %v14423_v24 = vpop.f32.mrb[53].mxu0 }
0x1026   :  { %v14424_v32 = vadd.f32 %v14423_v24, %v14422_v15  ;;  %v14425_v3 = vpop.f32.mrb[54].mxu0  ;;  %v12264_v13 = vcombine.low %v20921_v42, %v20924_v55  ;;  %v20932_v45 = vadd.f32 %v12121_v5, %v22405_v19  ;;  %v22406_v15 = vld [vmem:[#allocation52_spill] sm:$0xff]  ;;  %v22407_v24 = vld [vmem:[#allocation55_spill] sm:$0xff] }
0x1027   :  { %v14426_v39 = vpop.f32.mrb[55].mxu0  ;;  %v22409_v19 = vld [vmem:[#allocation56_spill] sm:$0xff] }
0x1028   :  { %v12010_v2 = vadd.f32 %v14424_v32, %v20916_v30  ;;  %v14427_v41 = vadd.f32 %v14426_v39, %v14425_v3  ;;  %v12312_v26 = vsel %vm268_vm0, %v12264_v13, 0.0  ;;  %v12265_v46 = vcombine.low %v20927_v8, %v20932_v45  ;;  %v22408_v32 = vld [vmem:[#allocation26_spill] sm:$0xff] }
0x1029   :  { %12313 = vadd.xlane.f32.xlu0 %v12312_v26 }
0x102a   :  { %v12122_v53 = vcombine.high %v12010_v2, %v12010_v2  ;;  %v12013_v52 = vadd.f32 %v14427_v41, %v20916_v30  ;;  %v12315_v40 = vsel %vm268_vm0, %v12265_v46, 0.0  ;;  %v20941_v35 = vadd.f32 %v12010_v2, %v22406_v15 }
0x102b   :  { %12316 = vadd.xlane.f32.xlu1 %v12315_v40 }
0x102c   :  { %v12123_v5 = vcombine.high %v12013_v52, %v12013_v52  ;;  %v20944_v6 = vadd.f32 %v12122_v53, %v22407_v24  ;;  %v20947_v3 = vadd.f32 %v12013_v52, %v22408_v32 }
0x102e   :  { %v12266_v13 = vcombine.low %v20941_v35, %v20944_v6  ;;  %v20952_v39 = vadd.f32 %v12123_v5, %v22409_v19 }
0x1030   :  { %22410 = vst [vmem:[#allocation54_spill] sm:$0xff] %v20952_v39  ;;  %v12318_v41 = vsel %vm268_vm0, %v12266_v13, 0.0  ;;  %v12267_v26 = vcombine.low %v20947_v3, %v20952_v39 }
0x1031   :  { %12319 = vadd.xlane.f32.xlu0 %v12318_v41 }
0x1032   :  { %v12321_v2 = vsel %vm268_vm0, %v12267_v26, 0.0 }
0x1033   :  { %12322 = vadd.xlane.f32.xlu1 %v12321_v2 }
0x1053   :  { %v14428_v46 = vpop.f32.mrb[56].mxu0 }
0x1054   :  { %v14429_v53 = vpop.f32.mrb[57].mxu0 }
0x1055   :  { %v14430_v40 = vadd.f32 %v14429_v53, %v14428_v46  ;;  %v14431_v52 = vpop.f32.mrb[58].mxu0 }
0x1056   :  { %v14432_v15 = vpop.f32.mrb[59].mxu0 }
0x1057   :  { %v12018_v24 = vadd.f32 %v14430_v40, %v20916_v30  ;;  %v14433_v32 = vadd.f32 %v14432_v15, %v14431_v52 }
0x1059   :  { %v12124_v29 = vcombine.high %v12018_v24, %v12018_v24  ;;  %v12021_v5 = vadd.f32 %v14433_v32, %v20916_v30  ;;  %v20961_v13 = vadd.f32 %v12018_v24, %v20559_v10 }
0x105b   :  { %v12125_v19 = vcombine.high %v12021_v5, %v12021_v5  ;;  %v14434_v39 = vpop.f32.mrb[60].mxu0  ;;  %v20964_v41 = vadd.f32 %v12124_v29, %v20562_v58  ;;  %v20967_v2 = vadd.f32 %v12021_v5, %v20567_v21 }
0x105c   :  { %v14435_v26 = vpop.f32.mrb[61].mxu0 }
0x105d   :  { %v14436_v46 = vadd.f32 %v14435_v26, %v14434_v39  ;;  %v14437_v53 = vpop.f32.mrb[62].mxu0  ;;  %v12268_v40 = vcombine.low %v20961_v13, %v20964_v41  ;;  %v20972_v52 = vadd.f32 %v12125_v19, %v20570_v33 }
0x105e   :  { %v14438_v15 = vpop.f32.mrb[63].mxu0 }
0x105f   :  { %v12026_v10 = vadd.f32 %v14436_v46, %v20916_v30  ;;  %v14439_v24 = vadd.f32 %v14438_v15, %v14437_v53  ;;  %v12324_v32 = vsel %vm268_vm0, %v12268_v40, 0.0  ;;  %v12269_v58 = vcombine.low %v20967_v2, %v20972_v52 }
0x1060   :  { %12325 = vadd.xlane.f32.xlu0 %v12324_v32 }
0x1061   :  { %v12126_v21 = vcombine.high %v12026_v10, %v12026_v10  ;;  %v12029_v29 = vadd.f32 %v14439_v24, %v20916_v30  ;;  %v12327_v39 = vsel %vm268_vm0, %v12269_v58, 0.0  ;;  %v20981_v5 = vadd.f32 %v12026_v10, %v20589_v54 }
0x1062   :  { %12328 = vadd.xlane.f32.xlu1 %v12327_v39 }
0x1063   :  { %v12127_v33 = vcombine.high %v12029_v29, %v12029_v29  ;;  %v20984_v19 = vadd.f32 %v12126_v21, %v20592_v36  ;;  %v20987_v26 = vadd.f32 %v12029_v29, %v20583_v49 }
0x1065   :  { %v12270_v46 = vcombine.low %v20981_v5, %v20984_v19  ;;  %v20992_v53 = vadd.f32 %v12127_v33, %v20586_v25 }
0x1067   :  { %22411 = vst [vmem:[#allocation31_spill] sm:$0xff] %v20992_v53  ;;  %v12330_v40 = vsel %vm268_vm0, %v12270_v46, 0.0  ;;  %v12271_v15 = vcombine.low %v20987_v26, %v20992_v53 }
0x1068   :  { %v14440_v54 = vpop.f32.mrb[64].mxu0  ;;  %12331 = vadd.xlane.f32.xlu0 %v12330_v40 }
0x1069   :  { %v14441_v10 = vpop.f32.mrb[65].mxu0  ;;  %v12333_v36 = vsel %vm268_vm0, %v12271_v15, 0.0 }
0x106a   :  { %v14442_v24 = vadd.f32 %v14441_v10, %v14440_v54  ;;  %v14443_v32 = vpop.f32.mrb[66].mxu0  ;;  %12334 = vadd.xlane.f32.xlu1 %v12333_v36 }
0x106b   :  { %v14444_v49 = vpop.f32.mrb[67].mxu0 }
0x106c   :  { %v12034_v58 = vadd.f32 %v14442_v24, %v20916_v30  ;;  %v14445_v21 = vadd.f32 %v14444_v49, %v14443_v32 }
0x106e   :  { %v12128_v29 = vcombine.high %v12034_v58, %v12034_v58  ;;  %v12037_v25 = vadd.f32 %v14445_v21, %v20916_v30  ;;  %v21001_v39 = vadd.f32 %v12034_v58, %v20613_v23 }
0x1070   :  { %v12129_v33 = vcombine.high %v12037_v25, %v12037_v25  ;;  %v14446_v46 = vpop.f32.mrb[68].mxu0  ;;  %v21004_v40 = vadd.f32 %v12128_v29, %v20616_v57  ;;  %v21007_v15 = vadd.f32 %v12037_v25, %v20627_v16 }
0x1071   :  { %v14447_v53 = vpop.f32.mrb[69].mxu0 }
0x1072   :  { %v14448_v54 = vadd.f32 %v14447_v53, %v14446_v46  ;;  %v14449_v10 = vpop.f32.mrb[70].mxu0  ;;  %v12272_v36 = vcombine.low %v21001_v39, %v21004_v40  ;;  %v21012_v24 = vadd.f32 %v12129_v33, %v20630_v44 }
0x1073   :  { %v14450_v32 = vpop.f32.mrb[71].mxu0 }
0x1074   :  { %v12042_v23 = vadd.f32 %v14448_v54, %v20916_v30  ;;  %v14451_v49 = vadd.f32 %v14450_v32, %v14449_v10  ;;  %v12336_v58 = vsel %vm268_vm0, %v12272_v36, 0.0  ;;  %v12273_v57 = vcombine.low %v21007_v15, %v21012_v24 }
0x1075   :  { %12337 = vadd.xlane.f32.xlu0 %v12336_v58 }
0x1076   :  { %v12130_v16 = vcombine.high %v12042_v23, %v12042_v23  ;;  %v12045_v53 = vadd.f32 %v14451_v49, %v20916_v30  ;;  %v12339_v21 = vsel %vm268_vm0, %v12273_v57, 0.0  ;;  %v21021_v29 = vadd.f32 %v12042_v23, %v20643_v22 }
0x1077   :  { %12340 = vadd.xlane.f32.xlu1 %v12339_v21 }
0x1078   :  { %v12131_v44 = vcombine.high %v12045_v53, %v12045_v53  ;;  %v14452_v25 = vpop.f32.mrb[72].mxu0  ;;  %v21024_v33 = vadd.f32 %v12130_v16, %v20646_v11  ;;  %v21027_v54 = vadd.f32 %v12045_v53, %v20649_v38 }
0x1079   :  { %v14453_v46 = vpop.f32.mrb[73].mxu0 }
0x107a   :  { %v14454_v10 = vadd.f32 %v14453_v46, %v14452_v25  ;;  %v14455_v36 = vpop.f32.mrb[74].mxu0  ;;  %v12274_v32 = vcombine.low %v21021_v29, %v21024_v33  ;;  %v21032_v49 = vadd.f32 %v12131_v44, %v20652_v27 }
0x107b   :  { %v14456_v58 = vpop.f32.mrb[75].mxu0 }
0x107c   :  { %v12050_v22 = vadd.f32 %v14454_v10, %v20916_v30  ;;  %v14457_v23 = vadd.f32 %v14456_v58, %v14455_v36  ;;  %v12342_v57 = vsel %vm268_vm0, %v12274_v32, 0.0  ;;  %v12275_v11 = vcombine.low %v21027_v54, %v21032_v49 }
0x107d   :  { %12343 = vadd.xlane.f32.xlu0 %v12342_v57 }
0x107e   :  { %v12132_v38 = vcombine.high %v12050_v22, %v12050_v22  ;;  %v12053_v16 = vadd.f32 %v14457_v23, %v20916_v30  ;;  %v12345_v53 = vsel %vm268_vm0, %v12275_v11, 0.0  ;;  %v21041_v21 = vadd.f32 %v12050_v22, %v20681_v43 }
0x107f   :  { %12346 = vadd.xlane.f32.xlu1 %v12345_v53 }
0x1080   :  { %v12133_v27 = vcombine.high %v12053_v16, %v12053_v16  ;;  %v14458_v44 = vpop.f32.mrb[76].mxu0  ;;  %v21044_v25 = vadd.f32 %v12132_v38, %v20684_v31  ;;  %v21047_v10 = vadd.f32 %v12053_v16, %v20675_v14 }
0x1081   :  { %v14459_v46 = vpop.f32.mrb[77].mxu0 }
0x1082   :  { %v14460_v36 = vadd.f32 %v14459_v46, %v14458_v44  ;;  %v14461_v32 = vpop.f32.mrb[78].mxu0  ;;  %v12276_v58 = vcombine.low %v21041_v21, %v21044_v25  ;;  %v21052_v23 = vadd.f32 %v12133_v27, %v20678_v50 }
0x1083   :  { %v14462_v57 = vpop.f32.mrb[79].mxu0 }
0x1084   :  { %v12058_v43 = vadd.f32 %v14460_v36, %v20916_v30  ;;  %v14463_v22 = vadd.f32 %v14462_v57, %v14461_v32  ;;  %v12348_v11 = vsel %vm268_vm0, %v12276_v58, 0.0  ;;  %v12277_v31 = vcombine.low %v21047_v10, %v21052_v23 }
0x1085   :  { %12349 = vadd.xlane.f32.xlu0 %v12348_v11 }
0x1086   :  { %v12134_v14 = vcombine.high %v12058_v43, %v12058_v43  ;;  %v12061_v38 = vadd.f32 %v14463_v22, %v20916_v30  ;;  %v12351_v16 = vsel %vm268_vm0, %v12277_v31, 0.0  ;;  %v21061_v53 = vadd.f32 %v12058_v43, %v20715_v9 }
0x1087   :  { %12352 = vadd.xlane.f32.xlu1 %v12351_v16 }
0x1088   :  { %v12135_v50 = vcombine.high %v12061_v38, %v12061_v38  ;;  %v14464_v27 = vpop.f32.mrb[80].mxu0  ;;  %v21064_v44 = vadd.f32 %v12134_v14, %v20718_v34  ;;  %v21067_v36 = vadd.f32 %v12061_v38, %v20706_v7 }
0x1089   :  { %v14465_v46 = vpop.f32.mrb[81].mxu0 }
0x108a   :  { %v14466_v32 = vadd.f32 %v14465_v46, %v14464_v27  ;;  %v14467_v58 = vpop.f32.mrb[82].mxu0  ;;  %v12278_v57 = vcombine.low %v21061_v53, %v21064_v44  ;;  %v21072_v22 = vadd.f32 %v12135_v50, %v20709_v51 }
0x108b   :  { %v14468_v11 = vpop.f32.mrb[83].mxu0 }
0x108c   :  { %v12066_v9 = vadd.f32 %v14466_v32, %v20916_v30  ;;  %v14469_v43 = vadd.f32 %v14468_v11, %v14467_v58  ;;  %v12354_v31 = vsel %vm268_vm0, %v12278_v57, 0.0  ;;  %v12279_v34 = vcombine.low %v21067_v36, %v21072_v22 }
0x108d   :  { %12355 = vadd.xlane.f32.xlu0 %v12354_v31 }
0x108e   :  { %v12136_v7 = vcombine.high %v12066_v9, %v12066_v9  ;;  %v12069_v14 = vadd.f32 %v14469_v43, %v20916_v30  ;;  %v12357_v38 = vsel %vm268_vm0, %v12279_v34, 0.0  ;;  %v21081_v16 = vadd.f32 %v12066_v9, %v20750_v59 }
0x108f   :  { %12358 = vadd.xlane.f32.xlu1 %v12357_v38 }
0x1090   :  { %v12137_v51 = vcombine.high %v12069_v14, %v12069_v14  ;;  %v14470_v50 = vpop.f32.mrb[84].mxu0  ;;  %v21084_v27 = vadd.f32 %v12136_v7, %v20753_v47  ;;  %v21087_v32 = vadd.f32 %v12069_v14, %v20756_v18 }
0x1091   :  { %v14471_v46 = vpop.f32.mrb[85].mxu0 }
0x1092   :  { %v14472_v58 = vadd.f32 %v14471_v46, %v14470_v50  ;;  %v14473_v57 = vpop.f32.mrb[86].mxu0  ;;  %v12280_v11 = vcombine.low %v21081_v16, %v21084_v27  ;;  %v21092_v43 = vadd.f32 %v12137_v51, %v20759_v62 }
0x1093   :  { %v14474_v31 = vpop.f32.mrb[87].mxu0 }
0x1094   :  { %v12074_v59 = vadd.f32 %v14472_v58, %v20916_v30  ;;  %v14475_v9 = vadd.f32 %v14474_v31, %v14473_v57  ;;  %v12360_v34 = vsel %vm268_vm0, %v12280_v11, 0.0  ;;  %v12281_v47 = vcombine.low %v21087_v32, %v21092_v43 }
0x1095   :  { %12361 = vadd.xlane.f32.xlu0 %v12360_v34 }
0x1096   :  { %v12138_v18 = vcombine.high %v12074_v59, %v12074_v59  ;;  %v12077_v7 = vadd.f32 %v14475_v9, %v20916_v30  ;;  %v12363_v14 = vsel %vm268_vm0, %v12281_v47, 0.0  ;;  %v21101_v38 = vadd.f32 %v12074_v59, %v20786_v4 }
0x1097   :  { %12364 = vadd.xlane.f32.xlu1 %v12363_v14 }
0x1098   :  { %v12139_v62 = vcombine.high %v12077_v7, %v12077_v7  ;;  %v14476_v51 = vpop.f32.mrb[88].mxu0  ;;  %v21104_v50 = vadd.f32 %v12138_v18, %v20789_v56  ;;  %v21107_v58 = vadd.f32 %v12077_v7, %v20778_v28 }
0x1099   :  { %v14477_v46 = vpop.f32.mrb[89].mxu0 }
0x109a   :  { %v14478_v57 = vadd.f32 %v14477_v46, %v14476_v51  ;;  %v14479_v11 = vpop.f32.mrb[90].mxu0  ;;  %v12282_v31 = vcombine.low %v21101_v38, %v21104_v50  ;;  %v21112_v9 = vadd.f32 %v12139_v62, %v20781_v63 }
0x109b   :  { %v14480_v34 = vpop.f32.mrb[91].mxu0 }
0x109c   :  { %v12082_v4 = vadd.f32 %v14478_v57, %v20916_v30  ;;  %v14481_v59 = vadd.f32 %v14480_v34, %v14479_v11  ;;  %v12366_v47 = vsel %vm268_vm0, %v12282_v31, 0.0  ;;  %v12283_v56 = vcombine.low %v21107_v58, %v21112_v9 }
0x109d   :  { %12367 = vadd.xlane.f32.xlu0 %v12366_v47 }
0x109e   :  { %v12140_v28 = vcombine.high %v12082_v4, %v12082_v4  ;;  %v12085_v18 = vadd.f32 %v14481_v59, %v20916_v30  ;;  %v12369_v7 = vsel %vm268_vm0, %v12283_v56, 0.0  ;;  %v21121_v14 = vadd.f32 %v12082_v4, %v20808_v1 }
0x109f   :  { %12370 = vadd.xlane.f32.xlu1 %v12369_v7 }
0x10a0   :  { %v12141_v63 = vcombine.high %v12085_v18, %v12085_v18  ;;  %v21124_v62 = vadd.f32 %v12140_v28, %v20811_v20  ;;  %v21127_v51 = vadd.f32 %v12085_v18, %v20814_v37 }
0x10a2   :  { %22412 = vst [vmem:[#allocation89_spill] sm:$0xff] %v21127_v51  ;;  %v12284_v46 = vcombine.low %v21121_v14, %v21124_v62  ;;  %v21132_v57 = vadd.f32 %v12141_v63, %v20817_v0 }
0x10a4   :  { %22413 = vst [vmem:[#allocation27_spill] sm:$0xff] %v21132_v57  ;;  %v12372_v11 = vsel %vm268_vm0, %v12284_v46, 0.0  ;;  %v12285_v31 = vcombine.low %v21127_v51, %v21132_v57 }
0x10a5   :  { %12373 = vadd.xlane.f32.xlu0 %v12372_v11 }
0x10a6   :  { %v12375_v1 = vsel %vm268_vm0, %v12285_v31, 0.0 }
0x10a7   :  { %12376 = vadd.xlane.f32.xlu1 %v12375_v1 }
0x10b6   :  { %v12314_v20 = vpop.xlane.xlu0 %12313 }
0x10b7   :  { %v12384_v34 = vmul.f32 0.010416667, %v12314_v20 }
0x10b8   :  { %v12317_v4 = vpop.xlane.xlu1 %12316 }
0x10b9   :  { %v12438_v37 = vrot.slane %v12384_v34, %v20052_v60  ;;  %v12445_v59 = vrot.slane %v12384_v34, %v20055_v17  ;;  %v12385_v47 = vmul.f32 0.010416667, %v12317_v4  ;;  %v14482_v56 = vpop.f32.mrb[92].mxu0 }
0x10ba   :  { %v14483_v0 = vpop.f32.mrb[93].mxu0 }
0x10bb   :  { %v12452_v28 = vrot.slane %v12385_v47, %v20052_v60  ;;  %v12459_v18 = vrot.slane %v12385_v47, %v20055_v17  ;;  %v14485_v7 = vpop.f32.mrb[94].mxu0  ;;  %v21143_v63 = vsub.f32 %v20921_v42, %v12438_v37  ;;  %v21146_v46 = vsub.f32 %v20924_v55, %v12445_v59 }
0x10bc   :  { %v14484_v11 = vadd.f32 %v14483_v0, %v14482_v56  ;;  %v14486_v31 = vpop.f32.mrb[95].mxu0 }
0x10bd   :  { %v21149_v1 = vsub.f32 %v20927_v8, %v12452_v28  ;;  %v14487_v20 = vadd.f32 %v14486_v31, %v14485_v7  ;;  %v21152_v34 = vsub.f32 %v20932_v45, %v12459_v18  ;;  %v12864_v55 = vmul.f32 %v21143_v63, %v21143_v63  ;;  %v22414_v31 = vld [vmem:[#allocation86_spill] sm:$0xff] }
0x10be   :  { %v12090_v4 = vadd.f32 %v14484_v11, %v20916_v30  ;;  %v12320_v57 = vpop.xlane.xlu0 %12319  ;;  %v12865_v59 = vmul.f32 %v21146_v46, %v21146_v46 }
0x10bf   :  { %v12093_v47 = vadd.f32 %v14487_v20, %v20916_v30  ;;  %v12386_v51 = vmul.f32 0.010416667, %v12320_v57  ;;  %v12866_v0 = vmul.f32 %v21149_v1, %v21149_v1  ;;  %v12867_v18 = vmul.f32 %v21152_v34, %v21152_v34 }
0x10c0   :  { %v12142_v42 = vcombine.high %v12090_v4, %v12090_v4  ;;  %v12323_v37 = vpop.xlane.xlu1 %12322  ;;  %v21165_v28 = vadd.f32 %v12090_v4, %v20840_v12 }
0x10c1   :  { %v12143_v8 = vcombine.high %v12093_v47, %v12093_v47  ;;  %v12466_v56 = vrot.slane %v12386_v51, %v20052_v60  ;;  %v12473_v45 = vrot.slane %v12386_v51, %v20055_v17  ;;  %v12387_v30 = vmul.f32 0.010416667, %v12323_v37 }
0x10c2   :  { %v21168_v57 = vadd.f32 %v12142_v42, %v20843_v48  ;;  %v21173_v7 = vadd.f32 %v12093_v47, %v20846_v61  ;;  %v12960_v47 = vcombine.low %v12864_v55, %v12865_v59  ;;  %v22415_v42 = vld [vmem:[#allocation54_spill] sm:$0xff] }
0x10c3   :  { %v21176_v11 = vsub.f32 %v20941_v35, %v12466_v56  ;;  %v21179_v51 = vsub.f32 %v20944_v6, %v12473_v45  ;;  %v21182_v20 = vadd.f32 %v12143_v8, %v22414_v31  ;;  %v12480_v12 = vrot.slane %v12387_v30, %v20052_v60 }
0x10c4   :  { %v12487_v48 = vrot.slane %v12387_v30, %v20055_v17  ;;  %v12286_v4 = vcombine.low %v21165_v28, %v21168_v57  ;;  %v12961_v30 = vcombine.low %v12866_v0, %v12867_v18  ;;  %v13008_v59 = vsel %vm268_vm0, %v12960_v47, 0.0 }
0x10c5   :  { %v12287_v61 = vcombine.low %v21173_v7, %v21182_v20  ;;  %v12868_v35 = vmul.f32 %v21176_v11, %v21176_v11  ;;  %v21193_v6 = vsub.f32 %v20947_v3, %v12480_v12  ;;  %v12869_v56 = vmul.f32 %v21179_v51, %v21179_v51 }
0x10c6   :  { %v21196_v37 = vsub.f32 %v22415_v42, %v12487_v48  ;;  %v12378_v8 = vsel %vm268_vm0, %v12286_v4, 0.0  ;;  %v13011_v12 = vsel %vm268_vm0, %v12961_v30, 0.0 }
0x10c7   :  { %12379 = vadd.xlane.f32.xlu0 %v12378_v8  ;;  %v12381_v45 = vsel %vm268_vm0, %v12287_v61, 0.0  ;;  %v12870_v55 = vmul.f32 %v21193_v6, %v21193_v6  ;;  %v12962_v31 = vcombine.low %v12868_v35, %v12869_v56 }
0x10c8   :  { %12382 = vadd.xlane.f32.xlu1 %v12381_v45  ;;  %v12871_v3 = vmul.f32 %v21196_v37, %v21196_v37 }
0x10c9   :  { %v13014_v4 = vsel %vm268_vm0, %v12962_v31, 0.0 }
0x10ca   :  { %v12963_v48 = vcombine.low %v12870_v55, %v12871_v3 }
0x10cb   :  { %13009 = vadd.xlane.f32.xlu0 %v13008_v59 }
0x10cc   :  { %13012 = vadd.xlane.f32.xlu1 %v13011_v12  ;;  %v13017_v0 = vsel %vm268_vm0, %v12963_v48, 0.0 }
0x10cf   :  { %13015 = vadd.xlane.f32.xlu0 %v13014_v4 }
0x10d0   :  { %13018 = vadd.xlane.f32.xlu1 %v13017_v0 }
0x10ed   :  { %v12326_v18 = vpop.xlane.xlu0 %12325 }
0x10ee   :  { %v12388_v61 = vmul.f32 0.010416667, %v12326_v18 }
0x10ef   :  { %v12329_v42 = vpop.xlane.xlu1 %12328 }
0x10f0   :  { %v12494_v8 = vrot.slane %v12388_v61, %v20052_v60  ;;  %v12501_v45 = vrot.slane %v12388_v61, %v20055_v17  ;;  %v12389_v47 = vmul.f32 0.010416667, %v12329_v42 }
0x10f2   :  { %v21213_v35 = vsub.f32 %v20961_v13, %v12494_v8  ;;  %v21216_v56 = vsub.f32 %v20964_v41, %v12501_v45  ;;  %v12508_v30 = vrot.slane %v12389_v47, %v20052_v60  ;;  %v12515_v55 = vrot.slane %v12389_v47, %v20055_v17 }
0x10f4   :  { %v21221_v3 = vsub.f32 %v20967_v2, %v12508_v30  ;;  %v21224_v59 = vsub.f32 %v20972_v52, %v12515_v55  ;;  %v12872_v31 = vmul.f32 %v21213_v35, %v21213_v35  ;;  %v12873_v13 = vmul.f32 %v21216_v56, %v21216_v56 }
0x10f5   :  { %v12332_v12 = vpop.xlane.xlu0 %12331 }
0x10f6   :  { %v12390_v48 = vmul.f32 0.010416667, %v12332_v12  ;;  %v12964_v41 = vcombine.low %v12872_v31, %v12873_v13  ;;  %v12874_v4 = vmul.f32 %v21221_v3, %v21221_v3  ;;  %v12875_v0 = vmul.f32 %v21224_v59, %v21224_v59  ;;  %v22416_v12 = vld [vmem:[#allocation31_spill] sm:$0xff] }
0x10f7   :  { %v12335_v2 = vpop.xlane.xlu1 %12334 }
0x10f8   :  { %v12522_v18 = vrot.slane %v12390_v48, %v20052_v60  ;;  %v12529_v52 = vrot.slane %v12390_v48, %v20055_v17  ;;  %v12391_v61 = vmul.f32 0.010416667, %v12335_v2  ;;  %v13020_v42 = vsel %vm268_vm0, %v12964_v41, 0.0 }
0x10f9   :  { %13021 = vadd.xlane.f32.xlu0 %v13020_v42  ;;  %v12965_v8 = vcombine.low %v12874_v4, %v12875_v0 }
0x10fa   :  { %v21238_v45 = vsub.f32 %v20981_v5, %v12522_v18  ;;  %v21241_v47 = vsub.f32 %v20984_v19, %v12529_v52  ;;  %v12536_v30 = vrot.slane %v12391_v61, %v20052_v60  ;;  %v12543_v55 = vrot.slane %v12391_v61, %v20055_v17 }
0x10fb   :  { %v13023_v31 = vsel %vm268_vm0, %v12965_v8, 0.0 }
0x10fc   :  { %v21247_v13 = vsub.f32 %v20987_v26, %v12536_v30  ;;  %v21250_v48 = vsub.f32 %v22416_v12, %v12543_v55  ;;  %13024 = vadd.xlane.f32.xlu1 %v13023_v31  ;;  %v12876_v5 = vmul.f32 %v21238_v45, %v21238_v45  ;;  %v12877_v19 = vmul.f32 %v21241_v47, %v21241_v47 }
0x10fe   :  { %v12966_v41 = vcombine.low %v12876_v5, %v12877_v19  ;;  %v12878_v4 = vmul.f32 %v21247_v13, %v21247_v13  ;;  %v12879_v0 = vmul.f32 %v21250_v48, %v21250_v48 }
0x1100   :  { %v13026_v26 = vsel %vm268_vm0, %v12966_v41, 0.0  ;;  %v12967_v2 = vcombine.low %v12878_v4, %v12879_v0 }
0x1101   :  { %13027 = vadd.xlane.f32.xlu0 %v13026_v26 }
0x1102   :  { %v12338_v18 = vpop.xlane.xlu0 %12337  ;;  %v13029_v52 = vsel %vm268_vm0, %v12967_v2, 0.0 }
0x1103   :  { %v12392_v61 = vmul.f32 0.010416667, %v12338_v18  ;;  %13030 = vadd.xlane.f32.xlu1 %v13029_v52 }
0x1104   :  { %v12341_v42 = vpop.xlane.xlu1 %12340 }
0x1105   :  { %v12550_v8 = vrot.slane %v12392_v61, %v20052_v60  ;;  %v12557_v30 = vrot.slane %v12392_v61, %v20055_v17  ;;  %v12393_v55 = vmul.f32 0.010416667, %v12341_v42 }
0x1107   :  { %v21265_v31 = vsub.f32 %v21001_v39, %v12550_v8  ;;  %v21268_v12 = vsub.f32 %v21004_v40, %v12557_v30  ;;  %v12564_v5 = vrot.slane %v12393_v55, %v20052_v60  ;;  %v12571_v19 = vrot.slane %v12393_v55, %v20055_v17 }
0x1109   :  { %v21273_v41 = vsub.f32 %v21007_v15, %v12564_v5  ;;  %v21276_v4 = vsub.f32 %v21012_v24, %v12571_v19  ;;  %v12880_v0 = vmul.f32 %v21265_v31, %v21265_v31  ;;  %v12881_v39 = vmul.f32 %v21268_v12, %v21268_v12 }
0x110a   :  { %v12344_v26 = vpop.xlane.xlu0 %12343 }
0x110b   :  { %v12394_v2 = vmul.f32 0.010416667, %v12344_v26  ;;  %v12968_v40 = vcombine.low %v12880_v0, %v12881_v39  ;;  %v12882_v18 = vmul.f32 %v21273_v41, %v21273_v41  ;;  %v12883_v52 = vmul.f32 %v21276_v4, %v21276_v4 }
0x110c   :  { %v12347_v15 = vpop.xlane.xlu1 %12346 }
0x110d   :  { %v12578_v61 = vrot.slane %v12394_v2, %v20052_v60  ;;  %v12585_v24 = vrot.slane %v12394_v2, %v20055_v17  ;;  %v12395_v42 = vmul.f32 0.010416667, %v12347_v15  ;;  %v13032_v8 = vsel %vm268_vm0, %v12968_v40, 0.0 }
0x110e   :  { %13033 = vadd.xlane.f32.xlu0 %v13032_v8  ;;  %v12969_v30 = vcombine.low %v12882_v18, %v12883_v52 }
0x110f   :  { %v21290_v55 = vsub.f32 %v21021_v29, %v12578_v61  ;;  %v21293_v5 = vsub.f32 %v21024_v33, %v12585_v24  ;;  %v12592_v19 = vrot.slane %v12395_v42, %v20052_v60  ;;  %v12599_v0 = vrot.slane %v12395_v42, %v20055_v17 }
0x1110   :  { %v13035_v39 = vsel %vm268_vm0, %v12969_v30, 0.0 }
0x1111   :  { %v21299_v26 = vsub.f32 %v21027_v54, %v12592_v19  ;;  %v21302_v2 = vsub.f32 %v21032_v49, %v12599_v0  ;;  %13036 = vadd.xlane.f32.xlu1 %v13035_v39  ;;  %v12884_v29 = vmul.f32 %v21290_v55, %v21290_v55  ;;  %v12885_v33 = vmul.f32 %v21293_v5, %v21293_v5 }
0x1112   :  { %v12350_v40 = vpop.xlane.xlu0 %12349 }
0x1113   :  { %v12396_v18 = vmul.f32 0.010416667, %v12350_v40  ;;  %v12970_v52 = vcombine.low %v12884_v29, %v12885_v33  ;;  %v12886_v15 = vmul.f32 %v21299_v26, %v21299_v26  ;;  %v12887_v54 = vmul.f32 %v21302_v2, %v21302_v2 }
0x1114   :  { %v12353_v61 = vpop.xlane.xlu1 %12352 }
0x1115   :  { %v12606_v49 = vrot.slane %v12396_v18, %v20052_v60  ;;  %v12613_v24 = vrot.slane %v12396_v18, %v20055_v17  ;;  %v12397_v42 = vmul.f32 0.010416667, %v12353_v61  ;;  %v13038_v8 = vsel %vm268_vm0, %v12970_v52, 0.0 }
0x1116   :  { %13039 = vadd.xlane.f32.xlu0 %v13038_v8  ;;  %v12971_v30 = vcombine.low %v12886_v15, %v12887_v54 }
0x1117   :  { %v21316_v19 = vsub.f32 %v21041_v21, %v12606_v49  ;;  %v21319_v0 = vsub.f32 %v21044_v25, %v12613_v24  ;;  %v12620_v39 = vrot.slane %v12397_v42, %v20052_v60  ;;  %v12627_v29 = vrot.slane %v12397_v42, %v20055_v17 }
0x1118   :  { %v13041_v33 = vsel %vm268_vm0, %v12971_v30, 0.0 }
0x1119   :  { %v21325_v40 = vsub.f32 %v21047_v10, %v12620_v39  ;;  %v21328_v18 = vsub.f32 %v21052_v23, %v12627_v29  ;;  %13042 = vadd.xlane.f32.xlu1 %v13041_v33  ;;  %v12888_v21 = vmul.f32 %v21316_v19, %v21316_v19  ;;  %v12889_v25 = vmul.f32 %v21319_v0, %v21319_v0 }
0x111a   :  { %v12356_v52 = vpop.xlane.xlu0 %12355 }
0x111b   :  { %v12398_v15 = vmul.f32 0.010416667, %v12356_v52  ;;  %v12972_v54 = vcombine.low %v12888_v21, %v12889_v25  ;;  %v12890_v61 = vmul.f32 %v21325_v40, %v21325_v40  ;;  %v12891_v10 = vmul.f32 %v21328_v18, %v21328_v18 }
0x111c   :  { %v12359_v49 = vpop.xlane.xlu1 %12358 }
0x111d   :  { %v12634_v23 = vrot.slane %v12398_v15, %v20052_v60  ;;  %v12641_v24 = vrot.slane %v12398_v15, %v20055_v17  ;;  %v12399_v42 = vmul.f32 0.010416667, %v12359_v49  ;;  %v13044_v8 = vsel %vm268_vm0, %v12972_v54, 0.0 }
0x111e   :  { %13045 = vadd.xlane.f32.xlu0 %v13044_v8  ;;  %v12973_v30 = vcombine.low %v12890_v61, %v12891_v10 }
0x111f   :  { %v21342_v39 = vsub.f32 %v21061_v53, %v12634_v23  ;;  %v21345_v29 = vsub.f32 %v21064_v44, %v12641_v24  ;;  %v12648_v33 = vrot.slane %v12399_v42, %v20052_v60  ;;  %v12655_v21 = vrot.slane %v12399_v42, %v20055_v17 }
0x1120   :  { %v13047_v25 = vsel %vm268_vm0, %v12973_v30, 0.0 }
0x1121   :  { %v21351_v52 = vsub.f32 %v21067_v36, %v12648_v33  ;;  %v21354_v15 = vsub.f32 %v21072_v22, %v12655_v21  ;;  %13048 = vadd.xlane.f32.xlu1 %v13047_v25  ;;  %v12892_v53 = vmul.f32 %v21342_v39, %v21342_v39  ;;  %v12893_v44 = vmul.f32 %v21345_v29, %v21345_v29 }
0x1122   :  { %v12362_v54 = vpop.xlane.xlu0 %12361 }
0x1123   :  { %v12400_v61 = vmul.f32 0.010416667, %v12362_v54  ;;  %v12974_v10 = vcombine.low %v12892_v53, %v12893_v44  ;;  %v12894_v49 = vmul.f32 %v21351_v52, %v21351_v52  ;;  %v12895_v36 = vmul.f32 %v21354_v15, %v21354_v15 }
0x1124   :  { %v12365_v23 = vpop.xlane.xlu1 %12364 }
0x1125   :  { %v12662_v22 = vrot.slane %v12400_v61, %v20052_v60  ;;  %v12669_v24 = vrot.slane %v12400_v61, %v20055_v17  ;;  %v12401_v42 = vmul.f32 0.010416667, %v12365_v23  ;;  %v13050_v8 = vsel %vm268_vm0, %v12974_v10, 0.0 }
0x1126   :  { %13051 = vadd.xlane.f32.xlu0 %v13050_v8  ;;  %v12975_v30 = vcombine.low %v12894_v49, %v12895_v36 }
0x1127   :  { %v21368_v33 = vsub.f32 %v21081_v16, %v12662_v22  ;;  %v21371_v21 = vsub.f32 %v21084_v27, %v12669_v24  ;;  %v12676_v25 = vrot.slane %v12401_v42, %v20052_v60  ;;  %v12683_v53 = vrot.slane %v12401_v42, %v20055_v17 }
0x1128   :  { %v13053_v44 = vsel %vm268_vm0, %v12975_v30, 0.0 }
0x1129   :  { %v21377_v54 = vsub.f32 %v21087_v32, %v12676_v25  ;;  %v21380_v61 = vsub.f32 %v21092_v43, %v12683_v53  ;;  %13054 = vadd.xlane.f32.xlu1 %v13053_v44  ;;  %v12896_v16 = vmul.f32 %v21368_v33, %v21368_v33  ;;  %v12897_v27 = vmul.f32 %v21371_v21, %v21371_v21 }
0x112a   :  { %v12368_v10 = vpop.xlane.xlu0 %12367 }
0x112b   :  { %v12402_v49 = vmul.f32 0.010416667, %v12368_v10  ;;  %v12976_v36 = vcombine.low %v12896_v16, %v12897_v27  ;;  %v12898_v23 = vmul.f32 %v21377_v54, %v21377_v54  ;;  %v12899_v32 = vmul.f32 %v21380_v61, %v21380_v61 }
0x112c   :  { %v12371_v22 = vpop.xlane.xlu1 %12370 }
0x112d   :  { %v12690_v43 = vrot.slane %v12402_v49, %v20052_v60  ;;  %v12697_v24 = vrot.slane %v12402_v49, %v20055_v17  ;;  %v12403_v42 = vmul.f32 0.010416667, %v12371_v22  ;;  %v13056_v8 = vsel %vm268_vm0, %v12976_v36, 0.0 }
0x112e   :  { %13057 = vadd.xlane.f32.xlu0 %v13056_v8  ;;  %v12977_v30 = vcombine.low %v12898_v23, %v12899_v32 }
0x112f   :  { %v21394_v25 = vsub.f32 %v21101_v38, %v12690_v43  ;;  %v21397_v53 = vsub.f32 %v21104_v50, %v12697_v24  ;;  %v12704_v44 = vrot.slane %v12403_v42, %v20052_v60  ;;  %v12711_v16 = vrot.slane %v12403_v42, %v20055_v17 }
0x1130   :  { %v13059_v27 = vsel %vm268_vm0, %v12977_v30, 0.0 }
0x1131   :  { %v21403_v10 = vsub.f32 %v21107_v58, %v12704_v44  ;;  %v21406_v49 = vsub.f32 %v21112_v9, %v12711_v16  ;;  %13060 = vadd.xlane.f32.xlu1 %v13059_v27  ;;  %v12900_v38 = vmul.f32 %v21394_v25, %v21394_v25  ;;  %v12901_v50 = vmul.f32 %v21397_v53, %v21397_v53 }
0x1132   :  { %v12374_v36 = vpop.xlane.xlu0 %12373 }
0x1133   :  { %22417 = vst [vmem:[#allocation93_spill] sm:$0xff] %v21406_v49  ;;  %v12404_v23 = vmul.f32 0.010416667, %v12374_v36  ;;  %v12978_v32 = vcombine.low %v12900_v38, %v12901_v50  ;;  %v12902_v22 = vmul.f32 %v21403_v10, %v21403_v10  ;;  %v12903_v58 = vmul.f32 %v21406_v49, %v21406_v49  ;;  %v22418_v36 = vld [vmem:[#allocation89_spill] sm:$0xff] }
0x1134   :  { %v12377_v43 = vpop.xlane.xlu1 %12376 }
0x1135   :  { %v12718_v9 = vrot.slane %v12404_v23, %v20052_v60  ;;  %v12725_v24 = vrot.slane %v12404_v23, %v20055_v17  ;;  %v12405_v42 = vmul.f32 0.010416667, %v12377_v43  ;;  %v13062_v8 = vsel %vm268_vm0, %v12978_v32, 0.0  ;;  %v22419_v23 = vld [vmem:[#allocation27_spill] sm:$0xff] }
0x1136   :  { %13063 = vadd.xlane.f32.xlu0 %v13062_v8  ;;  %v12979_v30 = vcombine.low %v12902_v22, %v12903_v58 }
0x1137   :  { %v21420_v44 = vsub.f32 %v21121_v14, %v12718_v9  ;;  %v21423_v16 = vsub.f32 %v21124_v62, %v12725_v24  ;;  %v12732_v27 = vrot.slane %v12405_v42, %v20052_v60  ;;  %v12739_v38 = vrot.slane %v12405_v42, %v20055_v17 }
0x1138   :  { %v13065_v50 = vsel %vm268_vm0, %v12979_v30, 0.0 }
0x1139   :  { %v21429_v49 = vsub.f32 %v22418_v36, %v12732_v27  ;;  %v21432_v43 = vsub.f32 %v22419_v23, %v12739_v38  ;;  %13066 = vadd.xlane.f32.xlu1 %v13065_v50  ;;  %v12904_v14 = vmul.f32 %v21420_v44, %v21420_v44  ;;  %v12905_v62 = vmul.f32 %v21423_v16, %v21423_v16 }
0x113b   :  { %v12980_v32 = vcombine.low %v12904_v14, %v12905_v62  ;;  %v12906_v22 = vmul.f32 %v21429_v49, %v21429_v49  ;;  %v12907_v58 = vmul.f32 %v21432_v43, %v21432_v43 }
0x113d   :  { %v13068_v9 = vsel %vm268_vm0, %v12980_v32, 0.0  ;;  %v12981_v24 = vcombine.low %v12906_v22, %v12907_v58 }
0x113e   :  { %13069 = vadd.xlane.f32.xlu0 %v13068_v9 }
0x113f   :  { %v13071_v42 = vsel %vm268_vm0, %v12981_v24, 0.0 }
0x1140   :  { %13072 = vadd.xlane.f32.xlu1 %v13071_v42 }
0x1154   :  { %v12380_v8 = vpop.xlane.xlu0 %12379 }
0x1155   :  { %v12406_v30 = vmul.f32 0.010416667, %v12380_v8  ;;  %v12383_v27 = vpop.xlane.xlu1 %12382 }
0x1156   :  { %v12407_v38 = vmul.f32 0.010416667, %v12383_v27 }
0x1157   :  { %v12746_v50 = vrot.slane %v12406_v30, %v20052_v60  ;;  %v12753_v36 = vrot.slane %v12406_v30, %v20055_v17 }
0x1158   :  { %v12760_v23 = vrot.slane %v12407_v38, %v20052_v60  ;;  %v12767_v14 = vrot.slane %v12407_v38, %v20055_v17  ;;  %v13010_v62 = vpop.xlane.xlu0 %13009 }
0x1159   :  { %v21449_v32 = vsub.f32 %v21165_v28, %v12746_v50  ;;  %v21452_v22 = vsub.f32 %v21168_v57, %v12753_v36  ;;  %v13080_v58 = vmul.f32 0.010416667, %v13010_v62  ;;  %v13013_v9 = vpop.xlane.xlu1 %13012 }
0x115a   :  { %v21455_v24 = vsub.f32 %v21173_v7, %v12760_v23  ;;  %v21458_v42 = vsub.f32 %v21182_v20, %v12767_v14  ;;  %v13081_v8 = vmul.f32 0.010416667, %v13013_v9 }
0x115b   :  { %22420 = vst [vmem:[#allocation91_spill] sm:$0xff] %v21449_v32  ;;  %22421 = vst [vmem:[#allocation87_spill] sm:$0xff] %v21452_v22  ;;  %v13104_v30 = vadd.f32 1e-05, %v13080_v58  ;;  %v12908_v27 = vmul.f32 %v21449_v32, %v21449_v32  ;;  %v12909_v28 = vmul.f32 %v21452_v22, %v21452_v22 }
0x115c   :  { %22422 = vst [vmem:[#allocation88_spill] sm:$0xff] %v21455_v24  ;;  %22423 = vst [vmem:[#allocation90_spill] sm:$0xff] %v21458_v42  ;;  %v13105_v38 = vadd.f32 1e-05, %v13081_v8  ;;  %v13016_v50 = vpop.xlane.xlu0 %13015  ;;  %v12910_v57 = vmul.f32 %v21455_v24, %v21455_v24  ;;  %v12911_v7 = vmul.f32 %v21458_v42, %v21458_v42 }
0x115d   :  { %16065 = vrsqrt.f32 %v13104_v30  ;;  %v13082_v36 = vmul.f32 0.010416667, %v13016_v50  ;;  %v13019_v20 = vpop.xlane.xlu1 %13018  ;;  %v12982_v23 = vcombine.low %v12908_v27, %v12909_v28  ;;  %v21473_v30 = vld [vmem:[%s21823_s15] ss:$0 sm:$0xff] }
0x115e   :  { %16067 = vrsqrt.f32 %v13105_v38  ;;  %v13083_v14 = vmul.f32 0.010416667, %v13019_v20  ;;  %v12983_v62 = vcombine.low %v12910_v57, %v12911_v7  ;;  %v21478_v27 = vld [vmem:[%s21824_s16] ss:$0 sm:$0xff]  ;;  %v21482_v38 = vcombine.high %v21473_v30, %v21473_v30 }
0x115f   :  { %v13106_v58 = vadd.f32 1e-05, %v13082_v36  ;;  %v13074_v9 = vsel %vm268_vm0, %v12982_v23, 0.0  ;;  %v21490_v20 = vcombine.high %v21478_v27, %v21478_v27 }
0x1160   :  { %v13107_v32 = vadd.f32 1e-05, %v13083_v14  ;;  %13075 = vadd.xlane.f32.xlu0 %v13074_v9  ;;  %v13077_v8 = vsel %vm268_vm0, %v12983_v62, 0.0 }
0x1161   :  { %16069 = vrsqrt.f32 %v13106_v58  ;;  %13078 = vadd.xlane.f32.xlu1 %v13077_v8 }
0x1162   :  { %16071 = vrsqrt.f32 %v13107_v32 }
0x1167   :  { %v16066_v50 = vpop.eup %16065 }
0x1168   :  { %v16068_v28 = vpop.eup %16067  ;;  %v13182_v57 = vrot.slane %v16066_v50, %v20052_v60  ;;  %v13189_v32 = vrot.slane %v16066_v50, %v20055_v17 }
0x1169   :  { %v13196_v7 = vrot.slane %v16068_v28, %v20052_v60  ;;  %v13203_v36 = vrot.slane %v16068_v28, %v20055_v17 }
0x116a   :  { %v13560_v23 = vmul.f32 %v13182_v57, %v21143_v63  ;;  %v13561_v14 = vmul.f32 %v13189_v32, %v21146_v46 }
0x116b   :  { %v16070_v62 = vpop.eup %16069  ;;  %v13562_v58 = vmul.f32 %v13196_v7, %v21149_v1  ;;  %v13563_v9 = vmul.f32 %v13203_v36, %v21152_v34 }
0x116c   :  { %v16072_v8 = vpop.eup %16071  ;;  %v13617_v50 = vmul.f32 %v21473_v30, %v13560_v23  ;;  %v13618_v42 = vmul.f32 %v21482_v38, %v13561_v14  ;;  %v13210_v28 = vrot.slane %v16070_v62, %v20052_v60  ;;  %v13217_v24 = vrot.slane %v16070_v62, %v20055_v17 }
0x116d   :  { %v13619_v22 = vmul.f32 %v21473_v30, %v13562_v58  ;;  %v13620_v63 = vmul.f32 %v21482_v38, %v13563_v9  ;;  %v13224_v46 = vrot.slane %v16072_v8, %v20052_v60  ;;  %v13231_v57 = vrot.slane %v16072_v8, %v20055_v17 }
0x116e   :  { %v13674_v1 = vadd.f32 %v21478_v27, %v13617_v50  ;;  %v13675_v34 = vadd.f32 %v21490_v20, %v13618_v42  ;;  %v13564_v32 = vmul.f32 %v13210_v28, %v21176_v11  ;;  %v13565_v7 = vmul.f32 %v13217_v24, %v21179_v51 }
0x116f   :  { %v13676_v36 = vadd.f32 %v21478_v27, %v13619_v22  ;;  %v13566_v23 = vmul.f32 %v13224_v46, %v21193_v6  ;;  %v13567_v14 = vmul.f32 %v13231_v57, %v21196_v37  ;;  %v13677_v6 = vadd.f32 %v21490_v20, %v13620_v63 }
0x1170   :  { %v13754_v62 = vcombine.low %v13674_v1, %v13675_v34  ;;  %v13621_v58 = vmul.f32 %v21473_v30, %v13564_v32  ;;  %v13622_v9 = vmul.f32 %v21482_v38, %v13565_v7 }
0x1171   :  { %13788 = vst.msk [vmem:[%s21825_s17 + $0x8] sm:$0xf] %vm13787_vm8, %v13676_v36  ;;  %v13623_v11 = vmul.f32 %v21473_v30, %v13566_v23  ;;  %v13624_v51 = vmul.f32 %v21482_v38, %v13567_v14 }
0x1172   :  { %13786 = vst.msk [vmem:[%s21825_s17] sm:$0xff] %vm268_vm0, %v13754_v62  ;;  %v13678_v37 = vadd.f32 %v21478_v27, %v13621_v58  ;;  %v13679_v22 = vadd.f32 %v21490_v20, %v13622_v9 }
0x1173   :  { %v13680_v24 = vadd.f32 %v21478_v27, %v13623_v11  ;;  %v13681_v42 = vadd.f32 %v21490_v20, %v13624_v51 }
0x1174   :  { %v13755_v8 = vcombine.low %v13677_v6, %v13678_v37  ;;  %13790 = vst.msk [vmem:[%s21825_s17 + $0x18] sm:$0xf] %vm13787_vm8, %v13679_v22 }
0x1175   :  { %v13756_v50 = vcombine.low %v13680_v24, %v13681_v42 }
0x1176   :  { %13789 = vst.msk [vmem:[%s21825_s17 + $0x10] sm:$0xff] %vm268_vm0, %v13755_v8 }
0x1177   :  { %13791 = vst.msk [vmem:[%s21825_s17 + $0x20] sm:$0xff] %vm268_vm0, %v13756_v50 }
0x1186   :  { %v13022_v28 = vpop.xlane.xlu0 %13021 }
0x1187   :  { %v13084_v63 = vmul.f32 0.010416667, %v13022_v28 }
0x1189   :  { %v13108_v46 = vadd.f32 1e-05, %v13084_v63  ;;  %v13025_v57 = vpop.xlane.xlu1 %13024 }
0x118a   :  { %v13085_v1 = vmul.f32 0.010416667, %v13025_v57 }
0x118b   :  { %16073 = vrsqrt.f32 %v13108_v46 }
0x118c   :  { %v13109_v34 = vadd.f32 1e-05, %v13085_v1 }
0x118e   :  { %16075 = vrsqrt.f32 %v13109_v34  ;;  %v13028_v32 = vpop.xlane.xlu0 %13027 }
0x118f   :  { %v13086_v7 = vmul.f32 0.010416667, %v13028_v32 }
0x1190   :  { %v13031_v36 = vpop.xlane.xlu1 %13030 }
0x1191   :  { %v13110_v23 = vadd.f32 1e-05, %v13086_v7  ;;  %v13087_v14 = vmul.f32 0.010416667, %v13031_v36 }
0x1193   :  { %16077 = vrsqrt.f32 %v13110_v23  ;;  %v13111_v62 = vadd.f32 1e-05, %v13087_v14 }
0x1195   :  { %v16074_v58 = vpop.eup %16073  ;;  %16079 = vrsqrt.f32 %v13111_v62 }
0x1196   :  { %v13238_v9 = vrot.slane %v16074_v58, %v20052_v60  ;;  %v13245_v11 = vrot.slane %v16074_v58, %v20055_v17 }
0x1198   :  { %v16076_v51 = vpop.eup %16075  ;;  %v13568_v6 = vmul.f32 %v13238_v9, %v21213_v35  ;;  %v13569_v37 = vmul.f32 %v13245_v11, %v21216_v56 }
0x1199   :  { %v13252_v22 = vrot.slane %v16076_v51, %v20052_v60  ;;  %v13259_v24 = vrot.slane %v16076_v51, %v20055_v17 }
0x119a   :  { %v13625_v42 = vmul.f32 %v21473_v30, %v13568_v6  ;;  %v13626_v8 = vmul.f32 %v21482_v38, %v13569_v37 }
0x119b   :  { %v13570_v50 = vmul.f32 %v13252_v22, %v21221_v3  ;;  %v13571_v28 = vmul.f32 %v13259_v24, %v21224_v59  ;;  %v13034_v63 = vpop.xlane.xlu0 %13033 }
0x119c   :  { %v13682_v46 = vadd.f32 %v21478_v27, %v13625_v42  ;;  %v13088_v57 = vmul.f32 0.010416667, %v13034_v63  ;;  %v13683_v36 = vadd.f32 %v21490_v20, %v13626_v8 }
0x119d   :  { %v16078_v1 = vpop.eup %16077  ;;  %v13627_v35 = vmul.f32 %v21473_v30, %v13570_v50  ;;  %v13628_v56 = vmul.f32 %v21482_v38, %v13571_v28 }
0x119e   :  { %13792 = vst.msk [vmem:[%s21825_s17 + $0x28] sm:$0xf] %vm13787_vm8, %v13682_v46  ;;  %v13266_v34 = vrot.slane %v16078_v1, %v20052_v60  ;;  %v13273_v3 = vrot.slane %v16078_v1, %v20055_v17  ;;  %v13112_v32 = vadd.f32 1e-05, %v13088_v57  ;;  %v13037_v59 = vpop.xlane.xlu1 %13036 }
0x119f   :  { %v16080_v7 = vpop.eup %16079  ;;  %v13684_v23 = vadd.f32 %v21478_v27, %v13627_v35  ;;  %v13685_v14 = vadd.f32 %v21490_v20, %v13628_v56  ;;  %v13089_v62 = vmul.f32 0.010416667, %v13037_v59 }
0x11a0   :  { %v13572_v58 = vmul.f32 %v13266_v34, %v21238_v45  ;;  %v13573_v9 = vmul.f32 %v13273_v3, %v21241_v47  ;;  %v13280_v11 = vrot.slane %v16080_v7, %v20052_v60  ;;  %16081 = vrsqrt.f32 %v13112_v32 }
0x11a1   :  { %v13757_v51 = vcombine.low %v13683_v36, %v13684_v23  ;;  %13794 = vst.msk [vmem:[%s21825_s17 + $0x38] sm:$0xf] %vm13787_vm8, %v13685_v14  ;;  %v13113_v6 = vadd.f32 1e-05, %v13089_v62  ;;  %v13287_v50 = vrot.slane %v16080_v7, %v20055_v17 }
0x11a2   :  { %v13629_v37 = vmul.f32 %v21473_v30, %v13572_v58  ;;  %v13630_v22 = vmul.f32 %v21482_v38, %v13573_v9  ;;  %v13574_v24 = vmul.f32 %v13280_v11, %v21247_v13 }
0x11a3   :  { %13793 = vst.msk [vmem:[%s21825_s17 + $0x30] sm:$0xff] %vm268_vm0, %v13757_v51  ;;  %16083 = vrsqrt.f32 %v13113_v6  ;;  %v13040_v45 = vpop.xlane.xlu0 %13039  ;;  %v13575_v35 = vmul.f32 %v13287_v50, %v21250_v48 }
0x11a4   :  { %v13686_v47 = vadd.f32 %v21478_v27, %v13629_v37  ;;  %v13687_v42 = vadd.f32 %v21490_v20, %v13630_v22  ;;  %v13631_v8 = vmul.f32 %v21473_v30, %v13574_v24  ;;  %v13090_v28 = vmul.f32 0.010416667, %v13040_v45 }
0x11a5   :  { %v13632_v23 = vmul.f32 %v21482_v38, %v13575_v35 }
0x11a6   :  { %v13758_v63 = vcombine.low %v13686_v47, %v13687_v42  ;;  %v13688_v46 = vadd.f32 %v21478_v27, %v13631_v8  ;;  %v13043_v13 = vpop.xlane.xlu1 %13042  ;;  %v13114_v57 = vadd.f32 1e-05, %v13090_v28 }
0x11a7   :  { %v13091_v1 = vmul.f32 0.010416667, %v13043_v13  ;;  %v13689_v45 = vadd.f32 %v21490_v20, %v13632_v23 }
0x11a8   :  { %13795 = vst.msk [vmem:[%s21825_s17 + $0x40] sm:$0xff] %vm268_vm0, %v13758_v63  ;;  %16085 = vrsqrt.f32 %v13114_v57 }
0x11a9   :  { %13796 = vst.msk [vmem:[%s21825_s17 + $0x48] sm:$0xf] %vm13787_vm8, %v13688_v46  ;;  %v13115_v56 = vadd.f32 1e-05, %v13091_v1 }
0x11aa   :  { %v16082_v34 = vpop.eup %16081 }
0x11ab   :  { %16087 = vrsqrt.f32 %v13115_v56  ;;  %v13046_v3 = vpop.xlane.xlu0 %13045  ;;  %v13294_v32 = vrot.slane %v16082_v34, %v20052_v60  ;;  %v13301_v59 = vrot.slane %v16082_v34, %v20055_v17 }
0x11ac   :  { %v13092_v7 = vmul.f32 0.010416667, %v13046_v3 }
0x11ad   :  { %v16084_v36 = vpop.eup %16083  ;;  %v13576_v14 = vmul.f32 %v13294_v32, %v21265_v31  ;;  %v13577_v62 = vmul.f32 %v13301_v59, %v21268_v12 }
0x11ae   :  { %v13308_v58 = vrot.slane %v16084_v36, %v20052_v60  ;;  %v13315_v48 = vrot.slane %v16084_v36, %v20055_v17  ;;  %v13049_v9 = vpop.xlane.xlu1 %13048  ;;  %v13116_v11 = vadd.f32 1e-05, %v13092_v7 }
0x11af   :  { %v13093_v51 = vmul.f32 0.010416667, %v13049_v9  ;;  %v13633_v6 = vmul.f32 %v21473_v30, %v13576_v14  ;;  %v13634_v37 = vmul.f32 %v21482_v38, %v13577_v62 }
0x11b0   :  { %v13578_v22 = vmul.f32 %v13308_v58, %v21273_v41  ;;  %v13579_v24 = vmul.f32 %v13315_v48, %v21276_v4  ;;  %16089 = vrsqrt.f32 %v13116_v11 }
0x11b1   :  { %v13117_v31 = vadd.f32 1e-05, %v13093_v51  ;;  %v13690_v12 = vadd.f32 %v21478_v27, %v13633_v6  ;;  %v13691_v47 = vadd.f32 %v21490_v20, %v13634_v37 }
0x11b2   :  { %v13635_v42 = vmul.f32 %v21473_v30, %v13578_v22  ;;  %v13636_v8 = vmul.f32 %v21482_v38, %v13579_v24  ;;  %v16086_v50 = vpop.eup %16085 }
0x11b3   :  { %16091 = vrsqrt.f32 %v13117_v31  ;;  %v13052_v28 = vpop.xlane.xlu0 %13051  ;;  %v13759_v63 = vcombine.low %v13689_v45, %v13690_v12  ;;  %13798 = vst.msk [vmem:[%s21825_s17 + $0x58] sm:$0xf] %vm13787_vm8, %v13691_v47  ;;  %v13322_v46 = vrot.slane %v16086_v50, %v20052_v60  ;;  %v13329_v57 = vrot.slane %v16086_v50, %v20055_v17 }
0x11b4   :  { %v13692_v41 = vadd.f32 %v21478_v27, %v13635_v42  ;;  %v13693_v4 = vadd.f32 %v21490_v20, %v13636_v8  ;;  %v13094_v1 = vmul.f32 0.010416667, %v13052_v28 }
0x11b5   :  { %v16088_v13 = vpop.eup %16087  ;;  %13797 = vst.msk [vmem:[%s21825_s17 + $0x50] sm:$0xff] %vm268_vm0, %v13759_v63  ;;  %v13580_v56 = vmul.f32 %v13322_v46, %v21290_v55  ;;  %v13581_v59 = vmul.f32 %v13329_v57, %v21293_v5 }
0x11b6   :  { %v13760_v35 = vcombine.low %v13692_v41, %v13693_v4  ;;  %v13336_v34 = vrot.slane %v16088_v13, %v20052_v60  ;;  %v13343_v3 = vrot.slane %v16088_v13, %v20055_v17  ;;  %v13055_v32 = vpop.xlane.xlu1 %13054  ;;  %v13118_v7 = vadd.f32 1e-05, %v13094_v1 }
0x11b7   :  { %v13095_v36 = vmul.f32 0.010416667, %v13055_v32  ;;  %v13637_v23 = vmul.f32 %v21473_v30, %v13580_v56  ;;  %v13638_v62 = vmul.f32 %v21482_v38, %v13581_v59 }
0x11b8   :  { %13799 = vst.msk [vmem:[%s21825_s17 + $0x60] sm:$0xff] %vm268_vm0, %v13760_v35  ;;  %v13582_v14 = vmul.f32 %v13336_v34, %v21299_v26  ;;  %v13583_v55 = vmul.f32 %v13343_v3, %v21302_v2  ;;  %16093 = vrsqrt.f32 %v13118_v7 }
0x11b9   :  { %v13119_v58 = vadd.f32 1e-05, %v13095_v36  ;;  %v13694_v48 = vadd.f32 %v21478_v27, %v13637_v23  ;;  %v13695_v51 = vadd.f32 %v21490_v20, %v13638_v62 }
0x11ba   :  { %v13639_v5 = vmul.f32 %v21473_v30, %v13582_v14  ;;  %v13640_v9 = vmul.f32 %v21482_v38, %v13583_v55  ;;  %v16090_v11 = vpop.eup %16089 }
0x11bb   :  { %16095 = vrsqrt.f32 %v13119_v58  ;;  %v13058_v6 = vpop.xlane.xlu0 %13057  ;;  %13800 = vst.msk [vmem:[%s21825_s17 + $0x68] sm:$0xf] %vm13787_vm8, %v13694_v48  ;;  %v13350_v37 = vrot.slane %v16090_v11, %v20052_v60  ;;  %v13357_v22 = vrot.slane %v16090_v11, %v20055_v17 }
0x11bc   :  { %v13696_v26 = vadd.f32 %v21478_v27, %v13639_v5  ;;  %v13697_v2 = vadd.f32 %v21490_v20, %v13640_v9  ;;  %v13096_v45 = vmul.f32 0.010416667, %v13058_v6 }
0x11bd   :  { %v16092_v24 = vpop.eup %16091  ;;  %v13584_v12 = vmul.f32 %v13350_v37, %v21316_v19  ;;  %v13585_v47 = vmul.f32 %v13357_v22, %v21319_v0 }
0x11be   :  { %v13761_v31 = vcombine.low %v13695_v51, %v13696_v26  ;;  %13802 = vst.msk [vmem:[%s21825_s17 + $0x78] sm:$0xf] %vm13787_vm8, %v13697_v2  ;;  %v13364_v42 = vrot.slane %v16092_v24, %v20052_v60  ;;  %v13061_v8 = vpop.xlane.xlu1 %13060  ;;  %v13371_v50 = vrot.slane %v16092_v24, %v20055_v17  ;;  %v13120_v28 = vadd.f32 1e-05, %v13096_v45 }
0x11bf   :  { %v13097_v63 = vmul.f32 0.010416667, %v13061_v8  ;;  %v13641_v41 = vmul.f32 %v21473_v30, %v13584_v12  ;;  %v13642_v4 = vmul.f32 %v21482_v38, %v13585_v47 }
0x11c0   :  { %13801 = vst.msk [vmem:[%s21825_s17 + $0x70] sm:$0xff] %vm268_vm0, %v13761_v31  ;;  %v13586_v19 = vmul.f32 %v13364_v42, %v21325_v40  ;;  %v13587_v0 = vmul.f32 %v13371_v50, %v21328_v18  ;;  %16097 = vrsqrt.f32 %v13120_v28 }
0x11c1   :  { %v13121_v46 = vadd.f32 1e-05, %v13097_v63  ;;  %v13698_v13 = vadd.f32 %v21478_v27, %v13641_v41  ;;  %v13699_v57 = vadd.f32 %v21490_v20, %v13642_v4 }
0x11c2   :  { %v13643_v1 = vmul.f32 %v21473_v30, %v13586_v19  ;;  %v16094_v35 = vpop.eup %16093  ;;  %v13644_v18 = vmul.f32 %v21482_v38, %v13587_v0 }
0x11c3   :  { %16099 = vrsqrt.f32 %v13121_v46  ;;  %v13064_v56 = vpop.xlane.xlu0 %13063  ;;  %v13762_v34 = vcombine.low %v13698_v13, %v13699_v57  ;;  %v13378_v32 = vrot.slane %v16094_v35, %v20052_v60  ;;  %v13385_v40 = vrot.slane %v16094_v35, %v20055_v17 }
0x11c4   :  { %v13700_v3 = vadd.f32 %v21478_v27, %v13643_v1  ;;  %v13098_v7 = vmul.f32 0.010416667, %v13064_v56  ;;  %v13701_v6 = vadd.f32 %v21490_v20, %v13644_v18 }
0x11c5   :  { %v16096_v59 = vpop.eup %16095  ;;  %13803 = vst.msk [vmem:[%s21825_s17 + $0x80] sm:$0xff] %vm268_vm0, %v13762_v34  ;;  %v13588_v36 = vmul.f32 %v13378_v32, %v21342_v39  ;;  %v13589_v23 = vmul.f32 %v13385_v40, %v21345_v29 }
0x11c6   :  { %13804 = vst.msk [vmem:[%s21825_s17 + $0x88] sm:$0xf] %vm13787_vm8, %v13700_v3  ;;  %v13392_v14 = vrot.slane %v16096_v59, %v20052_v60  ;;  %v13399_v55 = vrot.slane %v16096_v59, %v20055_v17  ;;  %v13067_v62 = vpop.xlane.xlu1 %13066  ;;  %v13122_v58 = vadd.f32 1e-05, %v13098_v7 }
0x11c7   :  { %v13099_v48 = vmul.f32 0.010416667, %v13067_v62  ;;  %v13645_v5 = vmul.f32 %v21473_v30, %v13588_v36  ;;  %v13646_v9 = vmul.f32 %v21482_v38, %v13589_v23 }
0x11c8   :  { %v13590_v11 = vmul.f32 %v13392_v14, %v21351_v52  ;;  %v13591_v51 = vmul.f32 %v13399_v55, %v21354_v15  ;;  %16101 = vrsqrt.f32 %v13122_v58 }
0x11c9   :  { %v13123_v39 = vadd.f32 1e-05, %v13099_v48  ;;  %v13702_v29 = vadd.f32 %v21478_v27, %v13645_v5  ;;  %v13703_v26 = vadd.f32 %v21490_v20, %v13646_v9  ;;  %v22424_v48 = vld [vmem:[#allocation93_spill] sm:$0xff] }
0x11ca   :  { %v13647_v2 = vmul.f32 %v21473_v30, %v13590_v11  ;;  %v13648_v37 = vmul.f32 %v21482_v38, %v13591_v51  ;;  %v16098_v22 = vpop.eup %16097 }
0x11cb   :  { %16103 = vrsqrt.f32 %v13123_v39  ;;  %v13070_v24 = vpop.xlane.xlu0 %13069  ;;  %v13763_v45 = vcombine.low %v13701_v6, %v13702_v29  ;;  %13806 = vst.msk [vmem:[%s21825_s17 + $0x98] sm:$0xf] %vm13787_vm8, %v13703_v26  ;;  %v13406_v31 = vrot.slane %v16098_v22, %v20052_v60  ;;  %v13413_v47 = vrot.slane %v16098_v22, %v20055_v17 }
0x11cc   :  { %v13704_v52 = vadd.f32 %v21478_v27, %v13647_v2  ;;  %v13705_v15 = vadd.f32 %v21490_v20, %v13648_v37  ;;  %v13100_v42 = vmul.f32 0.010416667, %v13070_v24 }
0x11cd   :  { %v16100_v12 = vpop.eup %16099  ;;  %v13073_v8 = vpop.xlane.xlu1 %13072  ;;  %13805 = vst.msk [vmem:[%s21825_s17 + $0x90] sm:$0xff] %vm268_vm0, %v13763_v45  ;;  %v13592_v28 = vmul.f32 %v13406_v31, %v21368_v33  ;;  %v13593_v4 = vmul.f32 %v13413_v47, %v21371_v21 }
0x11ce   :  { %v13764_v50 = vcombine.low %v13704_v52, %v13705_v15  ;;  %v13420_v63 = vrot.slane %v16100_v12, %v20052_v60  ;;  %v13427_v41 = vrot.slane %v16100_v12, %v20055_v17  ;;  %v13124_v19 = vadd.f32 1e-05, %v13100_v42 }
0x11cf   :  { %v13101_v0 = vmul.f32 0.010416667, %v13073_v8  ;;  %v13649_v46 = vmul.f32 %v21473_v30, %v13592_v28  ;;  %v13650_v33 = vmul.f32 %v21482_v38, %v13593_v4 }
0x11d0   :  { %13807 = vst.msk [vmem:[%s21825_s17 + $0xa0] sm:$0xff] %vm268_vm0, %v13764_v50  ;;  %v13594_v13 = vmul.f32 %v13420_v63, %v21377_v54  ;;  %v13595_v57 = vmul.f32 %v13427_v41, %v21380_v61  ;;  %16105 = vrsqrt.f32 %v13124_v19 }
0x11d1   :  { %v13125_v1 = vadd.f32 1e-05, %v13101_v0  ;;  %v13706_v35 = vadd.f32 %v21478_v27, %v13649_v46  ;;  %v13707_v3 = vadd.f32 %v21490_v20, %v13650_v33 }
0x11d2   :  { %v13651_v21 = vmul.f32 %v21473_v30, %v13594_v13  ;;  %v13652_v56 = vmul.f32 %v21482_v38, %v13595_v57  ;;  %v16102_v34 = vpop.eup %16101 }
0x11d3   :  { %16107 = vrsqrt.f32 %v13125_v1  ;;  %13808 = vst.msk [vmem:[%s21825_s17 + $0xa8] sm:$0xf] %vm13787_vm8, %v13706_v35  ;;  %v13434_v32 = vrot.slane %v16102_v34, %v20052_v60  ;;  %v13441_v40 = vrot.slane %v16102_v34, %v20055_v17  ;;  %v22426_v34 = vld [vmem:[#allocation87_spill] sm:$0xff] }
0x11d4   :  { %v13708_v54 = vadd.f32 %v21478_v27, %v13651_v21  ;;  %v13709_v61 = vadd.f32 %v21490_v20, %v13652_v56  ;;  %v22425_v21 = vld [vmem:[#allocation91_spill] sm:$0xff] }
0x11d5   :  { %v16104_v59 = vpop.eup %16103  ;;  %v13596_v7 = vmul.f32 %v13434_v32, %v21394_v25  ;;  %v13597_v36 = vmul.f32 %v13441_v40, %v21397_v53  ;;  %v22428_v32 = vld [vmem:[#allocation90_spill] sm:$0xff] }
0x11d6   :  { %v13765_v18 = vcombine.low %v13707_v3, %v13708_v54  ;;  %13810 = vst.msk [vmem:[%s21825_s17 + $0xb8] sm:$0xf] %vm13787_vm8, %v13709_v61  ;;  %v13448_v23 = vrot.slane %v16104_v59, %v20052_v60  ;;  %v13455_v14 = vrot.slane %v16104_v59, %v20055_v17  ;;  %v22427_v54 = vld [vmem:[#allocation88_spill] sm:$0xff] }
0x11d7   :  { %v13653_v55 = vmul.f32 %v21473_v30, %v13596_v7  ;;  %v13654_v62 = vmul.f32 %v21482_v38, %v13597_v36 }
0x11d8   :  { %13809 = vst.msk [vmem:[%s21825_s17 + $0xb0] sm:$0xff] %vm268_vm0, %v13765_v18  ;;  %v13598_v58 = vmul.f32 %v13448_v23, %v21403_v10  ;;  %v13599_v5 = vmul.f32 %v13455_v14, %v22424_v48 }
0x11d9   :  { %v13710_v25 = vadd.f32 %v21478_v27, %v13653_v55  ;;  %v13711_v53 = vadd.f32 %v21490_v20, %v13654_v62 }
0x11da   :  { %v13655_v9 = vmul.f32 %v21473_v30, %v13598_v58  ;;  %v16106_v11 = vpop.eup %16105  ;;  %v13656_v2 = vmul.f32 %v21482_v38, %v13599_v5 }
0x11db   :  { %v13766_v51 = vcombine.low %v13710_v25, %v13711_v53  ;;  %v13462_v39 = vrot.slane %v16106_v11, %v20052_v60  ;;  %v13469_v29 = vrot.slane %v16106_v11, %v20055_v17 }
0x11dc   :  { %v13712_v6 = vadd.f32 %v21478_v27, %v13655_v9  ;;  %v13713_v12 = vadd.f32 %v21490_v20, %v13656_v2 }
0x11dd   :  { %v16108_v26 = vpop.eup %16107  ;;  %13811 = vst.msk [vmem:[%s21825_s17 + $0xc0] sm:$0xff] %vm268_vm0, %v13766_v51  ;;  %v13600_v10 = vmul.f32 %v13462_v39, %v21420_v44  ;;  %v13601_v37 = vmul.f32 %v13469_v29, %v21423_v16 }
0x11de   :  { %13812 = vst.msk [vmem:[%s21825_s17 + $0xc8] sm:$0xf] %vm13787_vm8, %v13712_v6  ;;  %v13476_v22 = vrot.slane %v16108_v26, %v20052_v60  ;;  %v13483_v24 = vrot.slane %v16108_v26, %v20055_v17 }
0x11df   :  { %v13657_v45 = vmul.f32 %v21473_v30, %v13600_v10  ;;  %v13658_v52 = vmul.f32 %v21482_v38, %v13601_v37 }
0x11e0   :  { %v13602_v15 = vmul.f32 %v13476_v22, %v21429_v49  ;;  %v13603_v31 = vmul.f32 %v13483_v24, %v21432_v43 }
0x11e1   :  { %v13714_v47 = vadd.f32 %v21478_v27, %v13657_v45  ;;  %v13715_v44 = vadd.f32 %v21490_v20, %v13658_v52 }
0x11e2   :  { %v13659_v16 = vmul.f32 %v21473_v30, %v13602_v15  ;;  %v13660_v42 = vmul.f32 %v21482_v38, %v13603_v31 }
0x11e3   :  { %v13767_v8 = vcombine.low %v13713_v12, %v13714_v47  ;;  %13814 = vst.msk [vmem:[%s21825_s17 + $0xd8] sm:$0xf] %vm13787_vm8, %v13715_v44 }
0x11e4   :  { %v13716_v49 = vadd.f32 %v21478_v27, %v13659_v16  ;;  %v13717_v43 = vadd.f32 %v21490_v20, %v13660_v42 }
0x11e5   :  { %13813 = vst.msk [vmem:[%s21825_s17 + $0xd0] sm:$0xff] %vm268_vm0, %v13767_v8 }
0x11e6   :  { %v13768_v50 = vcombine.low %v13716_v49, %v13717_v43 }
0x11e8   :  { %13815 = vst.msk [vmem:[%s21825_s17 + $0xe0] sm:$0xff] %vm268_vm0, %v13768_v50 }
0x11ed   :  { %v13076_v28 = vpop.xlane.xlu0 %13075 }
0x11ee   :  { %v13102_v63 = vmul.f32 0.010416667, %v13076_v28  ;;  %v13079_v41 = vpop.xlane.xlu1 %13078 }
0x11ef   :  { %v13103_v4 = vmul.f32 0.010416667, %v13079_v41 }
0x11f0   :  { %v13126_v19 = vadd.f32 1e-05, %v13102_v63 }
0x11f1   :  { %v13127_v0 = vadd.f32 1e-05, %v13103_v4 }
0x11f2   :  { %16109 = vrsqrt.f32 %v13126_v19 }
0x11f3   :  { %16111 = vrsqrt.f32 %v13127_v0 }
0x11fc   :  { %v16110_v46 = vpop.eup %16109 }
0x11fd   :  { %v16112_v13 = vpop.eup %16111  ;;  %v13490_v57 = vrot.slane %v16110_v46, %v20052_v60  ;;  %v13497_v33 = vrot.slane %v16110_v46, %v20055_v17 }
0x11fe   :  { %v13504_v1 = vrot.slane %v16112_v13, %v20052_v60  ;;  %v13511_v35 = vrot.slane %v16112_v13, %v20055_v17 }
0x11ff   :  { %v13604_v56 = vmul.f32 %v13490_v57, %v22425_v21  ;;  %v13605_v3 = vmul.f32 %v13497_v33, %v22426_v34 }
0x1200   :  { %v13606_v61 = vmul.f32 %v13504_v1, %v22427_v54  ;;  %v13607_v40 = vmul.f32 %v13511_v35, %v22428_v32 }
0x1201   :  { %v13661_v59 = vmul.f32 %v21473_v30, %v13604_v56  ;;  %v13662_v18 = vmul.f32 %v21482_v38, %v13605_v3 }
0x1202   :  { %v13663_v7 = vmul.f32 %v21473_v30, %v13606_v61  ;;  %v13664_v36 = vmul.f32 %v21482_v38, %v13607_v40 }
0x1203   :  { %v13718_v60 = vadd.f32 %v21478_v27, %v13661_v59  ;;  %v13719_v17 = vadd.f32 %v21490_v20, %v13662_v18 }
0x1204   :  { %v13720_v23 = vadd.f32 %v21478_v27, %v13663_v7  ;;  %v13721_v14 = vadd.f32 %v21490_v20, %v13664_v36 }
0x1205   :  { %13816 = vst.msk [vmem:[%s21825_s17 + $0xe8] sm:$0xf] %vm13787_vm8, %v13718_v60 }
0x1206   :  { %v13769_v55 = vcombine.low %v13719_v17, %v13720_v23  ;;  %13818 = vst.msk [vmem:[%s21825_s17 + $0xf8] sm:$0xf] %vm13787_vm8, %v13721_v14 }
0x1208   :  { %13817 = vst.msk [vmem:[%s21825_s17 + $0xf0] sm:$0xff] %vm268_vm0, %v13769_v55 }

</bundles_post_ra>
